<compile_context>
chip_gen: v7x
topology: tpu7x:2x2x1
jax: 0.10.0
libtpu: 0.0.40
codegen_flags: <defaults>
</compile_context>

<pallas_src>
import functools

import jax
import jax.numpy as jnp
from jax.experimental import pallas as pl
from jax.experimental.pallas import tpu as pltpu


# ----------------------------- Pallas kernel -----------------------------

def _window_attn_kernel(x_ref, y_ref, wkv_ref, bkv_ref, wq_ref, bq_ref,
                        bias_ref, wproj_ref, bproj_ref, o_ref,
                        *, wins, seq_len, num_heads, head_dim):
    """One grid step processes `wins` windows of `seq_len` tokens each.

    x_ref, y_ref : (wins*L, C) compute-dtype token slabs (k/v source, q source)
    wkv_ref      : (C, 2C)   bkv_ref : (1, 2C)   f32 bias
    wq_ref       : (C, C)    bq_ref  : (1, C)    (q scale pre-folded)
    bias_ref     : (num_heads, L, L) f32 relative-position bias
    wproj_ref    : (C, C)    bproj_ref : (1, C)  f32 bias
    o_ref        : (wins*L, C) f32
    """
    C = num_heads * head_dim
    cdt = x_ref.dtype          # matmul operand dtype (bf16 or f32)
    f32 = jnp.float32

    x = x_ref[...]                                    # (M, C)
    y = y_ref[...]                                    # (M, C)

    # Fused projections over all windows in this block: M = wins*L rows.
    kv = jnp.dot(x, wkv_ref[...], preferred_element_type=f32) + bkv_ref[...]   # (M, 2C)
    q = jnp.dot(y, wq_ref[...], preferred_element_type=f32) + bq_ref[...]      # (M, C)

    # Split back into per-window token blocks.  seq_len is a multiple of 8 for
    # window_size >= 3, so these leading-dim reshapes are layout preserving.
    kv3 = kv.reshape(wins, seq_len, 2 * C).astype(cdt)
    q3 = q.reshape(wins, seq_len, C).astype(cdt)
    bias = bias_ref[...]                              # (nh, L, L) f32

    out = None
    for h in range(num_heads):
        lo = h * head_dim
        qh = q3[:, :, lo:lo + head_dim]               # (wins, L, hd)
        kh = kv3[:, :, lo:lo + head_dim]              # (wins, L, hd)  k columns
        vh = kv3[:, :, C + lo:C + lo + head_dim]      # (wins, L, hd)  v columns

        # Window-batched QK^T: contraction on head_dim, no explicit transpose.
        s = jnp.einsum('wld,wmd->wlm', qh, kh,
                       preferred_element_type=f32)    # (wins, L, L) f32
        s = s + bias[h]

        # SoftmaxPlusOne (kept in f32): exp(x - max) / (sum(exp(x - max)) + 1)
        m = jnp.max(s, axis=-1, keepdims=True)
        e = jnp.exp(s - m)
        denom = jnp.sum(e, axis=-1, keepdims=True) + 1.0
        p = (e / denom).astype(cdt)

        # Window-batched attn @ V.
        oh = jnp.einsum('wlm,wmd->wld', p, vh,
                        preferred_element_type=f32)   # (wins, L, hd)
        oh = oh.reshape(wins * seq_len, head_dim).astype(cdt)

        # Fold the output projection into the head loop (sublane row-slice of
        # Wproj) and accumulate in f32 -> no lane-axis concat of head outputs.
        part = jnp.dot(oh, wproj_ref[lo:lo + head_dim, :],
                       preferred_element_type=f32)    # (M, C)
        out = part if out is None else out + part

    out = out + bproj_ref[...]
    o_ref[...] = out.astype(o_ref.dtype)


# ----------------------------- wrapper / specs -----------------------------

def _pick_block_windows(num_windows, seq_len, target_tokens=256):
    """Largest divisor of num_windows with block tokens <= target, keeping
    >= 2 grid steps when possible (dual TensorCores on v7x).
    target_tokens=256 suits v6e/v7x (256-row MXU); use 128 on v5e."""
    divisors = [d for d in range(1, num_windows + 1) if num_windows % d == 0]
    fitting = [d for d in divisors if d * seq_len <= target_tokens] or [1]
    best = max(fitting)
    if best == num_windows and num_windows > 1:
        smaller = [d for d in fitting if d < num_windows]
        if smaller:
            best = max(smaller)
    return best


def _vmem_limit_bytes(M, C, num_heads, seq_len, act_dtype):
    act = jnp.dtype(act_dtype).itemsize
    f32 = 4
    est = 0
    est += 2 * 2 * M * C * act                         # x, y blocks (double-buffered)
    est += 2 * M * C * f32                             # output block
    est += 2 * (C * 2 * C + 2 * C * C) * act           # wkv, wq, wproj
    est += 2 * 4 * C * f32                             # bkv, bq, bproj
    est += 2 * num_heads * seq_len * seq_len * f32     # relative-position bias
    return int(2 * est) + (8 << 20)                    # headroom for f32 intermediates


def window_attention_pallas(x_tok, y_tok, kp, *, num_windows, seq_len, num_heads,
                            block_windows):
    """x_tok, y_tok: (num_windows*L, C) token slabs.  Returns (num_windows*L, C) f32."""
    total, C = x_tok.shape
    assert total == num_windows * seq_len
    assert num_windows % block_windows == 0, "block_windows must divide window count"
    head_dim = C // num_heads
    M = block_windows * seq_len
    grid = (num_windows // block_windows,)

    kernel = functools.partial(
        _window_attn_kernel, wins=block_windows, seq_len=seq_len,
        num_heads=num_heads, head_dim=head_dim)

    tok_spec = pl.BlockSpec((M, C), lambda i: (i, 0))
    # Constant operands: full block, constant index map.  (For production-size
    # weights on v7x's 64 MiB VMEM, single-buffer these constants and re-derive
    # block_windows; toy sizes here are tiny.)
    const2d = lambda r, c: pl.BlockSpec((r, c), lambda i: (0, 0))

    return pl.pallas_call(
        kernel,
        out_shape=jax.ShapeDtypeStruct((total, C), jnp.float32),
        grid=grid,
        in_specs=[
            tok_spec,                                           # x tokens (k/v source)
            tok_spec,                                           # y tokens (q source)
            const2d(C, 2 * C),                                  # W_kv
            const2d(1, 2 * C),                                  # b_kv
            const2d(C, C),                                      # W_q  (scale folded)
            const2d(1, C),                                      # b_q  (scale folded)
            pl.BlockSpec((num_heads, seq_len, seq_len),
                         lambda i: (0, 0, 0)),                  # relative position bias
            const2d(C, C),                                      # W_proj
            const2d(1, C),                                      # b_proj
        ],
        out_specs=pl.BlockSpec((M, C), lambda i: (i, 0)),
        compiler_params=pltpu.CompilerParams(
            dimension_semantics=("parallel",),
            vmem_limit_bytes=_vmem_limit_bytes(M, C, num_heads, seq_len, x_tok.dtype)),
    )(x_tok, y_tok, kp["wkv"], kp["bkv"], kp["wq"], kp["bq"],
      kp["rel_bias"], kp["wproj"], kp["bproj"])


# ----------------------------- JAX glue -----------------------------

def window_partition(x, ws):
    B, H, W, C = x.shape
    nH, nW = H // ws, W // ws
    x = x.reshape(B, nH, ws, nW, ws, C).transpose(0, 1, 3, 2, 4, 5)
    return x.reshape(B * nH * nW, ws * ws, C)


def window_unpartition(x, ws, B, H, W):
    nH, nW = H // ws, W // ws
    C = x.shape[-1]
    x = x.reshape(B, nH, nW, ws, ws, C).transpose(0, 1, 3, 2, 4, 5)
    return x.reshape(B, H, W, C)


def make_relative_position_bias(table, window_size, num_heads):
    """table: ((2*ws-1)**2, num_heads) -> (num_heads, L, L)."""
    ws = window_size
    coords = jnp.stack(jnp.meshgrid(jnp.arange(ws), jnp.arange(ws), indexing="ij"))
    coords_flat = coords.reshape(2, -1)                               # (2, L)
    rel = coords_flat[:, :, None] - coords_flat[:, None, :]           # (2, L, L)
    rel = rel.transpose(1, 2, 0)                                      # (L, L, 2)
    rel = rel.at[:, :, 0].add(ws - 1)
    rel = rel.at[:, :, 1].add(ws - 1)
    rel = rel.at[:, :, 0].multiply(2 * ws - 1)
    idx = rel.sum(-1)                                                 # (L, L)
    L = ws * ws
    bias = table[idx.reshape(-1)].reshape(L, L, num_heads)
    return bias.transpose(2, 0, 1)                                    # (nh, L, L)


def prepare_kernel_params(params, *, window_size, num_heads,
                          compute_dtype=jnp.bfloat16):
    """One-time constant folding: q-scale folded into wq/bq, weights cast to the
    matmul compute dtype, relative-position-bias gather done once.  Call once
    and reuse across forward calls (not per call)."""
    C = params["wq"].shape[0]
    head_dim = C // num_heads
    scale = head_dim ** (-0.5)
    rel_bias = make_relative_position_bias(params["rpb_table"], window_size, num_heads)
    return {
        "wkv": params["wkv"].astype(compute_dtype),
        "bkv": params["bkv"].astype(jnp.float32),
        "wq": (params["wq"] * scale).astype(compute_dtype),
        "bq": (params["bq"] * scale).astype(jnp.float32),
        "wproj": params["wproj"].astype(compute_dtype),
        "bproj": params["bproj"].astype(jnp.float32),
        "rel_bias": rel_bias.astype(jnp.float32),
    }


def window_attention_forward(x, y, kernel_params, *, window_size, num_heads,
                             block_windows=None):
    """x, y: (B, H, W, C) f32.  Returns (B, H, W, C) f32."""
    B, H, W, C = x.shape
    ws = window_size
    L = ws * ws
    compute_dtype = kernel_params["wq"].dtype

    x_win = window_partition(x, ws)                    # (Bn, L, C)
    y_win = window_partition(y, ws)
    Bn = x_win.shape[0]

    if block_windows is None:
        block_windows = _pick_block_windows(Bn, L, target_tokens=256)

    out_tok = window_attention_pallas(
        x_win.reshape(Bn * L, C).astype(compute_dtype),
        y_win.reshape(Bn * L, C).astype(compute_dtype),
        kernel_params,
        num_windows=Bn, seq_len=L, num_heads=num_heads,
        block_windows=block_windows)

    return window_unpartition(out_tok.reshape(Bn, L, C), ws, B, H, W)


# ----------------------------- Reference (plain JAX, f32) -----------------------------

def window_attention_reference(x, y, params, *, window_size, num_heads):
    B, H, W, C = x.shape
    hd = C // num_heads
    scale = hd ** (-0.5)
    xw = window_partition(x, window_size)
    yw = window_partition(y, window_size)
    Bn, L, _ = xw.shape

    kv = xw @ params["wkv"] + params["bkv"][0]                        # (Bn, L, 2C)
    q = yw @ params["wq"] + params["bq"][0]                           # (Bn, L, C)
    kv = kv.reshape(Bn, L, 2, num_heads, hd).transpose(2, 0, 3, 1, 4)
    k, v = kv[0], kv[1]                                               # (Bn, nh, L, hd)
    q = q.reshape(Bn, L, num_heads, hd).transpose(0, 2, 1, 3) * scale

    attn = jnp.einsum("bhld,bhmd->bhlm", q, k)
    attn = attn + make_relative_position_bias(params["rpb_table"], window_size, num_heads)[None]
    m = jnp.max(attn, axis=-1, keepdims=True)
    e = jnp.exp(attn - m)
    attn = e / (jnp.sum(e, axis=-1, keepdims=True) + 1.0)             # SoftmaxPlusOne

    o = jnp.einsum("bhlm,bhmd->bhld", attn, v)                        # (Bn, nh, L, hd)
    o = o.transpose(0, 2, 1, 3).reshape(Bn, L, C)                     # head-major concat
    o = o @ params["wproj"] + params["bproj"][0]
    return window_unpartition(o, window_size, B, H, W)


# ----------------------------- Main -----------------------------

if __name__ == "__main__":
    B, H, W, C = 2, 16, 16, 32
    window_size = 4            # L = 16 tokens/window, 32 windows total
    num_heads = 4

    key = jax.random.PRNGKey(0)
    ks = jax.random.split(key, 9)

    # Deterministic synthetic parameters (Linear weights stored pre-transposed: (in, out)).
    params = {
        "wkv":   jax.random.normal(ks[0], (C, 2 * C), jnp.float32) * 0.02,
        "bkv":   jax.random.normal(ks[1], (1, 2 * C), jnp.float32) * 0.02,
        "wq":    jax.random.normal(ks[2], (C, C), jnp.float32) * 0.02,
        "bq":    jax.random.normal(ks[3], (1, C), jnp.float32) * 0.02,
        "wproj": jax.random.normal(ks[4], (C, C), jnp.float32) * 0.02,
        "bproj": jax.random.normal(ks[5], (1, C), jnp.float32) * 0.02,
        # trunc_normal_(std=0.02) analogue
        "rpb_table": 0.02 * jax.random.truncated_normal(
            ks[6], -2.0, 2.0, ((2 * window_size - 1) ** 2, num_heads), jnp.float32),
    }

    x = jax.random.normal(ks[7], (B, H, W, C), jnp.float32)
    y = jax.random.normal(ks[8], (B, H, W, C), jnp.float32)

    ref = window_attention_reference(x, y, params, window_size=window_size, num_heads=num_heads)

    # 1) Exact-semantics check: f32 compute path.
    kp32 = prepare_kernel_params(params, window_size=window_size, num_heads=num_heads,
                                 compute_dtype=jnp.float32)
    out32 = window_attention_forward(x, y, kp32, window_size=window_size, num_heads=num_heads)
    out32 = jax.block_until_ready(out32)
    assert out32.shape == (B, H, W, C)
    assert jnp.allclose(out32, ref, atol=2e-3, rtol=2e-3), "f32 kernel mismatch vs reference"

    # 2) Performance path: bf16 MXU operands, f32 softmax / accumulation.
    kp16 = prepare_kernel_params(params, window_size=window_size, num_heads=num_heads,
                                 compute_dtype=jnp.bfloat16)
    out16 = window_attention_forward(x, y, kp16, window_size=window_size, num_heads=num_heads)
    out16 = jax.block_until_ready(out16)
    assert out16.shape == (B, H, W, C)
    assert jnp.allclose(out16, ref, atol=5e-3, rtol=5e-3), "bf16 kernel diverged from reference"

    # TODO(synk): shift_size>0 path (roll + attention mask), decode_is fused-qkv
    # path, and training-time mask_image/dropout are not exercised (eval mode).
    print("KERNEL_OK")
</pallas_src>

<mosaic_0001>
module attributes {stable_mosaic.version = 11 : i64} {
  func.func @_window_attn_kernel(%arg0: i32, %arg1: memref<256x32xf32, #tpu.memory_space<vmem>>, %arg2: memref<256x32xf32, #tpu.memory_space<vmem>>, %arg3: memref<32x64xf32, #tpu.memory_space<vmem>>, %arg4: memref<1x64xf32, #tpu.memory_space<vmem>>, %arg5: memref<32x32xf32, #tpu.memory_space<vmem>>, %arg6: memref<1x32xf32, #tpu.memory_space<vmem>>, %arg7: memref<4x16x16xf32, #tpu.memory_space<vmem>>, %arg8: memref<32x32xf32, #tpu.memory_space<vmem>>, %arg9: memref<1x32xf32, #tpu.memory_space<vmem>>, %arg10: memref<256x32xf32, #tpu.memory_space<vmem>>) attributes {dimension_semantics = [#tpu.dimension_semantics<parallel>], iteration_bounds = array<i64: 2>, scalar_prefetch = 0 : i64, scratch_operands = 0 : i64, tpu.core_type = #tpu.core_type<tc>, window_params = [{transform_indices = @transform_0, window_bounds = array<i64: 256, 32>}, {transform_indices = @transform_1, window_bounds = array<i64: 256, 32>}, {pipeline_mode = #tpu.pipeline_mode<synchronous>, transform_indices = @transform_2, window_bounds = array<i64: 32, 64>}, {pipeline_mode = #tpu.pipeline_mode<synchronous>, transform_indices = @transform_3, window_bounds = array<i64: 1, 64>}, {pipeline_mode = #tpu.pipeline_mode<synchronous>, transform_indices = @transform_4, window_bounds = array<i64: 32, 32>}, {pipeline_mode = #tpu.pipeline_mode<synchronous>, transform_indices = @transform_5, window_bounds = array<i64: 1, 32>}, {pipeline_mode = #tpu.pipeline_mode<synchronous>, transform_indices = @transform_6, window_bounds = array<i64: 4, 16, 16>}, {pipeline_mode = #tpu.pipeline_mode<synchronous>, transform_indices = @transform_7, window_bounds = array<i64: 32, 32>}, {pipeline_mode = #tpu.pipeline_mode<synchronous>, transform_indices = @transform_8, window_bounds = array<i64: 1, 32>}, {transform_indices = @transform_9, window_bounds = array<i64: 256, 32>}]} {
    %c0 = arith.constant 0 : index
    %c0_0 = arith.constant 0 : index
    %0 = vector.load %arg1[%c0, %c0_0] : memref<256x32xf32, #tpu.memory_space<vmem>>, vector<256x32xf32>
    %c0_1 = arith.constant 0 : index
    %c0_2 = arith.constant 0 : index
    %1 = vector.load %arg2[%c0_1, %c0_2] : memref<256x32xf32, #tpu.memory_space<vmem>>, vector<256x32xf32>
    %c0_3 = arith.constant 0 : index
    %c0_4 = arith.constant 0 : index
    %2 = vector.load %arg3[%c0_3, %c0_4] : memref<32x64xf32, #tpu.memory_space<vmem>>, vector<32x64xf32>
    %cst = arith.constant dense<0.000000e+00> : vector<256x64xf32>
    %3 = tpu.matmul %0, %2, %cst {dimension_numbers = #tpu.dot_dimension_numbers<[1], [0], [0], [1], [0, 0, 1, 1], [], []>} : vector<256x32xf32>, vector<32x64xf32>, vector<256x64xf32> -> vector<256x64xf32>
    %c0_5 = arith.constant 0 : index
    %c0_6 = arith.constant 0 : index
    %4 = vector.load %arg4[%c0_5, %c0_6] : memref<1x64xf32, #tpu.memory_space<vmem>>, vector<1x64xf32>
    %5 = vector.broadcast %4 : vector<1x64xf32> to vector<256x64xf32>
    %6 = arith.addf %3, %5 : vector<256x64xf32>
    %c0_7 = arith.constant 0 : index
    %c0_8 = arith.constant 0 : index
    %7 = vector.load %arg5[%c0_7, %c0_8] : memref<32x32xf32, #tpu.memory_space<vmem>>, vector<32x32xf32>
    %cst_9 = arith.constant dense<0.000000e+00> : vector<256x32xf32>
    %8 = tpu.matmul %1, %7, %cst_9 {dimension_numbers = #tpu.dot_dimension_numbers<[1], [0], [0], [1], [0, 0, 1, 1], [], []>} : vector<256x32xf32>, vector<32x32xf32>, vector<256x32xf32> -> vector<256x32xf32>
    %c0_10 = arith.constant 0 : index
    %c0_11 = arith.constant 0 : index
    %9 = vector.load %arg6[%c0_10, %c0_11] : memref<1x32xf32, #tpu.memory_space<vmem>>, vector<1x32xf32>
    %10 = vector.broadcast %9 : vector<1x32xf32> to vector<256x32xf32>
    %11 = arith.addf %8, %10 : vector<256x32xf32>
    %12 = vector.shape_cast %6 : vector<256x64xf32> to vector<16x16x64xf32>
    %13 = vector.shape_cast %11 : vector<256x32xf32> to vector<16x16x32xf32>
    %c0_12 = arith.constant 0 : index
    %c0_13 = arith.constant 0 : index
    %c0_14 = arith.constant 0 : index
    %14 = vector.load %arg7[%c0_12, %c0_13, %c0_14] : memref<4x16x16xf32, #tpu.memory_space<vmem>>, vector<4x16x16xf32>
    %15 = vector.extract_strided_slice %13 {offsets = [0, 0, 0], sizes = [16, 16, 8], strides = [1, 1, 1]} : vector<16x16x32xf32> to vector<16x16x8xf32>
    %16 = vector.extract_strided_slice %12 {offsets = [0, 0, 0], sizes = [16, 16, 8], strides = [1, 1, 1]} : vector<16x16x64xf32> to vector<16x16x8xf32>
    %17 = vector.extract_strided_slice %12 {offsets = [0, 0, 32], sizes = [16, 16, 8], strides = [1, 1, 1]} : vector<16x16x64xf32> to vector<16x16x8xf32>
    "tpu.trace_start"() <{level = 10 : i32, message = "wld,wmd->wlm"}> : () -> ()
    %cst_15 = arith.constant dense<0.000000e+00> : vector<16x16x16xf32>
    %18 = tpu.matmul %15, %16, %cst_15 {dimension_numbers = #tpu.dot_dimension_numbers<[2], [2], [1], [1], [0, 0, 0, 1, 1, 1], [0], [0]>} : vector<16x16x8xf32>, vector<16x16x8xf32>, vector<16x16x16xf32> -> vector<16x16x16xf32>
    "tpu.trace_stop"() : () -> ()
    %19 = vector.extract_strided_slice %14 {offsets = [0, 0, 0], sizes = [1, 16, 16], strides = [1, 1, 1]} : vector<4x16x16xf32> to vector<1x16x16xf32>
    %20 = vector.shape_cast %19 : vector<1x16x16xf32> to vector<16x16xf32>
    %21 = vector.shape_cast %20 : vector<16x16xf32> to vector<1x16x16xf32>
    %22 = vector.broadcast %21 : vector<1x16x16xf32> to vector<16x16x16xf32>
    %23 = arith.addf %18, %22 : vector<16x16x16xf32>
    %cst_16 = arith.constant dense<0xFF800000> : vector<16x16xf32>
    %24 = vector.multi_reduction <maximumf>, %23, %cst_16 [2] : vector<16x16x16xf32> to vector<16x16xf32>
    %25 = vector.shape_cast %24 : vector<16x16xf32> to vector<16x16x1xf32>
    %26 = vector.broadcast %25 : vector<16x16x1xf32> to vector<16x16x16xf32>
    %27 = arith.subf %23, %26 : vector<16x16x16xf32>
    %28 = math.exp %27 : vector<16x16x16xf32>
    %cst_17 = arith.constant dense<0.000000e+00> : vector<16x16xf32>
    %29 = vector.multi_reduction <add>, %28, %cst_17 [2] : vector<16x16x16xf32> to vector<16x16xf32>
    %30 = vector.shape_cast %29 : vector<16x16xf32> to vector<16x16x1xf32>
    %cst_18 = arith.constant 1.000000e+00 : f32
    %31 = vector.broadcast %cst_18 : f32 to vector<16x16x1xf32>
    %32 = arith.addf %30, %31 : vector<16x16x1xf32>
    %33 = vector.broadcast %32 : vector<16x16x1xf32> to vector<16x16x16xf32>
    %34 = arith.divf %28, %33 : vector<16x16x16xf32>
    "tpu.trace_start"() <{level = 10 : i32, message = "wlm,wmd->wld"}> : () -> ()
    %cst_19 = arith.constant dense<0.000000e+00> : vector<16x16x8xf32>
    %35 = tpu.matmul %34, %17, %cst_19 {dimension_numbers = #tpu.dot_dimension_numbers<[2], [1], [1], [2], [0, 0, 0, 1, 1, 2], [0], [0]>} : vector<16x16x16xf32>, vector<16x16x8xf32>, vector<16x16x8xf32> -> vector<16x16x8xf32>
    "tpu.trace_stop"() : () -> ()
    %36 = vector.shape_cast %35 : vector<16x16x8xf32> to vector<256x8xf32>
    %c0_20 = arith.constant 0 : index
    %c0_21 = arith.constant 0 : index
    %37 = vector.load %arg8[%c0_20, %c0_21] : memref<32x32xf32, #tpu.memory_space<vmem>>, vector<8x32xf32>
    %cst_22 = arith.constant dense<0.000000e+00> : vector<256x32xf32>
    %38 = tpu.matmul %36, %37, %cst_22 {dimension_numbers = #tpu.dot_dimension_numbers<[1], [0], [0], [1], [0, 0, 1, 1], [], []>} : vector<256x8xf32>, vector<8x32xf32>, vector<256x32xf32> -> vector<256x32xf32>
    %39 = vector.extract_strided_slice %13 {offsets = [0, 0, 8], sizes = [16, 16, 8], strides = [1, 1, 1]} : vector<16x16x32xf32> to vector<16x16x8xf32>
    %40 = vector.extract_strided_slice %12 {offsets = [0, 0, 8], sizes = [16, 16, 8], strides = [1, 1, 1]} : vector<16x16x64xf32> to vector<16x16x8xf32>
    %41 = vector.extract_strided_slice %12 {offsets = [0, 0, 40], sizes = [16, 16, 8], strides = [1, 1, 1]} : vector<16x16x64xf32> to vector<16x16x8xf32>
    "tpu.trace_start"() <{level = 10 : i32, message = "wld,wmd->wlm"}> : () -> ()
    %cst_23 = arith.constant dense<0.000000e+00> : vector<16x16x16xf32>
    %42 = tpu.matmul %39, %40, %cst_23 {dimension_numbers = #tpu.dot_dimension_numbers<[2], [2], [1], [1], [0, 0, 0, 1, 1, 1], [0], [0]>} : vector<16x16x8xf32>, vector<16x16x8xf32>, vector<16x16x16xf32> -> vector<16x16x16xf32>
    "tpu.trace_stop"() : () -> ()
    %43 = vector.extract_strided_slice %14 {offsets = [1, 0, 0], sizes = [1, 16, 16], strides = [1, 1, 1]} : vector<4x16x16xf32> to vector<1x16x16xf32>
    %44 = vector.shape_cast %43 : vector<1x16x16xf32> to vector<16x16xf32>
    %45 = vector.shape_cast %44 : vector<16x16xf32> to vector<1x16x16xf32>
    %46 = vector.broadcast %45 : vector<1x16x16xf32> to vector<16x16x16xf32>
    %47 = arith.addf %42, %46 : vector<16x16x16xf32>
    %cst_24 = arith.constant dense<0xFF800000> : vector<16x16xf32>
    %48 = vector.multi_reduction <maximumf>, %47, %cst_24 [2] : vector<16x16x16xf32> to vector<16x16xf32>
    %49 = vector.shape_cast %48 : vector<16x16xf32> to vector<16x16x1xf32>
    %50 = vector.broadcast %49 : vector<16x16x1xf32> to vector<16x16x16xf32>
    %51 = arith.subf %47, %50 : vector<16x16x16xf32>
    %52 = math.exp %51 : vector<16x16x16xf32>
    %cst_25 = arith.constant dense<0.000000e+00> : vector<16x16xf32>
    %53 = vector.multi_reduction <add>, %52, %cst_25 [2] : vector<16x16x16xf32> to vector<16x16xf32>
    %54 = vector.shape_cast %53 : vector<16x16xf32> to vector<16x16x1xf32>
    %cst_26 = arith.constant 1.000000e+00 : f32
    %55 = vector.broadcast %cst_26 : f32 to vector<16x16x1xf32>
    %56 = arith.addf %54, %55 : vector<16x16x1xf32>
    %57 = vector.broadcast %56 : vector<16x16x1xf32> to vector<16x16x16xf32>
    %58 = arith.divf %52, %57 : vector<16x16x16xf32>
    "tpu.trace_start"() <{level = 10 : i32, message = "wlm,wmd->wld"}> : () -> ()
    %cst_27 = arith.constant dense<0.000000e+00> : vector<16x16x8xf32>
    %59 = tpu.matmul %58, %41, %cst_27 {dimension_numbers = #tpu.dot_dimension_numbers<[2], [1], [1], [2], [0, 0, 0, 1, 1, 2], [0], [0]>} : vector<16x16x16xf32>, vector<16x16x8xf32>, vector<16x16x8xf32> -> vector<16x16x8xf32>
    "tpu.trace_stop"() : () -> ()
    %60 = vector.shape_cast %59 : vector<16x16x8xf32> to vector<256x8xf32>
    %c8 = arith.constant 8 : index
    %c0_28 = arith.constant 0 : index
    %61 = vector.load %arg8[%c8, %c0_28] : memref<32x32xf32, #tpu.memory_space<vmem>>, vector<8x32xf32>
    %cst_29 = arith.constant dense<0.000000e+00> : vector<256x32xf32>
    %62 = tpu.matmul %60, %61, %cst_29 {dimension_numbers = #tpu.dot_dimension_numbers<[1], [0], [0], [1], [0, 0, 1, 1], [], []>} : vector<256x8xf32>, vector<8x32xf32>, vector<256x32xf32> -> vector<256x32xf32>
    %63 = arith.addf %38, %62 : vector<256x32xf32>
    %64 = vector.extract_strided_slice %13 {offsets = [0, 0, 16], sizes = [16, 16, 8], strides = [1, 1, 1]} : vector<16x16x32xf32> to vector<16x16x8xf32>
    %65 = vector.extract_strided_slice %12 {offsets = [0, 0, 16], sizes = [16, 16, 8], strides = [1, 1, 1]} : vector<16x16x64xf32> to vector<16x16x8xf32>
    %66 = vector.extract_strided_slice %12 {offsets = [0, 0, 48], sizes = [16, 16, 8], strides = [1, 1, 1]} : vector<16x16x64xf32> to vector<16x16x8xf32>
    "tpu.trace_start"() <{level = 10 : i32, message = "wld,wmd->wlm"}> : () -> ()
    %cst_30 = arith.constant dense<0.000000e+00> : vector<16x16x16xf32>
    %67 = tpu.matmul %64, %65, %cst_30 {dimension_numbers = #tpu.dot_dimension_numbers<[2], [2], [1], [1], [0, 0, 0, 1, 1, 1], [0], [0]>} : vector<16x16x8xf32>, vector<16x16x8xf32>, vector<16x16x16xf32> -> vector<16x16x16xf32>
    "tpu.trace_stop"() : () -> ()
    %68 = vector.extract_strided_slice %14 {offsets = [2, 0, 0], sizes = [1, 16, 16], strides = [1, 1, 1]} : vector<4x16x16xf32> to vector<1x16x16xf32>
    %69 = vector.shape_cast %68 : vector<1x16x16xf32> to vector<16x16xf32>
    %70 = vector.shape_cast %69 : vector<16x16xf32> to vector<1x16x16xf32>
    %71 = vector.broadcast %70 : vector<1x16x16xf32> to vector<16x16x16xf32>
    %72 = arith.addf %67, %71 : vector<16x16x16xf32>
    %cst_31 = arith.constant dense<0xFF800000> : vector<16x16xf32>
    %73 = vector.multi_reduction <maximumf>, %72, %cst_31 [2] : vector<16x16x16xf32> to vector<16x16xf32>
    %74 = vector.shape_cast %73 : vector<16x16xf32> to vector<16x16x1xf32>
    %75 = vector.broadcast %74 : vector<16x16x1xf32> to vector<16x16x16xf32>
    %76 = arith.subf %72, %75 : vector<16x16x16xf32>
    %77 = math.exp %76 : vector<16x16x16xf32>
    %cst_32 = arith.constant dense<0.000000e+00> : vector<16x16xf32>
    %78 = vector.multi_reduction <add>, %77, %cst_32 [2] : vector<16x16x16xf32> to vector<16x16xf32>
    %79 = vector.shape_cast %78 : vector<16x16xf32> to vector<16x16x1xf32>
    %cst_33 = arith.constant 1.000000e+00 : f32
    %80 = vector.broadcast %cst_33 : f32 to vector<16x16x1xf32>
    %81 = arith.addf %79, %80 : vector<16x16x1xf32>
    %82 = vector.broadcast %81 : vector<16x16x1xf32> to vector<16x16x16xf32>
    %83 = arith.divf %77, %82 : vector<16x16x16xf32>
    "tpu.trace_start"() <{level = 10 : i32, message = "wlm,wmd->wld"}> : () -> ()
    %cst_34 = arith.constant dense<0.000000e+00> : vector<16x16x8xf32>
    %84 = tpu.matmul %83, %66, %cst_34 {dimension_numbers = #tpu.dot_dimension_numbers<[2], [1], [1], [2], [0, 0, 0, 1, 1, 2], [0], [0]>} : vector<16x16x16xf32>, vector<16x16x8xf32>, vector<16x16x8xf32> -> vector<16x16x8xf32>
    "tpu.trace_stop"() : () -> ()
    %85 = vector.shape_cast %84 : vector<16x16x8xf32> to vector<256x8xf32>
    %c16 = arith.constant 16 : index
    %c0_35 = arith.constant 0 : index
    %86 = vector.load %arg8[%c16, %c0_35] : memref<32x32xf32, #tpu.memory_space<vmem>>, vector<8x32xf32>
    %cst_36 = arith.constant dense<0.000000e+00> : vector<256x32xf32>
    %87 = tpu.matmul %85, %86, %cst_36 {dimension_numbers = #tpu.dot_dimension_numbers<[1], [0], [0], [1], [0, 0, 1, 1], [], []>} : vector<256x8xf32>, vector<8x32xf32>, vector<256x32xf32> -> vector<256x32xf32>
    %88 = arith.addf %63, %87 : vector<256x32xf32>
    %89 = vector.extract_strided_slice %13 {offsets = [0, 0, 24], sizes = [16, 16, 8], strides = [1, 1, 1]} : vector<16x16x32xf32> to vector<16x16x8xf32>
    %90 = vector.extract_strided_slice %12 {offsets = [0, 0, 24], sizes = [16, 16, 8], strides = [1, 1, 1]} : vector<16x16x64xf32> to vector<16x16x8xf32>
    %91 = vector.extract_strided_slice %12 {offsets = [0, 0, 56], sizes = [16, 16, 8], strides = [1, 1, 1]} : vector<16x16x64xf32> to vector<16x16x8xf32>
    "tpu.trace_start"() <{level = 10 : i32, message = "wld,wmd->wlm"}> : () -> ()
    %cst_37 = arith.constant dense<0.000000e+00> : vector<16x16x16xf32>
    %92 = tpu.matmul %89, %90, %cst_37 {dimension_numbers = #tpu.dot_dimension_numbers<[2], [2], [1], [1], [0, 0, 0, 1, 1, 1], [0], [0]>} : vector<16x16x8xf32>, vector<16x16x8xf32>, vector<16x16x16xf32> -> vector<16x16x16xf32>
    "tpu.trace_stop"() : () -> ()
    %93 = vector.extract_strided_slice %14 {offsets = [3, 0, 0], sizes = [1, 16, 16], strides = [1, 1, 1]} : vector<4x16x16xf32> to vector<1x16x16xf32>
    %94 = vector.shape_cast %93 : vector<1x16x16xf32> to vector<16x16xf32>
    %95 = vector.shape_cast %94 : vector<16x16xf32> to vector<1x16x16xf32>
    %96 = vector.broadcast %95 : vector<1x16x16xf32> to vector<16x16x16xf32>
    %97 = arith.addf %92, %96 : vector<16x16x16xf32>
    %cst_38 = arith.constant dense<0xFF800000> : vector<16x16xf32>
    %98 = vector.multi_reduction <maximumf>, %97, %cst_38 [2] : vector<16x16x16xf32> to vector<16x16xf32>
    %99 = vector.shape_cast %98 : vector<16x16xf32> to vector<16x16x1xf32>
    %100 = vector.broadcast %99 : vector<16x16x1xf32> to vector<16x16x16xf32>
    %101 = arith.subf %97, %100 : vector<16x16x16xf32>
    %102 = math.exp %101 : vector<16x16x16xf32>
    %cst_39 = arith.constant dense<0.000000e+00> : vector<16x16xf32>
    %103 = vector.multi_reduction <add>, %102, %cst_39 [2] : vector<16x16x16xf32> to vector<16x16xf32>
    %104 = vector.shape_cast %103 : vector<16x16xf32> to vector<16x16x1xf32>
    %cst_40 = arith.constant 1.000000e+00 : f32
    %105 = vector.broadcast %cst_40 : f32 to vector<16x16x1xf32>
    %106 = arith.addf %104, %105 : vector<16x16x1xf32>
    %107 = vector.broadcast %106 : vector<16x16x1xf32> to vector<16x16x16xf32>
    %108 = arith.divf %102, %107 : vector<16x16x16xf32>
    "tpu.trace_start"() <{level = 10 : i32, message = "wlm,wmd->wld"}> : () -> ()
    %cst_41 = arith.constant dense<0.000000e+00> : vector<16x16x8xf32>
    %109 = tpu.matmul %108, %91, %cst_41 {dimension_numbers = #tpu.dot_dimension_numbers<[2], [1], [1], [2], [0, 0, 0, 1, 1, 2], [0], [0]>} : vector<16x16x16xf32>, vector<16x16x8xf32>, vector<16x16x8xf32> -> vector<16x16x8xf32>
    "tpu.trace_stop"() : () -> ()
    %110 = vector.shape_cast %109 : vector<16x16x8xf32> to vector<256x8xf32>
    %c24 = arith.constant 24 : index
    %c0_42 = arith.constant 0 : index
    %111 = vector.load %arg8[%c24, %c0_42] : memref<32x32xf32, #tpu.memory_space<vmem>>, vector<8x32xf32>
    %cst_43 = arith.constant dense<0.000000e+00> : vector<256x32xf32>
    %112 = tpu.matmul %110, %111, %cst_43 {dimension_numbers = #tpu.dot_dimension_numbers<[1], [0], [0], [1], [0, 0, 1, 1], [], []>} : vector<256x8xf32>, vector<8x32xf32>, vector<256x32xf32> -> vector<256x32xf32>
    %113 = arith.addf %88, %112 : vector<256x32xf32>
    %c0_44 = arith.constant 0 : index
    %c0_45 = arith.constant 0 : index
    %114 = vector.load %arg9[%c0_44, %c0_45] : memref<1x32xf32, #tpu.memory_space<vmem>>, vector<1x32xf32>
    %115 = vector.broadcast %114 : vector<1x32xf32> to vector<256x32xf32>
    %116 = arith.addf %113, %115 : vector<256x32xf32>
    %c0_46 = arith.constant 0 : index
    %c0_47 = arith.constant 0 : index
    %117 = vector.load %arg10[%c0_46, %c0_47] : memref<256x32xf32, #tpu.memory_space<vmem>>, vector<256x32xf32>
    tpu.vector_store %arg10[%c0_46, %c0_47], %116 {strides = array<i32>} : memref<256x32xf32, #tpu.memory_space<vmem>>, vector<256x32xf32>,
    return
  }
  func.func @transform_0(%arg0: i32) -> (i32, i32) {
    %c0_i32 = arith.constant 0 : i32
    %c0_i32_0 = arith.constant 0 : i32
    return %arg0, %c0_i32 : i32, i32
  }
  func.func @transform_1(%arg0: i32) -> (i32, i32) {
    %c0_i32 = arith.constant 0 : i32
    %c0_i32_0 = arith.constant 0 : i32
    return %arg0, %c0_i32 : i32, i32
  }
  func.func @transform_2(%arg0: i32) -> (i32, i32) {
    %c0_i32 = arith.constant 0 : i32
    %c0_i32_0 = arith.constant 0 : i32
    %c0_i32_1 = arith.constant 0 : i32
    return %c0_i32, %c0_i32_0 : i32, i32
  }
  func.func @transform_3(%arg0: i32) -> (i32, i32) {
    %c0_i32 = arith.constant 0 : i32
    %c0_i32_0 = arith.constant 0 : i32
    %c0_i32_1 = arith.constant 0 : i32
    return %c0_i32, %c0_i32_0 : i32, i32
  }
  func.func @transform_4(%arg0: i32) -> (i32, i32) {
    %c0_i32 = arith.constant 0 : i32
    %c0_i32_0 = arith.constant 0 : i32
    %c0_i32_1 = arith.constant 0 : i32
    return %c0_i32, %c0_i32_0 : i32, i32
  }
  func.func @transform_5(%arg0: i32) -> (i32, i32) {
    %c0_i32 = arith.constant 0 : i32
    %c0_i32_0 = arith.constant 0 : i32
    %c0_i32_1 = arith.constant 0 : i32
    return %c0_i32, %c0_i32_0 : i32, i32
  }
  func.func @transform_6(%arg0: i32) -> (i32, i32, i32) {
    %c0_i32 = arith.constant 0 : i32
    %c0_i32_0 = arith.constant 0 : i32
    %c0_i32_1 = arith.constant 0 : i32
    %c0_i32_2 = arith.constant 0 : i32
    return %c0_i32, %c0_i32_0, %c0_i32_1 : i32, i32, i32
  }
  func.func @transform_7(%arg0: i32) -> (i32, i32) {
    %c0_i32 = arith.constant 0 : i32
    %c0_i32_0 = arith.constant 0 : i32
    %c0_i32_1 = arith.constant 0 : i32
    return %c0_i32, %c0_i32_0 : i32, i32
  }
  func.func @transform_8(%arg0: i32) -> (i32, i32) {
    %c0_i32 = arith.constant 0 : i32
    %c0_i32_0 = arith.constant 0 : i32
    %c0_i32_1 = arith.constant 0 : i32
    return %c0_i32, %c0_i32_0 : i32, i32
  }
  func.func @transform_9(%arg0: i32) -> (i32, i32) {
    %c0_i32 = arith.constant 0 : i32
    %c0_i32_0 = arith.constant 0 : i32
    return %arg0, %c0_i32 : i32, i32
  }
}

</mosaic_0001>

<bundles_post_ra>
// kernel: tpu_custom_call.1
= control target key start
LH: loop header
LB: loop body
LE: loop exit
PB: predicated region body
PF: predicated region fallthrough
CT: control target
= control target key end

     0   :  { %s19874_s30 = smov 0   ;;  %s23463_s0 = inlined_call_operand.vmem [shape: f32[512,32], index: 0, kind: input, shape index: {}]   ;;  %s23464_s1 = inlined_call_operand.vmem [shape: f32[512,32], index: 1, kind: input, shape index: {}]   ;;  %s23465_s2 = inlined_call_operand.vmem [shape: f32[32,64], index: 2, kind: input, shape index: {}]   ;;  %s23466_s3 = inlined_call_operand.vmem [shape: f32[1,64], index: 3, kind: input, shape index: {}]   ;;  %s23467_s4 = inlined_call_operand.vmem [shape: f32[32,32], index: 4, kind: input, shape index: {}]   ;;  %s23468_s5 = inlined_call_operand.vmem [shape: f32[1,32], index: 5, kind: input, shape index: {}]   ;;  %s23469_s6 = inlined_call_operand.vmem [shape: f32[4,16,16], index: 6, kind: input, shape index: {}]   ;;  %s23470_s7 = inlined_call_operand.vmem [shape: f32[32,32], index: 7, kind: input, shape index: {}]   ;;  %s23471_s8 = inlined_call_operand.vmem [shape: f32[1,32], index: 8, kind: input, shape index: {}]   ;;  %s23472_s9 = inlined_call_operand.vmem [shape: f32[512,32], index: 9, kind: output, shape index: {}]  }
   0x1 LB: > { %s15452_s10 = sadd.s32 4294967295, %s19815_s30   ;;  %p15456_p0 = scmp.ge.s32.totalorder %s19815_s30, 1  ;;  %s19815_s30 = sphi %s19874_s30, %s19_s30  }
   0x2   : > { %p299_p1 = scmp.lt.s32.totalorder %s19815_s30, 3 }
   0x4   : > { %p300_p2 = pnand %p15456_p0, %p299_p1 }
   0x6   : > { %303 = sbr.rel (%p300_p2) target bundleno = 3753 (0xea9), region = 56 }
   0xd   : > { %v422_v0 = vld [vmem:[%s23465_s2] sm:$0xff]  ;;  %v423_v1 = vld [vmem:[%s23465_s2 + $0x8] sm:$0xff]  ;;  %s15457_s17 = sshll.u32 %s15452_s10, 5  ;;  %v424_v5 = vld [vmem:[%s23465_s2 + $0x10] sm:$0xff]  ;;  %vm433_vm0 = vcmask 261120   ;;  %vm1095_vm1 = vcmask 64512  }
   0xe   : > { %v755_v2 = vld [vmem:[%s23467_s4] sm:$0xff]  ;;  %v17968_v3 = vpack.c.bf16 %v423_v1, %v422_v0  ;;  %v756_v4 = vld [vmem:[%s23467_s4 + $0x8] sm:$0xff]  ;;  %v425_v6 = vld [vmem:[%s23465_s2 + $0x18] sm:$0xff]  ;;  %p341_p3 = scmp.lt.s32.totalorder %s15457_s17, 63  ;;  %s19817_s19 = smov 120   ;;  %vm2488_vm3 = vcmask 130048  }
   0xf   : > { %v17976_v7 = vpack.c.bf16 %v756_v4, %v755_v2  ;;  %v17972_v8 = vpack.c.bf16 %v425_v6, %v424_v5  ;;  %v757_v9 = vld [vmem:[%s23467_s4 + $0x10] sm:$0xff]  ;;  %v758_v10 = vld [vmem:[%s23467_s4 + $0x18] sm:$0xff]  ;;  %vm20068_vm2 = vmpackc.low %vm1095_vm1, %vm1095_vm1  ;;  %s19818_s20 = smov 96   ;;  %s19819_s25 = smov 88  }
  0x10   : > { %17969 = vmatprep.subr.bf16.mxu0 %v17968_v3  ;;  %v17980_v11 = vpack.c.bf16 %v758_v10, %v757_v9  ;;  %s23920_s17 = smov (!%p341_p3, %s15457_s17), 63  ;;  %s19821_s12 = smov 80  }
  0x11   : > { %17977 = vmatprep.subr.bf16.mxu1 %v17976_v7  ;;  %17971 = vmatpush3.bf16.msra.mxu0 %v17968_v3  ;;  %s19906_s28 = sshll.u32 %s23920_s17, 3  ;;  %s19822_s21 = smov 104  }
  0x12   : > { %17979 = vmatpush3.bf16.msra.mxu1 %v17976_v7  ;;  %17973 = vmatprep.subr.bf16.mxu0 %v17972_v8  ;;  %s19912_s11 = scalar_lea.vmem %s23463_s0, %s19906_s28  ;;  %s19918_s14 = scalar_lea.vmem %s23464_s1, %s19906_s28 }
  0x13   : > { %17981 = vmatprep.subr.bf16.mxu1 %v17980_v11  ;;  %v358_v12 = vld [vmem:[%s19912_s11] sm:$0xff]  ;;  %v359_v14 = vld [vmem:[%s19912_s11 + $0x8] sm:$0xff]  ;;  %v360_v16 = vld [vmem:[%s19912_s11 + $0x10] sm:$0xff]  ;;  %s19823_s22 = smov 72   ;;  %s23340_s16 = scalar_lea.vmem %s23472_s9, %s19906_s28 }
  0x14   : > { %v390_v13 = vld [vmem:[%s19918_s14] sm:$0xff]  ;;  %16768 = vmatprep.mubr.msk.f32.mxu0 %vm433_vm0, %v358_v12  ;;  %v391_v15 = vld [vmem:[%s19918_s14 + $0x8] sm:$0xff]  ;;  %v392_v17 = vld [vmem:[%s19918_s14 + $0x10] sm:$0xff] }
  0x15   : > { %17975 = vmatpush3.bf16.msra.mxu0 %v17972_v8  ;;  %16824 = vmatprep.mubr.msk.f32.mxu1 %vm433_vm0, %v390_v13  ;;  %v361_v18 = vld [vmem:[%s19912_s11 + $0x18] sm:$0xff]  ;;  %v362_v20 = vld [vmem:[%s19912_s11 + $0x20] sm:$0xff]  ;;  %v363_v22 = vld [vmem:[%s19912_s11 + $0x28] sm:$0xff] }
  0x16   : > { %17983 = vmatpush3.bf16.msra.mxu1 %v17980_v11  ;;  %v393_v19 = vld [vmem:[%s19918_s14 + $0x18] sm:$0xff]  ;;  %v394_v21 = vld [vmem:[%s19918_s14 + $0x20] sm:$0xff]  ;;  %v364_v23 = vld [vmem:[%s19912_s11 + $0x30] sm:$0xff] }
  0x17   : > { %v395_v24 = vld [vmem:[%s19918_s14 + $0x28] sm:$0xff]  ;;  %v396_v25 = vld [vmem:[%s19918_s14 + $0x30] sm:$0xff]  ;;  %v365_v26 = vld [vmem:[%s19912_s11 + $0x38] sm:$0xff] }
  0x18   : > { %16769 = vmatmul.mubr.msk.f32.vlgmr.msra.gmra.mrb[0].mxu0 %vm433_vm0, %v359_v14  ;;  %v366_v27 = vld [vmem:[%s19912_s11 + $0x40] sm:$0xff]  ;;  %v397_v28 = vld [vmem:[%s19918_s14 + $0x38] sm:$0xff]  ;;  %v367_v30 = vld [vmem:[%s19912_s11 + $0x48] sm:$0xff] }
  0x19   : > { %16825 = vmatmul.mubr.msk.f32.vlgmr.msra.gmra.mrb[0].mxu1 %vm433_vm0, %v391_v15  ;;  %16771 = vmatprep.mubr.msk.f32.mxu0 %vm433_vm0, %v360_v16  ;;  %v398_v29 = vld [vmem:[%s19918_s14 + $0x40] sm:$0xff]  ;;  %v368_v31 = vld [vmem:[%s19912_s11 + $0x50] sm:$0xff]  ;;  %v399_v32 = vld [vmem:[%s19918_s14 + $0x48] sm:$0xff] }
  0x1a   : > { %16827 = vmatprep.mubr.msk.f32.mxu1 %vm433_vm0, %v392_v17  ;;  %v400_v33 = vld [vmem:[%s19918_s14 + $0x50] sm:$0xff]  ;;  %v369_v34 = vld [vmem:[%s19912_s11 + $0x58] sm:$0xff]  ;;  %v370_v35 = vld [vmem:[%s19912_s11 + $0x60] sm:$0xff] }
  0x1b   : > { %v401_v36 = vld [vmem:[%s19918_s14 + $0x58] sm:$0xff]  ;;  %v402_v37 = vld [vmem:[%s19918_s14 + $0x60] sm:$0xff]  ;;  %v371_v38 = vld [vmem:[%s19912_s11 + $0x68] sm:$0xff] }
  0x1c   : > { %16772 = vmatmul.mubr.msk.f32.gmra.mrb[2].mxu0 %vm433_vm0, %v361_v18  ;;  %v372_v39 = vld [vmem:[%s19912_s11 + $0x70] sm:$0xff]  ;;  %v403_v40 = vld [vmem:[%s19918_s14 + $0x68] sm:$0xff]  ;;  %v373_v42 = vld [vmem:[%s19912_s11 + $0x78] sm:$0xff] }
  0x1d   : > { %16828 = vmatmul.mubr.msk.f32.gmra.mrb[2].mxu1 %vm433_vm0, %v393_v19  ;;  %16774 = vmatprep.mubr.msk.f32.mxu0 %vm433_vm0, %v362_v20  ;;  %v404_v41 = vld [vmem:[%s19918_s14 + $0x70] sm:$0xff]  ;;  %v374_v43 = vld [vmem:[%s19912_s11 + $0x80] sm:$0xff]  ;;  %v405_v44 = vld [vmem:[%s19918_s14 + $0x78] sm:$0xff] }
  0x1e   : > { %16830 = vmatprep.mubr.msk.f32.mxu1 %vm433_vm0, %v394_v21  ;;  %v406_v45 = vld [vmem:[%s19918_s14 + $0x80] sm:$0xff]  ;;  %v375_v46 = vld [vmem:[%s19912_s11 + $0x88] sm:$0xff]  ;;  %v376_v47 = vld [vmem:[%s19912_s11 + $0x90] sm:$0xff] }
  0x1f   : > { %v407_v48 = vld [vmem:[%s19918_s14 + $0x88] sm:$0xff]  ;;  %v408_v49 = vld [vmem:[%s19918_s14 + $0x90] sm:$0xff]  ;;  %v377_v50 = vld [vmem:[%s19912_s11 + $0x98] sm:$0xff] }
  0x20   : > { %16775 = vmatmul.mubr.msk.f32.gmra.mrb[4].mxu0 %vm433_vm0, %v363_v22  ;;  %v378_v51 = vld [vmem:[%s19912_s11 + $0xa0] sm:$0xff]  ;;  %v409_v52 = vld [vmem:[%s19918_s14 + $0x98] sm:$0xff]  ;;  %v379_v54 = vld [vmem:[%s19912_s11 + $0xa8] sm:$0xff]  ;;  %v23606_v22 = vmov 0 }
  0x21   : > { %16777 = vmatprep.mubr.msk.f32.mxu0 %vm433_vm0, %v364_v23  ;;  %16831 = vmatmul.mubr.msk.f32.gmra.mrb[4].mxu1 %vm433_vm0, %v395_v24  ;;  %v410_v53 = vld [vmem:[%s19918_s14 + $0xa0] sm:$0xff]  ;;  %v380_v55 = vld [vmem:[%s19912_s11 + $0xb0] sm:$0xff]  ;;  %v411_v56 = vld [vmem:[%s19918_s14 + $0xa8] sm:$0xff]  ;;  %v23607_v22 = vsel %vm20068_vm2, 4294967295, %v23606_v22 }
  0x22   : > { %16833 = vmatprep.mubr.msk.f32.mxu1 %vm433_vm0, %v396_v25  ;;  %v412_v57 = vld [vmem:[%s19918_s14 + $0xb0] sm:$0xff]  ;;  %v381_v58 = vld [vmem:[%s19912_s11 + $0xb8] sm:$0xff]  ;;  %v382_v59 = vld [vmem:[%s19912_s11 + $0xc0] sm:$0xff]  ;;  %23608 = vst [vmem:[#allocation4_spill] sm:$0xff] %v23607_v22 }
  0x23   : > { %v413_v60 = vld [vmem:[%s19918_s14 + $0xb8] sm:$0xff]  ;;  %v414_v61 = vld [vmem:[%s19918_s14 + $0xc0] sm:$0xff]  ;;  %v383_v62 = vld [vmem:[%s19912_s11 + $0xc8] sm:$0xff] }
  0x24   : > { %16778 = vmatmul.mubr.msk.f32.gmra.mrb[6].mxu0 %vm433_vm0, %v365_v26  ;;  %v384_v63 = vld [vmem:[%s19912_s11 + $0xd0] sm:$0xff]  ;;  %v415_v0 = vld [vmem:[%s19918_s14 + $0xc8] sm:$0xff]  ;;  %v385_v2 = vld [vmem:[%s19912_s11 + $0xd8] sm:$0xff] }
  0x25   : > { %16780 = vmatprep.mubr.msk.f32.mxu0 %vm433_vm0, %v366_v27  ;;  %16834 = vmatmul.mubr.msk.f32.gmra.mrb[6].mxu1 %vm433_vm0, %v397_v28  ;;  %v416_v1 = vld [vmem:[%s19918_s14 + $0xd0] sm:$0xff]  ;;  %v386_v3 = vld [vmem:[%s19912_s11 + $0xe0] sm:$0xff]  ;;  %v417_v4 = vld [vmem:[%s19918_s14 + $0xd8] sm:$0xff] }
  0x26   : > { %16836 = vmatprep.mubr.msk.f32.mxu1 %vm433_vm0, %v398_v29  ;;  %v418_v5 = vld [vmem:[%s19918_s14 + $0xe0] sm:$0xff]  ;;  %v387_v6 = vld [vmem:[%s19912_s11 + $0xe8] sm:$0xff]  ;;  %v388_v7 = vld [vmem:[%s19912_s11 + $0xf0] sm:$0xff] }
  0x27   : > { %v419_v8 = vld [vmem:[%s19918_s14 + $0xe8] sm:$0xff]  ;;  %v420_v9 = vld [vmem:[%s19918_s14 + $0xf0] sm:$0xff]  ;;  %v389_v10 = vld [vmem:[%s19912_s11 + $0xf8] sm:$0xff]  ;;  %s19820_s11 = smov 112  }
  0x28   : > { %16781 = vmatmul.mubr.msk.f32.gmra.mrb[8].mxu0 %vm433_vm0, %v367_v30  ;;  %v421_v11 = vld [vmem:[%s19918_s14 + $0xf8] sm:$0xff]  ;;  %v20051_v12 = vld [vmem:[%s23466_s3] ss:$0 sm:$0xff] }
  0x29   : > { %16783 = vmatprep.mubr.msk.f32.mxu0 %vm433_vm0, %v368_v31  ;;  %16837 = vmatmul.mubr.msk.f32.gmra.mrb[8].mxu1 %vm433_vm0, %v399_v32  ;;  %v20056_v13 = vld [vmem:[%s23468_s5] ss:$0 sm:$0xff] }
  0x2a   : > { %16839 = vmatprep.mubr.msk.f32.mxu1 %vm433_vm0, %v400_v33 }
  0x2c   : > { %16784 = vmatmul.mubr.msk.f32.gmra.mrb[10].mxu0 %vm433_vm0, %v369_v34 }
  0x2d   : > { %16786 = vmatprep.mubr.msk.f32.mxu0 %vm433_vm0, %v370_v35  ;;  %16840 = vmatmul.mubr.msk.f32.gmra.mrb[10].mxu1 %vm433_vm0, %v401_v36 }
  0x2e   : > { %16842 = vmatprep.mubr.msk.f32.mxu1 %vm433_vm0, %v402_v37 }
  0x30   : > { %16787 = vmatmul.mubr.msk.f32.gmra.mrb[12].mxu0 %vm433_vm0, %v371_v38 }
  0x31   : > { %16789 = vmatprep.mubr.msk.f32.mxu0 %vm433_vm0, %v372_v39  ;;  %16843 = vmatmul.mubr.msk.f32.gmra.mrb[12].mxu1 %vm433_vm0, %v403_v40 }
  0x32   : > { %16845 = vmatprep.mubr.msk.f32.mxu1 %vm433_vm0, %v404_v41 }
  0x34   : > { %16790 = vmatmul.mubr.msk.f32.gmra.mrb[14].mxu0 %vm433_vm0, %v373_v42 }
  0x35   : > { %16792 = vmatprep.mubr.msk.f32.mxu0 %vm433_vm0, %v374_v43  ;;  %16846 = vmatmul.mubr.msk.f32.gmra.mrb[14].mxu1 %vm433_vm0, %v405_v44 }
  0x36   : > { %16848 = vmatprep.mubr.msk.f32.mxu1 %vm433_vm0, %v406_v45 }
  0x38   : > { %16793 = vmatmul.mubr.msk.f32.gmra.mrb[16].mxu0 %vm433_vm0, %v375_v46 }
  0x39   : > { %16795 = vmatprep.mubr.msk.f32.mxu0 %vm433_vm0, %v376_v47  ;;  %16849 = vmatmul.mubr.msk.f32.gmra.mrb[16].mxu1 %vm433_vm0, %v407_v48 }
  0x3a   : > { %16851 = vmatprep.mubr.msk.f32.mxu1 %vm433_vm0, %v408_v49 }
  0x3c   : > { %16796 = vmatmul.mubr.msk.f32.gmra.mrb[18].mxu0 %vm433_vm0, %v377_v50 }
  0x3d   : > { %16798 = vmatprep.mubr.msk.f32.mxu0 %vm433_vm0, %v378_v51  ;;  %16852 = vmatmul.mubr.msk.f32.gmra.mrb[18].mxu1 %vm433_vm0, %v409_v52 }
  0x3e   : > { %16854 = vmatprep.mubr.msk.f32.mxu1 %vm433_vm0, %v410_v53 }
  0x40   : > { %16799 = vmatmul.mubr.msk.f32.gmra.mrb[20].mxu0 %vm433_vm0, %v379_v54 }
  0x41   : > { %16801 = vmatprep.mubr.msk.f32.mxu0 %vm433_vm0, %v380_v55  ;;  %16855 = vmatmul.mubr.msk.f32.gmra.mrb[20].mxu1 %vm433_vm0, %v411_v56 }
  0x42   : > { %16857 = vmatprep.mubr.msk.f32.mxu1 %vm433_vm0, %v412_v57 }
  0x44   : > { %16802 = vmatmul.mubr.msk.f32.gmra.mrb[22].mxu0 %vm433_vm0, %v381_v58 }
  0x45   : > { %16804 = vmatprep.mubr.msk.f32.mxu0 %vm433_vm0, %v382_v59  ;;  %16858 = vmatmul.mubr.msk.f32.gmra.mrb[22].mxu1 %vm433_vm0, %v413_v60 }
  0x46   : > { %16860 = vmatprep.mubr.msk.f32.mxu1 %vm433_vm0, %v414_v61 }
  0x48   : > { %16805 = vmatmul.mubr.msk.f32.gmra.mrb[24].mxu0 %vm433_vm0, %v383_v62 }
  0x49   : > { %16807 = vmatprep.mubr.msk.f32.mxu0 %vm433_vm0, %v384_v63  ;;  %16861 = vmatmul.mubr.msk.f32.gmra.mrb[24].mxu1 %vm433_vm0, %v415_v0 }
  0x4a   : > { %16863 = vmatprep.mubr.msk.f32.mxu1 %vm433_vm0, %v416_v1 }
  0x4c   : > { %16808 = vmatmul.mubr.msk.f32.gmra.mrb[26].mxu0 %vm433_vm0, %v385_v2 }
  0x4d   : > { %16810 = vmatprep.mubr.msk.f32.mxu0 %vm433_vm0, %v386_v3  ;;  %16864 = vmatmul.mubr.msk.f32.gmra.mrb[26].mxu1 %vm433_vm0, %v417_v4 }
  0x4e   : > { %16866 = vmatprep.mubr.msk.f32.mxu1 %vm433_vm0, %v418_v5 }
  0x50   : > { %16811 = vmatmul.mubr.msk.f32.gmra.mrb[28].mxu0 %vm433_vm0, %v387_v6 }
  0x51   : > { %16813 = vmatprep.mubr.msk.f32.mxu0 %vm433_vm0, %v388_v7  ;;  %16867 = vmatmul.mubr.msk.f32.gmra.mrb[28].mxu1 %vm433_vm0, %v419_v8 }
  0x52   : > { %16869 = vmatprep.mubr.msk.f32.mxu1 %vm433_vm0, %v420_v9 }
  0x54   : > { %16814 = vmatmul.mubr.msk.f32.gmra.mrb[30].mxu0 %vm433_vm0, %v389_v10 }
  0x55   : > { %16870 = vmatmul.mubr.msk.f32.gmra.mrb[30].mxu1 %vm433_vm0, %v421_v11 }
  0xeb   : > { %v16770_v14 = vpop.f32.mrb[0].mxu0 }
  0xec   : > { %v602_v15 = vadd.f32 %v16770_v14, %v20051_v12  ;;  %v16826_v16 = vpop.f32.mrb[0].mxu1  ;;  %v596_v17 = vpop.f32.mrb[1].mxu0 }
  0xed   : > { %v20060_v18 = vadd.f32 %v16826_v16, %v20056_v13  ;;  %v597_v19 = vadd.f32 %v20051_v12, %v596_v17  ;;  %v928_v20 = vpop.f32.mrb[1].mxu1 }
  0xee   : > { %v20064_v21 = vadd.f32 %v20056_v13, %v928_v20 }
  0xef   : > { %23604 = vst [vmem:[#allocation2_spill] sm:$0xff] %v20060_v18  ;;  %4268 = vrot.lane.b32.xlu0 %v20060_v18, %s19817_s19  ;;  %v16773_v23 = vpop.f32.mrb[2].mxu0  ;;  %v17984_v24 = vpack.c.bf16 %v602_v15, %v597_v19  ;;  %v20074_v25 = vpack.i.bf16 %v602_v15, %v597_v19 }
  0xf0   : > { %23605 = vst [vmem:[#allocation3_spill] sm:$0xff] %v20064_v21  ;;  %4266 = vrot.lane.b32.xlu1 %v20064_v21, %s19817_s19  ;;  %v612_v26 = vadd.f32 %v16773_v23, %v20051_v12  ;;  %v606_v27 = vpop.f32.mrb[3].mxu0  ;;  %v16829_v28 = vpop.f32.mrb[2].mxu1  ;;  %16876 = vmatprep.mubr.msk.f32.mxu0 %vm1095_vm1, %v20064_v21 }
  0xf1   : > { %23609 = vst [vmem:[#allocation5_spill] sm:$0xff] %v20074_v25  ;;  %v607_v29 = vadd.f32 %v20051_v12, %v606_v27  ;;  %v20083_v30 = vadd.f32 %v16829_v28, %v20056_v13  ;;  %17986 = vmatprep.subr.msk.bf16.mxu0 %vm20068_vm2, %v17984_v24  ;;  %v938_v31 = vpop.f32.mrb[3].mxu1 }
  0xf2   : > { %17989 = vmatpush3.bf16.xpose.msk.msra.mxu0 %vm20068_vm2, %v17984_v24  ;;  %v20090_v32 = vadd.f32 %v20056_v13, %v938_v31 }
  0xf3   : > { %23610 = vst [vmem:[#allocation6_spill] sm:$0xff] %v20083_v30  ;;  %18738 = vrot.lane.b32.xlu0 %v20074_v25, %s19818_s20  ;;  %v16776_v33 = vpop.f32.mrb[4].mxu0  ;;  %v17990_v34 = vpack.c.bf16 %v612_v26, %v607_v29  ;;  %v20094_v35 = vpack.i.bf16 %v612_v26, %v607_v29 }
  0xf4   : > { %23611 = vst [vmem:[#allocation7_spill] sm:$0xff] %v20090_v32  ;;  %4359 = vrot.lane.b32.xlu1 %v20083_v30, %s19817_s19  ;;  %v622_v36 = vadd.f32 %v16776_v33, %v20051_v12  ;;  %v616_v37 = vpop.f32.mrb[5].mxu0  ;;  %16883 = vmatprep.mubr.msk.f32.mxu1 %vm1095_vm1, %v20090_v32  ;;  %v16832_v38 = vpop.f32.mrb[4].mxu1 }
  0xf5   : > { %23612 = vst [vmem:[#allocation8_spill] sm:$0xff] %v20094_v35  ;;  %v617_v39 = vadd.f32 %v20051_v12, %v616_v37  ;;  %17992 = vmatprep.subr.msk.bf16.mxu1 %vm20068_vm2, %v17990_v34  ;;  %v948_v40 = vpop.f32.mrb[5].mxu1  ;;  %v20124_v50 = vadd.f32 %v16832_v38, %v20056_v13 }
  0xf6   : > { %17995 = vmatpush3.bf16.xpose.msk.msra.mxu1 %vm20068_vm2, %v17990_v34  ;;  %v20107_v41 = vadd.f32 %v20056_v13, %v948_v40 }
  0xf7   : > { %18743 = vrot.lane.b32.xlu0 %v20074_v25, %s19817_s19  ;;  %v16779_v42 = vpop.f32.mrb[6].mxu0  ;;  %v17996_v43 = vpack.c.bf16 %v622_v36, %v617_v39  ;;  %v20111_v44 = vpack.i.bf16 %v622_v36, %v617_v39  ;;  %23615 = vst [vmem:[#allocation11_spill] sm:$0xff] %v20124_v50 }
  0xf8   : > { %23613 = vst [vmem:[#allocation9_spill] sm:$0xff] %v20107_v41  ;;  %v632_v45 = vadd.f32 %v16779_v42, %v20051_v12  ;;  %18748 = vrot.lane.b32.xlu1 %v20094_v35, %s19818_s20  ;;  %v626_v46 = vpop.f32.mrb[7].mxu0  ;;  %v16835_v47 = vpop.f32.mrb[6].mxu1 }
  0xf9   : > { %23614 = vst [vmem:[#allocation10_spill] sm:$0xff] %v20111_v44  ;;  %v627_v48 = vadd.f32 %v20051_v12, %v626_v46  ;;  %16877 = vmatmul.mubr.msk.f32.vlgmr.msra.gmra.mrb[32].mxu0 %vm1095_vm1, %v20060_v18  ;;  %17998 = vmatprep.subr.msk.bf16.mxu0 %vm20068_vm2, %v17996_v43  ;;  %v958_v49 = vpop.f32.mrb[7].mxu1  ;;  %v20159_v4 = vadd.f32 %v16835_v47, %v20056_v13 }
  0xfa   : > { %18001 = vmatpush3.bf16.xpose.msk.msra.mxu0 %vm20068_vm2, %v17996_v43  ;;  %v20127_v51 = vadd.f32 %v20056_v13, %v958_v49  ;;  %16890 = vmatprep.mubr.msk.f32.mxu0 %vm1095_vm1, %v20107_v41 }
  0xfb   : > { %v16782_v52 = vpop.f32.mrb[8].mxu0  ;;  %v18002_v53 = vpack.c.bf16 %v632_v45, %v627_v48  ;;  %4357 = vrot.lane.b32.xlu0 %v20090_v32, %s19817_s19  ;;  %v20133_v54 = vpack.i.bf16 %v632_v45, %v627_v48  ;;  %23620 = vst [vmem:[#allocation16_spill] sm:$0xff] %v20159_v4 }
  0xfc   : > { %23616 = vst [vmem:[#allocation12_spill] sm:$0xff] %v20127_v51  ;;  %v642_v55 = vadd.f32 %v16782_v52, %v20051_v12  ;;  %18753 = vrot.lane.b32.xlu1 %v20094_v35, %s19817_s19  ;;  %v636_v56 = vpop.f32.mrb[9].mxu0  ;;  %v16838_v57 = vpop.f32.mrb[8].mxu1 }
  0xfd   : > { %23617 = vst [vmem:[#allocation13_spill] sm:$0xff] %v20133_v54  ;;  %v637_v58 = vadd.f32 %v20051_v12, %v636_v56  ;;  %16884 = vmatmul.mubr.msk.f32.vlgmr.msra.gmra.mrb[32].mxu1 %vm1095_vm1, %v20083_v30  ;;  %18004 = vmatprep.subr.msk.bf16.mxu1 %vm20068_vm2, %v18002_v53  ;;  %v968_v59 = vpop.f32.mrb[9].mxu1  ;;  %v20181_v16 = vadd.f32 %v16838_v57, %v20056_v13 }
  0xfe   : > { %18007 = vmatpush3.bf16.xpose.msk.msra.mxu1 %vm20068_vm2, %v18002_v53  ;;  %16897 = vmatprep.mubr.msk.f32.mxu1 %vm1095_vm1, %v20127_v51  ;;  %v20148_v60 = vadd.f32 %v20056_v13, %v968_v59 }
  0xff   : > { %v16785_v61 = vpop.f32.mrb[10].mxu0  ;;  %v18008_v62 = vpack.c.bf16 %v642_v55, %v637_v58  ;;  %4450 = vrot.lane.b32.xlu0 %v20124_v50, %s19817_s19  ;;  %v20152_v63 = vpack.i.bf16 %v642_v55, %v637_v58  ;;  %23623 = vst [vmem:[#allocation19_spill] sm:$0xff] %v20181_v16 }
 0x100   : > { %23618 = vst [vmem:[#allocation14_spill] sm:$0xff] %v20148_v60  ;;  %v652_v0 = vadd.f32 %v16785_v61, %v20051_v12  ;;  %v646_v1 = vpop.f32.mrb[11].mxu0  ;;  %v16841_v2 = vpop.f32.mrb[10].mxu1  ;;  %4448 = vrot.lane.b32.xlu1 %v20107_v41, %s19817_s19 }
 0x101   : > { %23619 = vst [vmem:[#allocation15_spill] sm:$0xff] %v20152_v63  ;;  %v647_v3 = vadd.f32 %v20051_v12, %v646_v1  ;;  %18010 = vmatprep.subr.msk.bf16.mxu0 %vm20068_vm2, %v18008_v62  ;;  %16891 = vmatmul.mubr.msk.f32.vlgmr.msra.gmra.mrb[34].mxu0 %vm1095_vm1, %v20124_v50  ;;  %v978_v5 = vpop.f32.mrb[11].mxu1  ;;  %v20203_v31 = vadd.f32 %v16841_v2, %v20056_v13 }
 0x102   : > { %18013 = vmatpush3.bf16.xpose.msk.msra.mxu0 %vm20068_vm2, %v18008_v62  ;;  %v20168_v6 = vadd.f32 %v20056_v13, %v978_v5  ;;  %16904 = vmatprep.mubr.msk.f32.mxu0 %vm1095_vm1, %v20148_v60 }
 0x103   : > { %v16788_v7 = vpop.f32.mrb[12].mxu0  ;;  %v18014_v8 = vpack.c.bf16 %v652_v0, %v647_v3  ;;  %18758 = vrot.lane.b32.xlu0 %v20111_v44, %s19818_s20  ;;  %v20174_v9 = vpack.i.bf16 %v652_v0, %v647_v3  ;;  %23626 = vst [vmem:[#allocation22_spill] sm:$0xff] %v20203_v31 }
 0x104   : > { %23621 = vst [vmem:[#allocation17_spill] sm:$0xff] %v20168_v6  ;;  %v662_v10 = vadd.f32 %v16788_v7, %v20051_v12  ;;  %v656_v11 = vpop.f32.mrb[13].mxu0  ;;  %v16844_v14 = vpop.f32.mrb[12].mxu1  ;;  %18773 = vrot.lane.b32.xlu1 %v20133_v54, %s19817_s19 }
 0x105   : > { %23622 = vst [vmem:[#allocation18_spill] sm:$0xff] %v20174_v9  ;;  %v657_v15 = vadd.f32 %v20051_v12, %v656_v11  ;;  %16898 = vmatmul.mubr.msk.f32.vlgmr.msra.gmra.mrb[34].mxu1 %vm1095_vm1, %v20159_v4  ;;  %18016 = vmatprep.subr.msk.bf16.mxu1 %vm20068_vm2, %v18014_v8  ;;  %v988_v17 = vpop.f32.mrb[13].mxu1  ;;  %v20225_v45 = vadd.f32 %v16844_v14, %v20056_v13 }
 0x106   : > { %18019 = vmatpush3.bf16.xpose.msk.msra.mxu1 %vm20068_vm2, %v18014_v8  ;;  %16911 = vmatprep.mubr.msk.f32.mxu1 %vm1095_vm1, %v20168_v6  ;;  %v20192_v19 = vadd.f32 %v20056_v13, %v988_v17 }
 0x107   : > { %v16791_v20 = vpop.f32.mrb[14].mxu0  ;;  %v18020_v23 = vpack.c.bf16 %v662_v10, %v657_v15  ;;  %18763 = vrot.lane.b32.xlu0 %v20111_v44, %s19817_s19  ;;  %v20196_v24 = vpack.i.bf16 %v662_v10, %v657_v15  ;;  %23628 = vst [vmem:[#allocation24_spill] sm:$0xff] %v20225_v45 }
 0x108   : > { %23624 = vst [vmem:[#allocation20_spill] sm:$0xff] %v20192_v19  ;;  %v672_v26 = vadd.f32 %v16791_v20, %v20051_v12  ;;  %v666_v27 = vpop.f32.mrb[15].mxu0  ;;  %v16847_v28 = vpop.f32.mrb[14].mxu1  ;;  %18778 = vrot.lane.b32.xlu1 %v20152_v63, %s19818_s20 }
 0x109   : > { %23625 = vst [vmem:[#allocation21_spill] sm:$0xff] %v20196_v24  ;;  %v667_v29 = vadd.f32 %v20051_v12, %v666_v27  ;;  %18022 = vmatprep.subr.msk.bf16.mxu0 %vm20068_vm2, %v18020_v23  ;;  %16905 = vmatmul.mubr.msk.f32.vlgmr.msra.gmra.mrb[36].mxu0 %vm1095_vm1, %v20181_v16  ;;  %v998_v33 = vpop.f32.mrb[15].mxu1  ;;  %v20247_v58 = vadd.f32 %v16847_v28, %v20056_v13 }
 0x10a   : > { %18025 = vmatpush3.bf16.xpose.msk.msra.mxu0 %vm20068_vm2, %v18020_v23  ;;  %v20212_v34 = vadd.f32 %v20056_v13, %v998_v33  ;;  %16918 = vmatprep.mubr.msk.f32.mxu0 %vm1095_vm1, %v20192_v19 }
 0x10b   : > { %v16794_v36 = vpop.f32.mrb[16].mxu0  ;;  %v18026_v37 = vpack.c.bf16 %v672_v26, %v667_v29  ;;  %18768 = vrot.lane.b32.xlu0 %v20133_v54, %s19818_s20  ;;  %v20218_v38 = vpack.i.bf16 %v672_v26, %v667_v29  ;;  %23631 = vst [vmem:[#allocation27_spill] sm:$0xff] %v20247_v58 }
 0x10c   : > { %23627 = vst [vmem:[#allocation23_spill] sm:$0xff] %v20212_v34  ;;  %v682_v39 = vadd.f32 %v16794_v36, %v20051_v12  ;;  %v676_v40 = vpop.f32.mrb[17].mxu0  ;;  %v16850_v42 = vpop.f32.mrb[16].mxu1  ;;  %18793 = vrot.lane.b32.xlu1 %v20174_v9, %s19817_s19 }
 0x10d   : > { %v677_v43 = vadd.f32 %v20051_v12, %v676_v40  ;;  %16912 = vmatmul.mubr.msk.f32.vlgmr.msra.gmra.mrb[36].mxu1 %vm1095_vm1, %v20203_v31  ;;  %18028 = vmatprep.subr.msk.bf16.mxu1 %vm20068_vm2, %v18026_v37  ;;  %v1008_v46 = vpop.f32.mrb[17].mxu1  ;;  %v20269_v8 = vadd.f32 %v16850_v42, %v20056_v13 }
 0x10e   : > { %18031 = vmatpush3.bf16.xpose.msk.msra.mxu1 %vm20068_vm2, %v18026_v37  ;;  %16925 = vmatprep.mubr.msk.f32.mxu1 %vm1095_vm1, %v20212_v34  ;;  %v20236_v47 = vadd.f32 %v20056_v13, %v1008_v46 }
 0x10f   : > { %v16797_v48 = vpop.f32.mrb[18].mxu0  ;;  %v18032_v49 = vpack.c.bf16 %v682_v39, %v677_v43  ;;  %18783 = vrot.lane.b32.xlu0 %v20152_v63, %s19817_s19  ;;  %v20240_v52 = vpack.i.bf16 %v682_v39, %v677_v43  ;;  %23633 = vst [vmem:[#allocation29_spill] sm:$0xff] %v20269_v8 }
 0x110   : > { %23629 = vst [vmem:[#allocation25_spill] sm:$0xff] %v20236_v47  ;;  %v692_v53 = vadd.f32 %v16797_v48, %v20051_v12  ;;  %v686_v55 = vpop.f32.mrb[19].mxu0  ;;  %v16853_v56 = vpop.f32.mrb[18].mxu1  ;;  %18798 = vrot.lane.b32.xlu1 %v20196_v24, %s19818_s20 }
 0x111   : > { %23630 = vst [vmem:[#allocation26_spill] sm:$0xff] %v20240_v52  ;;  %v687_v57 = vadd.f32 %v20051_v12, %v686_v55  ;;  %18034 = vmatprep.subr.msk.bf16.mxu0 %vm20068_vm2, %v18032_v49  ;;  %16919 = vmatmul.mubr.msk.f32.vlgmr.msra.gmra.mrb[38].mxu0 %vm1095_vm1, %v20225_v45  ;;  %v1018_v59 = vpop.f32.mrb[19].mxu1  ;;  %v20289_v28 = vadd.f32 %v16853_v56, %v20056_v13 }
 0x112   : > { %18037 = vmatpush3.bf16.xpose.msk.msra.mxu0 %vm20068_vm2, %v18032_v49  ;;  %v20256_v61 = vadd.f32 %v20056_v13, %v1018_v59  ;;  %16932 = vmatprep.mubr.msk.f32.mxu0 %vm1095_vm1, %v20236_v47 }
 0x113   : > { %v16800_v62 = vpop.f32.mrb[20].mxu0  ;;  %v18038_v0 = vpack.c.bf16 %v692_v53, %v687_v57  ;;  %18788 = vrot.lane.b32.xlu0 %v20174_v9, %s19818_s20  ;;  %v20262_v1 = vpack.i.bf16 %v692_v53, %v687_v57  ;;  %23636 = vst [vmem:[#allocation32_spill] sm:$0xff] %v20289_v28 }
 0x114   : > { %23632 = vst [vmem:[#allocation28_spill] sm:$0xff] %v20256_v61  ;;  %v702_v2 = vadd.f32 %v16800_v62, %v20051_v12  ;;  %v696_v3 = vpop.f32.mrb[21].mxu0  ;;  %v16856_v5 = vpop.f32.mrb[20].mxu1  ;;  %18808 = vrot.lane.b32.xlu1 %v20240_v52, %s19818_s20 }
 0x115   : > { %v697_v7 = vadd.f32 %v20051_v12, %v696_v3  ;;  %16926 = vmatmul.mubr.msk.f32.vlgmr.msra.gmra.mrb[38].mxu1 %vm1095_vm1, %v20247_v58  ;;  %18040 = vmatprep.subr.msk.bf16.mxu1 %vm20068_vm2, %v18038_v0  ;;  %v1028_v10 = vpop.f32.mrb[21].mxu1  ;;  %v20309_v48 = vadd.f32 %v16856_v5, %v20056_v13 }
 0x116   : > { %18043 = vmatpush3.bf16.xpose.msk.msra.mxu1 %vm20068_vm2, %v18038_v0  ;;  %16939 = vmatprep.mubr.msk.f32.mxu1 %vm1095_vm1, %v20256_v61  ;;  %v20280_v11 = vadd.f32 %v20056_v13, %v1028_v10 }
 0x117   : > { %v16803_v14 = vpop.f32.mrb[22].mxu0  ;;  %v18044_v15 = vpack.c.bf16 %v702_v2, %v697_v7  ;;  %18803 = vrot.lane.b32.xlu0 %v20218_v38, %s19818_s20  ;;  %v20284_v17 = vpack.i.bf16 %v702_v2, %v697_v7  ;;  %23639 = vst [vmem:[#allocation35_spill] sm:$0xff] %v20309_v48 }
 0x118   : > { %23634 = vst [vmem:[#allocation30_spill] sm:$0xff] %v20280_v11  ;;  %v712_v20 = vadd.f32 %v16803_v14, %v20051_v12  ;;  %v706_v23 = vpop.f32.mrb[23].mxu0  ;;  %v16859_v26 = vpop.f32.mrb[22].mxu1 }
 0x119   : > { %23635 = vst [vmem:[#allocation31_spill] sm:$0xff] %v20284_v17  ;;  %v707_v27 = vadd.f32 %v20051_v12, %v706_v23  ;;  %18046 = vmatprep.subr.msk.bf16.mxu0 %vm20068_vm2, %v18044_v15  ;;  %16933 = vmatmul.mubr.msk.f32.vlgmr.msra.gmra.mrb[40].mxu0 %vm1095_vm1, %v20269_v8  ;;  %v1038_v29 = vpop.f32.mrb[23].mxu1  ;;  %v20331_v3 = vadd.f32 %v16859_v26, %v20056_v13 }
 0x11a   : > { %18049 = vmatpush3.bf16.xpose.msk.msra.mxu0 %vm20068_vm2, %v18044_v15  ;;  %v20298_v33 = vadd.f32 %v20056_v13, %v1038_v29  ;;  %16946 = vmatprep.mubr.msk.f32.mxu0 %vm1095_vm1, %v20280_v11 }
 0x11b   : > { %v16806_v36 = vpop.f32.mrb[24].mxu0  ;;  %v18050_v37 = vpack.c.bf16 %v712_v20, %v707_v27  ;;  %18813 = vrot.lane.b32.xlu0 %v20262_v1, %s19818_s20  ;;  %v20304_v39 = vpack.i.bf16 %v712_v20, %v707_v27  ;;  %23642 = vst [vmem:[#allocation38_spill] sm:$0xff] %v20331_v3 }
 0x11c   : > { %23637 = vst [vmem:[#allocation33_spill] sm:$0xff] %v20298_v33  ;;  %v722_v40 = vadd.f32 %v16806_v36, %v20051_v12  ;;  %v716_v42 = vpop.f32.mrb[25].mxu0  ;;  %v16862_v43 = vpop.f32.mrb[24].mxu1 }
 0x11d   : > { %23638 = vst [vmem:[#allocation34_spill] sm:$0xff] %v20304_v39  ;;  %v717_v46 = vadd.f32 %v20051_v12, %v716_v42  ;;  %16940 = vmatmul.mubr.msk.f32.vlgmr.msra.gmra.mrb[40].mxu1 %vm1095_vm1, %v20289_v28  ;;  %18052 = vmatprep.subr.msk.bf16.mxu1 %vm20068_vm2, %v18050_v37  ;;  %v1048_v49 = vpop.f32.mrb[25].mxu1  ;;  %v20340_v7 = vadd.f32 %v16862_v43, %v20056_v13 }
 0x11e   : > { %18055 = vmatpush3.bf16.xpose.msk.msra.mxu1 %vm20068_vm2, %v18050_v37  ;;  %16953 = vmatprep.mubr.msk.f32.mxu1 %vm1095_vm1, %v20298_v33  ;;  %v20320_v53 = vadd.f32 %v20056_v13, %v1048_v49 }
 0x11f   : > { %v16809_v55 = vpop.f32.mrb[26].mxu0  ;;  %v18056_v56 = vpack.c.bf16 %v722_v40, %v717_v46  ;;  %18818 = vrot.lane.b32.xlu0 %v20284_v17, %s19818_s20  ;;  %18823 = vrot.lane.b32.xlu1 %v20304_v39, %s19818_s20  ;;  %v20326_v57 = vpack.i.bf16 %v722_v40, %v717_v46  ;;  %23643 = vst [vmem:[#allocation39_spill] sm:$0xff] %v20340_v7 }
 0x120   : > { %23640 = vst [vmem:[#allocation36_spill] sm:$0xff] %v20320_v53  ;;  %v732_v59 = vadd.f32 %v16809_v55, %v20051_v12  ;;  %v726_v62 = vpop.f32.mrb[27].mxu0  ;;  %v16865_v0 = vpop.f32.mrb[26].mxu1 }
 0x121   : > { %23641 = vst [vmem:[#allocation37_spill] sm:$0xff] %v20326_v57  ;;  %v727_v2 = vadd.f32 %v20051_v12, %v726_v62  ;;  %18058 = vmatprep.subr.msk.bf16.mxu0 %vm20068_vm2, %v18056_v56  ;;  %16947 = vmatmul.mubr.msk.f32.vlgmr.msra.gmra.mrb[42].mxu0 %vm1095_vm1, %v20309_v48  ;;  %v1058_v5 = vpop.f32.mrb[27].mxu1  ;;  %v20363_v40 = vadd.f32 %v16865_v0, %v20056_v13 }
 0x122   : > { %18061 = vmatpush3.bf16.xpose.msk.msra.mxu0 %vm20068_vm2, %v18056_v56  ;;  %v20343_v10 = vadd.f32 %v20056_v13, %v1058_v5  ;;  %16960 = vmatprep.mubr.msk.f32.mxu0 %vm1095_vm1, %v20320_v53 }
 0x123   : > { %v16812_v14 = vpop.f32.mrb[28].mxu0  ;;  %v18062_v15 = vpack.c.bf16 %v732_v59, %v727_v2  ;;  %18828 = vrot.lane.b32.xlu0 %v20326_v57, %s19818_s20  ;;  %v20349_v20 = vpack.i.bf16 %v732_v59, %v727_v2  ;;  %23647 = vst [vmem:[#allocation43_spill] sm:$0xff] %v20363_v40 }
 0x124   : > { %23644 = vst [vmem:[#allocation40_spill] sm:$0xff] %v20343_v10  ;;  %v742_v23 = vadd.f32 %v16812_v14, %v20051_v12  ;;  %v736_v26 = vpop.f32.mrb[29].mxu0  ;;  %v16868_v27 = vpop.f32.mrb[28].mxu1 }
 0x125   : > { %23645 = vst [vmem:[#allocation41_spill] sm:$0xff] %v20349_v20  ;;  %v737_v29 = vadd.f32 %v20051_v12, %v736_v26  ;;  %16954 = vmatmul.mubr.msk.f32.vlgmr.msra.gmra.mrb[42].mxu1 %vm1095_vm1, %v20331_v3  ;;  %18064 = vmatprep.subr.msk.bf16.mxu1 %vm20068_vm2, %v18062_v15  ;;  %v20358_v36 = vadd.f32 %v16868_v27, %v20056_v13  ;;  %v1068_v37 = vpop.f32.mrb[29].mxu1 }
 0x126   : > { %18067 = vmatpush3.bf16.xpose.msk.msra.mxu1 %vm20068_vm2, %v18062_v15  ;;  %16967 = vmatprep.mubr.msk.f32.mxu1 %vm1095_vm1, %v20343_v10  ;;  %v20368_v42 = vadd.f32 %v20056_v13, %v1068_v37 }
 0x127   : > { %23646 = vst [vmem:[#allocation42_spill] sm:$0xff] %v20358_v36  ;;  %v16815_v43 = vpop.f32.mrb[30].mxu0  ;;  %v18068_v46 = vpack.c.bf16 %v742_v23, %v737_v29  ;;  %18833 = vrot.lane.b32.xlu1 %v20349_v20, %s19818_s20  ;;  %v20372_v49 = vpack.i.bf16 %v742_v23, %v737_v29 }
 0x128   : > { %23648 = vst [vmem:[#allocation44_spill] sm:$0xff] %v20368_v42  ;;  %v752_v55 = vadd.f32 %v16815_v43, %v20051_v12  ;;  %v746_v56 = vpop.f32.mrb[31].mxu0  ;;  %v16871_v59 = vpop.f32.mrb[30].mxu1 }
 0x129   : > { %23649 = vst [vmem:[#allocation45_spill] sm:$0xff] %v20372_v49  ;;  %v747_v62 = vadd.f32 %v20051_v12, %v746_v56  ;;  %18070 = vmatprep.subr.msk.bf16.mxu0 %vm20068_vm2, %v18068_v46  ;;  %16961 = vmatmul.mubr.msk.f32.vlgmr.msra.gmra.mrb[44].mxu0 %vm1095_vm1, %v20340_v7  ;;  %v20381_v0 = vadd.f32 %v16871_v59, %v20056_v13  ;;  %v1078_v2 = vpop.f32.mrb[31].mxu1 }
 0x12a   : > { %18073 = vmatpush3.bf16.xpose.msk.msra.mxu0 %vm20068_vm2, %v18068_v46  ;;  %16974 = vmatprep.mubr.msk.f32.mxu0 %vm1095_vm1, %v20368_v42  ;;  %v20388_v5 = vadd.f32 %v20056_v13, %v1078_v2 }
 0x12b   : > { %23650 = vst [vmem:[#allocation46_spill] sm:$0xff] %v20381_v0  ;;  %v18074_v12 = vpack.c.bf16 %v752_v55, %v747_v62  ;;  %18838 = vrot.lane.b32.xlu0 %v20372_v49, %s19818_s20  ;;  %v20392_v14 = vpack.i.bf16 %v752_v55, %v747_v62 }
 0x12c   : > { %23651 = vst [vmem:[#allocation47_spill] sm:$0xff] %v20388_v5 }
 0x12d   : > { %23652 = vst [vmem:[#allocation48_spill] sm:$0xff] %v20392_v14  ;;  %16968 = vmatmul.mubr.msk.f32.vlgmr.msra.gmra.mrb[44].mxu1 %vm1095_vm1, %v20363_v40  ;;  %18076 = vmatprep.subr.msk.bf16.mxu1 %vm20068_vm2, %v18074_v12 }
 0x12e   : > { %18079 = vmatpush3.bf16.xpose.msk.msra.mxu1 %vm20068_vm2, %v18074_v12  ;;  %16981 = vmatprep.mubr.msk.f32.mxu1 %vm1095_vm1, %v20388_v5 }
 0x12f   : > { %18843 = vrot.lane.b32.xlu1 %v20392_v14, %s19818_s20 }
 0x131   : > { %16975 = vmatmul.mubr.msk.f32.vlgmr.msra.gmra.mrb[46].mxu0 %vm1095_vm1, %v20358_v36 }
 0x135   : > { %16982 = vmatmul.mubr.msk.f32.vlgmr.msra.gmra.mrb[46].mxu1 %vm1095_vm1, %v20381_v0 }
 0x161   : > { %v20408_v13 = vpop.permute.xlu0 %4268 }
 0x162   : > { %23653 = vst [vmem:[#allocation49_spill] sm:$0xff] %v20408_v13  ;;  %v20410_v15 = vpop.permute.xlu1 %4266 }
 0x163   : > { %23654 = vst [vmem:[#allocation50_spill] sm:$0xff] %v20410_v15 }
 0x165   : > { %v18739_v23 = vpop.permute.xlu0 %18738 }
 0x166   : > { %v18741_v26 = vunpack.i.h.bf16 %v18739_v23  ;;  %v18740_v27 = vunpack.i.l.bf16 %v18739_v23  ;;  %v20412_v29 = vpop.permute.xlu1 %4359 }
 0x167   : > { %23655 = vst [vmem:[#allocation51_spill] sm:$0xff] %v20412_v29 }
 0x168   : > { %v18080_v37 = vpack.c.bf16 %v18741_v26, %v18740_v27 }
 0x169   : > { %v20414_v43 = vpop.permute.xlu0 %18743 }
 0x16a   : > { %23656 = vst [vmem:[#allocation52_spill] sm:$0xff] %v20414_v43  ;;  %v18749_v46 = vpop.permute.xlu1 %18748  ;;  %18081 = vmatprep.subr.bf16.mxu0 %v18080_v37 }
 0x16b   : > { %v18751_v55 = vunpack.i.h.bf16 %v18749_v46  ;;  %v18750_v56 = vunpack.i.l.bf16 %v18749_v46  ;;  %18083 = vmatpush3.bf16.msra.mxu0 %v18080_v37 }
 0x16d   : > { %v18084_v59 = vpack.c.bf16 %v18751_v55, %v18750_v56  ;;  %v20416_v62 = vpop.permute.xlu0 %4357  ;;  %v20431_v55 = vld [vmem:[%s23469_s6 + $0x8] sm:$0xff] }
 0x16e   : > { %23657 = vst [vmem:[#allocation53_spill] sm:$0xff] %v20416_v62 }
 0x16f   : > { %18085 = vmatprep.subr.bf16.mxu1 %v18084_v59 }
 0x170   : > { %18087 = vmatpush3.bf16.msra.mxu1 %v18084_v59 }
 0x171   : > { %v20418_v2 = vpop.permute.xlu0 %4450 }
 0x172   : > { %23658 = vst [vmem:[#allocation54_spill] sm:$0xff] %v20418_v2 }
 0x175   : > { %v18759_v12 = vpop.permute.xlu0 %18758 }
 0x176   : > { %v18761_v41 = vunpack.i.h.bf16 %v18759_v12  ;;  %v18760_v23 = vunpack.i.l.bf16 %v18759_v12 }
 0x178   : > { %v20420_v30 = vpack.c.bf16 %v18761_v41, %v18760_v23  ;;  %v20436_v41 = vld [vmem:[%s23469_s6] sm:$0xff] }
 0x179   : > { %v20422_v26 = vpop.permute.xlu0 %18763 }
 0x17a   : > { %23659 = vst [vmem:[#allocation55_spill] sm:$0xff] %v20420_v30  ;;  %23660 = vst [vmem:[#allocation56_spill] sm:$0xff] %v20422_v26  ;;  %18089 = vmatprep.subr.bf16.mxu0 %v20420_v30 }
 0x17d   : > { %v18769_v27 = vpop.permute.xlu0 %18768 }
 0x17e   : > { %v18771_v18 = vunpack.i.h.bf16 %v18769_v27  ;;  %v18770_v46 = vunpack.i.l.bf16 %v18769_v27 }
 0x180   : > { %v20425_v37 = vpack.c.bf16 %v18771_v18, %v18770_v46 }
 0x182   : > { %23661 = vst [vmem:[#allocation57_spill] sm:$0xff] %v20425_v37  ;;  %18093 = vmatprep.subr.bf16.mxu1 %v20425_v37 }
 0x1cc   : > { %v16878_v56 = vpop.f32.mrb[32].mxu0 }
 0x1cd   : > { %v20439_v59 = vadd.f32 %v16878_v56, %v20431_v55  ;;  %v1174_v12 = vpop.f32.mrb[33].mxu0 }
 0x1ce   : > { %v20444_v23 = vadd.f32 %v1174_v12, %v20436_v41 }
 0x1cf   : > { %v2492_v18 = vsel %vm2488_vm3, %v20439_v59, -inf }
 0x1d0   : > { %v16885_v27 = vpop.f32.mrb[32].mxu1  ;;  %2493 = vmax.xlane.f32.xlu0 %v2492_v18  ;;  %v2489_v56 = vsel %vm2488_vm3, %v20444_v23, -inf }
 0x1d1   : > { %v1261_v46 = vpop.f32.mrb[33].mxu1  ;;  %v20450_v50 = vadd.f32 %v16885_v27, %v20431_v55 }
 0x1d2   : > { %v20447_v21 = vadd.f32 %v1261_v46, %v20436_v41 }
 0x1d3   : > { %v2498_v46 = vsel %vm2488_vm3, %v20450_v50, -inf }
 0x1d4   : > { %2490 = vmax.xlane.f32.xlu0 %v2489_v56  ;;  %v2495_v32 = vsel %vm2488_vm3, %v20447_v21, -inf  ;;  %v16892_v2 = vpop.f32.mrb[34].mxu0 }
 0x1d5   : > { %2496 = vmax.xlane.f32.xlu1 %v2495_v32  ;;  %v20457_v12 = vadd.f32 %v16892_v2, %v20431_v55  ;;  %v1348_v18 = vpop.f32.mrb[35].mxu0 }
 0x1d6   : > { %v20464_v13 = vadd.f32 %v1348_v18, %v20436_v41 }
 0x1d7   : > { %v2504_v27 = vsel %vm2488_vm3, %v20457_v12, -inf }
 0x1d8   : > { %v16899_v29 = vpop.f32.mrb[34].mxu1  ;;  %2499 = vmax.xlane.f32.xlu0 %v2498_v46  ;;  %v2501_v26 = vsel %vm2488_vm3, %v20464_v13, -inf }
 0x1d9   : > { %v20467_v56 = vadd.f32 %v16899_v29, %v20431_v55  ;;  %2505 = vmax.xlane.f32.xlu1 %v2504_v27  ;;  %v1435_v32 = vpop.f32.mrb[35].mxu1 }
 0x1da   : > { %v20470_v2 = vadd.f32 %v1435_v32, %v20436_v41 }
 0x1db   : > { %v2510_v62 = vsel %vm2488_vm3, %v20467_v56, -inf }
 0x1dc   : > { %2511 = vmax.xlane.f32.xlu0 %v2510_v62  ;;  %v16906_v15 = vpop.f32.mrb[36].mxu0  ;;  %v2507_v29 = vsel %vm2488_vm3, %v20470_v2, -inf }
 0x1dd   : > { %v20477_v46 = vadd.f32 %v16906_v15, %v20431_v55  ;;  %2502 = vmax.xlane.f32.xlu1 %v2501_v26  ;;  %v1522_v18 = vpop.f32.mrb[37].mxu0 }
 0x1de   : > { %v20484_v22 = vadd.f32 %v1522_v18, %v20436_v41 }
 0x1df   : > { %v2516_v27 = vsel %vm2488_vm3, %v20477_v46, -inf }
 0x1e0   : > { %v16913_v32 = vpop.f32.mrb[36].mxu1  ;;  %2508 = vmax.xlane.f32.xlu0 %v2507_v29  ;;  %v2513_v44 = vsel %vm2488_vm3, %v20484_v22, -inf }
 0x1e1   : > { %v20487_v62 = vadd.f32 %v16913_v32, %v20431_v55  ;;  %2517 = vmax.xlane.f32.xlu1 %v2516_v27  ;;  %v1609_v43 = vpop.f32.mrb[37].mxu1 }
 0x1e2   : > { %v20490_v15 = vadd.f32 %v1609_v43, %v20436_v41 }
 0x1e3   : > { %v2522_v26 = vsel %vm2488_vm3, %v20487_v62, -inf }
 0x1e4   : > { %2523 = vmax.xlane.f32.xlu0 %v2522_v26  ;;  %v16920_v63 = vpop.f32.mrb[38].mxu0  ;;  %v2519_v27 = vsel %vm2488_vm3, %v20490_v15, -inf }
 0x1e5   : > { %v20497_v29 = vadd.f32 %v16920_v63, %v20431_v55  ;;  %2514 = vmax.xlane.f32.xlu1 %v2513_v44  ;;  %v1696_v18 = vpop.f32.mrb[39].mxu0 }
 0x1e6   : > { %v20504_v25 = vadd.f32 %v1696_v18, %v20436_v41 }
 0x1e7   : > { %v2528_v43 = vsel %vm2488_vm3, %v20497_v29, -inf }
 0x1e8   : > { %v16927_v32 = vpop.f32.mrb[38].mxu1  ;;  %2520 = vmax.xlane.f32.xlu0 %v2519_v27  ;;  %v2525_v54 = vsel %vm2488_vm3, %v20504_v25, -inf }
 0x1e9   : > { %v20507_v26 = vadd.f32 %v16927_v32, %v20431_v55  ;;  %2529 = vmax.xlane.f32.xlu1 %v2528_v43  ;;  %v1783_v9 = vpop.f32.mrb[39].mxu1 }
 0x1ea   : > { %v20510_v63 = vadd.f32 %v1783_v9, %v20436_v41 }
 0x1eb   : > { %v2534_v44 = vsel %vm2488_vm3, %v20507_v26, -inf }
 0x1ec   : > { %2535 = vmax.xlane.f32.xlu0 %v2534_v44  ;;  %v16934_v0 = vpop.f32.mrb[40].mxu0  ;;  %v2531_v43 = vsel %vm2488_vm3, %v20510_v63, -inf }
 0x1ed   : > { %v20517_v27 = vadd.f32 %v16934_v0, %v20431_v55  ;;  %2526 = vmax.xlane.f32.xlu1 %v2525_v54  ;;  %v1870_v18 = vpop.f32.mrb[41].mxu0 }
 0x1ee   : > { %v20524_v36 = vadd.f32 %v1870_v18, %v20436_v41 }
 0x1ef   : > { %v2540_v9 = vsel %vm2488_vm3, %v20517_v27, -inf }
 0x1f0   : > { %v16941_v32 = vpop.f32.mrb[40].mxu1  ;;  %2532 = vmax.xlane.f32.xlu0 %v2531_v43  ;;  %v2537_v5 = vsel %vm2488_vm3, %v20524_v36, -inf }
 0x1f1   : > { %v20527_v44 = vadd.f32 %v16941_v32, %v20431_v55  ;;  %2541 = vmax.xlane.f32.xlu1 %v2540_v9  ;;  %v1957_v35 = vpop.f32.mrb[41].mxu1 }
 0x1f2   : > { %v20530_v0 = vadd.f32 %v1957_v35, %v20436_v41 }
 0x1f3   : > { %v2546_v54 = vsel %vm2488_vm3, %v20527_v44, -inf }
 0x1f4   : > { %2547 = vmax.xlane.f32.xlu0 %v2546_v54  ;;  %v16948_v40 = vpop.f32.mrb[42].mxu0  ;;  %v2543_v18 = vsel %vm2488_vm3, %v20530_v0, -inf }
 0x1f5   : > { %v20537_v43 = vadd.f32 %v16948_v40, %v20431_v55  ;;  %2538 = vmax.xlane.f32.xlu1 %v2537_v5  ;;  %v2044_v9 = vpop.f32.mrb[43].mxu0 }
 0x1f6   : > { %v20542_v32 = vadd.f32 %v2044_v9, %v20436_v41 }
 0x1f7   : > { %v2552_v35 = vsel %vm2488_vm3, %v20537_v43, -inf }
 0x1f8   : > { %v16955_v14 = vpop.f32.mrb[42].mxu1  ;;  %2544 = vmax.xlane.f32.xlu0 %v2543_v18  ;;  %v2549_v5 = vsel %vm2488_vm3, %v20542_v32, -inf }
 0x1f9   : > { %v20547_v54 = vadd.f32 %v16955_v14, %v20431_v55  ;;  %2553 = vmax.xlane.f32.xlu1 %v2552_v35  ;;  %v2131_v42 = vpop.f32.mrb[43].mxu1 }
 0x1fa   : > { %v20550_v40 = vadd.f32 %v2131_v42, %v20436_v41 }
 0x1fb   : > { %v2558_v9 = vsel %vm2488_vm3, %v20547_v54, -inf }
 0x1fc   : > { %2559 = vmax.xlane.f32.xlu0 %v2558_v9  ;;  %v16962_v53 = vpop.f32.mrb[44].mxu0  ;;  %v2555_v14 = vsel %vm2488_vm3, %v20550_v40, -inf }
 0x1fd   : > { %v20557_v10 = vadd.f32 %v16962_v53, %v20431_v55  ;;  %2550 = vmax.xlane.f32.xlu1 %v2549_v5  ;;  %v2218_v18 = vpop.f32.mrb[45].mxu0 }
 0x1fe   : > { %v20562_v35 = vadd.f32 %v2218_v18, %v20436_v41 }
 0x1ff   : > { %v2564_v42 = vsel %vm2488_vm3, %v20557_v10, -inf }
 0x200   : > { %v16969_v3 = vpop.f32.mrb[44].mxu1  ;;  %2556 = vmax.xlane.f32.xlu0 %v2555_v14  ;;  %v2561_v5 = vsel %vm2488_vm3, %v20562_v35, -inf }
 0x201   : > { %v2305_v7 = vpop.f32.mrb[45].mxu1  ;;  %2565 = vmax.xlane.f32.xlu1 %v2564_v42  ;;  %v20567_v9 = vadd.f32 %v16969_v3, %v20431_v55 }
 0x202   : > { %v20570_v53 = vadd.f32 %v2305_v7, %v20436_v41 }
 0x203   : > { %v2570_v3 = vsel %vm2488_vm3, %v20567_v9, -inf }
 0x204   : > { %v16976_v20 = vpop.f32.mrb[46].mxu0  ;;  %v2567_v18 = vsel %vm2488_vm3, %v20570_v53, -inf }
 0x205   : > { %v2392_v49 = vpop.f32.mrb[47].mxu0  ;;  %2562 = vmax.xlane.f32.xlu1 %v2561_v5  ;;  %2568 = vmax.xlane.f32.xlu0 %v2567_v18  ;;  %v20577_v14 = vadd.f32 %v16976_v20, %v20431_v55 }
 0x206   : > { %v20580_v42 = vadd.f32 %v2392_v49, %v20436_v41 }
 0x207   : > { %v2576_v20 = vsel %vm2488_vm3, %v20577_v14, -inf }
 0x208   : > { %v16983_v7 = vpop.f32.mrb[46].mxu1  ;;  %v2573_v11 = vsel %vm2488_vm3, %v20580_v42, -inf }
 0x209   : > { %v20587_v33 = vadd.f32 %v16983_v7, %v20431_v55  ;;  %v2479_v28 = vpop.f32.mrb[47].mxu1  ;;  %2571 = vmax.xlane.f32.xlu1 %v2570_v3  ;;  %2574 = vmax.xlane.f32.xlu0 %v2573_v11  ;;  %v20598_v55 = vpop.permute.xlu1 %18753 }
 0x20a   : > { %v20590_v5 = vadd.f32 %v2479_v28, %v20436_v41  ;;  %23662 = vst [vmem:[#allocation58_spill] sm:$0xff] %v20598_v55  ;;  %v20604_v28 = vpop.permute.xlu0 %18783 }
 0x20b   : > { %v2582_v18 = vsel %vm2488_vm3, %v20587_v33, -inf  ;;  %23665 = vst [vmem:[#allocation61_spill] sm:$0xff] %v20604_v28 }
 0x20c   : > { %v2579_v49 = vsel %vm2488_vm3, %v20590_v5, -inf }
 0x20d   : > { %2577 = vmax.xlane.f32.xlu1 %v2576_v20  ;;  %2580 = vmax.xlane.f32.xlu0 %v2579_v49  ;;  %v20600_v7 = vpop.permute.xlu1 %4448 }
 0x20e   : > { %23663 = vst [vmem:[#allocation59_spill] sm:$0xff] %v20600_v7  ;;  %v20608_v3 = vpop.permute.xlu0 %18788 }
 0x20f   : > { %23666 = vst [vmem:[#allocation62_spill] sm:$0xff] %v20608_v3 }
 0x211   : > { %2583 = vmax.xlane.f32.xlu1 %v2582_v18  ;;  %v20602_v11 = vpop.permute.xlu1 %18773 }
 0x212   : > { %23664 = vst [vmem:[#allocation60_spill] sm:$0xff] %v20602_v11  ;;  %v20612_v20 = vpop.permute.xlu0 %18803 }
 0x213   : > { %23668 = vst [vmem:[#allocation64_spill] sm:$0xff] %v20612_v20 }
 0x215   : > { %v20606_v41 = vpop.permute.xlu1 %18778 }
 0x216   : > { %v20616_v48 = vpop.permute.xlu0 %18813 }
 0x217   : > { %23670 = vst [vmem:[#allocation66_spill] sm:$0xff] %v20616_v48 }
 0x219   : > { %v20610_v37 = vpop.permute.xlu1 %18793 }
 0x21a   : > { %23667 = vst [vmem:[#allocation63_spill] sm:$0xff] %v20610_v37  ;;  %v20618_v18 = vpop.permute.xlu0 %18818 }
 0x21b   : > { %23671 = vst [vmem:[#allocation67_spill] sm:$0xff] %v20618_v18 }
 0x21d   : > { %v20614_v49 = vpop.permute.xlu1 %18798 }
 0x21e   : > { %23669 = vst [vmem:[#allocation65_spill] sm:$0xff] %v20614_v49  ;;  %v20622_v7 = vpop.permute.xlu0 %18828 }
 0x21f   : > { %23673 = vst [vmem:[#allocation69_spill] sm:$0xff] %v20622_v7 }
 0x221   : > { %v20620_v55 = vpop.permute.xlu1 %18808 }
 0x222   : > { %23672 = vst [vmem:[#allocation68_spill] sm:$0xff] %v20620_v55  ;;  %v20626_v28 = vpop.permute.xlu0 %18838 }
 0x223   : > { %23675 = vst [vmem:[#allocation71_spill] sm:$0xff] %v20626_v28 }
 0x225   : > { %v20624_v11 = vpop.permute.xlu1 %18823 }
 0x226   : > { %23674 = vst [vmem:[#allocation70_spill] sm:$0xff] %v20624_v11 }
 0x229   : > { %v20628_v39 = vpop.permute.xlu1 %18833 }
 0x22a   : > { %23676 = vst [vmem:[#allocation72_spill] sm:$0xff] %v20628_v39 }
 0x22d   : > { %v20630_v37 = vpop.permute.xlu1 %18843 }
 0x22e   : > { %23677 = vst [vmem:[#allocation73_spill] sm:$0xff] %v20630_v37 }
 0x25d   : > { %v2494_v3 = vpop.xlane.xlu0 %2493 }
 0x25e   : > { %v2586_v20 = vsub.f32 %v20439_v59, %v2494_v3 }
 0x260   : > { %v2619_v49 = vmul.f32 1.442695, %v2586_v20 }
 0x261   : > { %v2491_v57 = vpop.xlane.xlu0 %2490 }
 0x262   : > { %19297 = vpow2.f32 %v2619_v49  ;;  %v2585_v18 = vsub.f32 %v20444_v23, %v2491_v57  ;;  %v2497_v48 = vpop.xlane.xlu1 %2496 }
 0x263   : > { %v2587_v7 = vsub.f32 %v20447_v21, %v2497_v48 }
 0x264   : > { %v2617_v55 = vmul.f32 1.442695, %v2585_v18 }
 0x265   : > { %v2500_v47 = vpop.xlane.xlu0 %2499  ;;  %v2621_v30 = vmul.f32 1.442695, %v2587_v7 }
 0x266   : > { %19299 = vpow2.f32 %v2617_v55  ;;  %v2588_v28 = vsub.f32 %v20450_v50, %v2500_v47  ;;  %v2506_v11 = vpop.xlane.xlu1 %2505 }
 0x267   : > { %v2590_v39 = vsub.f32 %v20457_v12, %v2506_v11 }
 0x268   : > { %v2623_v37 = vmul.f32 1.442695, %v2588_v28 }
 0x269   : > { %v2627_v61 = vmul.f32 1.442695, %v2590_v39  ;;  %v2512_v59 = vpop.xlane.xlu0 %2511 }
 0x26a   : > { %19301 = vpow2.f32 %v2623_v37  ;;  %v2592_v3 = vsub.f32 %v20467_v56, %v2512_v59  ;;  %v2503_v20 = vpop.xlane.xlu1 %2502 }
 0x26b   : > { %19303 = vpow2.f32 %v2627_v61  ;;  %v2589_v57 = vsub.f32 %v20464_v13, %v2503_v20 }
 0x26c   : > { %v20639_v23 = vpop.eup %19297  ;;  %19305 = vpow2.f32 %v2621_v30  ;;  %v2631_v21 = vmul.f32 1.442695, %v2592_v3 }
 0x26d   : > { %v2625_v48 = vmul.f32 1.442695, %v2589_v57  ;;  %v2509_v50 = vpop.xlane.xlu0 %2508  ;;  %v2684_v47 = vsel %vm2488_vm3, %v20639_v23, 0.0 }
 0x26e   : > { %v2591_v12 = vsub.f32 %v20470_v2, %v2509_v50  ;;  %2685 = vadd.xlane.f32.xlu1 %v2684_v47  ;;  %v2518_v39 = vpop.xlane.xlu1 %2517 }
 0x26f   : > { %19307 = vpow2.f32 %v2625_v48  ;;  %v2594_v37 = vsub.f32 %v20477_v46, %v2518_v39 }
 0x270   : > { %v20645_v56 = vpop.eup %19299  ;;  %19309 = vpow2.f32 %v2631_v21  ;;  %v2629_v61 = vmul.f32 1.442695, %v2591_v12 }
 0x271   : > { %v2635_v13 = vmul.f32 1.442695, %v2594_v37  ;;  %v2524_v55 = vpop.xlane.xlu0 %2523  ;;  %v2681_v30 = vsel %vm2488_vm3, %v20645_v56, 0.0 }
 0x272   : > { %v2596_v7 = vsub.f32 %v20487_v62, %v2524_v55  ;;  %v2515_v11 = vpop.xlane.xlu1 %2514  ;;  %2682 = vadd.xlane.f32.xlu0 %v2681_v30 }
 0x273   : > { %19311 = vpow2.f32 %v2635_v13  ;;  %v2593_v2 = vsub.f32 %v20484_v22, %v2515_v11 }
 0x274   : > { %v20651_v28 = vpop.eup %19301  ;;  %19313 = vpow2.f32 %v2629_v61  ;;  %v2639_v46 = vmul.f32 1.442695, %v2596_v7 }
 0x275   : > { %v20653_v49 = vpop.eup %19303  ;;  %v2633_v18 = vmul.f32 1.442695, %v2593_v2  ;;  %v2521_v59 = vpop.xlane.xlu0 %2520  ;;  %v2690_v3 = vsel %vm2488_vm3, %v20651_v28, 0.0 }
 0x276   : > { %v20657_v20 = vpop.eup %19305  ;;  %v2595_v62 = vsub.f32 %v20490_v15, %v2521_v59  ;;  %v2530_v57 = vpop.xlane.xlu1 %2529  ;;  %2691 = vadd.xlane.f32.xlu0 %v2690_v3  ;;  %v2696_v22 = vsel %vm2488_vm3, %v20653_v49, 0.0 }
 0x277   : > { %19315 = vpow2.f32 %v2633_v18  ;;  %v2598_v21 = vsub.f32 %v20497_v29, %v2530_v57  ;;  %2697 = vadd.xlane.f32.xlu1 %v2696_v22  ;;  %v2687_v39 = vsel %vm2488_vm3, %v20657_v20, 0.0 }
 0x278   : > { %19317 = vpow2.f32 %v2639_v46  ;;  %v2637_v48 = vmul.f32 1.442695, %v2595_v62 }
 0x279   : > { %v20663_v50 = vpop.eup %19307  ;;  %v2643_v47 = vmul.f32 1.442695, %v2598_v21  ;;  %v2536_v12 = vpop.xlane.xlu0 %2535 }
 0x27a   : > { %v20667_v37 = vpop.eup %19309  ;;  %v2600_v15 = vsub.f32 %v20507_v26, %v2536_v12  ;;  %v2527_v61 = vpop.xlane.xlu1 %2526  ;;  %2688 = vadd.xlane.f32.xlu0 %v2687_v39  ;;  %v2693_v13 = vsel %vm2488_vm3, %v20663_v50, 0.0 }
 0x27b   : > { %19319 = vpow2.f32 %v2643_v47  ;;  %v2597_v29 = vsub.f32 %v20504_v25, %v2527_v61  ;;  %2694 = vadd.xlane.f32.xlu1 %v2693_v13  ;;  %v2702_v2 = vsel %vm2488_vm3, %v20667_v37, 0.0 }
 0x27c   : > { %19321 = vpow2.f32 %v2637_v48  ;;  %v2647_v55 = vmul.f32 1.442695, %v2600_v15 }
 0x27d   : > { %v20673_v30 = vpop.eup %19311  ;;  %v2641_v7 = vmul.f32 1.442695, %v2597_v29  ;;  %v2533_v11 = vpop.xlane.xlu0 %2532 }
 0x27e   : > { %v20677_v46 = vpop.eup %19313  ;;  %v2599_v26 = vsub.f32 %v20510_v63, %v2533_v11  ;;  %v2542_v18 = vpop.xlane.xlu1 %2541  ;;  %2703 = vadd.xlane.f32.xlu0 %v2702_v2  ;;  %v2708_v59 = vsel %vm2488_vm3, %v20673_v30, 0.0 }
 0x27f   : > { %19323 = vpow2.f32 %v2641_v7  ;;  %v2602_v25 = vsub.f32 %v20517_v27, %v2542_v18  ;;  %2709 = vadd.xlane.f32.xlu1 %v2708_v59  ;;  %v2699_v21 = vsel %vm2488_vm3, %v20677_v46, 0.0 }
 0x280   : > { %19325 = vpow2.f32 %v2647_v55  ;;  %v2645_v3 = vmul.f32 1.442695, %v2599_v26 }
 0x281   : > { %v20683_v62 = vpop.eup %19315  ;;  %v2651_v57 = vmul.f32 1.442695, %v2602_v25  ;;  %v2548_v22 = vpop.xlane.xlu0 %2547 }
 0x282   : > { %v20687_v48 = vpop.eup %19317  ;;  %v2604_v63 = vsub.f32 %v20527_v44, %v2548_v22  ;;  %v2539_v47 = vpop.xlane.xlu1 %2538  ;;  %2700 = vadd.xlane.f32.xlu0 %v2699_v21  ;;  %v2705_v12 = vsel %vm2488_vm3, %v20683_v62, 0.0 }
 0x283   : > { %19327 = vpow2.f32 %v2651_v57  ;;  %v2601_v27 = vsub.f32 %v20524_v36, %v2539_v47  ;;  %2706 = vadd.xlane.f32.xlu1 %v2705_v12  ;;  %v2714_v29 = vsel %vm2488_vm3, %v20687_v48, 0.0 }
 0x284   : > { %19329 = vpow2.f32 %v2645_v3  ;;  %v2655_v39 = vmul.f32 1.442695, %v2604_v63 }
 0x285   : > { %v20693_v15 = vpop.eup %19319  ;;  %v2649_v61 = vmul.f32 1.442695, %v2601_v27  ;;  %v2545_v13 = vpop.xlane.xlu0 %2544 }
 0x286   : > { %v20697_v55 = vpop.eup %19321  ;;  %v2603_v44 = vsub.f32 %v20530_v0, %v2545_v13  ;;  %2715 = vadd.xlane.f32.xlu0 %v2714_v29  ;;  %v2720_v7 = vsel %vm2488_vm3, %v20693_v15, 0.0 }
 0x287   : > { %19331 = vpow2.f32 %v2649_v61  ;;  %2721 = vadd.xlane.f32.xlu1 %v2720_v7  ;;  %v2711_v2 = vsel %vm2488_vm3, %v20697_v55, 0.0  ;;  %v2554_v61 = vpop.xlane.xlu1 %2553 }
 0x288   : > { %19333 = vpow2.f32 %v2655_v39  ;;  %v2653_v36 = vmul.f32 1.442695, %v2603_v44  ;;  %v2606_v44 = vsub.f32 %v20537_v43, %v2554_v61 }
 0x289   : > { %v20702_v11 = vpop.eup %19323  ;;  %v2560_v39 = vpop.xlane.xlu0 %2559 }
 0x28a   : > { %v20706_v26 = vpop.eup %19325  ;;  %2712 = vadd.xlane.f32.xlu0 %v2711_v2  ;;  %v2717_v18 = vsel %vm2488_vm3, %v20702_v11, 0.0  ;;  %19335 = vpow2.f32 %v2653_v36  ;;  %v2659_v36 = vmul.f32 1.442695, %v2606_v44 }
 0x28b   : > { %2718 = vadd.xlane.f32.xlu1 %v2717_v18  ;;  %v2726_v59 = vsel %vm2488_vm3, %v20706_v26, 0.0  ;;  %v2551_v29 = vpop.xlane.xlu1 %2550 }
 0x28c   : > { %v2605_v2 = vsub.f32 %v20542_v32, %v2551_v29  ;;  %19337 = vpow2.f32 %v2659_v36 }
 0x28d   : > { %v20710_v0 = vpop.eup %19327  ;;  %v2557_v13 = vpop.xlane.xlu0 %2556 }
 0x28e   : > { %v20714_v25 = vpop.eup %19329  ;;  %2727 = vadd.xlane.f32.xlu0 %v2726_v59  ;;  %v2732_v3 = vsel %vm2488_vm3, %v20710_v0, 0.0  ;;  %v2607_v43 = vsub.f32 %v20550_v40, %v2557_v13 }
 0x28f   : > { %2733 = vadd.xlane.f32.xlu1 %v2732_v3  ;;  %v2723_v22 = vsel %vm2488_vm3, %v20714_v25, 0.0  ;;  %v2566_v18 = vpop.xlane.xlu1 %2565 }
 0x290   : > { %v2661_v29 = vmul.f32 1.442695, %v2607_v43 }
 0x291   : > { %v20718_v57 = vpop.eup %19331 }
 0x292   : > { %v20722_v21 = vpop.eup %19333  ;;  %2724 = vadd.xlane.f32.xlu0 %v2723_v22  ;;  %v2729_v63 = vsel %vm2488_vm3, %v20718_v57, 0.0  ;;  %v2569_v7 = vpop.xlane.xlu0 %2568  ;;  %v2608_v22 = vsub.f32 %v20547_v54, %v2560_v39 }
 0x293   : > { %2730 = vadd.xlane.f32.xlu1 %v2729_v63  ;;  %v2738_v47 = vsel %vm2488_vm3, %v20722_v21, 0.0  ;;  %v2611_v3 = vsub.f32 %v20570_v53, %v2569_v7  ;;  %v2657_v63 = vmul.f32 1.442695, %v2605_v2  ;;  %v2610_v53 = vsub.f32 %v20557_v10, %v2566_v18 }
 0x294   : > { %v20728_v12 = vpop.eup %19335 }
 0x295   : > { %v2735_v27 = vsel %vm2488_vm3, %v20728_v12, 0.0  ;;  %19339 = vpow2.f32 %v2657_v63 }
 0x296   : > { %2739 = vadd.xlane.f32.xlu0 %v2738_v47  ;;  %v2575_v59 = vpop.xlane.xlu0 %2574  ;;  %v2563_v47 = vpop.xlane.xlu1 %2562 }
 0x297   : > { %v20744_v54 = vpop.eup %19337  ;;  %v2609_v36 = vsub.f32 %v20562_v35, %v2563_v47 }
 0x298   : > { %v2744_v40 = vsel %vm2488_vm3, %v20744_v54, 0.0 }
 0x29a   : > { %2736 = vadd.xlane.f32.xlu0 %v2735_v27  ;;  %v2669_v27 = vmul.f32 1.442695, %v2611_v3  ;;  %v2581_v61 = vpop.xlane.xlu0 %2580  ;;  %v2572_v7 = vpop.xlane.xlu1 %2571 }
 0x29b   : > { %v2615_v32 = vsub.f32 %v20590_v5, %v2581_v61  ;;  %v2612_v10 = vsub.f32 %v20567_v9, %v2572_v7 }
 0x29c   : > { %19341 = vpow2.f32 %v2669_v27 }
 0x29d   : > { %v2677_v39 = vmul.f32 1.442695, %v2615_v32  ;;  %v2671_v35 = vmul.f32 1.442695, %v2612_v10 }
 0x29f   : > { %v20749_v13 = vpop.eup %19339 }
 0x2a0   : > { %v2741_v2 = vsel %vm2488_vm3, %v20749_v13, 0.0 }
 0x2a4   : > { %4541 = vrot.lane.b32.xlu1 %v20159_v4, %s19817_s19  ;;  %v2613_v4 = vsub.f32 %v20580_v42, %v2575_v59  ;;  %v2667_v42 = vmul.f32 1.442695, %v2610_v53 }
 0x2a6   : > { %v2673_v44 = vmul.f32 1.442695, %v2613_v4  ;;  %v2578_v4 = vpop.xlane.xlu1 %2577  ;;  %v20752_v5 = vpop.eup %19341 }
 0x2a7   : > { %v2614_v59 = vsub.f32 %v20577_v14, %v2578_v4  ;;  %v2759_v3 = vsel %vm2488_vm3, %v20752_v5, 0.0 }
 0x2a9   : > { %v2675_v27 = vmul.f32 1.442695, %v2614_v59 }
 0x2aa   : > { %v2584_v63 = vpop.xlane.xlu1 %2583 }
 0x2ab   : > { %v2616_v43 = vsub.f32 %v20587_v33, %v2584_v63 }
 0x2b0   : > { %4539 = vrot.lane.b32.xlu0 %v20127_v51, %s19817_s19  ;;  %v2663_v51 = vmul.f32 1.442695, %v2608_v22 }
 0x2b2   : > { %19343 = vpow2.f32 %v2663_v51  ;;  %v2665_v51 = vmul.f32 1.442695, %v2609_v36 }
 0x2b3   : > { %19345 = vpow2.f32 %v2673_v44 }
 0x2b4   : > { %19347 = vpow2.f32 %v2661_v29  ;;  %v2679_v29 = vmul.f32 1.442695, %v2616_v43 }
 0x2b5   : > { %19349 = vpow2.f32 %v2677_v39 }
 0x2b6   : > { %19351 = vpow2.f32 %v2667_v42 }
 0x2b7   : > { %19353 = vpow2.f32 %v2665_v51 }
 0x2b8   : > { %19355 = vpow2.f32 %v2671_v35 }
 0x2b9   : > { %19357 = vpow2.f32 %v2675_v27 }
 0x2ba   : > { %19359 = vpow2.f32 %v2679_v29 }
 0x2bc   : > { %v20756_v18 = vpop.eup %19343 }
 0x2bd   : > { %v20761_v22 = vpop.eup %19345  ;;  %v2750_v9 = vsel %vm2488_vm3, %v20756_v18, 0.0 }
 0x2be   : > { %v20765_v47 = vpop.eup %19347  ;;  %v2765_v14 = vsel %vm2488_vm3, %v20761_v22, 0.0 }
 0x2bf   : > { %v20770_v61 = vpop.eup %19349  ;;  %v2747_v44 = vsel %vm2488_vm3, %v20765_v47, 0.0 }
 0x2c0   : > { %v20774_v32 = vpop.eup %19351  ;;  %v2771_v53 = vsel %vm2488_vm3, %v20770_v61, 0.0 }
 0x2c1   : > { %v2756_v33 = vsel %vm2488_vm3, %v20774_v32, 0.0  ;;  %v20780_v7 = vpop.eup %19353 }
 0x2c2   : > { %v2753_v39 = vsel %vm2488_vm3, %v20780_v7, 0.0  ;;  %v20784_v42 = vpop.eup %19355 }
 0x2c3   : > { %v2762_v36 = vsel %vm2488_vm3, %v20784_v42, 0.0 }
 0x2c8   : > { %2745 = vadd.xlane.f32.xlu1 %v2744_v40  ;;  %v20788_v40 = vpop.eup %19357 }
 0x2c9   : > { %v2768_v4 = vsel %vm2488_vm3, %v20788_v40, 0.0  ;;  %v20792_v51 = vpop.eup %19359 }
 0x2ca   : > { %v2774_v10 = vsel %vm2488_vm3, %v20792_v51, 0.0 }
 0x2cc   : > { %2742 = vadd.xlane.f32.xlu1 %v2741_v2 }
 0x2cf   : > { %2760 = vadd.xlane.f32.xlu0 %v2759_v3 }
 0x2d0   : > { %2751 = vadd.xlane.f32.xlu1 %v2750_v9 }
 0x2d3   : > { %2766 = vadd.xlane.f32.xlu0 %v2765_v14 }
 0x2d4   : > { %2748 = vadd.xlane.f32.xlu1 %v2747_v44 }
 0x2d7   : > { %2772 = vadd.xlane.f32.xlu0 %v2771_v53 }
 0x2d8   : > { %2757 = vadd.xlane.f32.xlu1 %v2756_v33 }
 0x2dc   : > { %2754 = vadd.xlane.f32.xlu1 %v2753_v39 }
 0x2e0   : > { %2763 = vadd.xlane.f32.xlu1 %v2762_v36 }
 0x2e4   : > { %2769 = vadd.xlane.f32.xlu1 %v2768_v4  ;;  %v18781_v4 = vunpack.i.h.bf16 %v20606_v41 }
 0x2e8   : > { %2775 = vadd.xlane.f32.xlu1 %v2774_v10  ;;  %v18780_v10 = vunpack.i.l.bf16 %v20606_v41 }
 0x2ea   : > { %v18096_v41 = vpack.c.bf16 %v18781_v4, %v18780_v10  ;;  %v23682_v10 = vld [vmem:[#allocation62_spill] sm:$0xff] }
 0x2ed   : > { %18848 = vrot.lane.b32.xlu0 %v20196_v24, %s19817_s19 }
 0x2f1   : > { %4632 = vrot.lane.b32.xlu0 %v20181_v16, %s19817_s19 }
 0x2f5   : > { %4721 = vrot.lane.b32.xlu0 %v20168_v6, %s19817_s19 }
 0x2f9   : > { %4630 = vrot.lane.b32.xlu1 %v20148_v60, %s19817_s19  ;;  %18858 = vrot.lane.b32.xlu0 %v20240_v52, %s19817_s19 }
 0x2fb   : > { %v2686_v2 = vpop.xlane.xlu1 %2685 }
 0x2fc   : > { %v2778_v35 = vadd.f32 1.0, %v2686_v2 }
 0x2fd   : > { %18853 = vrot.lane.b32.xlu1 %v20218_v38, %s19817_s19  ;;  %4814 = vrot.lane.b32.xlu0 %v20225_v45, %s19817_s19 }
 0x2fe   : > { %19361 = vrcp.f32 %v2778_v35 }
 0x2ff   : > { %v2683_v59 = vpop.xlane.xlu0 %2682 }
 0x300   : > { %v2777_v3 = vadd.f32 1.0, %v2683_v59 }
 0x301   : > { %4723 = vrot.lane.b32.xlu1 %v20203_v31, %s19817_s19  ;;  %4903 = vrot.lane.b32.xlu0 %v20212_v34, %s19817_s19 }
 0x302   : > { %19363 = vrcp.f32 %v2777_v3  ;;  %v23678_v3 = vld [vmem:[#allocation28_spill] sm:$0xff] }
 0x303   : > { %v2692_v63 = vpop.xlane.xlu0 %2691 }
 0x304   : > { %v2780_v9 = vadd.f32 1.0, %v2692_v63  ;;  %v2698_v27 = vpop.xlane.xlu1 %2697 }
 0x305   : > { %v2782_v43 = vadd.f32 1.0, %v2698_v27  ;;  %4812 = vrot.lane.b32.xlu1 %v20192_v19, %s19817_s19  ;;  %18868 = vrot.lane.b32.xlu0 %v20284_v17, %s19817_s19 }
 0x306   : > { %19365 = vrcp.f32 %v2780_v9 }
 0x307   : > { %v2689_v14 = vpop.xlane.xlu0 %2688  ;;  %19367 = vrcp.f32 %v2782_v43 }
 0x308   : > { %v2779_v44 = vadd.f32 1.0, %v2689_v14  ;;  %v2695_v29 = vpop.xlane.xlu1 %2694  ;;  %v19362_v33 = vpop.eup %19361 }
 0x309   : > { %v2781_v53 = vadd.f32 1.0, %v2695_v29  ;;  %18863 = vrot.lane.b32.xlu1 %v20262_v1, %s19817_s19  ;;  %4996 = vrot.lane.b32.xlu0 %v20269_v8, %s19817_s19  ;;  %v2812_v9 = vmul.f32 %v19362_v33, %v20639_v23  ;;  %v23679_v29 = vld [vmem:[#allocation55_spill] sm:$0xff]  ;;  %v23681_v23 = vld [vmem:[#allocation37_spill] sm:$0xff] }
 0x30a   : > { %19369 = vrcp.f32 %v2779_v44 }
 0x30b   : > { %19371 = vrcp.f32 %v2781_v53  ;;  %v2704_v39 = vpop.xlane.xlu0 %2703  ;;  %v23680_v53 = vld [vmem:[#allocation25_spill] sm:$0xff] }
 0x30c   : > { %v19364_v36 = vpop.eup %19363  ;;  %v2784_v2 = vadd.f32 1.0, %v2704_v39  ;;  %v2710_v35 = vpop.xlane.xlu1 %2709 }
 0x30d   : > { %v2786_v59 = vadd.f32 1.0, %v2710_v35  ;;  %4905 = vrot.lane.b32.xlu1 %v20247_v58, %s19817_s19  ;;  %5085 = vrot.lane.b32.xlu0 %v23678_v3, %s19817_s19  ;;  %v2810_v63 = vmul.f32 %v19364_v36, %v20645_v56 }
 0x30e   : > { %19373 = vrcp.f32 %v2784_v2 }
 0x30f   : > { %16988 = vmatprep.mubr.msk.f32.mxu0 %vm2488_vm3, %v2810_v63  ;;  %v2701_v27 = vpop.xlane.xlu0 %2700  ;;  %19375 = vrcp.f32 %v2786_v59  ;;  %v18791_v59 = vunpack.i.h.bf16 %v23682_v10  ;;  %v18790_v63 = vunpack.i.l.bf16 %v23682_v10 }
 0x310   : > { %v2783_v43 = vadd.f32 1.0, %v2701_v27  ;;  %v2707_v14 = vpop.xlane.xlu1 %2706  ;;  %16989 = vmatmul.mubr.msk.f32.vlgmr.msra.gmra.mrb[48].mxu0 %vm2488_vm3, %v2812_v9  ;;  %v19366_v39 = vpop.eup %19365  ;;  %v23683_v27 = vld [vmem:[#allocation34_spill] sm:$0xff] }
 0x311   : > { %v2785_v44 = vadd.f32 1.0, %v2707_v14  ;;  %18091 = vmatpush3.bf16.msra.mxu0 %v23679_v29  ;;  %4994 = vrot.lane.b32.xlu1 %v23680_v53, %s19817_s19  ;;  %v19368_v56 = vpop.eup %19367  ;;  %v23684_v14 = vld [vmem:[#allocation65_spill] sm:$0xff] }
 0x312   : > { %19377 = vrcp.f32 %v2783_v43  ;;  %18878 = vrot.lane.b32.xlu0 %v23681_v23, %s19817_s19  ;;  %18097 = vmatprep.subr.bf16.mxu0 %v18096_v41  ;;  %v18801_v29 = vunpack.i.h.bf16 %v23684_v14  ;;  %v18800_v53 = vunpack.i.l.bf16 %v23684_v14  ;;  %v23686_v14 = vld [vmem:[#allocation57_spill] sm:$0xff] }
 0x313   : > { %19379 = vrcp.f32 %v2785_v44  ;;  %v2716_v33 = vpop.xlane.xlu0 %2715  ;;  %v23685_v44 = vld [vmem:[#allocation35_spill] sm:$0xff] }
 0x314   : > { %v19370_v36 = vpop.eup %19369  ;;  %v2788_v2 = vadd.f32 1.0, %v2716_v33  ;;  %v2722_v35 = vpop.xlane.xlu1 %2721  ;;  %v2816_v33 = vmul.f32 %v19366_v39, %v20651_v28  ;;  %v23687_v28 = vld [vmem:[#allocation32_spill] sm:$0xff] }
 0x315   : > { %v19372_v4 = vpop.eup %19371  ;;  %v2790_v9 = vadd.f32 1.0, %v2722_v35  ;;  %18873 = vrot.lane.b32.xlu1 %v23683_v27, %s19817_s19  ;;  %v2814_v43 = vmul.f32 %v19370_v36, %v20657_v20  ;;  %v2820_v20 = vmul.f32 %v19368_v56, %v20653_v49 }
 0x316   : > { %5178 = vrot.lane.b32.xlu0 %v23685_v44, %s19817_s19  ;;  %v2818_v58 = vmul.f32 %v19372_v4, %v20663_v50  ;;  %19381 = vrcp.f32 %v2788_v2  ;;  %v18100_v50 = vpack.c.bf16 %v18791_v59, %v18790_v63  ;;  %v23688_v2 = vld [vmem:[#allocation33_spill] sm:$0xff]  ;;  %v18104_v4 = vpack.c.bf16 %v18801_v29, %v18800_v53  ;;  %v23691_v29 = vld [vmem:[#allocation68_spill] sm:$0xff] }
 0x317   : > { %16995 = vmatprep.mubr.msk.f32.mxu1 %vm2488_vm3, %v2814_v43  ;;  %v2713_v10 = vpop.xlane.xlu0 %2712  ;;  %19383 = vrcp.f32 %v2790_v9 }
 0x318   : > { %v2787_v35 = vadd.f32 1.0, %v2713_v10  ;;  %v2719_v19 = vpop.xlane.xlu1 %2718  ;;  %16996 = vmatmul.mubr.msk.f32.vlgmr.msra.gmra.mrb[48].mxu1 %vm2488_vm3, %v2816_v33  ;;  %17002 = vmatprep.mubr.msk.f32.mxu0 %vm2488_vm3, %v2818_v58  ;;  %v19374_v39 = vpop.eup %19373  ;;  %v23689_v33 = vld [vmem:[#allocation64_spill] sm:$0xff] }
 0x319   : > { %v2789_v36 = vadd.f32 1.0, %v2719_v19  ;;  %18095 = vmatpush3.bf16.msra.mxu1 %v23686_v14  ;;  %5087 = vrot.lane.b32.xlu1 %v23687_v28, %s19817_s19  ;;  %v19376_v43 = vpop.eup %19375  ;;  %v18806_v59 = vunpack.i.h.bf16 %v23689_v33  ;;  %v18805_v63 = vunpack.i.l.bf16 %v23689_v33  ;;  %v2824_v14 = vmul.f32 %v19374_v39, %v20667_v37  ;;  %v23694_v39 = vld [vmem:[#allocation39_spill] sm:$0xff] }
 0x31a   : > { %19385 = vrcp.f32 %v2787_v35  ;;  %5267 = vrot.lane.b32.xlu0 %v23688_v2, %s19817_s19  ;;  %17003 = vmatmul.mubr.msk.f32.vlgmr.msra.gmra.mrb[50].mxu0 %vm2488_vm3, %v2820_v20  ;;  %v23690_v35 = vld [vmem:[#allocation30_spill] sm:$0xff]  ;;  %v18811_v20 = vunpack.i.h.bf16 %v23691_v29 }
 0x31b   : > { %19387 = vrcp.f32 %v2789_v36  ;;  %18099 = vmatpush3.bf16.msra.mxu0 %v18096_v41  ;;  %18101 = vmatprep.subr.bf16.mxu1 %v18100_v50  ;;  %v2728_v58 = vpop.xlane.xlu0 %2727  ;;  %v18810_v41 = vunpack.i.l.bf16 %v23691_v29  ;;  %v23692_v36 = vld [vmem:[#allocation45_spill] sm:$0xff]  ;;  %v18108_v37 = vpack.c.bf16 %v18806_v59, %v18805_v63 }
 0x31c   : > { %v19378_v19 = vpop.eup %19377  ;;  %18105 = vmatprep.subr.bf16.mxu0 %v18104_v4  ;;  %v2792_v49 = vadd.f32 1.0, %v2728_v58  ;;  %v2734_v56 = vpop.xlane.xlu1 %2733  ;;  %v23693_v29 = vld [vmem:[#allocation41_spill] sm:$0xff] }
 0x31d   : > { %v19380_v9 = vpop.eup %19379  ;;  %v2794_v10 = vadd.f32 1.0, %v2734_v56  ;;  %5176 = vrot.lane.b32.xlu1 %v23690_v35, %s19817_s19  ;;  %v2822_v53 = vmul.f32 %v19378_v19, %v20677_v46  ;;  %v2828_v46 = vmul.f32 %v19376_v43, %v20673_v30 }
 0x31e   : > { %18888 = vrot.lane.b32.xlu0 %v23692_v36, %s19817_s19  ;;  %v2826_v58 = vmul.f32 %v19380_v9, %v20683_v62  ;;  %19389 = vrcp.f32 %v2792_v49  ;;  %v18112_v49 = vpack.c.bf16 %v18811_v20, %v18810_v41 }
 0x31f   : > { %17009 = vmatprep.mubr.msk.f32.mxu1 %vm2488_vm3, %v2822_v53  ;;  %v2725_v33 = vpop.xlane.xlu0 %2724  ;;  %19391 = vrcp.f32 %v2794_v10  ;;  %v23696_v53 = vld [vmem:[#allocation38_spill] sm:$0xff] }
 0x320   : > { %v2791_v56 = vadd.f32 1.0, %v2725_v33  ;;  %v2731_v28 = vpop.xlane.xlu1 %2730  ;;  %17010 = vmatmul.mubr.msk.f32.vlgmr.msra.gmra.mrb[50].mxu1 %vm2488_vm3, %v2824_v14  ;;  %17016 = vmatprep.mubr.msk.f32.mxu0 %vm2488_vm3, %v2826_v58  ;;  %v19382_v62 = vpop.eup %19381  ;;  %v23697_v58 = vld [vmem:[#allocation67_spill] sm:$0xff] }
 0x321   : > { %v2793_v19 = vadd.f32 1.0, %v2731_v28  ;;  %18103 = vmatpush3.bf16.msra.mxu1 %v18100_v50  ;;  %18883 = vrot.lane.b32.xlu1 %v23693_v29, %s19817_s19  ;;  %v19384_v9 = vpop.eup %19383  ;;  %v23695_v50 = vld [vmem:[#allocation66_spill] sm:$0xff]  ;;  %v18821_v20 = vunpack.i.h.bf16 %v23697_v58  ;;  %v18820_v41 = vunpack.i.l.bf16 %v23697_v58  ;;  %v2832_v33 = vmul.f32 %v19382_v62, %v20687_v48  ;;  %v23700_v48 = vld [vmem:[#allocation44_spill] sm:$0xff] }
 0x322   : > { %19393 = vrcp.f32 %v2791_v56  ;;  %5360 = vrot.lane.b32.xlu0 %v23694_v39, %s19817_s19  ;;  %17017 = vmatmul.mubr.msk.f32.vlgmr.msra.gmra.mrb[52].mxu0 %vm2488_vm3, %v2828_v46  ;;  %v18816_v10 = vunpack.i.h.bf16 %v23695_v50  ;;  %v18815_v59 = vunpack.i.l.bf16 %v23695_v50 }
 0x323   : > { %19395 = vrcp.f32 %v2793_v19  ;;  %18107 = vmatpush3.bf16.msra.mxu0 %v18104_v4  ;;  %18109 = vmatprep.subr.bf16.mxu1 %v18108_v37  ;;  %v2740_v30 = vpop.xlane.xlu0 %2739  ;;  %v23698_v4 = vld [vmem:[#allocation40_spill] sm:$0xff] }
 0x324   : > { %v19386_v43 = vpop.eup %19385  ;;  %18113 = vmatprep.subr.bf16.mxu0 %v18112_v49  ;;  %v2796_v63 = vadd.f32 1.0, %v2740_v30  ;;  %v23699_v30 = vld [vmem:[#allocation36_spill] sm:$0xff] }
 0x325   : > { %v19388_v28 = vpop.eup %19387  ;;  %5269 = vrot.lane.b32.xlu1 %v23696_v53, %s19817_s19  ;;  %v2830_v14 = vmul.f32 %v19386_v43, %v20697_v55  ;;  %v2836_v55 = vmul.f32 %v19384_v9, %v20693_v15  ;;  %v18116_v43 = vpack.c.bf16 %v18816_v10, %v18815_v59  ;;  %v23701_v9 = vld [vmem:[#allocation70_spill] sm:$0xff]  ;;  %v23702_v10 = vld [vmem:[#allocation48_spill] sm:$0xff] }
 0x326   : > { %5449 = vrot.lane.b32.xlu0 %v23698_v4, %s19817_s19  ;;  %v2834_v56 = vmul.f32 %v19388_v28, %v20702_v11  ;;  %19397 = vrcp.f32 %v2796_v63  ;;  %v18120_v11 = vpack.c.bf16 %v18821_v20, %v18820_v41  ;;  %v18825_v63 = vunpack.i.l.bf16 %v23701_v9  ;;  %v23704_v20 = vld [vmem:[#allocation47_spill] sm:$0xff] }
 0x327   : > { %17023 = vmatprep.mubr.msk.f32.mxu1 %vm2488_vm3, %v2830_v14  ;;  %v2737_v46 = vpop.xlane.xlu0 %2736  ;;  %v23703_v14 = vld [vmem:[#allocation69_spill] sm:$0xff] }
 0x328   : > { %v2795_v19 = vadd.f32 1.0, %v2737_v46  ;;  %17024 = vmatmul.mubr.msk.f32.vlgmr.msra.gmra.mrb[52].mxu1 %vm2488_vm3, %v2832_v33  ;;  %17030 = vmatprep.mubr.msk.f32.mxu0 %vm2488_vm3, %v2834_v56  ;;  %v19390_v50 = vpop.eup %19389  ;;  %v18831_v58 = vunpack.i.h.bf16 %v23703_v14  ;;  %v18830_v33 = vunpack.i.l.bf16 %v23703_v14  ;;  %v20945_v14 = vpop.permute.xlu1 %4541 }
 0x329   : > { %18111 = vmatpush3.bf16.msra.mxu1 %v18108_v37  ;;  %5358 = vrot.lane.b32.xlu1 %v23699_v30, %s19817_s19  ;;  %v19392_v62 = vpop.eup %19391  ;;  %v18826_v37 = vunpack.i.h.bf16 %v23701_v9 }
 0x32a   : > { %19399 = vrcp.f32 %v2795_v19  ;;  %5540 = vrot.lane.b32.xlu0 %v23700_v48, %s19817_s19  ;;  %17031 = vmatmul.mubr.msk.f32.vlgmr.msra.gmra.mrb[54].mxu0 %vm2488_vm3, %v2836_v55  ;;  %v2844_v56 = vmul.f32 %v19392_v62, %v20710_v0  ;;  %v23706_v19 = vld [vmem:[#allocation8_spill] sm:$0xff] }
 0x32b   : > { %18115 = vmatpush3.bf16.msra.mxu0 %v18112_v49  ;;  %18117 = vmatprep.subr.bf16.mxu1 %v18116_v43  ;;  %v2840_v49 = vmul.f32 %v19390_v50, %v20706_v26  ;;  %v18124_v46 = vpack.c.bf16 %v18826_v37, %v18825_v63  ;;  %v18128_v26 = vpack.c.bf16 %v18831_v58, %v18830_v33  ;;  %v23707_v50 = vld [vmem:[#allocation72_spill] sm:$0xff]  ;;  %v23710_v37 = vld [vmem:[#allocation46_spill] sm:$0xff] }
 0x32c   : > { %v19394_v28 = vpop.eup %19393  ;;  %18121 = vmatprep.subr.bf16.mxu0 %v18120_v11  ;;  %v18835_v0 = vunpack.i.l.bf16 %v23707_v50  ;;  %v23711_v63 = vld [vmem:[#allocation18_spill] sm:$0xff] }
 0x32d   : > { %v19396_v15 = vpop.eup %19395  ;;  %18893 = vrot.lane.b32.xlu1 %v23702_v10, %s19817_s19  ;;  %v2838_v59 = vmul.f32 %v19394_v28, %v20714_v25  ;;  %v23705_v25 = vld [vmem:[#allocation43_spill] sm:$0xff]  ;;  %v18836_v28 = vunpack.i.h.bf16 %v23707_v50 }
 0x32e   : > { %5631 = vrot.lane.b32.xlu0 %v23704_v20, %s19817_s19  ;;  %v2842_v41 = vmul.f32 %v19396_v15, %v20718_v57  ;;  %v23709_v15 = vld [vmem:[#allocation13_spill] sm:$0xff] }
 0x32f   : > { %17037 = vmatprep.mubr.msk.f32.mxu1 %vm2488_vm3, %v2838_v59  ;;  %v23714_v59 = vld [vmem:[#allocation15_spill] sm:$0xff] }
 0x330   : > { %17038 = vmatmul.mubr.msk.f32.vlgmr.msra.gmra.mrb[54].mxu1 %vm2488_vm3, %v2840_v49  ;;  %17044 = vmatprep.mubr.msk.f32.mxu0 %vm2488_vm3, %v2842_v41  ;;  %v19398_v57 = vpop.eup %19397  ;;  %v20947_v49 = vpop.permute.xlu0 %4539 }
 0x331   : > { %18119 = vmatpush3.bf16.msra.mxu1 %v18116_v43  ;;  %5451 = vrot.lane.b32.xlu1 %v23705_v25, %s19817_s19  ;;  %v23708_v43 = vld [vmem:[#allocation42_spill] sm:$0xff]  ;;  %v2848_v9 = vmul.f32 %v19398_v57, %v20722_v21  ;;  %v23715_v25 = vld [vmem:[#allocation71_spill] sm:$0xff] }
 0x332   : > { %18903 = vrot.lane.b32.xlu0 %v23706_v19, %s19819_s25  ;;  %17045 = vmatmul.mubr.msk.f32.vlgmr.msra.gmra.mrb[56].mxu0 %vm2488_vm3, %v2844_v56  ;;  %v23713_v21 = vld [vmem:[#allocation10_spill] sm:$0xff]  ;;  %v18841_v30 = vunpack.i.h.bf16 %v23715_v25 }
 0x333   : > { %18123 = vmatpush3.bf16.msra.mxu0 %v18120_v11  ;;  %18125 = vmatprep.subr.bf16.mxu1 %v18124_v46  ;;  %v20928_v11 = vpack.c.bf16 %v18836_v28, %v18835_v0 }
 0x334   : > { %v19400_v55 = vpop.eup %19399  ;;  %18129 = vmatprep.subr.bf16.mxu0 %v18128_v26 }
 0x335   : > { %5542 = vrot.lane.b32.xlu1 %v23708_v43, %s19817_s19  ;;  %v2846_v62 = vmul.f32 %v19400_v55, %v20728_v12  ;;  %v23712_v12 = vld [vmem:[#allocation5_spill] sm:$0xff] }
 0x336   : > { %18913 = vrot.lane.b32.xlu0 %v23709_v15, %s19819_s25 }
 0x337   : > { %17051 = vmatprep.mubr.msk.f32.mxu1 %vm2488_vm3, %v2846_v62 }
 0x338   : > { %17052 = vmatmul.mubr.msk.f32.vlgmr.msra.gmra.mrb[56].mxu1 %vm2488_vm3, %v2848_v9 }
 0x339   : > { %18127 = vmatpush3.bf16.msra.mxu1 %v18124_v46  ;;  %5633 = vrot.lane.b32.xlu1 %v23710_v37, %s19817_s19 }
 0x33a   : > { %18923 = vrot.lane.b32.xlu0 %v23711_v63, %s19819_s25  ;;  %18133 = vmatprep.subr.bf16.mxu1 %v20928_v11 }
 0x33d   : > { %18898 = vrot.lane.b32.xlu1 %v23712_v12, %s19819_s25 }
 0x33e   : > { %18933 = vrot.lane.b32.xlu0 %v20218_v38, %s19819_s25 }
 0x341   : > { %18908 = vrot.lane.b32.xlu1 %v23713_v21, %s19819_s25 }
 0x345   : > { %18918 = vrot.lane.b32.xlu1 %v23714_v59, %s19819_s25 }
 0x349   : > { %18928 = vrot.lane.b32.xlu1 %v20196_v24, %s19819_s25 }
 0x355   : > { %v2746_v58 = vpop.xlane.xlu1 %2745 }
 0x356   : > { %v2798_v33 = vadd.f32 1.0, %v2746_v58 }
 0x358   : > { %19401 = vrcp.f32 %v2798_v33 }
 0x359   : > { %v2743_v41 = vpop.xlane.xlu1 %2742 }
 0x35a   : > { %v2797_v56 = vadd.f32 1.0, %v2743_v41  ;;  %v18840_v41 = vunpack.i.l.bf16 %v23715_v25 }
 0x35c   : > { %19403 = vrcp.f32 %v2797_v56  ;;  %v2761_v46 = vpop.xlane.xlu0 %2760 }
 0x35d   : > { %v2752_v57 = vpop.xlane.xlu1 %2751  ;;  %v2803_v55 = vadd.f32 1.0, %v2761_v46 }
 0x35e   : > { %v2800_v50 = vadd.f32 1.0, %v2752_v57 }
 0x35f   : > { %19405 = vrcp.f32 %v2803_v55 }
 0x360   : > { %v2767_v28 = vpop.xlane.xlu0 %2766  ;;  %19407 = vrcp.f32 %v2800_v50 }
 0x361   : > { %v2749_v0 = vpop.xlane.xlu1 %2748  ;;  %v2805_v33 = vadd.f32 1.0, %v2767_v28 }
 0x362   : > { %v2799_v62 = vadd.f32 1.0, %v2749_v0  ;;  %v19402_v20 = vpop.eup %19401  ;;  %v18136_v0 = vpack.c.bf16 %v18841_v30, %v18840_v41 }
 0x363   : > { %v2852_v57 = vmul.f32 %v19402_v20, %v20744_v54  ;;  %v23716_v54 = vld [vmem:[#allocation73_spill] sm:$0xff] }
 0x364   : > { %19409 = vrcp.f32 %v2799_v62  ;;  %v2773_v9 = vpop.xlane.xlu0 %2772  ;;  %v18846_v20 = vunpack.i.h.bf16 %v23716_v54 }
 0x365   : > { %v2758_v48 = vpop.xlane.xlu1 %2757  ;;  %19411 = vrcp.f32 %v2805_v33  ;;  %v2807_v62 = vadd.f32 1.0, %v2773_v9 }
 0x366   : > { %v19404_v58 = vpop.eup %19403  ;;  %v2802_v56 = vadd.f32 1.0, %v2758_v48 }
 0x367   : > { %v2850_v53 = vmul.f32 %v19404_v58, %v20749_v13 }
 0x368   : > { %v20952_v46 = vpop.permute.xlu0 %18848  ;;  %19413 = vrcp.f32 %v2802_v56 }
 0x369   : > { %v2755_v55 = vpop.xlane.xlu1 %2754  ;;  %17058 = vmatprep.mubr.msk.f32.mxu0 %vm2488_vm3, %v2850_v53  ;;  %v19406_v25 = vpop.eup %19405  ;;  %v18845_v53 = vunpack.i.l.bf16 %v23716_v54 }
 0x36a   : > { %v2801_v50 = vadd.f32 1.0, %v2755_v55  ;;  %17059 = vmatmul.mubr.msk.f32.vlgmr.msra.gmra.mrb[58].mxu0 %vm2488_vm3, %v2852_v57  ;;  %v19408_v13 = vpop.eup %19407  ;;  %v2862_v41 = vmul.f32 %v19406_v25, %v20752_v5 }
 0x36b   : > { %18131 = vmatpush3.bf16.msra.mxu0 %v18128_v26  ;;  %v2856_v26 = vmul.f32 %v19408_v13, %v20756_v18  ;;  %v18140_v55 = vpack.c.bf16 %v18846_v20, %v18845_v53 }
 0x36c   : > { %19415 = vrcp.f32 %v2801_v50  ;;  %18137 = vmatprep.subr.bf16.mxu0 %v18136_v0  ;;  %v20957_v48 = vpop.permute.xlu0 %4632 }
 0x36d   : > { %v2764_v28 = vpop.xlane.xlu1 %2763  ;;  %19417 = vrcp.f32 %v2807_v62 }
 0x36e   : > { %v19410_v58 = vpop.eup %19409  ;;  %v2804_v33 = vadd.f32 1.0, %v2764_v28  ;;  %v23717_v28 = vld [vmem:[#allocation52_spill] sm:$0xff] }
 0x36f   : > { %v2854_v57 = vmul.f32 %v19410_v58, %v20765_v47  ;;  %v19412_v50 = vpop.eup %19411  ;;  %v18746_v58 = vunpack.i.h.bf16 %v23717_v28  ;;  %v18745_v5 = vunpack.i.l.bf16 %v23717_v28 }
 0x370   : > { %19419 = vrcp.f32 %v2804_v33  ;;  %v20962_v30 = vpop.permute.xlu0 %4721  ;;  %v23718_v33 = vld [vmem:[#allocation58_spill] sm:$0xff] }
 0x371   : > { %v2770_v9 = vpop.xlane.xlu1 %2769  ;;  %17065 = vmatprep.mubr.msk.f32.mxu1 %vm2488_vm3, %v2854_v57  ;;  %v18756_v57 = vunpack.i.h.bf16 %v23718_v33 }
 0x372   : > { %v2806_v56 = vadd.f32 1.0, %v2770_v9  ;;  %17066 = vmatmul.mubr.msk.f32.vlgmr.msra.gmra.mrb[58].mxu1 %vm2488_vm3, %v2856_v26  ;;  %v19414_v62 = vpop.eup %19413  ;;  %v18755_v26 = vunpack.i.l.bf16 %v23718_v33  ;;  %v23722_v33 = vld [vmem:[#allocation50_spill] sm:$0xff] }
 0x373   : > { %18135 = vmatpush3.bf16.msra.mxu1 %v20928_v11  ;;  %17079 = vmatprep.mubr.msk.f32.mxu1 %vm2488_vm3, %v2862_v41  ;;  %v2860_v11 = vmul.f32 %v19414_v62, %v20774_v32  ;;  %v2866_v41 = vmul.f32 %v19412_v50, %v20761_v22 }
 0x374   : > { %19421 = vrcp.f32 %v2806_v56  ;;  %18141 = vmatprep.subr.bf16.mxu1 %v18140_v55  ;;  %v20970_v47 = vpop.permute.xlu0 %18858  ;;  %v18150_v28 = vpack.c.bf16 %v18756_v57, %v18755_v26 }
 0x375   : > { %v2776_v18 = vpop.xlane.xlu1 %2775 }
 0x376   : > { %v19416_v13 = vpop.eup %19415  ;;  %v2808_v25 = vadd.f32 1.0, %v2776_v18  ;;  %v18144_v18 = vpack.c.bf16 %v18746_v58, %v18745_v5 }
 0x377   : > { %v2858_v54 = vmul.f32 %v19416_v13, %v20780_v7  ;;  %v19418_v53 = vpop.eup %19417 }
 0x378   : > { %19423 = vrcp.f32 %v2808_v25  ;;  %v20975_v20 = vpop.permute.xlu0 %4814  ;;  %v2870_v13 = vmul.f32 %v19418_v53, %v20770_v61 }
 0x379   : > { %v20980_v9 = vpop.permute.xlu1 %4630  ;;  %17072 = vmatprep.mubr.msk.f32.mxu0 %vm2488_vm3, %v2858_v54 }
 0x37a   : > { %v19420_v56 = vpop.eup %19419  ;;  %17073 = vmatmul.mubr.msk.f32.vlgmr.msra.gmra.mrb[60].mxu0 %vm2488_vm3, %v2860_v11  ;;  %v23721_v11 = vld [vmem:[#allocation60_spill] sm:$0xff] }
 0x37b   : > { %18139 = vmatpush3.bf16.msra.mxu0 %v18136_v0  ;;  %17086 = vmatprep.mubr.msk.f32.mxu0 %vm2488_vm3, %v2866_v41  ;;  %v2864_v32 = vmul.f32 %v19420_v56, %v20784_v42  ;;  %v23720_v0 = vld [vmem:[#allocation56_spill] sm:$0xff]  ;;  %v18775_v53 = vunpack.i.l.bf16 %v23721_v11 }
 0x37c   : > { %18146 = vmatprep.subr.msk.bf16.mxu0 %vm20068_vm2, %v18144_v18  ;;  %v20989_v62 = vpop.permute.xlu0 %4903  ;;  %v18766_v50 = vunpack.i.h.bf16 %v23720_v0  ;;  %v18765_v58 = vunpack.i.l.bf16 %v23720_v0 }
 0x37d   : > { %v18854_v25 = vpop.permute.xlu1 %18853  ;;  %17080 = vmatmul.mubr.msk.f32.vlgmr.msra.gmra.mrb[60].mxu1 %vm2488_vm3, %v2864_v32  ;;  %v23723_v32 = vld [vmem:[#allocation53_spill] sm:$0xff] }
 0x37e   : > { %v19422_v22 = vpop.eup %19421  ;;  %18143 = vmatpush3.bf16.msra.mxu1 %v18140_v55  ;;  %17093 = vmatprep.mubr.msk.f32.mxu1 %vm2488_vm3, %v2870_v13  ;;  %v18776_v55 = vunpack.i.h.bf16 %v23721_v11  ;;  %v18156_v57 = vpack.c.bf16 %v18766_v50, %v18765_v58  ;;  %v23724_v13 = vld [vmem:[#allocation61_spill] sm:$0xff]  ;;  %v23725_v50 = vld [vmem:[#allocation63_spill] sm:$0xff] }
 0x37f   : > { %18152 = vmatprep.subr.msk.bf16.mxu1 %vm20068_vm2, %v18150_v28  ;;  %v2868_v42 = vmul.f32 %v19422_v22, %v20788_v40  ;;  %v18786_v22 = vunpack.i.h.bf16 %v23724_v13  ;;  %v18785_v0 = vunpack.i.l.bf16 %v23724_v13  ;;  %v18796_v58 = vunpack.i.h.bf16 %v23725_v50  ;;  %v23726_v11 = vld [vmem:[#allocation49_spill] sm:$0xff] }
 0x380   : > { %v20999_v5 = vpop.permute.xlu0 %18868  ;;  %v18162_v56 = vpack.c.bf16 %v18776_v55, %v18775_v53  ;;  %v23727_v55 = vld [vmem:[#allocation59_spill] sm:$0xff]  ;;  %v18850_v13 = vunpack.i.l.bf16 %v20952_v46 }
 0x381   : > { %v21001_v61 = vpop.permute.xlu1 %4723  ;;  %17087 = vmatmul.mubr.msk.f32.vlgmr.msra.gmra.mrb[62].mxu0 %vm2488_vm3, %v2868_v42  ;;  %v18795_v42 = vunpack.i.l.bf16 %v23725_v50  ;;  %v18855_v50 = vunpack.i.l.bf16 %v18854_v25 }
 0x382   : > { %v19424_v54 = vpop.eup %19423  ;;  %17100 = vmatprep.mubr.msk.f32.mxu0 %vm1095_vm1, %v23722_v33 }
 0x383   : > { %v2872_v26 = vmul.f32 %v19424_v54, %v20792_v51  ;;  %v18168_v54 = vpack.c.bf16 %v18786_v22, %v18785_v0  ;;  %v18174_v33 = vpack.c.bf16 %v18796_v58, %v18795_v42  ;;  %v18856_v0 = vunpack.i.h.bf16 %v18854_v25  ;;  %v23729_v42 = vld [vmem:[#allocation54_spill] sm:$0xff] }
 0x384   : > { %18149 = vmatpush3.bf16.xpose.msk.msra.mxu0 %vm20068_vm2, %v18144_v18  ;;  %v21011_v40 = vpop.permute.xlu0 %4996  ;;  %v18861_v25 = vunpack.i.h.bf16 %v20970_v47 }
 0x385   : > { %18158 = vmatprep.subr.msk.bf16.mxu0 %vm20068_vm2, %v18156_v57  ;;  %v4813_v41 = vpop.permute.xlu1 %4812  ;;  %17094 = vmatmul.mubr.msk.f32.vlgmr.msra.gmra.mrb[62].mxu1 %vm2488_vm3, %v2872_v26  ;;  %v23728_v26 = vld [vmem:[#allocation51_spill] sm:$0xff] }
 0x386   : > { %17107 = vmatprep.mubr.msk.f32.mxu1 %vm1095_vm1, %v23723_v32  ;;  %v18851_v32 = vunpack.i.h.bf16 %v20952_v46 }
 0x387   : > { %18155 = vmatpush3.bf16.xpose.msk.msra.mxu1 %vm20068_vm2, %v18150_v28 }
 0x388   : > { %18164 = vmatprep.subr.msk.bf16.mxu1 %vm20068_vm2, %v18162_v56  ;;  %v21024_v51 = vpop.permute.xlu0 %5085  ;;  %v18180_v58 = vpack.c.bf16 %v18851_v32, %v18850_v13 }
 0x389   : > { %v18864_v18 = vpop.permute.xlu1 %18863 }
 0x38b   : > { %17101 = vmatmul.mubr.msk.f32.vlgmr.msra.gmra.mrb[64].mxu0 %vm1095_vm1, %v23726_v11  ;;  %v18860_v11 = vunpack.i.l.bf16 %v20970_v47  ;;  %v18871_v47 = vunpack.i.h.bf16 %v20999_v5 }
 0x38c   : > { %18161 = vmatpush3.bf16.xpose.msk.msra.mxu0 %vm20068_vm2, %v18156_v57  ;;  %17114 = vmatprep.mubr.msk.f32.mxu0 %vm1095_vm1, %v23727_v55  ;;  %v21034_v28 = vpop.permute.xlu0 %18878  ;;  %v18866_v55 = vunpack.i.h.bf16 %v18864_v18 }
 0x38d   : > { %18170 = vmatprep.subr.msk.bf16.mxu0 %vm20068_vm2, %v18168_v54  ;;  %v4906_v53 = vpop.permute.xlu1 %4905  ;;  %v18192_v32 = vpack.c.bf16 %v18861_v25, %v18860_v11 }
 0x38e   : > { %17108 = vmatmul.mubr.msk.f32.vlgmr.msra.gmra.mrb[64].mxu1 %vm1095_vm1, %v23728_v26  ;;  %v18865_v26 = vunpack.i.l.bf16 %v18864_v18  ;;  %v18870_v18 = vunpack.i.l.bf16 %v20999_v5 }
 0x38f   : > { %18167 = vmatpush3.bf16.xpose.msk.msra.mxu1 %vm20068_vm2, %v18162_v56  ;;  %17121 = vmatprep.mubr.msk.f32.mxu1 %vm1095_vm1, %v20947_v49  ;;  %v18186_v56 = vpack.c.bf16 %v18856_v0, %v18855_v50  ;;  %v18881_v50 = vunpack.i.h.bf16 %v21034_v28 }
 0x390   : > { %18176 = vmatprep.subr.msk.bf16.mxu1 %vm20068_vm2, %v18174_v33  ;;  %v21048_v57 = vpop.permute.xlu0 %5178  ;;  %v18204_v0 = vpack.c.bf16 %v18871_v47, %v18870_v18 }
 0x391   : > { %v4995_v22 = vpop.permute.xlu1 %4994 }
 0x393   : > { %17115 = vmatmul.mubr.msk.f32.vlgmr.msra.gmra.mrb[66].mxu0 %vm1095_vm1, %v23729_v42 }
 0x394   : > { %18173 = vmatpush3.bf16.xpose.msk.msra.mxu0 %vm20068_vm2, %v18168_v54  ;;  %17128 = vmatprep.mubr.msk.f32.mxu0 %vm1095_vm1, %v20980_v9  ;;  %v5268_v46 = vpop.permute.xlu0 %5267 }
 0x395   : > { %18182 = vmatprep.subr.msk.bf16.mxu0 %vm20068_vm2, %v18180_v58  ;;  %v18874_v49 = vpop.permute.xlu1 %18873 }
 0x396   : > { %17122 = vmatmul.mubr.msk.f32.vlgmr.msra.gmra.mrb[66].mxu1 %vm1095_vm1, %v20945_v14  ;;  %v18875_v13 = vunpack.i.l.bf16 %v18874_v49 }
 0x397   : > { %18179 = vmatpush3.bf16.xpose.msk.msra.mxu1 %vm20068_vm2, %v18174_v33  ;;  %17135 = vmatprep.mubr.msk.f32.mxu1 %vm1095_vm1, %v20962_v30  ;;  %v18198_v30 = vpack.c.bf16 %v18866_v55, %v18865_v26 }
 0x398   : > { %18188 = vmatprep.subr.msk.bf16.mxu1 %vm20068_vm2, %v18186_v56  ;;  %v18889_v9 = vpop.permute.xlu0 %18888 }
 0x399   : > { %v5088_v54 = vpop.permute.xlu1 %5087  ;;  %v18890_v25 = vunpack.i.l.bf16 %v18889_v9 }
 0x39b   : > { %17129 = vmatmul.mubr.msk.f32.vlgmr.msra.gmra.mrb[68].mxu0 %vm1095_vm1, %v20957_v48 }
 0x39c   : > { %18185 = vmatpush3.bf16.xpose.msk.msra.mxu0 %vm20068_vm2, %v18180_v58  ;;  %17142 = vmatprep.mubr.msk.f32.mxu0 %vm1095_vm1, %v4813_v41  ;;  %v5361_v33 = vpop.permute.xlu0 %5360  ;;  %v18876_v41 = vunpack.i.h.bf16 %v18874_v49  ;;  %v18880_v58 = vunpack.i.l.bf16 %v21034_v28 }
 0x39d   : > { %18194 = vmatprep.subr.msk.bf16.mxu0 %vm20068_vm2, %v18192_v32  ;;  %v5177_v14 = vpop.permute.xlu1 %5176 }
 0x39e   : > { %17136 = vmatmul.mubr.msk.f32.vlgmr.msra.gmra.mrb[68].mxu1 %vm1095_vm1, %v21001_v61  ;;  %v18210_v61 = vpack.c.bf16 %v18876_v41, %v18875_v13  ;;  %v18216_v49 = vpack.c.bf16 %v18881_v50, %v18880_v58 }
 0x39f   : > { %18191 = vmatpush3.bf16.xpose.msk.msra.mxu1 %vm20068_vm2, %v18186_v56  ;;  %17149 = vmatprep.mubr.msk.f32.mxu1 %vm1095_vm1, %v20989_v62 }
 0x3a0   : > { %18200 = vmatprep.subr.msk.bf16.mxu1 %vm20068_vm2, %v18198_v30  ;;  %v5450_v5 = vpop.permute.xlu0 %5449 }
 0x3a1   : > { %v18884_v48 = vpop.permute.xlu1 %18883 }
 0x3a2   : > { %v18885_v42 = vunpack.i.l.bf16 %v18884_v48 }
 0x3a3   : > { %17143 = vmatmul.mubr.msk.f32.vlgmr.msra.gmra.mrb[70].mxu0 %vm1095_vm1, %v20975_v20 }
 0x3a4   : > { %18197 = vmatpush3.bf16.xpose.msk.msra.mxu0 %vm20068_vm2, %v18192_v32  ;;  %17156 = vmatprep.mubr.msk.f32.mxu0 %vm1095_vm1, %v4995_v22  ;;  %v18886_v22 = vunpack.i.h.bf16 %v18884_v48  ;;  %v5541_v56 = vpop.permute.xlu0 %5540 }
 0x3a5   : > { %18206 = vmatprep.subr.msk.bf16.mxu0 %vm20068_vm2, %v18204_v0  ;;  %v5270_v62 = vpop.permute.xlu1 %5269 }
 0x3a6   : > { %17150 = vmatmul.mubr.msk.f32.vlgmr.msra.gmra.mrb[70].mxu1 %vm1095_vm1, %v4906_v53  ;;  %v18222_v28 = vpack.c.bf16 %v18886_v22, %v18885_v42  ;;  %v18891_v53 = vunpack.i.h.bf16 %v18889_v9 }
 0x3a7   : > { %18203 = vmatpush3.bf16.xpose.msk.msra.mxu1 %vm20068_vm2, %v18198_v30  ;;  %17163 = vmatprep.mubr.msk.f32.mxu1 %vm1095_vm1, %v21024_v51 }
 0x3a8   : > { %18212 = vmatprep.subr.msk.bf16.mxu1 %vm20068_vm2, %v18210_v61  ;;  %v18228_v32 = vpack.c.bf16 %v18891_v53, %v18890_v25 }
 0x3a9   : > { %v5359_v20 = vpop.permute.xlu1 %5358 }
 0x3ab   : > { %17157 = vmatmul.mubr.msk.f32.vlgmr.msra.gmra.mrb[72].mxu0 %vm1095_vm1, %v21011_v40  ;;  %v5632_v40 = vpop.permute.xlu0 %5631 }
 0x3ac   : > { %18209 = vmatpush3.bf16.xpose.msk.msra.mxu0 %vm20068_vm2, %v18204_v0  ;;  %17170 = vmatprep.mubr.msk.f32.mxu0 %vm1095_vm1, %v5177_v14 }
 0x3ad   : > { %18218 = vmatprep.subr.msk.bf16.mxu0 %vm20068_vm2, %v18216_v49  ;;  %v18894_v51 = vpop.permute.xlu1 %18893 }
 0x3ae   : > { %17164 = vmatmul.mubr.msk.f32.vlgmr.msra.gmra.mrb[72].mxu1 %vm1095_vm1, %v5088_v54  ;;  %v18896_v55 = vunpack.i.h.bf16 %v18894_v51  ;;  %v18895_v26 = vunpack.i.l.bf16 %v18894_v51 }
 0x3af   : > { %18215 = vmatpush3.bf16.xpose.msk.msra.mxu1 %vm20068_vm2, %v18210_v61  ;;  %17177 = vmatprep.mubr.msk.f32.mxu1 %vm1095_vm1, %v5268_v46  ;;  %v18904_v54 = vpop.permute.xlu0 %18903 }
 0x3b0   : > { %18224 = vmatprep.subr.msk.bf16.mxu1 %vm20068_vm2, %v18222_v28  ;;  %v18234_v9 = vpack.c.bf16 %v18896_v55, %v18895_v26  ;;  %v18906_v14 = vunpack.i.h.bf16 %v18904_v54  ;;  %v18905_v30 = vunpack.i.l.bf16 %v18904_v54 }
 0x3b1   : > { %v5452_v11 = vpop.permute.xlu1 %5451 }
 0x3b2   : > { %v18244_v41 = vpack.c.bf16 %v18906_v14, %v18905_v30 }
 0x3b3   : > { %17171 = vmatmul.mubr.msk.f32.vlgmr.msra.gmra.mrb[74].mxu0 %vm1095_vm1, %v21048_v57  ;;  %v18914_v13 = vpop.permute.xlu0 %18913 }
 0x3b4   : > { %18221 = vmatpush3.bf16.xpose.msk.msra.mxu0 %vm20068_vm2, %v18216_v49  ;;  %17184 = vmatprep.mubr.msk.f32.mxu0 %vm1095_vm1, %v5359_v20 }
 0x3b5   : > { %18230 = vmatprep.subr.msk.bf16.mxu0 %vm20068_vm2, %v18228_v32  ;;  %v5543_v46 = vpop.permute.xlu1 %5542 }
 0x3b6   : > { %17178 = vmatmul.mubr.msk.f32.vlgmr.msra.gmra.mrb[74].mxu1 %vm1095_vm1, %v5270_v62  ;;  %v18915_v62 = vunpack.i.l.bf16 %v18914_v13 }
 0x3b7   : > { %18227 = vmatpush3.bf16.xpose.msk.msra.mxu1 %vm20068_vm2, %v18222_v28  ;;  %17191 = vmatprep.mubr.msk.f32.mxu1 %vm1095_vm1, %v5450_v5  ;;  %v18916_v5 = vunpack.i.h.bf16 %v18914_v13 }
 0x3b8   : > { %18236 = vmatprep.subr.msk.bf16.mxu1 %vm20068_vm2, %v18234_v9 }
 0x3b9   : > { %v5634_v57 = vpop.permute.xlu1 %5633  ;;  %v21140_v20 = vpack.c.bf16 %v18916_v5, %v18915_v62 }
 0x3bb   : > { %17185 = vmatmul.mubr.msk.f32.vlgmr.msra.gmra.mrb[76].mxu0 %vm1095_vm1, %v5361_v33  ;;  %23731 = vst [vmem:[#allocation62_spill] sm:$0xff] %v21140_v20 }
 0x3bc   : > { %18233 = vmatpush3.bf16.xpose.msk.msra.mxu0 %vm20068_vm2, %v18228_v32  ;;  %17198 = vmatprep.mubr.msk.f32.mxu0 %vm1095_vm1, %v5541_v56 }
 0x3bd   : > { %v18899_v47 = vpop.permute.xlu1 %18898 }
 0x3be   : > { %v18901_v18 = vunpack.i.h.bf16 %v18899_v47  ;;  %v18900_v48 = vunpack.i.l.bf16 %v18899_v47  ;;  %17192 = vmatmul.mubr.msk.f32.vlgmr.msra.gmra.mrb[76].mxu1 %vm1095_vm1, %v5452_v11 }
 0x3bf   : > { %18239 = vmatpush3.bf16.xpose.msk.msra.mxu1 %vm20068_vm2, %v18234_v9  ;;  %17205 = vmatprep.mubr.msk.f32.mxu1 %vm1095_vm1, %v5632_v40 }
 0x3c0   : > { %18245 = vmatprep.subr.bf16.mxu1 %v18244_v41  ;;  %v18240_v0 = vpack.c.bf16 %v18901_v18, %v18900_v48 }
 0x3c1   : > { %v18909_v33 = vpop.permute.xlu1 %18908 }
 0x3c2   : > { %v18911_v61 = vunpack.i.h.bf16 %v18909_v33  ;;  %v18910_v50 = vunpack.i.l.bf16 %v18909_v33  ;;  %18241 = vmatprep.subr.bf16.mxu0 %v18240_v0 }
 0x3c3   : > { %17199 = vmatmul.mubr.msk.f32.vlgmr.msra.gmra.mrb[78].mxu0 %vm1095_vm1, %v5543_v46 }
 0x3c4   : > { %18243 = vmatpush3.bf16.msra.mxu0 %v18240_v0  ;;  %v21136_v58 = vpack.c.bf16 %v18911_v61, %v18910_v50 }
 0x3c6   : > { %23730 = vst [vmem:[#allocation55_spill] sm:$0xff] %v21136_v58  ;;  %17206 = vmatmul.mubr.msk.f32.vlgmr.msra.gmra.mrb[78].mxu1 %vm1095_vm1, %v5634_v57  ;;  %18249 = vmatprep.subr.bf16.mxu0 %v21136_v58 }
 0x3c7   : > { %18247 = vmatpush3.bf16.msra.mxu1 %v18244_v41 }
 0x3c8   : > { %18253 = vmatprep.subr.bf16.mxu1 %v21140_v20 }
 0x3e3   : > { %v21143_v22 = vpop.f32.mrb[48].mxu0 }
 0x3e4   : > { %23732 = vst [vmem:[#allocation34_spill] sm:$0xff] %v21143_v22  ;;  %v21145_v42 = vpop.f32.mrb[49].mxu0 }
 0x3e5   : > { %23733 = vst [vmem:[#allocation65_spill] sm:$0xff] %v21145_v42 }
 0x3eb   : > { %v21147_v49 = vpop.f32.mrb[48].mxu1 }
 0x3ec   : > { %23734 = vst [vmem:[#allocation57_spill] sm:$0xff] %v21147_v49  ;;  %v21149_v56 = vpop.f32.mrb[49].mxu1 }
 0x3ed   : > { %23735 = vst [vmem:[#allocation64_spill] sm:$0xff] %v21149_v56  ;;  %v21151_v51 = vpop.f32.mrb[50].mxu0 }
 0x3ee   : > { %23736 = vst [vmem:[#allocation68_spill] sm:$0xff] %v21151_v51  ;;  %v21153_v28 = vpop.f32.mrb[51].mxu0 }
 0x3ef   : > { %23737 = vst [vmem:[#allocation45_spill] sm:$0xff] %v21153_v28 }
 0x3f3   : > { %v21155_v53 = vpop.f32.mrb[50].mxu1 }
 0x3f4   : > { %23738 = vst [vmem:[#allocation66_spill] sm:$0xff] %v21155_v53  ;;  %v21157_v25 = vpop.f32.mrb[51].mxu1 }
 0x3f5   : > { %23739 = vst [vmem:[#allocation67_spill] sm:$0xff] %v21157_v25  ;;  %v21159_v40 = vpop.f32.mrb[52].mxu0 }
 0x3f6   : > { %23740 = vst [vmem:[#allocation70_spill] sm:$0xff] %v21159_v40  ;;  %v21161_v11 = vpop.f32.mrb[53].mxu0 }
 0x3f7   : > { %23741 = vst [vmem:[#allocation69_spill] sm:$0xff] %v21161_v11 }
 0x3fb   : > { %v21163_v55 = vpop.f32.mrb[52].mxu1 }
 0x3fc   : > { %23742 = vst [vmem:[#allocation72_spill] sm:$0xff] %v21163_v55  ;;  %v21165_v26 = vpop.f32.mrb[53].mxu1 }
 0x3fd   : > { %23743 = vst [vmem:[#allocation18_spill] sm:$0xff] %v21165_v26  ;;  %v21167_v32 = vpop.f32.mrb[54].mxu0 }
 0x3fe   : > { %23744 = vst [vmem:[#allocation71_spill] sm:$0xff] %v21167_v32  ;;  %v21169_v46 = vpop.f32.mrb[55].mxu0 }
 0x3ff   : > { %23745 = vst [vmem:[#allocation73_spill] sm:$0xff] %v21169_v46 }
 0x403   : > { %v21171_v9 = vpop.f32.mrb[54].mxu1 }
 0x404   : > { %23746 = vst [vmem:[#allocation52_spill] sm:$0xff] %v21171_v9  ;;  %v21173_v54 = vpop.f32.mrb[55].mxu1 }
 0x405   : > { %23747 = vst [vmem:[#allocation58_spill] sm:$0xff] %v21173_v54  ;;  %v21175_v57 = vpop.f32.mrb[56].mxu0 }
 0x406   : > { %23748 = vst [vmem:[#allocation56_spill] sm:$0xff] %v21175_v57  ;;  %v21177_v14 = vpop.f32.mrb[57].mxu0 }
 0x407   : > { %23749 = vst [vmem:[#allocation60_spill] sm:$0xff] %v21177_v14 }
 0x40b   : > { %v21179_v30 = vpop.f32.mrb[56].mxu1 }
 0x40c   : > { %23750 = vst [vmem:[#allocation50_spill] sm:$0xff] %v21179_v30  ;;  %v21181_v47 = vpop.f32.mrb[57].mxu1 }
 0x40d   : > { %23751 = vst [vmem:[#allocation53_spill] sm:$0xff] %v21181_v47 }
 0x43d   : > { %v21183_v18 = vpop.f32.mrb[58].mxu0 }
 0x43e   : > { %23752 = vst [vmem:[#allocation61_spill] sm:$0xff] %v21183_v18  ;;  %v21185_v48 = vpop.f32.mrb[59].mxu0 }
 0x43f   : > { %23753 = vst [vmem:[#allocation63_spill] sm:$0xff] %v21185_v48 }
 0x445   : > { %v21187_v41 = vpop.f32.mrb[58].mxu1 }
 0x446   : > { %23754 = vst [vmem:[#allocation49_spill] sm:$0xff] %v21187_v41  ;;  %v21189_v13 = vpop.f32.mrb[59].mxu1  ;;  %v21210_v41 = vld [vmem:[%s23469_s6 + $0x18] sm:$0xff] }
 0x447   : > { %23755 = vst [vmem:[#allocation59_spill] sm:$0xff] %v21189_v13 }
 0x44d   : > { %v21191_v0 = vpop.f32.mrb[60].mxu0 }
 0x44e   : > { %23756 = vst [vmem:[#allocation51_spill] sm:$0xff] %v21191_v0  ;;  %v21193_v33 = vpop.f32.mrb[61].mxu0 }
 0x44f   : > { %23757 = vst [vmem:[#allocation54_spill] sm:$0xff] %v21193_v33 }
 0x450   : > { %v21195_v5 = vpop.f32.mrb[60].mxu1 }
 0x451   : > { %23758 = vst [vmem:[#allocation74_spill] sm:$0xff] %v21195_v5  ;;  %v21197_v62 = vpop.f32.mrb[61].mxu1  ;;  %v21215_v5 = vld [vmem:[%s23469_s6 + $0x10] sm:$0xff] }
 0x452   : > { %23759 = vst [vmem:[#allocation75_spill] sm:$0xff] %v21197_v62 }
 0x454   : > { %v21199_v61 = vpop.f32.mrb[62].mxu0 }
 0x455   : > { %23760 = vst [vmem:[#allocation76_spill] sm:$0xff] %v21199_v61  ;;  %v21201_v50 = vpop.f32.mrb[63].mxu0 }
 0x456   : > { %23761 = vst [vmem:[#allocation77_spill] sm:$0xff] %v21201_v50 }
 0x458   : > { %v21203_v30 = vpop.f32.mrb[62].mxu1 }
 0x459   : > { %23762 = vst [vmem:[#allocation78_spill] sm:$0xff] %v21203_v30  ;;  %v21205_v18 = vpop.f32.mrb[63].mxu1 }
 0x45a   : > { %23763 = vst [vmem:[#allocation79_spill] sm:$0xff] %v21205_v18 }
 0x45e   : > { %v17102_v0 = vpop.f32.mrb[64].mxu0 }
 0x45f   : > { %v21218_v62 = vadd.f32 %v17102_v0, %v21210_v41  ;;  %v4348_v61 = vpop.f32.mrb[65].mxu0 }
 0x460   : > { %v21221_v50 = vadd.f32 %v4348_v61, %v21215_v5 }
 0x461   : > { %v17109_v30 = vpop.f32.mrb[64].mxu1  ;;  %v5725_v18 = vsel %vm2488_vm3, %v21218_v62, -inf }
 0x462   : > { %5726 = vmax.xlane.f32.xlu0 %v5725_v18  ;;  %v4439_v33 = vpop.f32.mrb[65].mxu1  ;;  %v21229_v48 = vadd.f32 %v17109_v30, %v21210_v41  ;;  %v5722_v0 = vsel %vm2488_vm3, %v21221_v50, -inf }
 0x463   : > { %v21226_v13 = vadd.f32 %v4439_v33, %v21215_v5 }
 0x464   : > { %v5731_v33 = vsel %vm2488_vm3, %v21229_v48, -inf }
 0x465   : > { %v5728_v47 = vsel %vm2488_vm3, %v21226_v13, -inf }
 0x466   : > { %v17116_v61 = vpop.f32.mrb[66].mxu0  ;;  %5723 = vmax.xlane.f32.xlu0 %v5722_v0  ;;  %5729 = vmax.xlane.f32.xlu1 %v5728_v47 }
 0x467   : > { %v4530_v57 = vpop.f32.mrb[67].mxu0  ;;  %v21236_v14 = vadd.f32 %v17116_v61, %v21210_v41 }
 0x468   : > { %v21249_v47 = vadd.f32 %v4530_v57, %v21215_v5 }
 0x469   : > { %v17123_v18 = vpop.f32.mrb[66].mxu1  ;;  %v5737_v61 = vsel %vm2488_vm3, %v21236_v14, -inf }
 0x46a   : > { %v21241_v30 = vadd.f32 %v17123_v18, %v21210_v41  ;;  %5732 = vmax.xlane.f32.xlu0 %v5731_v33  ;;  %v4621_v9 = vpop.f32.mrb[67].mxu1  ;;  %v5734_v55 = vsel %vm2488_vm3, %v21249_v47, -inf }
 0x46b   : > { %v21244_v54 = vadd.f32 %v4621_v9, %v21215_v5 }
 0x46c   : > { %v5743_v0 = vsel %vm2488_vm3, %v21241_v30, -inf }
 0x46d   : > { %5744 = vmax.xlane.f32.xlu1 %v5743_v0  ;;  %v5740_v18 = vsel %vm2488_vm3, %v21244_v54, -inf }
 0x46e   : > { %5738 = vmax.xlane.f32.xlu0 %v5737_v61  ;;  %v17130_v32 = vpop.f32.mrb[68].mxu0 }
 0x46f   : > { %v4712_v46 = vpop.f32.mrb[69].mxu0  ;;  %v21256_v33 = vadd.f32 %v17130_v32, %v21210_v41 }
 0x470   : > { %v21269_v40 = vadd.f32 %v4712_v46, %v21215_v5 }
 0x471   : > { %5741 = vmax.xlane.f32.xlu1 %v5740_v18  ;;  %v17137_v9 = vpop.f32.mrb[68].mxu1  ;;  %v5749_v32 = vsel %vm2488_vm3, %v21256_v33, -inf }
 0x472   : > { %v21261_v57 = vadd.f32 %v17137_v9, %v21210_v41  ;;  %5735 = vmax.xlane.f32.xlu0 %v5734_v55  ;;  %v4803_v0 = vpop.f32.mrb[69].mxu1  ;;  %v5746_v53 = vsel %vm2488_vm3, %v21269_v40, -inf }
 0x473   : > { %v21264_v61 = vadd.f32 %v4803_v0, %v21215_v5 }
 0x474   : > { %v5755_v26 = vsel %vm2488_vm3, %v21261_v57, -inf }
 0x475   : > { %5756 = vmax.xlane.f32.xlu1 %v5755_v26  ;;  %v5752_v55 = vsel %vm2488_vm3, %v21264_v61, -inf }
 0x476   : > { %5750 = vmax.xlane.f32.xlu0 %v5749_v32  ;;  %v17144_v18 = vpop.f32.mrb[70].mxu0 }
 0x477   : > { %v4894_v11 = vpop.f32.mrb[71].mxu0  ;;  %v21276_v9 = vadd.f32 %v17144_v18, %v21210_v41 }
 0x478   : > { %v21289_v51 = vadd.f32 %v4894_v11, %v21215_v5 }
 0x479   : > { %5753 = vmax.xlane.f32.xlu1 %v5752_v55  ;;  %v17151_v0 = vpop.f32.mrb[70].mxu1  ;;  %v5761_v18 = vsel %vm2488_vm3, %v21276_v9, -inf }
 0x47a   : > { %v21281_v46 = vadd.f32 %v17151_v0, %v21210_v41  ;;  %5747 = vmax.xlane.f32.xlu0 %v5746_v53  ;;  %v4985_v26 = vpop.f32.mrb[71].mxu1 }
 0x47b   : > { %v21284_v32 = vadd.f32 %v4985_v26, %v21215_v5 }
 0x47c   : > { %v5767_v25 = vsel %vm2488_vm3, %v21281_v46, -inf }
 0x47d   : > { %5768 = vmax.xlane.f32.xlu1 %v5767_v25  ;;  %v5764_v53 = vsel %vm2488_vm3, %v21284_v32, -inf  ;;  %v5758_v25 = vsel %vm2488_vm3, %v21289_v51, -inf }
 0x47e   : > { %5762 = vmax.xlane.f32.xlu0 %v5761_v18  ;;  %v17158_v55 = vpop.f32.mrb[72].mxu0 }
 0x47f   : > { %v5076_v28 = vpop.f32.mrb[73].mxu0  ;;  %v21294_v0 = vadd.f32 %v17158_v55, %v21210_v41 }
 0x480   : > { %v21299_v26 = vadd.f32 %v5076_v28, %v21215_v5 }
 0x481   : > { %5765 = vmax.xlane.f32.xlu1 %v5764_v53  ;;  %v17165_v49 = vpop.f32.mrb[72].mxu1  ;;  %v5773_v55 = vsel %vm2488_vm3, %v21294_v0, -inf }
 0x482   : > { %v5167_v11 = vpop.f32.mrb[73].mxu1  ;;  %5759 = vmax.xlane.f32.xlu0 %v5758_v25  ;;  %v21304_v18 = vadd.f32 %v17165_v49, %v21210_v41  ;;  %v5770_v28 = vsel %vm2488_vm3, %v21299_v26, -inf }
 0x483   : > { %v21309_v56 = vadd.f32 %v5167_v11, %v21215_v5 }
 0x484   : > { %v5779_v49 = vsel %vm2488_vm3, %v21304_v18, -inf }
 0x485   : > { %5774 = vmax.xlane.f32.xlu1 %v5773_v55  ;;  %v5776_v11 = vsel %vm2488_vm3, %v21309_v56, -inf }
 0x486   : > { %v17172_v53 = vpop.f32.mrb[74].mxu0  ;;  %5771 = vmax.xlane.f32.xlu0 %v5770_v28 }
 0x487   : > { %v5258_v22 = vpop.f32.mrb[75].mxu0  ;;  %v21314_v42 = vadd.f32 %v17172_v53, %v21210_v41 }
 0x488   : > { %v21319_v25 = vadd.f32 %v5258_v22, %v21215_v5 }
 0x489   : > { %v17179_v7 = vpop.f32.mrb[74].mxu1  ;;  %5780 = vmax.xlane.f32.xlu1 %v5779_v49  ;;  %v5785_v28 = vsel %vm2488_vm3, %v21314_v42, -inf }
 0x48a   : > { %v5349_v55 = vpop.f32.mrb[75].mxu1  ;;  %5777 = vmax.xlane.f32.xlu0 %v5776_v11  ;;  %v21324_v35 = vadd.f32 %v17179_v7, %v21210_v41  ;;  %v5782_v22 = vsel %vm2488_vm3, %v21319_v25, -inf }
 0x48b   : > { %v21329_v53 = vadd.f32 %v5349_v55, %v21215_v5 }
 0x48c   : > { %v5791_v7 = vsel %vm2488_vm3, %v21324_v35, -inf }
 0x48d   : > { %5786 = vmax.xlane.f32.xlu1 %v5785_v28  ;;  %v5788_v55 = vsel %vm2488_vm3, %v21329_v53, -inf }
 0x48e   : > { %v17186_v31 = vpop.f32.mrb[76].mxu0  ;;  %5783 = vmax.xlane.f32.xlu0 %v5782_v22 }
 0x48f   : > { %v5440_v49 = vpop.f32.mrb[77].mxu0  ;;  %v21334_v60 = vadd.f32 %v17186_v31, %v21210_v41 }
 0x490   : > { %v21339_v11 = vadd.f32 %v5440_v49, %v21215_v5 }
 0x491   : > { %v17193_v58 = vpop.f32.mrb[76].mxu1  ;;  %5792 = vmax.xlane.f32.xlu1 %v5791_v7  ;;  %v5797_v31 = vsel %vm2488_vm3, %v21334_v60, -inf }
 0x492   : > { %v5531_v28 = vpop.f32.mrb[77].mxu1  ;;  %5789 = vmax.xlane.f32.xlu0 %v5788_v55  ;;  %v21344_v24 = vadd.f32 %v17193_v58, %v21210_v41  ;;  %v5794_v49 = vsel %vm2488_vm3, %v21339_v11, -inf }
 0x493   : > { %v21349_v22 = vadd.f32 %v5531_v28, %v21215_v5 }
 0x494   : > { %v5803_v58 = vsel %vm2488_vm3, %v21344_v24, -inf }
 0x495   : > { %5798 = vmax.xlane.f32.xlu1 %v5797_v31  ;;  %v5800_v28 = vsel %vm2488_vm3, %v21349_v22, -inf }
 0x496   : > { %v17200_v59 = vpop.f32.mrb[78].mxu0  ;;  %5795 = vmax.xlane.f32.xlu0 %v5794_v49 }
 0x497   : > { %v5622_v7 = vpop.f32.mrb[79].mxu0  ;;  %v21354_v20 = vadd.f32 %v17200_v59, %v21210_v41 }
 0x498   : > { %v21359_v55 = vadd.f32 %v5622_v7, %v21215_v5 }
 0x499   : > { %v17207_v37 = vpop.f32.mrb[78].mxu1  ;;  %5804 = vmax.xlane.f32.xlu1 %v5803_v58  ;;  %v5809_v59 = vsel %vm2488_vm3, %v21354_v20, -inf }
 0x49a   : > { %v5713_v31 = vpop.f32.mrb[79].mxu1  ;;  %5801 = vmax.xlane.f32.xlu0 %v5800_v28  ;;  %v21367_v49 = vadd.f32 %v17207_v37, %v21210_v41  ;;  %v5806_v7 = vsel %vm2488_vm3, %v21359_v55, -inf  ;;  %v21387_v41 = vpop.permute.xlu0 %18923 }
 0x49b   : > { %v21364_v21 = vadd.f32 %v5713_v31, %v21215_v5  ;;  %23764 = vst [vmem:[#allocation80_spill] sm:$0xff] %v21387_v41  ;;  %v21389_v5 = vpop.permute.xlu1 %18918 }
 0x49c   : > { %v5815_v58 = vsel %vm2488_vm3, %v21367_v49, -inf  ;;  %23765 = vst [vmem:[#allocation81_spill] sm:$0xff] %v21389_v5 }
 0x49d   : > { %5810 = vmax.xlane.f32.xlu1 %v5809_v59  ;;  %v5812_v37 = vsel %vm2488_vm3, %v21364_v21, -inf }
 0x49e   : > { %5807 = vmax.xlane.f32.xlu0 %v5806_v7  ;;  %v21391_v28 = vpop.permute.xlu0 %18933 }
 0x49f   : > { %23766 = vst [vmem:[#allocation82_spill] sm:$0xff] %v21391_v28  ;;  %v21393_v31 = vpop.permute.xlu1 %18928 }
 0x4a0   : > { %23767 = vst [vmem:[#allocation83_spill] sm:$0xff] %v21393_v31 }
 0x4a1   : > { %5816 = vmax.xlane.f32.xlu1 %v5815_v58 }
 0x4b2   : > { %18938 = vrot.lane.b32.xlu1 %v20240_v52, %s19819_s25 }
 0x4b4   : > { %18943 = vrot.lane.b32.xlu0 %v20262_v1, %s19819_s25 }
 0x4b8   : > { %18948 = vrot.lane.b32.xlu0 %v20284_v17, %s19819_s25 }
 0x4bc   : > { %18953 = vrot.lane.b32.xlu0 %v23683_v27, %s19819_s25 }
 0x4c0   : > { %18958 = vrot.lane.b32.xlu0 %v23681_v23, %s19819_s25 }
 0x4df   : > { %5813 = vmax.xlane.f32.xlu0 %v5812_v37 }
 0x4ef   : > { %v5727_v59 = vpop.xlane.xlu0 %5726 }
 0x4f0   : > { %v5819_v31 = vsub.f32 %v21218_v62, %v5727_v59 }
 0x4f3   : > { %v5730_v7 = vpop.xlane.xlu1 %5729  ;;  %v5724_v58 = vpop.xlane.xlu0 %5723 }
 0x4f4   : > { %v5820_v23 = vsub.f32 %v21226_v13, %v5730_v7  ;;  %v5818_v13 = vsub.f32 %v21221_v50, %v5724_v58 }
 0x4f5   : > { %18963 = vrot.lane.b32.xlu0 %v23693_v29, %s19819_s25  ;;  %v5852_v29 = vmul.f32 1.442695, %v5819_v31 }
 0x4f6   : > { %v5854_v37 = vmul.f32 1.442695, %v5820_v23 }
 0x4f7   : > { %v5733_v17 = vpop.xlane.xlu0 %5732 }
 0x4f8   : > { %v5821_v52 = vsub.f32 %v21229_v48, %v5733_v17 }
 0x4fa   : > { %v5856_v43 = vmul.f32 1.442695, %v5821_v52  ;;  %v5745_v41 = vpop.xlane.xlu1 %5744 }
 0x4fb   : > { %v5825_v5 = vsub.f32 %v21241_v30, %v5745_v41  ;;  %v5739_v4 = vpop.xlane.xlu0 %5738  ;;  %v5850_v30 = vmul.f32 1.442695, %v5818_v13 }
 0x4fc   : > { %19425 = vpow2.f32 %v5856_v43  ;;  %v5823_v43 = vsub.f32 %v21236_v14, %v5739_v4 }
 0x4fd   : > { %19427 = vpow2.f32 %v5854_v37  ;;  %v5864_v28 = vmul.f32 1.442695, %v5825_v5 }
 0x4fe   : > { %v5742_v19 = vpop.xlane.xlu1 %5741 }
 0x4ff   : > { %v5824_v39 = vsub.f32 %v21244_v54, %v5742_v19  ;;  %v5736_v12 = vpop.xlane.xlu0 %5735  ;;  %19429 = vpow2.f32 %v5864_v28 }
 0x500   : > { %19431 = vpow2.f32 %v5852_v29  ;;  %v5822_v29 = vsub.f32 %v21249_v47, %v5736_v12 }
 0x501   : > { %v5862_v17 = vmul.f32 1.442695, %v5824_v39 }
 0x502   : > { %v5757_v23 = vpop.xlane.xlu1 %5756  ;;  %v5858_v7 = vmul.f32 1.442695, %v5822_v29 }
 0x503   : > { %v5829_v52 = vsub.f32 %v21261_v57, %v5757_v23  ;;  %v5751_v48 = vpop.xlane.xlu0 %5750  ;;  %19433 = vpow2.f32 %v5862_v17  ;;  %v5860_v57 = vmul.f32 1.442695, %v5823_v43 }
 0x504   : > { %19435 = vpow2.f32 %v5850_v30  ;;  %v5827_v58 = vsub.f32 %v21256_v33, %v5751_v48 }
 0x505   : > { %v5872_v41 = vmul.f32 1.442695, %v5829_v52 }
 0x506   : > { %v21405_v62 = vpop.eup %19425  ;;  %v5754_v5 = vpop.xlane.xlu1 %5753  ;;  %v5868_v52 = vmul.f32 1.442695, %v5827_v58 }
 0x507   : > { %v5828_v19 = vsub.f32 %v21264_v61, %v5754_v5  ;;  %v5748_v54 = vpop.xlane.xlu0 %5747  ;;  %v5923_v50 = vsel %vm2488_vm3, %v21405_v62, 0.0  ;;  %v21410_v39 = vpop.eup %19427  ;;  %19437 = vpow2.f32 %v5872_v41 }
 0x508   : > { %5924 = vadd.xlane.f32.xlu1 %v5923_v50  ;;  %v5920_v61 = vsel %vm2488_vm3, %v21410_v39, 0.0  ;;  %19439 = vpow2.f32 %v5860_v57  ;;  %v5826_v30 = vsub.f32 %v21269_v40, %v5748_v54 }
 0x509   : > { %v5870_v4 = vmul.f32 1.442695, %v5828_v19  ;;  %v21416_v59 = vpop.eup %19429 }
 0x50a   : > { %v5769_v14 = vpop.xlane.xlu1 %5768  ;;  %v21419_v12 = vpop.eup %19431  ;;  %v5866_v40 = vmul.f32 1.442695, %v5826_v30 }
 0x50b   : > { %v5833_v28 = vsub.f32 %v21281_v46, %v5769_v14  ;;  %v5763_v31 = vpop.xlane.xlu0 %5762  ;;  %19441 = vpow2.f32 %v5870_v4  ;;  %v5935_v46 = vsel %vm2488_vm3, %v21416_v59, 0.0  ;;  %v5917_v19 = vsel %vm2488_vm3, %v21419_v12, 0.0 }
 0x50c   : > { %5921 = vadd.xlane.f32.xlu1 %v5920_v61  ;;  %19443 = vpow2.f32 %v5858_v7  ;;  %v5831_v54 = vsub.f32 %v21276_v9, %v5763_v31 }
 0x50d   : > { %v5880_v37 = vmul.f32 1.442695, %v5833_v28  ;;  %v21424_v23 = vpop.eup %19433 }
 0x50e   : > { %v5766_v13 = vpop.xlane.xlu1 %5765  ;;  %v21427_v43 = vpop.eup %19435  ;;  %v5876_v9 = vmul.f32 1.442695, %v5831_v54 }
 0x50f   : > { %v5832_v47 = vsub.f32 %v21284_v32, %v5766_v13  ;;  %v5760_v17 = vpop.xlane.xlu0 %5759  ;;  %19445 = vpow2.f32 %v5880_v37  ;;  %v5932_v32 = vsel %vm2488_vm3, %v21424_v23, 0.0  ;;  %v5914_v61 = vsel %vm2488_vm3, %v21427_v43, 0.0 }
 0x510   : > { %5936 = vadd.xlane.f32.xlu1 %v5935_v46  ;;  %19447 = vpow2.f32 %v5868_v52  ;;  %v5830_v31 = vsub.f32 %v21289_v51, %v5760_v17 }
 0x511   : > { %v5878_v33 = vmul.f32 1.442695, %v5832_v47  ;;  %v21434_v50 = vpop.eup %19437 }
 0x512   : > { %v5775_v48 = vpop.xlane.xlu1 %5774  ;;  %v21437_v4 = vpop.eup %19439  ;;  %v5947_v28 = vsel %vm2488_vm3, %v21434_v50, 0.0  ;;  %v5874_v30 = vmul.f32 1.442695, %v5830_v31 }
 0x513   : > { %v5835_v41 = vsub.f32 %v21294_v0, %v5775_v48  ;;  %v5772_v5 = vpop.xlane.xlu0 %5771  ;;  %19449 = vpow2.f32 %v5878_v33  ;;  %v5929_v46 = vsel %vm2488_vm3, %v21437_v4, 0.0 }
 0x514   : > { %5933 = vadd.xlane.f32.xlu1 %v5932_v32  ;;  %5918 = vadd.xlane.f32.xlu0 %v5917_v19  ;;  %19451 = vpow2.f32 %v5866_v40  ;;  %v5834_v51 = vsub.f32 %v21299_v26, %v5772_v5 }
 0x515   : > { %v5884_v57 = vmul.f32 1.442695, %v5835_v41  ;;  %v21444_v7 = vpop.eup %19441 }
 0x516   : > { %v5781_v29 = vpop.xlane.xlu1 %5780  ;;  %v21447_v13 = vpop.eup %19443  ;;  %v5944_v47 = vsel %vm2488_vm3, %v21444_v7, 0.0  ;;  %v5882_v26 = vmul.f32 1.442695, %v5834_v51 }
 0x517   : > { %v5837_v0 = vsub.f32 %v21304_v18, %v5781_v29  ;;  %v5778_v14 = vpop.xlane.xlu0 %5777  ;;  %19453 = vpow2.f32 %v5884_v57  ;;  %v5926_v19 = vsel %vm2488_vm3, %v21447_v13, 0.0 }
 0x518   : > { %5948 = vadd.xlane.f32.xlu1 %v5947_v28  ;;  %5915 = vadd.xlane.f32.xlu0 %v5914_v61  ;;  %19455 = vpow2.f32 %v5876_v9  ;;  %v5836_v5 = vsub.f32 %v21309_v56, %v5778_v14 }
 0x519   : > { %v5888_v58 = vmul.f32 1.442695, %v5837_v0  ;;  %v21454_v52 = vpop.eup %19445 }
 0x51a   : > { %v5787_v37 = vpop.xlane.xlu1 %5786  ;;  %v21457_v41 = vpop.eup %19447  ;;  %v5959_v32 = vsel %vm2488_vm3, %v21454_v52, 0.0  ;;  %v5886_v56 = vmul.f32 1.442695, %v5836_v5 }
 0x51b   : > { %v5839_v18 = vsub.f32 %v21314_v42, %v5787_v37  ;;  %v5784_v17 = vpop.xlane.xlu0 %5783  ;;  %19457 = vpow2.f32 %v5888_v58  ;;  %v5941_v61 = vsel %vm2488_vm3, %v21457_v41, 0.0 }
 0x51c   : > { %5945 = vadd.xlane.f32.xlu1 %v5944_v47  ;;  %5930 = vadd.xlane.f32.xlu0 %v5929_v46  ;;  %19459 = vpow2.f32 %v5874_v30  ;;  %v5838_v14 = vsub.f32 %v21319_v25, %v5784_v17 }
 0x51d   : > { %v5892_v33 = vmul.f32 1.442695, %v5839_v18  ;;  %v21464_v40 = vpop.eup %19449 }
 0x51e   : > { %v5793_v48 = vpop.xlane.xlu1 %5792  ;;  %v21467_v29 = vpop.eup %19451  ;;  %v5956_v28 = vsel %vm2488_vm3, %v21464_v40, 0.0  ;;  %v5890_v30 = vmul.f32 1.442695, %v5838_v14 }
 0x51f   : > { %v5841_v42 = vsub.f32 %v21324_v35, %v5793_v48  ;;  %19461 = vpow2.f32 %v5892_v33  ;;  %v5790_v35 = vpop.xlane.xlu0 %5789  ;;  %v5938_v47 = vsel %vm2488_vm3, %v21467_v29, 0.0 }
 0x520   : > { %5960 = vadd.xlane.f32.xlu1 %v5959_v32  ;;  %5927 = vadd.xlane.f32.xlu0 %v5926_v19  ;;  %19463 = vpow2.f32 %v5882_v26  ;;  %v5840_v51 = vsub.f32 %v21329_v53, %v5790_v35 }
 0x521   : > { %v5896_v54 = vmul.f32 1.442695, %v5841_v42  ;;  %v21474_v9 = vpop.eup %19453 }
 0x522   : > { %v5799_v57 = vpop.xlane.xlu1 %5798  ;;  %v21477_v37 = vpop.eup %19455  ;;  %v5965_v18 = vsel %vm2488_vm3, %v21474_v9, 0.0  ;;  %v5894_v19 = vmul.f32 1.442695, %v5840_v51 }
 0x523   : > { %v5843_v0 = vsub.f32 %v21334_v60, %v5799_v57  ;;  %19465 = vpow2.f32 %v5896_v54  ;;  %v5796_v25 = vpop.xlane.xlu0 %5795  ;;  %v5953_v42 = vsel %vm2488_vm3, %v21477_v37, 0.0 }
 0x524   : > { %5957 = vadd.xlane.f32.xlu1 %v5956_v28  ;;  %5942 = vadd.xlane.f32.xlu0 %v5941_v61  ;;  %19467 = vpow2.f32 %v5886_v56  ;;  %v5842_v26 = vsub.f32 %v21339_v11, %v5796_v25 }
 0x525   : > { %v5900_v31 = vmul.f32 1.442695, %v5843_v0  ;;  %v21484_v46 = vpop.eup %19457 }
 0x526   : > { %v5805_v58 = vpop.xlane.xlu1 %5804  ;;  %v21487_v48 = vpop.eup %19459  ;;  %v5898_v11 = vmul.f32 1.442695, %v5842_v26 }
 0x527   : > { %v5845_v60 = vsub.f32 %v21344_v24, %v5805_v58  ;;  %19469 = vpow2.f32 %v5900_v31  ;;  %v5971_v24 = vsel %vm2488_vm3, %v21484_v46, 0.0  ;;  %v5802_v54 = vpop.xlane.xlu0 %5801  ;;  %v5950_v0 = vsel %vm2488_vm3, %v21487_v48, 0.0 }
 0x528   : > { %5966 = vadd.xlane.f32.xlu1 %v5965_v18  ;;  %5939 = vadd.xlane.f32.xlu0 %v5938_v47  ;;  %19471 = vpow2.f32 %v5890_v30  ;;  %v5844_v56 = vsub.f32 %v21349_v22, %v5802_v54 }
 0x529   : > { %v5904_v17 = vmul.f32 1.442695, %v5845_v60  ;;  %v21493_v32 = vpop.eup %19461 }
 0x52a   : > { %v5811_v33 = vpop.xlane.xlu1 %5810  ;;  %v21496_v5 = vpop.eup %19463  ;;  %v5977_v35 = vsel %vm2488_vm3, %v21493_v32, 0.0  ;;  %v5902_v60 = vmul.f32 1.442695, %v5844_v56 }
 0x52b   : > { %19473 = vpow2.f32 %v5904_v17  ;;  %v5962_v31 = vsel %vm2488_vm3, %v21496_v5, 0.0  ;;  %v5847_v18 = vsub.f32 %v21354_v20, %v5811_v33  ;;  %v5808_v22 = vpop.xlane.xlu0 %5807 }
 0x52c   : > { %5972 = vadd.xlane.f32.xlu1 %v5971_v24  ;;  %5954 = vadd.xlane.f32.xlu0 %v5953_v42  ;;  %19475 = vpow2.f32 %v5894_v19  ;;  %v5846_v24 = vsub.f32 %v21359_v55, %v5808_v22  ;;  %v23769_v22 = vld [vmem:[#allocation11_spill] sm:$0xff] }
 0x52d   : > { %v21503_v28 = vpop.eup %19465  ;;  %v5908_v17 = vmul.f32 1.442695, %v5847_v18 }
 0x52e   : > { %v5817_v53 = vpop.xlane.xlu1 %5816  ;;  %v21506_v14 = vpop.eup %19467  ;;  %v5906_v26 = vmul.f32 1.442695, %v5846_v24 }
 0x52f   : > { %v5849_v57 = vsub.f32 %v21367_v49, %v5817_v53  ;;  %v5983_v49 = vsel %vm2488_vm3, %v21503_v28, 0.0  ;;  %v5968_v25 = vsel %vm2488_vm3, %v21506_v14, 0.0 }
 0x530   : > { %5978 = vadd.xlane.f32.xlu1 %v5977_v35  ;;  %5951 = vadd.xlane.f32.xlu0 %v5950_v0 }
 0x531   : > { %v5912_v61 = vmul.f32 1.442695, %v5849_v57  ;;  %v21512_v58 = vpop.eup %19469 }
 0x532   : > { %v21515_v47 = vpop.eup %19471  ;;  %v5989_v30 = vsel %vm2488_vm3, %v21512_v58, 0.0 }
 0x533   : > { %19477 = vpow2.f32 %v5912_v61  ;;  %v5974_v33 = vsel %vm2488_vm3, %v21515_v47, 0.0 }
 0x534   : > { %5984 = vadd.xlane.f32.xlu1 %v5983_v49  ;;  %5963 = vadd.xlane.f32.xlu0 %v5962_v31  ;;  %19479 = vpow2.f32 %v5898_v11  ;;  %v23768_v31 = vld [vmem:[#allocation7_spill] sm:$0xff] }
 0x535   : > { %v21521_v51 = vpop.eup %19473  ;;  %19481 = vpow2.f32 %v5902_v60  ;;  %v21556_v60 = vpop.permute.xlu0 %18943 }
 0x536   : > { %v5995_v20 = vsel %vm2488_vm3, %v21521_v51, 0.0  ;;  %v21528_v42 = vpop.eup %19475  ;;  %19483 = vpow2.f32 %v5908_v17 }
 0x537   : > { %v5980_v55 = vsel %vm2488_vm3, %v21528_v42, 0.0  ;;  %19485 = vpow2.f32 %v5906_v26 }
 0x538   : > { %5990 = vadd.xlane.f32.xlu1 %v5989_v30  ;;  %5969 = vadd.xlane.f32.xlu0 %v5968_v25  ;;  %v23770_v30 = vld [vmem:[#allocation12_spill] sm:$0xff] }
 0x539   : > { %v21560_v18 = vpop.permute.xlu0 %18948 }
 0x53c   : > { %5996 = vadd.xlane.f32.xlu1 %v5995_v20  ;;  %5975 = vadd.xlane.f32.xlu0 %v5974_v33 }
 0x53d   : > { %v21530_v19 = vpop.eup %19477  ;;  %v21566_v25 = vpop.permute.xlu0 %18953 }
 0x53e   : > { %v6007_v53 = vsel %vm2488_vm3, %v21530_v19, 0.0  ;;  %v21536_v54 = vpop.eup %19479 }
 0x53f   : > { %v5986_v57 = vsel %vm2488_vm3, %v21536_v54, 0.0  ;;  %v21540_v35 = vpop.eup %19481 }
 0x540   : > { %6008 = vadd.xlane.f32.xlu1 %v6007_v53  ;;  %5981 = vadd.xlane.f32.xlu0 %v5980_v55  ;;  %v5992_v0 = vsel %vm2488_vm3, %v21540_v35, 0.0  ;;  %v21544_v61 = vpop.eup %19483  ;;  %v23771_v55 = vld [vmem:[#allocation41_spill] sm:$0xff] }
 0x541   : > { %v6001_v11 = vsel %vm2488_vm3, %v21544_v61, 0.0  ;;  %v21548_v56 = vpop.eup %19485  ;;  %v21570_v17 = vpop.permute.xlu0 %18958 }
 0x542   : > { %v5998_v49 = vsel %vm2488_vm3, %v21548_v56, 0.0 }
 0x544   : > { %5987 = vadd.xlane.f32.xlu0 %v5986_v57 }
 0x548   : > { %5993 = vadd.xlane.f32.xlu0 %v5992_v0 }
 0x54c   : > { %6002 = vadd.xlane.f32.xlu0 %v6001_v11  ;;  %v23772_v11 = vld [vmem:[#allocation5_spill] sm:$0xff] }
 0x550   : > { %5999 = vadd.xlane.f32.xlu0 %v5998_v49  ;;  %v23773_v49 = vld [vmem:[#allocation39_spill] sm:$0xff] }
 0x551   : > { %18973 = vrot.lane.b32.xlu1 %v23702_v10, %s19819_s25 }
 0x555   : > { %8232 = vrot.lane.b32.xlu1 %v23768_v31, %s19820_s11 }
 0x559   : > { %18993 = vrot.lane.b32.xlu1 %v23709_v15, %s19820_s11 }
 0x55d   : > { %8325 = vrot.lane.b32.xlu1 %v23769_v22, %s19820_s11 }
 0x561   : > { %8414 = vrot.lane.b32.xlu1 %v23770_v30, %s19820_s11 }
 0x565   : > { %19003 = vrot.lane.b32.xlu1 %v23711_v63, %s19820_s11 }
 0x569   : > { %8507 = vrot.lane.b32.xlu1 %v20181_v16, %s19820_s11 }
 0x56c   : > { %v5814_v24 = vpop.xlane.xlu0 %5813 }
 0x56d   : > { %v5848_v20 = vsub.f32 %v21364_v21, %v5814_v24  ;;  %8596 = vrot.lane.b32.xlu1 %v20168_v6, %s19820_s11  ;;  %v21597_v21 = vpop.permute.xlu1 %18938 }
 0x56f   : > { %v5910_v33 = vmul.f32 1.442695, %v5848_v20 }
 0x571   : > { %19487 = vpow2.f32 %v5910_v33  ;;  %19013 = vrot.lane.b32.xlu1 %v20218_v38, %s19820_s11  ;;  %v23774_v33 = vld [vmem:[#allocation8_spill] sm:$0xff] }
 0x575   : > { %8689 = vrot.lane.b32.xlu1 %v20225_v45, %s19820_s11 }
 0x579   : > { %8778 = vrot.lane.b32.xlu1 %v20212_v34, %s19820_s11 }
 0x57b   : > { %v21583_v26 = vpop.eup %19487 }
 0x57c   : > { %v6004_v53 = vsel %vm2488_vm3, %v21583_v26, 0.0 }
 0x57d   : > { %19023 = vrot.lane.b32.xlu1 %v20262_v1, %s19820_s11  ;;  %6005 = vadd.xlane.f32.xlu0 %v6004_v53  ;;  %v21611_v53 = vpop.permute.xlu0 %18963 }
 0x581   : > { %8871 = vrot.lane.b32.xlu1 %v20269_v8, %s19820_s11  ;;  %v23777_v8 = vld [vmem:[#allocation2_spill] sm:$0xff] }
 0x585   : > { %8960 = vrot.lane.b32.xlu1 %v23678_v3, %s19820_s11  ;;  %v23776_v3 = vld [vmem:[#allocation3_spill] sm:$0xff] }
 0x589   : > { %19033 = vrot.lane.b32.xlu1 %v23683_v27, %s19820_s11 }
 0x58d   : > { %9053 = vrot.lane.b32.xlu1 %v23685_v44, %s19820_s11 }
 0x591   : > { %9142 = vrot.lane.b32.xlu1 %v23688_v2, %s19820_s11  ;;  %v23775_v2 = vld [vmem:[#allocation40_spill] sm:$0xff] }
 0x593   : > { %18968 = vrot.lane.b32.xlu0 %v23692_v36, %s19819_s25 }
 0x595   : > { %19043 = vrot.lane.b32.xlu1 %v23771_v55, %s19820_s11  ;;  %v5925_v57 = vpop.xlane.xlu1 %5924 }
 0x596   : > { %v6013_v0 = vadd.f32 1.0, %v5925_v57 }
 0x597   : > { %18978 = vrot.lane.b32.xlu0 %v23772_v11, %s19820_s11 }
 0x598   : > { %19489 = vrcp.f32 %v6013_v0 }
 0x599   : > { %9235 = vrot.lane.b32.xlu1 %v23773_v49, %s19820_s11  ;;  %v5922_v24 = vpop.xlane.xlu1 %5921 }
 0x59a   : > { %v6012_v20 = vadd.f32 1.0, %v5922_v24 }
 0x59b   : > { %18983 = vrot.lane.b32.xlu0 %v23774_v33, %s19820_s11 }
 0x59c   : > { %19491 = vrcp.f32 %v6012_v20 }
 0x59d   : > { %9324 = vrot.lane.b32.xlu1 %v23775_v2, %s19820_s11  ;;  %v5937_v44 = vpop.xlane.xlu1 %5936  ;;  %v23778_v2 = vld [vmem:[#allocation42_spill] sm:$0xff] }
 0x59e   : > { %v6017_v57 = vadd.f32 1.0, %v5937_v44 }
 0x59f   : > { %8141 = vrot.lane.b32.xlu0 %v23776_v3, %s19820_s11  ;;  %v23779_v3 = vld [vmem:[#allocation80_spill] sm:$0xff] }
 0x5a0   : > { %19493 = vrcp.f32 %v6017_v57  ;;  %v18926_v16 = vunpack.i.h.bf16 %v23779_v3 }
 0x5a1   : > { %19053 = vrot.lane.b32.xlu1 %v23702_v10, %s19820_s11  ;;  %v5934_v49 = vpop.xlane.xlu1 %5933  ;;  %v5919_v24 = vpop.xlane.xlu0 %5918  ;;  %v18925_v10 = vunpack.i.l.bf16 %v23779_v3  ;;  %v23782_v3 = vld [vmem:[#allocation62_spill] sm:$0xff] }
 0x5a2   : > { %v6016_v0 = vadd.f32 1.0, %v5934_v49  ;;  %v6011_v20 = vadd.f32 1.0, %v5919_v24  ;;  %v19490_v34 = vpop.eup %19489  ;;  %v23780_v49 = vld [vmem:[#allocation10_spill] sm:$0xff] }
 0x5a3   : > { %8143 = vrot.lane.b32.xlu0 %v23777_v8, %s19820_s11  ;;  %v6049_v24 = vmul.f32 %v19490_v34, %v21405_v62 }
 0x5a4   : > { %19495 = vrcp.f32 %v6016_v0  ;;  %v23781_v0 = vld [vmem:[#allocation46_spill] sm:$0xff] }
 0x5a5   : > { %9417 = vrot.lane.b32.xlu1 %v23778_v2, %s19820_s11  ;;  %v5949_v44 = vpop.xlane.xlu1 %5948  ;;  %v5916_v45 = vpop.xlane.xlu0 %5915  ;;  %19497 = vrcp.f32 %v6011_v20  ;;  %v23784_v20 = vld [vmem:[#allocation82_spill] sm:$0xff] }
 0x5a6   : > { %v19492_v6 = vpop.eup %19491  ;;  %v6010_v30 = vadd.f32 1.0, %v5916_v45  ;;  %v6021_v22 = vadd.f32 1.0, %v5949_v44  ;;  %v18260_v45 = vpack.c.bf16 %v18926_v16, %v18925_v10  ;;  %v18936_v44 = vunpack.i.h.bf16 %v23784_v20 }
 0x5a7   : > { %18988 = vrot.lane.b32.xlu0 %v23780_v49, %s19820_s11  ;;  %v6047_v57 = vmul.f32 %v19492_v6, %v21410_v39  ;;  %v23783_v6 = vld [vmem:[#allocation6_spill] sm:$0xff]  ;;  %v18935_v16 = vunpack.i.l.bf16 %v23784_v20 }
 0x5a8   : > { %19499 = vrcp.f32 %v6010_v30 }
 0x5a9   : > { %9508 = vrot.lane.b32.xlu1 %v23781_v0, %s19820_s11  ;;  %17219 = vmatprep.mubr.msk.f32.mxu1 %vm2488_vm3, %v6047_v57  ;;  %v5946_v2 = vpop.xlane.xlu1 %5945  ;;  %v5931_v31 = vpop.xlane.xlu0 %5930  ;;  %19501 = vrcp.f32 %v6021_v22  ;;  %v23785_v57 = vld [vmem:[#allocation9_spill] sm:$0xff] }
 0x5aa   : > { %v6020_v8 = vadd.f32 1.0, %v5946_v2  ;;  %17220 = vmatmul.mubr.msk.f32.vlgmr.msra.gmra.mrb[80].mxu1 %vm2488_vm3, %v6049_v24  ;;  %v6015_v34 = vadd.f32 1.0, %v5931_v31  ;;  %v19494_v62 = vpop.eup %19493 }
 0x5ab   : > { %18255 = vmatpush3.bf16.msra.mxu1 %v23782_v3  ;;  %8234 = vrot.lane.b32.xlu0 %v23783_v6, %s19820_s11  ;;  %v6057_v31 = vmul.f32 %v19494_v62, %v21416_v59  ;;  %v23787_v59 = vld [vmem:[#allocation15_spill] sm:$0xff] }
 0x5ac   : > { %19503 = vrcp.f32 %v6020_v8  ;;  %18261 = vmatprep.subr.bf16.mxu1 %v18260_v45 }
 0x5ad   : > { %19063 = vrot.lane.b32.xlu1 %v23774_v33, %s19821_s12  ;;  %v5961_v39 = vpop.xlane.xlu1 %5960  ;;  %v5928_v30 = vpop.xlane.xlu0 %5927  ;;  %19505 = vrcp.f32 %v6015_v34 }
 0x5ae   : > { %v19496_v2 = vpop.eup %19495  ;;  %v6014_v10 = vadd.f32 1.0, %v5928_v30  ;;  %v6025_v22 = vadd.f32 1.0, %v5961_v39  ;;  %v18268_v39 = vpack.c.bf16 %v18936_v44, %v18935_v16 }
 0x5af   : > { %8323 = vrot.lane.b32.xlu0 %v23785_v57, %s19820_s11  ;;  %v6055_v8 = vmul.f32 %v19496_v2, %v21424_v23  ;;  %v19498_v0 = vpop.eup %19497  ;;  %v23786_v57 = vld [vmem:[#allocation81_spill] sm:$0xff] }
 0x5b0   : > { %19507 = vrcp.f32 %v6014_v10  ;;  %v18921_v6 = vunpack.i.h.bf16 %v23786_v57  ;;  %v18920_v23 = vunpack.i.l.bf16 %v23786_v57  ;;  %v23788_v10 = vld [vmem:[#allocation21_spill] sm:$0xff]  ;;  %v18945_v57 = vunpack.i.l.bf16 %v21556_v60 }
 0x5b1   : > { %19073 = vrot.lane.b32.xlu1 %v23709_v15, %s19821_s12  ;;  %17233 = vmatprep.mubr.msk.f32.mxu1 %vm2488_vm3, %v6055_v8  ;;  %v5958_v24 = vpop.xlane.xlu1 %5957  ;;  %v5943_v3 = vpop.xlane.xlu0 %5942  ;;  %19509 = vrcp.f32 %v6025_v22  ;;  %v6045_v8 = vmul.f32 %v19498_v0, %v21419_v12  ;;  %v18946_v22 = vunpack.i.h.bf16 %v21556_v60  ;;  %v23791_v12 = vld [vmem:[#allocation26_spill] sm:$0xff]  ;;  %v18956_v15 = vunpack.i.h.bf16 %v21566_v25 }
 0x5b2   : > { %v6024_v20 = vadd.f32 1.0, %v5958_v24  ;;  %17234 = vmatmul.mubr.msk.f32.vlgmr.msra.gmra.mrb[82].mxu1 %vm2488_vm3, %v6057_v31  ;;  %v19500_v30 = vpop.eup %19499  ;;  %v6019_v34 = vadd.f32 1.0, %v5943_v3  ;;  %v18256_v24 = vpack.c.bf16 %v18921_v6, %v18920_v23  ;;  %v23793_v23 = vld [vmem:[#allocation14_spill] sm:$0xff] }
 0x5b3   : > { %18263 = vmatpush3.bf16.msra.mxu1 %v18260_v45  ;;  %18998 = vrot.lane.b32.xlu0 %v23787_v59, %s19820_s11  ;;  %v6043_v62 = vmul.f32 %v19500_v30, %v21427_v43  ;;  %v19502_v2 = vpop.eup %19501  ;;  %v23789_v43 = vld [vmem:[#allocation16_spill] sm:$0xff] }
 0x5b4   : > { %19511 = vrcp.f32 %v6024_v20  ;;  %18269 = vmatprep.subr.bf16.mxu1 %v18268_v39  ;;  %v23790_v20 = vld [vmem:[#allocation55_spill] sm:$0xff]  ;;  %v6065_v60 = vmul.f32 %v19502_v2, %v21434_v50 }
 0x5b5   : > { %19088 = vrot.lane.b32.xlu1 %v23788_v10, %s19821_s12  ;;  %v5967_v44 = vpop.xlane.xlu1 %5966  ;;  %v5940_v16 = vpop.xlane.xlu0 %5939  ;;  %17212 = vmatprep.mubr.msk.f32.mxu0 %vm2488_vm3, %v6043_v62  ;;  %19513 = vrcp.f32 %v6019_v34  ;;  %v18276_v34 = vpack.c.bf16 %v18946_v22, %v18945_v57 }
 0x5b6   : > { %v19504_v31 = vpop.eup %19503  ;;  %v6018_v45 = vadd.f32 1.0, %v5940_v16  ;;  %17213 = vmatmul.mubr.msk.f32.vlgmr.msra.gmra.mrb[80].mxu0 %vm2488_vm3, %v6045_v8  ;;  %v23792_v8 = vld [vmem:[#allocation83_spill] sm:$0xff]  ;;  %v6027_v22 = vadd.f32 1.0, %v5967_v44  ;;  %v18940_v44 = vunpack.i.l.bf16 %v21597_v21 }
 0x5b7   : > { %8416 = vrot.lane.b32.xlu0 %v23789_v43, %s19820_s11  ;;  %v6063_v3 = vmul.f32 %v19504_v31, %v21444_v7  ;;  %18251 = vmatpush3.bf16.msra.mxu0 %v23790_v20  ;;  %v19506_v62 = vpop.eup %19505  ;;  %v18931_v6 = vunpack.i.h.bf16 %v23792_v8  ;;  %v18930_v7 = vunpack.i.l.bf16 %v23792_v8  ;;  %v18955_v8 = vunpack.i.l.bf16 %v21566_v25 }
 0x5b8   : > { %19515 = vrcp.f32 %v6018_v45  ;;  %18257 = vmatprep.subr.bf16.mxu0 %v18256_v24 }
 0x5b9   : > { %19098 = vrot.lane.b32.xlu1 %v23791_v12, %s19821_s12  ;;  %v5973_v0 = vpop.xlane.xlu1 %5972  ;;  %v5955_v30 = vpop.xlane.xlu0 %5954  ;;  %17247 = vmatprep.mubr.msk.f32.mxu1 %vm2488_vm3, %v6063_v3  ;;  %v6053_v3 = vmul.f32 %v19506_v62, %v21437_v4 }
 0x5ba   : > { %v19508_v16 = vpop.eup %19507  ;;  %17248 = vmatmul.mubr.msk.f32.vlgmr.msra.gmra.mrb[84].mxu1 %vm2488_vm3, %v6065_v60  ;;  %v6023_v31 = vadd.f32 1.0, %v5955_v30 }
 0x5bb   : > { %8505 = vrot.lane.b32.xlu0 %v23793_v23, %s19820_s11  ;;  %18271 = vmatpush3.bf16.msra.mxu1 %v18268_v39  ;;  %v6051_v45 = vmul.f32 %v19508_v16, %v21447_v13  ;;  %v19510_v20 = vpop.eup %19509  ;;  %v18264_v13 = vpack.c.bf16 %v18931_v6, %v18930_v7  ;;  %v21685_v16 = vpack.c.bf16 %v18956_v15, %v18955_v8  ;;  %v18950_v8 = vunpack.i.l.bf16 %v21560_v18 }
 0x5bc   : > { %18277 = vmatprep.subr.bf16.mxu1 %v18276_v34  ;;  %19517 = vrcp.f32 %v6023_v31  ;;  %v6073_v4 = vmul.f32 %v19510_v20, %v21454_v52  ;;  %v23794_v52 = vld [vmem:[#allocation22_spill] sm:$0xff] }
 0x5bd   : > { %v5979_v50 = vpop.xlane.xlu1 %5978  ;;  %v5952_v2 = vpop.xlane.xlu0 %5951  ;;  %17226 = vmatprep.mubr.msk.f32.mxu0 %vm2488_vm3, %v6051_v45 }
 0x5be   : > { %v19512_v43 = vpop.eup %19511  ;;  %v6022_v60 = vadd.f32 1.0, %v5952_v2  ;;  %17227 = vmatmul.mubr.msk.f32.vlgmr.msra.gmra.mrb[82].mxu0 %vm2488_vm3, %v6053_v3 }
 0x5bf   : > { %19008 = vrot.lane.b32.xlu0 %v23788_v10, %s19820_s11  ;;  %v6071_v39 = vmul.f32 %v19512_v43, %v21464_v40  ;;  %18259 = vmatpush3.bf16.msra.mxu0 %v18256_v24  ;;  %v19514_v30 = vpop.eup %19513  ;;  %v18941_v40 = vunpack.i.h.bf16 %v21597_v21  ;;  %v6029_v43 = vadd.f32 1.0, %v5973_v0  ;;  %v23795_v21 = vld [vmem:[#allocation20_spill] sm:$0xff]  ;;  %v6031_v0 = vadd.f32 1.0, %v5979_v50 }
 0x5c0   : > { %19519 = vrcp.f32 %v6022_v60  ;;  %18265 = vmatprep.subr.bf16.mxu0 %v18264_v13  ;;  %v6061_v15 = vmul.f32 %v19514_v30, %v21457_v41  ;;  %v18951_v41 = vunpack.i.h.bf16 %v21560_v18  ;;  %v18960_v30 = vunpack.i.l.bf16 %v21570_v17 }
 0x5c1   : > { %17261 = vmatprep.mubr.msk.f32.mxu1 %vm2488_vm3, %v6071_v39  ;;  %v5985_v25 = vpop.xlane.xlu1 %5984  ;;  %v5964_v57 = vpop.xlane.xlu0 %5963  ;;  %19521 = vrcp.f32 %v6027_v22 }
 0x5c2   : > { %v6026_v62 = vadd.f32 1.0, %v5964_v57  ;;  %17262 = vmatmul.mubr.msk.f32.vlgmr.msra.gmra.mrb[86].mxu1 %vm2488_vm3, %v6073_v4  ;;  %v19516_v6 = vpop.eup %19515  ;;  %v6033_v60 = vadd.f32 1.0, %v5985_v25  ;;  %v18961_v57 = vunpack.i.h.bf16 %v21570_v17  ;;  %v23796_v25 = vld [vmem:[#allocation27_spill] sm:$0xff] }
 0x5c3   : > { %18279 = vmatpush3.bf16.msra.mxu1 %v18276_v34  ;;  %8598 = vrot.lane.b32.xlu0 %v23794_v52, %s19820_s11  ;;  %v6059_v24 = vmul.f32 %v19516_v6, %v21467_v29  ;;  %v18272_v34 = vpack.c.bf16 %v18941_v40, %v18940_v44 }
 0x5c4   : > { %18285 = vmatprep.subr.bf16.mxu1 %v21685_v16  ;;  %19523 = vrcp.f32 %v6026_v62 }
 0x5c5   : > { %v5970_v7 = vpop.xlane.xlu0 %5969  ;;  %v5991_v31 = vpop.xlane.xlu1 %5990  ;;  %17240 = vmatprep.mubr.msk.f32.mxu0 %vm2488_vm3, %v6059_v24  ;;  %19525 = vrcp.f32 %v6029_v43 }
 0x5c6   : > { %v6028_v45 = vadd.f32 1.0, %v5970_v7  ;;  %17241 = vmatmul.mubr.msk.f32.vlgmr.msra.gmra.mrb[84].mxu0 %vm2488_vm3, %v6061_v15  ;;  %v19518_v20 = vpop.eup %19517  ;;  %v6035_v6 = vadd.f32 1.0, %v5991_v31  ;;  %v18288_v7 = vpack.c.bf16 %v18961_v57, %v18960_v30  ;;  %v18966_v31 = vunpack.i.h.bf16 %v21611_v53 }
 0x5c7   : > { %8687 = vrot.lane.b32.xlu0 %v23795_v21, %s19820_s11  ;;  %18267 = vmatpush3.bf16.msra.mxu0 %v18264_v13  ;;  %v6069_v13 = vmul.f32 %v19518_v20, %v21477_v37 }
 0x5c8   : > { %19527 = vrcp.f32 %v6028_v45  ;;  %18273 = vmatprep.subr.bf16.mxu0 %v18272_v34  ;;  %v18965_v45 = vunpack.i.l.bf16 %v21611_v53 }
 0x5c9   : > { %v5976_v29 = vpop.xlane.xlu0 %5975  ;;  %19529 = vrcp.f32 %v6031_v0  ;;  %v5997_v39 = vpop.xlane.xlu1 %5996 }
 0x5ca   : > { %v6030_v2 = vadd.f32 1.0, %v5976_v29  ;;  %v19520_v3 = vpop.eup %19519 }
 0x5cb   : > { %19018 = vrot.lane.b32.xlu0 %v23791_v12, %s19820_s11  ;;  %v6067_v22 = vmul.f32 %v19520_v3, %v21487_v48  ;;  %v19522_v4 = vpop.eup %19521  ;;  %v18280_v48 = vpack.c.bf16 %v18951_v41, %v18950_v8  ;;  %v23798_v3 = vld [vmem:[#allocation31_spill] sm:$0xff]  ;;  %v18292_v41 = vpack.c.bf16 %v18966_v31, %v18965_v45 }
 0x5cc   : > { %19531 = vrcp.f32 %v6030_v2  ;;  %v6077_v17 = vmul.f32 %v19522_v4, %v21474_v9  ;;  %v23799_v4 = vld [vmem:[#allocation32_spill] sm:$0xff]  ;;  %v23806_v31 = vld [vmem:[#allocation47_spill] sm:$0xff] }
 0x5cd   : > { %v5982_v50 = vpop.xlane.xlu0 %5981  ;;  %17254 = vmatprep.mubr.msk.f32.mxu0 %vm2488_vm3, %v6067_v22  ;;  %19533 = vrcp.f32 %v6033_v60  ;;  %v21712_v43 = vpop.xlane.xlu1 %6008 }
 0x5ce   : > { %v6032_v18 = vadd.f32 1.0, %v5982_v50  ;;  %v19524_v62 = vpop.eup %19523  ;;  %17255 = vmatmul.mubr.msk.f32.vlgmr.msra.gmra.mrb[86].mxu0 %vm2488_vm3, %v6069_v13  ;;  %v6041_v45 = vadd.f32 1.0, %v21712_v43 }
 0x5cf   : > { %8780 = vrot.lane.b32.xlu0 %v23796_v25, %s19820_s11  ;;  %18275 = vmatpush3.bf16.msra.mxu0 %v18272_v34  ;;  %v6075_v37 = vmul.f32 %v19524_v62, %v21496_v5  ;;  %v19526_v44 = vpop.eup %19525  ;;  %v6037_v34 = vadd.f32 1.0, %v5997_v39  ;;  %v23797_v5 = vld [vmem:[#allocation25_spill] sm:$0xff]  ;;  %v23800_v62 = vld [vmem:[#allocation30_spill] sm:$0xff] }
 0x5d0   : > { %19535 = vrcp.f32 %v6032_v18  ;;  %18281 = vmatprep.subr.bf16.mxu0 %v18280_v48  ;;  %v6081_v29 = vmul.f32 %v19526_v44, %v21484_v46 }
 0x5d1   : > { %v5988_v40 = vpop.xlane.xlu0 %5987  ;;  %17268 = vmatprep.mubr.msk.f32.mxu0 %vm2488_vm3, %v6075_v37  ;;  %19537 = vrcp.f32 %v6035_v6  ;;  %v18974_v8 = vpop.permute.xlu1 %18973 }
 0x5d2   : > { %v6034_v24 = vadd.f32 1.0, %v5988_v40  ;;  %v19528_v15 = vpop.eup %19527  ;;  %17269 = vmatmul.mubr.msk.f32.vlgmr.msra.gmra.mrb[88].mxu0 %vm2488_vm3, %v6077_v17  ;;  %v18976_v50 = vunpack.i.h.bf16 %v18974_v8  ;;  %v18975_v13 = vunpack.i.l.bf16 %v18974_v8  ;;  %v23801_v40 = vld [vmem:[#allocation37_spill] sm:$0xff] }
 0x5d3   : > { %8869 = vrot.lane.b32.xlu0 %v23797_v5, %s19820_s11  ;;  %18283 = vmatpush3.bf16.msra.mxu0 %v18280_v48  ;;  %v6079_v9 = vmul.f32 %v19528_v15, %v21506_v14  ;;  %v19530_v20 = vpop.eup %19529  ;;  %v23805_v15 = vld [vmem:[#allocation44_spill] sm:$0xff] }
 0x5d4   : > { %19539 = vrcp.f32 %v6034_v24  ;;  %18289 = vmatprep.subr.bf16.mxu0 %v18288_v7  ;;  %v6085_v60 = vmul.f32 %v19530_v20, %v21493_v32  ;;  %v18300_v6 = vpack.c.bf16 %v18976_v50, %v18975_v13 }
 0x5d5   : > { %v5994_v0 = vpop.xlane.xlu0 %5993  ;;  %17275 = vmatprep.mubr.msk.f32.mxu1 %vm2488_vm3, %v6079_v9  ;;  %19541 = vrcp.f32 %v6037_v34 }
 0x5d6   : > { %v6036_v2 = vadd.f32 1.0, %v5994_v0  ;;  %v19532_v53 = vpop.eup %19531  ;;  %17276 = vmatmul.mubr.msk.f32.vlgmr.msra.gmra.mrb[88].mxu1 %vm2488_vm3, %v6081_v29 }
 0x5d7   : > { %19028 = vrot.lane.b32.xlu0 %v23798_v3, %s19820_s11  ;;  %18287 = vmatpush3.bf16.msra.mxu1 %v21685_v16  ;;  %v6083_v14 = vmul.f32 %v19532_v53, %v21515_v47  ;;  %v19534_v39 = vpop.eup %19533 }
 0x5d8   : > { %19543 = vrcp.f32 %v6036_v2  ;;  %18293 = vmatprep.subr.bf16.mxu1 %v18292_v41  ;;  %v6089_v30 = vmul.f32 %v19534_v39, %v21503_v28 }
 0x5d9   : > { %v6003_v46 = vpop.xlane.xlu0 %6002  ;;  %17282 = vmatprep.mubr.msk.f32.mxu0 %vm2488_vm3, %v6083_v14 }
 0x5da   : > { %v19536_v22 = vpop.eup %19535  ;;  %17283 = vmatmul.mubr.msk.f32.vlgmr.msra.gmra.mrb[90].mxu0 %vm2488_vm3, %v6085_v60 }
 0x5db   : > { %8962 = vrot.lane.b32.xlu0 %v23799_v4, %s19820_s11  ;;  %18291 = vmatpush3.bf16.msra.mxu0 %v18288_v7  ;;  %v6087_v16 = vmul.f32 %v19536_v22, %v21528_v42  ;;  %v19538_v57 = vpop.eup %19537  ;;  %v23803_v7 = vld [vmem:[#allocation36_spill] sm:$0xff] }
 0x5dc   : > { %v6093_v42 = vmul.f32 %v19538_v57, %v21512_v58  ;;  %v7498_v58 = vld [vmem:[%s23470_s7 + $0x8] sm:$0xff] }
 0x5dd   : > { %v6000_v47 = vpop.xlane.xlu0 %5999  ;;  %17289 = vmatprep.mubr.msk.f32.mxu1 %vm2488_vm3, %v6087_v16 }
 0x5de   : > { %v19540_v18 = vpop.eup %19539  ;;  %v6038_v32 = vadd.f32 1.0, %v6000_v47  ;;  %17290 = vmatmul.mubr.msk.f32.vlgmr.msra.gmra.mrb[90].mxu1 %vm2488_vm3, %v6089_v30 }
 0x5df   : > { %9051 = vrot.lane.b32.xlu0 %v23800_v62, %s19820_s11  ;;  %v6091_v48 = vmul.f32 %v19540_v18, %v21536_v54  ;;  %18295 = vmatpush3.bf16.msra.mxu1 %v18292_v41  ;;  %v19542_v37 = vpop.eup %19541  ;;  %v23802_v54 = vld [vmem:[#allocation38_spill] sm:$0xff] }
 0x5e0   : > { %19545 = vrcp.f32 %v6038_v32  ;;  %18301 = vmatprep.subr.bf16.mxu1 %v18300_v6  ;;  %v6097_v44 = vmul.f32 %v19542_v37, %v21521_v51  ;;  %v23804_v51 = vld [vmem:[#allocation43_spill] sm:$0xff] }
 0x5e1   : > { %17296 = vmatprep.mubr.msk.f32.mxu0 %vm2488_vm3, %v6091_v48 }
 0x5e2   : > { %v19544_v28 = vpop.eup %19543  ;;  %17297 = vmatmul.mubr.msk.f32.vlgmr.msra.gmra.mrb[92].mxu0 %vm2488_vm3, %v6093_v42 }
 0x5e3   : > { %19038 = vrot.lane.b32.xlu0 %v23801_v40, %s19820_s11  ;;  %v6095_v17 = vmul.f32 %v19544_v28, %v21540_v35 }
 0x5e5   : > { %17303 = vmatprep.mubr.msk.f32.mxu1 %vm2488_vm3, %v6095_v17 }
 0x5e6   : > { %17304 = vmatmul.mubr.msk.f32.vlgmr.msra.gmra.mrb[92].mxu1 %vm2488_vm3, %v6097_v44 }
 0x5e7   : > { %18303 = vmatpush3.bf16.msra.mxu1 %v18300_v6  ;;  %9144 = vrot.lane.b32.xlu0 %v23802_v54, %s19820_s11 }
 0x5e8   : > { %18624 = vmatprep.subr.mxu1 %v7498_v58 }
 0x5ea   : > { %v19546_v24 = vpop.eup %19545 }
 0x5eb   : > { %9233 = vrot.lane.b32.xlu0 %v23803_v7, %s19820_s11  ;;  %v6099_v35 = vmul.f32 %v19546_v24, %v21548_v56  ;;  %v6039_v56 = vadd.f32 1.0, %v6003_v46  ;;  %v4265_v46 = vld [vmem:[%s23470_s7] sm:$0xff] }
 0x5ed   : > { %17310 = vmatprep.mubr.msk.f32.mxu0 %vm2488_vm3, %v6099_v35  ;;  %19547 = vrcp.f32 %v6039_v56 }
 0x5ee   : > { %19549 = vrcp.f32 %v6041_v45 }
 0x5ef   : > { %19048 = vrot.lane.b32.xlu0 %v23692_v36, %s19820_s11 }
 0x5f3   : > { %9326 = vrot.lane.b32.xlu0 %v23804_v51, %s19820_s11 }
 0x5f7   : > { %9415 = vrot.lane.b32.xlu0 %v23805_v15, %s19820_s11  ;;  %v19548_v53 = vpop.eup %19547 }
 0x5f8   : > { %v6101_v43 = vmul.f32 %v19548_v53, %v21544_v61  ;;  %v19550_v8 = vpop.eup %19549 }
 0x5f9   : > { %v6105_v61 = vmul.f32 %v19550_v8, %v21530_v19 }
 0x5fb   : > { %9506 = vrot.lane.b32.xlu0 %v23806_v31, %s19820_s11 }
 0x5ff   : > { %19058 = vrot.lane.b32.xlu0 %v23772_v11, %s19821_s12 }
 0x603   : > { %19068 = vrot.lane.b32.xlu0 %v23780_v49, %s19821_s12 }
 0x607   : > { %19078 = vrot.lane.b32.xlu0 %v23787_v59, %s19821_s12 }
 0x60a   : > { %v6006_v34 = vpop.xlane.xlu0 %6005 }
 0x60b   : > { %v6040_v9 = vadd.f32 1.0, %v6006_v34  ;;  %19083 = vrot.lane.b32.xlu0 %v23711_v63, %s19821_s12 }
 0x60d   : > { %19551 = vrcp.f32 %v6040_v9 }
 0x60e   : > { %v18969_v0 = vpop.permute.xlu0 %18968 }
 0x60f   : > { %v18971_v29 = vunpack.i.h.bf16 %v18969_v0  ;;  %v18970_v20 = vunpack.i.l.bf16 %v18969_v0  ;;  %19093 = vrot.lane.b32.xlu0 %v20218_v38, %s19821_s12 }
 0x611   : > { %v18296_v2 = vpack.c.bf16 %v18971_v29, %v18970_v20 }
 0x612   : > { %v18979_v41 = vpop.permute.xlu0 %18978 }
 0x613   : > { %19103 = vrot.lane.b32.xlu0 %v20262_v1, %s19821_s12  ;;  %18297 = vmatprep.subr.bf16.mxu0 %v18296_v2  ;;  %v18981_v39 = vunpack.i.h.bf16 %v18979_v41  ;;  %v18980_v22 = vunpack.i.l.bf16 %v18979_v41 }
 0x614   : > { %18299 = vmatpush3.bf16.msra.mxu0 %v18296_v2 }
 0x615   : > { %17320 = vmatprep.subr.mxu0 %v7498_v58  ;;  %v18304_v16 = vpack.c.bf16 %v18981_v39, %v18980_v22 }
 0x616   : > { %v21780_v14 = vpop.permute.xlu0 %18983 }
 0x617   : > { %v19552_v60 = vpop.eup %19551  ;;  %19108 = vrot.lane.b32.xlu0 %v23798_v3, %s19821_s12  ;;  %17311 = vmatmul.mubr.msk.f32.vlgmr.msra.gmra.mrb[94].mxu0 %vm2488_vm3, %v6101_v43  ;;  %v18986_v21 = vunpack.i.h.bf16 %v21780_v14 }
 0x618   : > { %v6103_v50 = vmul.f32 %v19552_v60, %v21583_v26  ;;  %17321 = vmatpush3.msra.mxu0 %v7498_v58 }
 0x619   : > { %17370 = vmatprep.subr.mxu0 %v4265_v46 }
 0x61a   : > { %v21790_v13 = vpop.permute.xlu0 %8141  ;;  %17317 = vmatprep.mubr.msk.f32.mxu1 %vm2488_vm3, %v6103_v50 }
 0x61b   : > { %17318 = vmatmul.mubr.msk.f32.vlgmr.msra.gmra.mrb[94].mxu1 %vm2488_vm3, %v6105_v61 }
 0x61c   : > { %18625 = vmatpush3.msra.mxu1 %v7498_v58 }
 0x61d   : > { %18306 = vmatprep.subr.msk.bf16.mxu1 %vm20068_vm2, %v18304_v16 }
 0x61e   : > { %v21796_v47 = vpop.permute.xlu0 %8143 }
 0x622   : > { %v21798_v30 = vpop.permute.xlu0 %18988 }
 0x626   : > { %v21800_v26 = vpop.permute.xlu0 %8234 }
 0x62a   : > { %v21802_v18 = vpop.permute.xlu0 %8323 }
 0x62e   : > { %v21804_v19 = vpop.permute.xlu0 %18998 }
 0x632   : > { %v21806_v32 = vpop.permute.xlu0 %8416 }
 0x636   : > { %v21808_v6 = vpop.permute.xlu0 %8505 }
 0x63a   : > { %v21810_v48 = vpop.permute.xlu0 %19008 }
 0x63e   : > { %v21812_v42 = vpop.permute.xlu0 %8598 }
 0x642   : > { %v21814_v37 = vpop.permute.xlu0 %8687 }
 0x646   : > { %v21816_v28 = vpop.permute.xlu0 %19018 }
 0x64a   : > { %v21818_v17 = vpop.permute.xlu0 %8780 }
 0x64e   : > { %v21820_v44 = vpop.permute.xlu0 %8869 }
 0x652   : > { %v21822_v58 = vpop.permute.xlu0 %19028 }
 0x656   : > { %v21824_v24 = vpop.permute.xlu0 %8962 }
 0x65a   : > { %v21826_v35 = vpop.permute.xlu0 %9051 }
 0x65e   : > { %v21828_v56 = vpop.permute.xlu0 %19038 }
 0x662   : > { %v21830_v45 = vpop.permute.xlu0 %9144 }
 0x666   : > { %v21832_v34 = vpop.permute.xlu0 %9233 }
 0x66a   : > { %v21834_v9 = vpop.permute.xlu0 %19048 }
 0x66e   : > { %v21836_v0 = vpop.permute.xlu0 %9326 }
 0x672   : > { %v21838_v29 = vpop.permute.xlu0 %9415 }
 0x676   : > { %v21840_v53 = vpop.permute.xlu0 %9506 }
 0x67a   : > { %v19059_v43 = vpop.permute.xlu0 %19058 }
 0x67b   : > { %v19061_v60 = vunpack.i.h.bf16 %v19059_v43  ;;  %v19060_v39 = vunpack.i.l.bf16 %v19059_v43  ;;  %v18985_v43 = vunpack.i.l.bf16 %v21780_v14 }
 0x67d   : > { %v17221_v20 = vpop.f32.mrb[80].mxu1  ;;  %v18400_v61 = vpack.c.bf16 %v19061_v60, %v19060_v39  ;;  %v23808_v60 = vld [vmem:[#allocation65_spill] sm:$0xff] }
 0x67e   : > { %v6271_v2 = vpop.f32.mrb[81].mxu1 }
 0x685   : > { %v17235_v41 = vpop.f32.mrb[82].mxu1 }
 0x686   : > { %v6445_v8 = vpop.f32.mrb[83].mxu1 }
 0x689   : > { %v17214_v22 = vpop.f32.mrb[80].mxu0 }
 0x68a   : > { %v6184_v50 = vpop.f32.mrb[81].mxu0 }
 0x68b   : > { %17322 = vmatprep.mubr.msk.f32.mxu0 %vm1095_vm1, %v6184_v50 }
 0x68c   : > { %17323 = vmatmul.mubr.msk.f32.vlgmr.msra.gmra.mrb[96].mxu0 %vm1095_vm1, %v17214_v22 }
 0x68d   : > { %17371 = vmatpush3.msra.mxu0 %v4265_v46  ;;  %v17249_v31 = vpop.f32.mrb[84].mxu1  ;;  %17325 = vmatprep.mubr.msk.f32.mxu0 %vm1095_vm1, %v6271_v2  ;;  %v21852_v2 = vpack.c.bf16 %v18986_v21, %v18985_v43  ;;  %v19069_v21 = vpop.permute.xlu0 %19068  ;;  %v23810_v43 = vld [vmem:[#allocation64_spill] sm:$0xff] }
 0x68e   : > { %18401 = vmatprep.subr.bf16.mxu0 %v18400_v61  ;;  %v6619_v15 = vpop.f32.mrb[85].mxu1 }
 0x690   : > { %17326 = vmatmul.mubr.msk.f32.gmra.mrb[98].mxu0 %vm1095_vm1, %v17221_v20 }
 0x691   : > { %v17228_v3 = vpop.f32.mrb[82].mxu0 }
 0x692   : > { %v6358_v12 = vpop.f32.mrb[83].mxu0 }
 0x693   : > { %17328 = vmatprep.mubr.msk.f32.mxu0 %vm1095_vm1, %v6358_v12 }
 0x694   : > { %17329 = vmatmul.mubr.msk.f32.gmra.mrb[100].mxu0 %vm1095_vm1, %v17228_v3 }
 0x695   : > { %v17263_v22 = vpop.f32.mrb[86].mxu1  ;;  %17331 = vmatprep.mubr.msk.f32.mxu0 %vm1095_vm1, %v6445_v8 }
 0x696   : > { %v6793_v46 = vpop.f32.mrb[87].mxu1 }
 0x697   : > { %17343 = vmatprep.mubr.msk.f32.mxu1 %vm1095_vm1, %v6793_v46  ;;  %v23811_v46 = vld [vmem:[#allocation57_spill] sm:$0xff] }
 0x698   : > { %17344 = vmatmul.mubr.msk.f32.vlgmr.msra.gmra.mrb[96].mxu1 %vm1095_vm1, %v17263_v22  ;;  %17332 = vmatmul.mubr.msk.f32.gmra.mrb[102].mxu0 %vm1095_vm1, %v17235_v41  ;;  %v19070_v41 = vunpack.i.l.bf16 %v19069_v21 }
 0x699   : > { %18309 = vmatpush3.bf16.xpose.msk.msra.mxu1 %vm20068_vm2, %v18304_v16  ;;  %v17242_v14 = vpop.f32.mrb[84].mxu0  ;;  %v19071_v16 = vunpack.i.h.bf16 %v19069_v21 }
 0x69a   : > { %18312 = vmatprep.subr.msk.bf16.mxu1 %vm20068_vm2, %v21852_v2  ;;  %v6532_v12 = vpop.f32.mrb[85].mxu0 }
 0x69b   : > { %17334 = vmatprep.mubr.msk.f32.mxu0 %vm1095_vm1, %v6532_v12  ;;  %v23812_v12 = vld [vmem:[#allocation45_spill] sm:$0xff] }
 0x69c   : > { %17335 = vmatmul.mubr.msk.f32.gmra.mrb[104].mxu0 %vm1095_vm1, %v17242_v14 }
 0x69d   : > { %17337 = vmatprep.mubr.msk.f32.mxu0 %vm1095_vm1, %v6619_v15  ;;  %v23809_v15 = vld [vmem:[#allocation34_spill] sm:$0xff] }
 0x6a0   : > { %17338 = vmatmul.mubr.msk.f32.gmra.mrb[106].mxu0 %vm1095_vm1, %v17249_v31  ;;  %v21873_v31 = vpack.c.bf16 %v19071_v16, %v19070_v41  ;;  %v23815_v41 = vld [vmem:[#allocation66_spill] sm:$0xff] }
 0x6a1   : > { %v17256_v3 = vpop.f32.mrb[86].mxu0 }
 0x6a2   : > { %v6706_v20 = vpop.f32.mrb[87].mxu0 }
 0x6a3   : > { %17340 = vmatprep.mubr.msk.f32.mxu0 %vm1095_vm1, %v6706_v20  ;;  %v23814_v20 = vld [vmem:[#allocation67_spill] sm:$0xff] }
 0x6a4   : > { %17341 = vmatmul.mubr.msk.f32.gmra.mrb[108].mxu0 %vm1095_vm1, %v17256_v3 }
 0x6a5   : > { %v17270_v8 = vpop.f32.mrb[88].mxu0  ;;  %17372 = vmatprep.mubr.msk.f32.mxu0 %vm1095_vm1, %v23808_v60  ;;  %v23816_v60 = vld [vmem:[#allocation69_spill] sm:$0xff] }
 0x6a6   : > { %v6880_v39 = vpop.f32.mrb[89].mxu0 }
 0x6a7   : > { %17346 = vmatprep.mubr.msk.f32.mxu1 %vm1095_vm1, %v6880_v39 }
 0x6a8   : > { %17347 = vmatmul.mubr.msk.f32.gmra.mrb[98].mxu1 %vm1095_vm1, %v17270_v8  ;;  %17373 = vmatmul.mubr.msk.f32.vlgmr.msra.gmra.mrb[96].mxu0 %vm1095_vm1, %v23809_v15  ;;  %v23817_v15 = vld [vmem:[#allocation70_spill] sm:$0xff] }
 0x6a9   : > { %18403 = vmatpush3.bf16.msra.mxu0 %v18400_v61  ;;  %v17277_v50 = vpop.f32.mrb[88].mxu1  ;;  %17375 = vmatprep.mubr.msk.f32.mxu0 %vm1095_vm1, %v23810_v43  ;;  %v23813_v61 = vld [vmem:[#allocation68_spill] sm:$0xff]  ;;  %v23818_v43 = vld [vmem:[#allocation18_spill] sm:$0xff] }
 0x6aa   : > { %18409 = vmatprep.subr.bf16.mxu0 %v21873_v31  ;;  %v6967_v22 = vpop.f32.mrb[89].mxu1 }
 0x6ab   : > { %17349 = vmatprep.mubr.msk.f32.mxu1 %vm1095_vm1, %v6967_v22 }
 0x6ac   : > { %17350 = vmatmul.mubr.msk.f32.gmra.mrb[100].mxu1 %vm1095_vm1, %v17277_v50  ;;  %17376 = vmatmul.mubr.msk.f32.gmra.mrb[98].mxu0 %vm1095_vm1, %v23811_v46  ;;  %v23819_v46 = vld [vmem:[#allocation72_spill] sm:$0xff] }
 0x6ad   : > { %v17284_v14 = vpop.f32.mrb[90].mxu0  ;;  %17378 = vmatprep.mubr.msk.f32.mxu0 %vm1095_vm1, %v23812_v12  ;;  %v23821_v12 = vld [vmem:[#allocation71_spill] sm:$0xff] }
 0x6ae   : > { %v7054_v21 = vpop.f32.mrb[91].mxu0 }
 0x6af   : > { %17352 = vmatprep.mubr.msk.f32.mxu1 %vm1095_vm1, %v7054_v21  ;;  %v23822_v21 = vld [vmem:[#allocation58_spill] sm:$0xff] }
 0x6b0   : > { %17353 = vmatmul.mubr.msk.f32.gmra.mrb[102].mxu1 %vm1095_vm1, %v17284_v14  ;;  %17379 = vmatmul.mubr.msk.f32.gmra.mrb[100].mxu0 %vm1095_vm1, %v23813_v61  ;;  %v23820_v14 = vld [vmem:[#allocation73_spill] sm:$0xff]  ;;  %v23823_v61 = vld [vmem:[#allocation52_spill] sm:$0xff] }
 0x6b1   : > { %v17291_v3 = vpop.f32.mrb[90].mxu1  ;;  %17381 = vmatprep.mubr.msk.f32.mxu0 %vm1095_vm1, %v23814_v20  ;;  %v23825_v20 = vld [vmem:[#allocation56_spill] sm:$0xff] }
 0x6b2   : > { %v7141_v16 = vpop.f32.mrb[91].mxu1 }
 0x6b3   : > { %17355 = vmatprep.mubr.msk.f32.mxu1 %vm1095_vm1, %v7141_v16  ;;  %v23826_v16 = vld [vmem:[#allocation53_spill] sm:$0xff] }
 0x6b4   : > { %17356 = vmatmul.mubr.msk.f32.gmra.mrb[104].mxu1 %vm1095_vm1, %v17291_v3  ;;  %17382 = vmatmul.mubr.msk.f32.gmra.mrb[102].mxu0 %vm1095_vm1, %v23815_v41  ;;  %v23824_v3 = vld [vmem:[#allocation60_spill] sm:$0xff]  ;;  %v23827_v41 = vld [vmem:[#allocation50_spill] sm:$0xff] }
 0x6b5   : > { %v17298_v8 = vpop.f32.mrb[92].mxu0  ;;  %17384 = vmatprep.mubr.msk.f32.mxu0 %vm1095_vm1, %v23816_v60  ;;  %v23829_v60 = vld [vmem:[#allocation61_spill] sm:$0xff] }
 0x6b6   : > { %v7228_v39 = vpop.f32.mrb[93].mxu0 }
 0x6b7   : > { %17358 = vmatprep.mubr.msk.f32.mxu1 %vm1095_vm1, %v7228_v39  ;;  %v23830_v39 = vld [vmem:[#allocation59_spill] sm:$0xff] }
 0x6b8   : > { %17359 = vmatmul.mubr.msk.f32.gmra.mrb[106].mxu1 %vm1095_vm1, %v17298_v8  ;;  %17385 = vmatmul.mubr.msk.f32.gmra.mrb[104].mxu0 %vm1095_vm1, %v23817_v15  ;;  %v23828_v8 = vld [vmem:[#allocation63_spill] sm:$0xff]  ;;  %v23831_v15 = vld [vmem:[#allocation49_spill] sm:$0xff] }
 0x6b9   : > { %v17305_v50 = vpop.f32.mrb[92].mxu1  ;;  %17387 = vmatprep.mubr.msk.f32.mxu0 %vm1095_vm1, %v23818_v43  ;;  %v23833_v43 = vld [vmem:[#allocation51_spill] sm:$0xff] }
 0x6ba   : > { %v7315_v22 = vpop.f32.mrb[93].mxu1 }
 0x6bb   : > { %17361 = vmatprep.mubr.msk.f32.mxu1 %vm1095_vm1, %v7315_v22  ;;  %v8233_v22 = vpop.permute.xlu1 %8232 }
 0x6bc   : > { %17362 = vmatmul.mubr.msk.f32.gmra.mrb[108].mxu1 %vm1095_vm1, %v17305_v50  ;;  %17388 = vmatmul.mubr.msk.f32.gmra.mrb[106].mxu0 %vm1095_vm1, %v23819_v46  ;;  %v23832_v50 = vld [vmem:[#allocation54_spill] sm:$0xff]  ;;  %v23834_v46 = vld [vmem:[#allocation75_spill] sm:$0xff] }
 0x6bd   : > { %17390 = vmatprep.mubr.msk.f32.mxu0 %vm1095_vm1, %v23820_v14  ;;  %v23835_v14 = vld [vmem:[#allocation74_spill] sm:$0xff] }
 0x6c0   : > { %17391 = vmatmul.mubr.msk.f32.gmra.mrb[108].mxu0 %vm1095_vm1, %v23821_v12  ;;  %v23836_v12 = vld [vmem:[#allocation77_spill] sm:$0xff] }
 0x6c1   : > { %17393 = vmatprep.mubr.msk.f32.mxu0 %vm1095_vm1, %v23822_v21  ;;  %v18994_v21 = vpop.permute.xlu1 %18993 }
 0x6c4   : > { %17394 = vmatmul.mubr.msk.f32.gmra.mrb[110].mxu0 %vm1095_vm1, %v23823_v61  ;;  %v23837_v61 = vld [vmem:[#allocation76_spill] sm:$0xff] }
 0x6c5   : > { %17396 = vmatprep.mubr.msk.f32.mxu0 %vm1095_vm1, %v23824_v3  ;;  %v23838_v3 = vld [vmem:[#allocation79_spill] sm:$0xff] }
 0x6c8   : > { %17397 = vmatmul.mubr.msk.f32.gmra.mrb[112].mxu0 %vm1095_vm1, %v23825_v20  ;;  %v23839_v20 = vld [vmem:[#allocation78_spill] sm:$0xff] }
 0x6c9   : > { %17399 = vmatprep.mubr.msk.f32.mxu0 %vm1095_vm1, %v23826_v16  ;;  %v8326_v16 = vpop.permute.xlu1 %8325 }
 0x6cc   : > { %17400 = vmatmul.mubr.msk.f32.gmra.mrb[114].mxu0 %vm1095_vm1, %v23827_v41 }
 0x6cd   : > { %17402 = vmatprep.mubr.msk.f32.mxu0 %vm1095_vm1, %v23828_v8 }
 0x6d0   : > { %17403 = vmatmul.mubr.msk.f32.gmra.mrb[116].mxu0 %vm1095_vm1, %v23829_v60  ;;  %v8415_v60 = vpop.permute.xlu1 %8414 }
 0x6d1   : > { %17405 = vmatprep.mubr.msk.f32.mxu0 %vm1095_vm1, %v23830_v39 }
 0x6d4   : > { %17406 = vmatmul.mubr.msk.f32.gmra.mrb[118].mxu0 %vm1095_vm1, %v23831_v15 }
 0x6d5   : > { %17408 = vmatprep.mubr.msk.f32.mxu0 %vm1095_vm1, %v23832_v50  ;;  %v18991_v50 = vunpack.i.h.bf16 %v21798_v30 }
 0x6d8   : > { %17409 = vmatmul.mubr.msk.f32.gmra.mrb[120].mxu0 %vm1095_vm1, %v23833_v43  ;;  %v18990_v43 = vunpack.i.l.bf16 %v21798_v30 }
 0x6d9   : > { %17411 = vmatprep.mubr.msk.f32.mxu0 %vm1095_vm1, %v23834_v46  ;;  %v19004_v46 = vpop.permute.xlu1 %19003 }
 0x6dc   : > { %17412 = vmatmul.mubr.msk.f32.gmra.mrb[122].mxu0 %vm1095_vm1, %v23835_v14  ;;  %v18316_v14 = vpack.c.bf16 %v18991_v50, %v18990_v43  ;;  %v19020_v43 = vunpack.i.l.bf16 %v21816_v28 }
 0x6dd   : > { %17414 = vmatprep.mubr.msk.f32.mxu0 %vm1095_vm1, %v23836_v12  ;;  %v8508_v30 = vpop.permute.xlu1 %8507  ;;  %v18996_v12 = vunpack.i.h.bf16 %v18994_v21 }
 0x6e0   : > { %17415 = vmatmul.mubr.msk.f32.gmra.mrb[124].mxu0 %vm1095_vm1, %v23837_v61  ;;  %v18995_v61 = vunpack.i.l.bf16 %v18994_v21 }
 0x6e1   : > { %17417 = vmatprep.mubr.msk.f32.mxu0 %vm1095_vm1, %v23838_v3 }
 0x6e2   : > { %v18322_v3 = vpack.c.bf16 %v18996_v12, %v18995_v61  ;;  %v19031_v61 = vunpack.i.h.bf16 %v21822_v58 }
 0x6e4   : > { %17418 = vmatmul.mubr.msk.f32.gmra.mrb[126].mxu0 %vm1095_vm1, %v23839_v20 }
 0x6ea   : > { %v17312_v41 = vpop.f32.mrb[94].mxu0 }
 0x6eb   : > { %v7402_v8 = vpop.f32.mrb[95].mxu0 }
 0x6ec   : > { %17364 = vmatprep.mubr.msk.f32.mxu1 %vm1095_vm1, %v7402_v8  ;;  %v19010_v8 = vunpack.i.l.bf16 %v21810_v48 }
 0x6ed   : > { %17365 = vmatmul.mubr.msk.f32.gmra.mrb[110].mxu1 %vm1095_vm1, %v17312_v41 }
 0x6ee   : > { %v17319_v39 = vpop.f32.mrb[94].mxu1 }
 0x6ef   : > { %v7489_v15 = vpop.f32.mrb[95].mxu1 }
 0x6f0   : > { %17367 = vmatprep.mubr.msk.f32.mxu1 %vm1095_vm1, %v7489_v15 }
 0x6f1   : > { %17368 = vmatmul.mubr.msk.f32.gmra.mrb[112].mxu1 %vm1095_vm1, %v17319_v39 }
 0x6f2   : > { %17424 = vmatprep.mubr.msk.f32.mxu1 %vm1095_vm1, %v21790_v13  ;;  %v8597_v13 = vpop.permute.xlu1 %8596 }
 0x6f5   : > { %17425 = vmatmul.mubr.msk.f32.vlgmr.msra.gmra.mrb[114].mxu1 %vm1095_vm1, %v21796_v47  ;;  %v19001_v47 = vunpack.i.h.bf16 %v21804_v19 }
 0x6f6   : > { %18315 = vmatpush3.bf16.xpose.msk.msra.mxu1 %vm20068_vm2, %v21852_v2  ;;  %17431 = vmatprep.mubr.msk.f32.mxu1 %vm1095_vm1, %v8233_v22  ;;  %v19000_v2 = vunpack.i.l.bf16 %v21804_v19  ;;  %v19014_v22 = vpop.permute.xlu1 %19013 }
 0x6f7   : > { %18318 = vmatprep.subr.msk.bf16.mxu1 %vm20068_vm2, %v18316_v14 }
 0x6f8   : > { %v18328_v21 = vpack.c.bf16 %v19001_v47, %v19000_v2 }
 0x6fa   : > { %v8690_v20 = vpop.permute.xlu1 %8689 }
 0x6fd   : > { %17432 = vmatmul.mubr.msk.f32.vlgmr.msra.gmra.mrb[116].mxu1 %vm1095_vm1, %v21800_v26  ;;  %v19006_v26 = vunpack.i.h.bf16 %v19004_v46 }
 0x6fe   : > { %18321 = vmatpush3.bf16.xpose.msk.msra.mxu1 %vm20068_vm2, %v18316_v14  ;;  %17438 = vmatprep.mubr.msk.f32.mxu1 %vm1095_vm1, %v21802_v18  ;;  %v19005_v18 = vunpack.i.l.bf16 %v19004_v46  ;;  %v8779_v19 = vpop.permute.xlu1 %8778 }
 0x6ff   : > { %18324 = vmatprep.subr.msk.bf16.mxu1 %vm20068_vm2, %v18322_v3 }
 0x700   : > { %v18334_v41 = vpack.c.bf16 %v19006_v26, %v19005_v18  ;;  %v19040_v26 = vunpack.i.l.bf16 %v21828_v56 }
 0x702   : > { %v19024_v39 = vpop.permute.xlu1 %19023 }
 0x705   : > { %17439 = vmatmul.mubr.msk.f32.vlgmr.msra.gmra.mrb[118].mxu1 %vm1095_vm1, %v8326_v16  ;;  %v19011_v16 = vunpack.i.h.bf16 %v21810_v48  ;;  %v19021_v48 = vunpack.i.h.bf16 %v21816_v28 }
 0x706   : > { %18327 = vmatpush3.bf16.xpose.msk.msra.mxu1 %vm20068_vm2, %v18322_v3  ;;  %17445 = vmatprep.mubr.msk.f32.mxu1 %vm1095_vm1, %v8415_v60  ;;  %v8872_v15 = vpop.permute.xlu1 %8871  ;;  %v19030_v3 = vunpack.i.l.bf16 %v21822_v58 }
 0x707   : > { %18330 = vmatprep.subr.msk.bf16.mxu1 %vm20068_vm2, %v18328_v21  ;;  %v18340_v60 = vpack.c.bf16 %v19011_v16, %v19010_v8  ;;  %v18352_v14 = vpack.c.bf16 %v19021_v48, %v19020_v43  ;;  %v19050_v16 = vunpack.i.l.bf16 %v21834_v9 }
 0x708   : > { %v18364_v47 = vpack.c.bf16 %v19031_v61, %v19030_v3 }
 0x70a   : > { %v8961_v46 = vpop.permute.xlu1 %8960 }
 0x70d   : > { %17446 = vmatmul.mubr.msk.f32.vlgmr.msra.gmra.mrb[120].mxu1 %vm1095_vm1, %v21806_v32  ;;  %v19016_v32 = vunpack.i.h.bf16 %v19014_v22 }
 0x70e   : > { %18333 = vmatpush3.bf16.xpose.msk.msra.mxu1 %vm20068_vm2, %v18328_v21  ;;  %17452 = vmatprep.mubr.msk.f32.mxu1 %vm1095_vm1, %v21808_v6  ;;  %v19015_v6 = vunpack.i.l.bf16 %v19014_v22  ;;  %v19041_v21 = vunpack.i.h.bf16 %v21828_v56  ;;  %v19051_v56 = vunpack.i.h.bf16 %v21834_v9 }
 0x70f   : > { %18336 = vmatprep.subr.msk.bf16.mxu1 %vm20068_vm2, %v18334_v41 }
 0x710   : > { %v18346_v50 = vpack.c.bf16 %v19016_v32, %v19015_v6  ;;  %v18376_v18 = vpack.c.bf16 %v19041_v21, %v19040_v26  ;;  %v22114_v26 = vld [vmem:[%s23469_s6 + $0x28] sm:$0xff] }
 0x715   : > { %17453 = vmatmul.mubr.msk.f32.vlgmr.msra.gmra.mrb[122].mxu1 %vm1095_vm1, %v8508_v30  ;;  %v19025_v30 = vunpack.i.l.bf16 %v19024_v39 }
 0x716   : > { %18339 = vmatpush3.bf16.xpose.msk.msra.mxu1 %vm20068_vm2, %v18334_v41  ;;  %17459 = vmatprep.mubr.msk.f32.mxu1 %vm1095_vm1, %v8597_v13 }
 0x717   : > { %18342 = vmatprep.subr.msk.bf16.mxu1 %vm20068_vm2, %v18340_v60 }
 0x71d   : > { %17460 = vmatmul.mubr.msk.f32.vlgmr.msra.gmra.mrb[124].mxu1 %vm1095_vm1, %v21812_v42  ;;  %v19034_v42 = vpop.permute.xlu1 %19033 }
 0x71e   : > { %18345 = vmatpush3.bf16.xpose.msk.msra.mxu1 %vm20068_vm2, %v18340_v60  ;;  %17466 = vmatprep.mubr.msk.f32.mxu1 %vm1095_vm1, %v21814_v37  ;;  %v19026_v37 = vunpack.i.h.bf16 %v19024_v39  ;;  %v18388_v60 = vpack.c.bf16 %v19051_v56, %v19050_v16 }
 0x71f   : > { %18348 = vmatprep.subr.msk.bf16.mxu1 %vm20068_vm2, %v18346_v50 }
 0x720   : > { %v18358_v12 = vpack.c.bf16 %v19026_v37, %v19025_v30 }
 0x721   : > { %v9054_v28 = vpop.permute.xlu1 %9053 }
 0x725   : > { %17467 = vmatmul.mubr.msk.f32.vlgmr.msra.gmra.mrb[126].mxu1 %vm1095_vm1, %v8690_v20  ;;  %v9143_v13 = vpop.permute.xlu1 %9142 }
 0x726   : > { %18351 = vmatpush3.bf16.xpose.msk.msra.mxu1 %vm20068_vm2, %v18346_v50  ;;  %17473 = vmatprep.mubr.msk.f32.mxu1 %vm1095_vm1, %v8779_v19 }
 0x727   : > { %18354 = vmatprep.subr.msk.bf16.mxu1 %vm20068_vm2, %v18352_v14 }
 0x729   : > { %v19044_v2 = vpop.permute.xlu1 %19043 }
 0x72d   : > { %17474 = vmatmul.mubr.msk.f32.vlgmr.msra.gmra.mrb[128].mxu1 %vm1095_vm1, %v21818_v17  ;;  %v19036_v17 = vunpack.i.h.bf16 %v19034_v42  ;;  %v9236_v58 = vpop.permute.xlu1 %9235 }
 0x72e   : > { %18357 = vmatpush3.bf16.xpose.msk.msra.mxu1 %vm20068_vm2, %v18352_v14  ;;  %17480 = vmatprep.mubr.msk.f32.mxu1 %vm1095_vm1, %v21820_v44  ;;  %v19035_v44 = vunpack.i.l.bf16 %v19034_v42 }
 0x72f   : > { %18360 = vmatprep.subr.msk.bf16.mxu1 %vm20068_vm2, %v18358_v12 }
 0x730   : > { %v18370_v22 = vpack.c.bf16 %v19036_v17, %v19035_v44 }
 0x731   : > { %v9325_v20 = vpop.permute.xlu1 %9324 }
 0x735   : > { %17481 = vmatmul.mubr.msk.f32.vlgmr.msra.gmra.mrb[130].mxu1 %vm1095_vm1, %v8872_v15  ;;  %v19054_v41 = vpop.permute.xlu1 %19053 }
 0x736   : > { %18363 = vmatpush3.bf16.xpose.msk.msra.mxu1 %vm20068_vm2, %v18358_v12  ;;  %17487 = vmatprep.mubr.msk.f32.mxu1 %vm1095_vm1, %v8961_v46  ;;  %v19055_v39 = vunpack.i.l.bf16 %v19054_v41 }
 0x737   : > { %18366 = vmatprep.subr.msk.bf16.mxu1 %vm20068_vm2, %v18364_v47 }
 0x739   : > { %v9418_v8 = vpop.permute.xlu1 %9417 }
 0x73d   : > { %17488 = vmatmul.mubr.msk.f32.vlgmr.msra.gmra.mrb[132].mxu1 %vm1095_vm1, %v21824_v24  ;;  %v19046_v24 = vunpack.i.h.bf16 %v19044_v2 }
 0x73e   : > { %18369 = vmatpush3.bf16.xpose.msk.msra.mxu1 %vm20068_vm2, %v18364_v47  ;;  %17494 = vmatprep.mubr.msk.f32.mxu1 %vm1095_vm1, %v21826_v35  ;;  %v19045_v35 = vunpack.i.l.bf16 %v19044_v2 }
 0x73f   : > { %18372 = vmatprep.subr.msk.bf16.mxu1 %vm20068_vm2, %v18370_v22 }
 0x740   : > { %v18382_v19 = vpack.c.bf16 %v19046_v24, %v19045_v35 }
 0x745   : > { %17495 = vmatmul.mubr.msk.f32.vlgmr.msra.gmra.mrb[134].mxu1 %vm1095_vm1, %v9054_v28 }
 0x746   : > { %18375 = vmatpush3.bf16.xpose.msk.msra.mxu1 %vm20068_vm2, %v18370_v22  ;;  %17501 = vmatprep.mubr.msk.f32.mxu1 %vm1095_vm1, %v9143_v13 }
 0x747   : > { %18378 = vmatprep.subr.msk.bf16.mxu1 %vm20068_vm2, %v18376_v18 }
 0x74d   : > { %17502 = vmatmul.mubr.msk.f32.vlgmr.msra.gmra.mrb[136].mxu1 %vm1095_vm1, %v21830_v45  ;;  %v9509_v45 = vpop.permute.xlu1 %9508 }
 0x74e   : > { %18381 = vmatpush3.bf16.xpose.msk.msra.mxu1 %vm20068_vm2, %v18376_v18  ;;  %17508 = vmatprep.mubr.msk.f32.mxu1 %vm1095_vm1, %v21832_v34  ;;  %v19056_v34 = vunpack.i.h.bf16 %v19054_v41  ;;  %v22119_v18 = vld [vmem:[%s23469_s6 + $0x20] sm:$0xff] }
 0x74f   : > { %18384 = vmatprep.subr.msk.bf16.mxu1 %vm20068_vm2, %v18382_v19 }
 0x750   : > { %v18394_v32 = vpack.c.bf16 %v19056_v34, %v19055_v39 }
 0x751   : > { %v19064_v9 = vpop.permute.xlu1 %19063 }
 0x752   : > { %v19066_v6 = vunpack.i.h.bf16 %v19064_v9  ;;  %v19065_v15 = vunpack.i.l.bf16 %v19064_v9 }
 0x754   : > { %v18404_v50 = vpack.c.bf16 %v19066_v6, %v19065_v15 }
 0x755   : > { %17509 = vmatmul.mubr.msk.f32.vlgmr.msra.gmra.mrb[138].mxu1 %vm1095_vm1, %v9236_v58  ;;  %v19074_v48 = vpop.permute.xlu1 %19073 }
 0x756   : > { %18387 = vmatpush3.bf16.xpose.msk.msra.mxu1 %vm20068_vm2, %v18382_v19  ;;  %17515 = vmatprep.mubr.msk.f32.mxu1 %vm1095_vm1, %v9325_v20  ;;  %v19075_v43 = vunpack.i.l.bf16 %v19074_v48 }
 0x757   : > { %18390 = vmatprep.subr.msk.bf16.mxu1 %vm20068_vm2, %v18388_v60 }
 0x759   : > { %v22287_v52 = vpop.permute.xlu1 %19088 }
 0x75d   : > { %17516 = vmatmul.mubr.msk.f32.vlgmr.msra.gmra.mrb[140].mxu1 %vm1095_vm1, %v21836_v0  ;;  %v19076_v0 = vunpack.i.h.bf16 %v19074_v48 }
 0x75e   : > { %18393 = vmatpush3.bf16.xpose.msk.msra.mxu1 %vm20068_vm2, %v18388_v60  ;;  %17522 = vmatprep.mubr.msk.f32.mxu1 %vm1095_vm1, %v21838_v29 }
 0x75f   : > { %18396 = vmatprep.subr.msk.bf16.mxu1 %vm20068_vm2, %v18394_v32  ;;  %v22076_v14 = vpack.c.bf16 %v19076_v0, %v19075_v43 }
 0x765   : > { %17523 = vmatmul.mubr.msk.f32.vlgmr.msra.gmra.mrb[142].mxu1 %vm1095_vm1, %v9418_v8 }
 0x766   : > { %18399 = vmatpush3.bf16.xpose.msk.msra.mxu1 %vm20068_vm2, %v18394_v32  ;;  %17529 = vmatprep.mubr.msk.f32.mxu1 %vm1095_vm1, %v21840_v53 }
 0x767   : > { %18405 = vmatprep.subr.bf16.mxu1 %v18404_v50 }
 0x76b   : > { %v22071_v46 = vpop.f32.mrb[96].mxu1 }
 0x76c   : > { %23840 = vst [vmem:[#allocation41_spill] sm:$0xff] %v22071_v46  ;;  %v22073_v29 = vpop.f32.mrb[97].mxu1 }
 0x76d   : > { %23841 = vst [vmem:[#allocation8_spill] sm:$0xff] %v22073_v29  ;;  %17530 = vmatmul.mubr.msk.f32.vlgmr.msra.gmra.mrb[144].mxu1 %vm1095_vm1, %v9509_v45 }
 0x76e   : > { %18407 = vmatpush3.bf16.msra.mxu1 %v18404_v50 }
 0x76f   : > { %18413 = vmatprep.subr.bf16.mxu1 %v22076_v14 }
 0x77b   : > { %v22079_v42 = vpop.f32.mrb[98].mxu1 }
 0x77c   : > { %23842 = vst [vmem:[#allocation80_spill] sm:$0xff] %v22079_v42  ;;  %v22081_v37 = vpop.f32.mrb[99].mxu1 }
 0x77d   : > { %23843 = vst [vmem:[#allocation62_spill] sm:$0xff] %v22081_v37 }
 0x77f   : > { %v22083_v30 = vpop.f32.mrb[100].mxu1 }
 0x780   : > { %23844 = vst [vmem:[#allocation82_spill] sm:$0xff] %v22083_v30  ;;  %v22085_v53 = vpop.f32.mrb[101].mxu1 }
 0x781   : > { %23845 = vst [vmem:[#allocation81_spill] sm:$0xff] %v22085_v53 }
 0x783   : > { %v22087_v12 = vpop.f32.mrb[102].mxu1 }
 0x784   : > { %23846 = vst [vmem:[#allocation55_spill] sm:$0xff] %v22087_v12  ;;  %v22089_v28 = vpop.f32.mrb[103].mxu1 }
 0x785   : > { %23847 = vst [vmem:[#allocation83_spill] sm:$0xff] %v22089_v28 }
 0x787   : > { %v22091_v61 = vpop.f32.mrb[104].mxu1 }
 0x788   : > { %23848 = vst [vmem:[#allocation27_spill] sm:$0xff] %v22091_v61  ;;  %v22093_v3 = vpop.f32.mrb[105].mxu1 }
 0x789   : > { %23849 = vst [vmem:[#allocation25_spill] sm:$0xff] %v22093_v3 }
 0x78b   : > { %v22095_v13 = vpop.f32.mrb[106].mxu1 }
 0x78c   : > { %23850 = vst [vmem:[#allocation37_spill] sm:$0xff] %v22095_v13  ;;  %v22097_v47 = vpop.f32.mrb[107].mxu1 }
 0x78d   : > { %23851 = vst [vmem:[#allocation65_spill] sm:$0xff] %v22097_v47 }
 0x78f   : > { %v22099_v17 = vpop.f32.mrb[108].mxu1 }
 0x790   : > { %23852 = vst [vmem:[#allocation34_spill] sm:$0xff] %v22099_v17  ;;  %v22101_v44 = vpop.f32.mrb[109].mxu1 }
 0x791   : > { %23853 = vst [vmem:[#allocation64_spill] sm:$0xff] %v22101_v44 }
 0x7c0   : > { %v22103_v2 = vpop.f32.mrb[110].mxu1 }
 0x7c1   : > { %23854 = vst [vmem:[#allocation57_spill] sm:$0xff] %v22103_v2  ;;  %v22105_v22 = vpop.f32.mrb[111].mxu1 }
 0x7c2   : > { %23855 = vst [vmem:[#allocation45_spill] sm:$0xff] %v22105_v22 }
 0x7c4   : > { %v22107_v58 = vpop.f32.mrb[112].mxu1 }
 0x7c5   : > { %23856 = vst [vmem:[#allocation68_spill] sm:$0xff] %v22107_v58  ;;  %v22109_v21 = vpop.f32.mrb[113].mxu1 }
 0x7c6   : > { %23857 = vst [vmem:[#allocation67_spill] sm:$0xff] %v22109_v21 }
 0x7c8   : > { %v17426_v20 = vpop.f32.mrb[114].mxu1 }
 0x7c9   : > { %v22122_v24 = vadd.f32 %v17426_v20, %v22114_v26  ;;  %v8223_v35 = vpop.f32.mrb[115].mxu1 }
 0x7ca   : > { %v22125_v41 = vadd.f32 %v8223_v35, %v22119_v18 }
 0x7cb   : > { %v9600_v19 = vsel %vm2488_vm3, %v22122_v24, -inf }
 0x7cc   : > { %9601 = vmax.xlane.f32.xlu1 %v9600_v19  ;;  %v9597_v56 = vsel %vm2488_vm3, %v22125_v41, -inf }
 0x7cd   : > { %9598 = vmax.xlane.f32.xlu0 %v9597_v56 }
 0x7d0   : > { %v17433_v16 = vpop.f32.mrb[116].mxu1 }
 0x7d1   : > { %v22132_v8 = vadd.f32 %v17433_v16, %v22114_v26  ;;  %v8314_v60 = vpop.f32.mrb[117].mxu1 }
 0x7d2   : > { %v22135_v45 = vadd.f32 %v8314_v60, %v22119_v18 }
 0x7d3   : > { %v9606_v34 = vsel %vm2488_vm3, %v22132_v8, -inf }
 0x7d4   : > { %9607 = vmax.xlane.f32.xlu0 %v9606_v34  ;;  %v9603_v39 = vsel %vm2488_vm3, %v22135_v45, -inf }
 0x7d8   : > { %v17440_v32 = vpop.f32.mrb[118].mxu1  ;;  %9604 = vmax.xlane.f32.xlu0 %v9603_v39 }
 0x7d9   : > { %v22142_v9 = vadd.f32 %v17440_v32, %v22114_v26  ;;  %v8405_v6 = vpop.f32.mrb[119].mxu1 }
 0x7da   : > { %v22145_v15 = vadd.f32 %v8405_v6, %v22119_v18 }
 0x7db   : > { %v9612_v50 = vsel %vm2488_vm3, %v22142_v9, -inf }
 0x7dc   : > { %9613 = vmax.xlane.f32.xlu0 %v9612_v50  ;;  %v9609_v48 = vsel %vm2488_vm3, %v22145_v15, -inf }
 0x7dd   : > { %9610 = vmax.xlane.f32.xlu1 %v9609_v48 }
 0x7e0   : > { %v17447_v0 = vpop.f32.mrb[120].mxu1 }
 0x7e1   : > { %v22152_v43 = vadd.f32 %v17447_v0, %v22114_v26  ;;  %v8496_v20 = vpop.f32.mrb[121].mxu1 }
 0x7e2   : > { %v22155_v35 = vadd.f32 %v8496_v20, %v22119_v18 }
 0x7e3   : > { %v9618_v19 = vsel %vm2488_vm3, %v22152_v43, -inf }
 0x7e4   : > { %9619 = vmax.xlane.f32.xlu0 %v9618_v19  ;;  %v9615_v56 = vsel %vm2488_vm3, %v22155_v35, -inf }
 0x7e5   : > { %9616 = vmax.xlane.f32.xlu1 %v9615_v56 }
 0x7e8   : > { %v17454_v16 = vpop.f32.mrb[122].mxu1 }
 0x7e9   : > { %v22162_v60 = vadd.f32 %v17454_v16, %v22114_v26  ;;  %v8587_v34 = vpop.f32.mrb[123].mxu1 }
 0x7ea   : > { %v22165_v39 = vadd.f32 %v8587_v34, %v22119_v18 }
 0x7eb   : > { %v9624_v32 = vsel %vm2488_vm3, %v22162_v60, -inf }
 0x7ec   : > { %9625 = vmax.xlane.f32.xlu0 %v9624_v32  ;;  %v9621_v6 = vsel %vm2488_vm3, %v22165_v39, -inf }
 0x7ed   : > { %9622 = vmax.xlane.f32.xlu1 %v9621_v6 }
 0x7f0   : > { %v17461_v50 = vpop.f32.mrb[124].mxu1 }
 0x7f1   : > { %v22172_v48 = vadd.f32 %v17461_v50, %v22114_v26  ;;  %v8678_v0 = vpop.f32.mrb[125].mxu1 }
 0x7f2   : > { %v22175_v20 = vadd.f32 %v8678_v0, %v22119_v18 }
 0x7f3   : > { %v9630_v19 = vsel %vm2488_vm3, %v22172_v48, -inf }
 0x7f4   : > { %9631 = vmax.xlane.f32.xlu0 %v9630_v19  ;;  %v9627_v56 = vsel %vm2488_vm3, %v22175_v20, -inf }
 0x7f5   : > { %9628 = vmax.xlane.f32.xlu1 %v9627_v56 }
 0x7f8   : > { %v17468_v16 = vpop.f32.mrb[126].mxu1 }
 0x7f9   : > { %v22182_v34 = vadd.f32 %v17468_v16, %v22114_v26  ;;  %v8769_v32 = vpop.f32.mrb[127].mxu1 }
 0x7fa   : > { %v22185_v6 = vadd.f32 %v8769_v32, %v22119_v18 }
 0x7fb   : > { %v9636_v50 = vsel %vm2488_vm3, %v22182_v34, -inf }
 0x7fc   : > { %9637 = vmax.xlane.f32.xlu0 %v9636_v50  ;;  %v9633_v0 = vsel %vm2488_vm3, %v22185_v6, -inf }
 0x7fd   : > { %9634 = vmax.xlane.f32.xlu1 %v9633_v0 }
 0x800   : > { %v17475_v19 = vpop.f32.mrb[128].mxu1 }
 0x801   : > { %v22192_v21 = vadd.f32 %v17475_v19, %v22114_v26  ;;  %v8860_v56 = vpop.f32.mrb[129].mxu1 }
 0x802   : > { %v22195_v16 = vadd.f32 %v8860_v56, %v22119_v18 }
 0x803   : > { %v9642_v32 = vsel %vm2488_vm3, %v22192_v21, -inf }
 0x804   : > { %9643 = vmax.xlane.f32.xlu0 %v9642_v32  ;;  %v9639_v58 = vsel %vm2488_vm3, %v22195_v16, -inf }
 0x805   : > { %9640 = vmax.xlane.f32.xlu1 %v9639_v58 }
 0x808   : > { %v17482_v50 = vpop.f32.mrb[130].mxu1 }
 0x809   : > { %v22202_v22 = vadd.f32 %v17482_v50, %v22114_v26  ;;  %v8951_v0 = vpop.f32.mrb[131].mxu1 }
 0x80a   : > { %v22205_v19 = vadd.f32 %v8951_v0, %v22119_v18 }
 0x80b   : > { %v9648_v56 = vsel %vm2488_vm3, %v22202_v22, -inf }
 0x80c   : > { %9649 = vmax.xlane.f32.xlu0 %v9648_v56  ;;  %v9645_v2 = vsel %vm2488_vm3, %v22205_v19, -inf }
 0x80d   : > { %9646 = vmax.xlane.f32.xlu1 %v9645_v2 }
 0x810   : > { %v17489_v32 = vpop.f32.mrb[132].mxu1 }
 0x811   : > { %v22212_v44 = vadd.f32 %v17489_v32, %v22114_v26  ;;  %v9042_v58 = vpop.f32.mrb[133].mxu1 }
 0x812   : > { %v22215_v50 = vadd.f32 %v9042_v58, %v22119_v18 }
 0x813   : > { %v9654_v0 = vsel %vm2488_vm3, %v22212_v44, -inf }
 0x814   : > { %9655 = vmax.xlane.f32.xlu0 %v9654_v0  ;;  %v9651_v17 = vsel %vm2488_vm3, %v22215_v50, -inf }
 0x815   : > { %9652 = vmax.xlane.f32.xlu1 %v9651_v17 }
 0x818   : > { %v17496_v56 = vpop.f32.mrb[134].mxu1 }
 0x819   : > { %v22222_v47 = vadd.f32 %v17496_v56, %v22114_v26  ;;  %v9133_v2 = vpop.f32.mrb[135].mxu1 }
 0x81a   : > { %v22225_v32 = vadd.f32 %v9133_v2, %v22119_v18 }
 0x81b   : > { %v9660_v58 = vsel %vm2488_vm3, %v22222_v47, -inf }
 0x81c   : > { %9661 = vmax.xlane.f32.xlu0 %v9660_v58  ;;  %v9657_v13 = vsel %vm2488_vm3, %v22225_v32, -inf }
 0x81d   : > { %9658 = vmax.xlane.f32.xlu1 %v9657_v13 }
 0x820   : > { %v17503_v0 = vpop.f32.mrb[136].mxu1 }
 0x821   : > { %v22232_v3 = vadd.f32 %v17503_v0, %v22114_v26  ;;  %v9224_v17 = vpop.f32.mrb[137].mxu1 }
 0x822   : > { %v22235_v56 = vadd.f32 %v9224_v17, %v22119_v18 }
 0x823   : > { %v9666_v2 = vsel %vm2488_vm3, %v22232_v3, -inf }
 0x824   : > { %9667 = vmax.xlane.f32.xlu0 %v9666_v2  ;;  %v9663_v61 = vsel %vm2488_vm3, %v22235_v56, -inf }
 0x825   : > { %9664 = vmax.xlane.f32.xlu1 %v9663_v61 }
 0x828   : > { %v17510_v58 = vpop.f32.mrb[138].mxu1 }
 0x829   : > { %v22242_v28 = vadd.f32 %v17510_v58, %v22114_v26  ;;  %v9315_v13 = vpop.f32.mrb[139].mxu1 }
 0x82a   : > { %v22245_v0 = vadd.f32 %v9315_v13, %v22119_v18 }
 0x82b   : > { %v9672_v17 = vsel %vm2488_vm3, %v22242_v28, -inf }
 0x82c   : > { %9673 = vmax.xlane.f32.xlu0 %v9672_v17  ;;  %v9669_v12 = vsel %vm2488_vm3, %v22245_v0, -inf }
 0x82d   : > { %9670 = vmax.xlane.f32.xlu1 %v9669_v12 }
 0x830   : > { %v17517_v2 = vpop.f32.mrb[140].mxu1 }
 0x831   : > { %v22252_v53 = vadd.f32 %v17517_v2, %v22114_v26  ;;  %v9406_v61 = vpop.f32.mrb[141].mxu1 }
 0x832   : > { %v22255_v58 = vadd.f32 %v9406_v61, %v22119_v18 }
 0x833   : > { %v9678_v13 = vsel %vm2488_vm3, %v22252_v53, -inf }
 0x834   : > { %9679 = vmax.xlane.f32.xlu0 %v9678_v13  ;;  %v9675_v30 = vsel %vm2488_vm3, %v22255_v58, -inf  ;;  %v22271_v13 = vpop.permute.xlu0 %19078 }
 0x835   : > { %9676 = vmax.xlane.f32.xlu1 %v9675_v30 }
 0x838   : > { %v17524_v17 = vpop.f32.mrb[142].mxu1  ;;  %v22281_v57 = vpop.permute.xlu0 %19083 }
 0x839   : > { %v22262_v37 = vadd.f32 %v17524_v17, %v22114_v26  ;;  %v9497_v12 = vpop.f32.mrb[143].mxu1 }
 0x83a   : > { %v22265_v2 = vadd.f32 %v9497_v12, %v22119_v18 }
 0x83b   : > { %v9684_v61 = vsel %vm2488_vm3, %v22262_v37, -inf }
 0x83c   : > { %9685 = vmax.xlane.f32.xlu0 %v9684_v61  ;;  %v9681_v42 = vsel %vm2488_vm3, %v22265_v2, -inf }
 0x83d   : > { %9682 = vmax.xlane.f32.xlu1 %v9681_v42  ;;  %v22285_v42 = vpop.permute.xlu0 %19093 }
 0x840   : > { %v17531_v29 = vpop.f32.mrb[144].mxu1 }
 0x841   : > { %v22274_v30 = vadd.f32 %v17531_v29, %v22114_v26  ;;  %v9588_v17 = vpop.f32.mrb[145].mxu1  ;;  %v22289_v29 = vpop.permute.xlu0 %19103 }
 0x842   : > { %v22277_v46 = vadd.f32 %v9588_v17, %v22119_v18  ;;  %v22291_v26 = vpop.permute.xlu1 %19098 }
 0x843   : > { %v9690_v12 = vsel %vm2488_vm3, %v22274_v30, -inf }
 0x844   : > { %9691 = vmax.xlane.f32.xlu0 %v9690_v12  ;;  %v9687_v61 = vsel %vm2488_vm3, %v22277_v46, -inf }
 0x845   : > { %9688 = vmax.xlane.f32.xlu1 %v9687_v61  ;;  %v22293_v18 = vpop.permute.xlu0 %19108 }
 0x846   : > { %23858 = vst [vmem:[#allocation66_spill] sm:$0xff] %v22293_v18 }
 0x859   : > { %v9602_v17 = vpop.xlane.xlu1 %9601 }
 0x85a   : > { %v9694_v10 = vsub.f32 %v22122_v24, %v9602_v17  ;;  %v9599_v23 = vpop.xlane.xlu0 %9598 }
 0x85b   : > { %v9693_v12 = vsub.f32 %v22125_v41, %v9599_v23 }
 0x85c   : > { %v9727_v51 = vmul.f32 1.442695, %v9694_v10 }
 0x85d   : > { %v9725_v59 = vmul.f32 1.442695, %v9693_v12 }
 0x85e   : > { %19553 = vpow2.f32 %v9727_v51 }
 0x85f   : > { %19555 = vpow2.f32 %v9725_v59 }
 0x861   : > { %v9608_v61 = vpop.xlane.xlu0 %9607 }
 0x862   : > { %v9696_v7 = vsub.f32 %v22132_v8, %v9608_v61 }
 0x864   : > { %v9731_v54 = vmul.f32 1.442695, %v9696_v7 }
 0x865   : > { %v9605_v49 = vpop.xlane.xlu0 %9604 }
 0x866   : > { %19557 = vpow2.f32 %v9731_v54  ;;  %v9695_v62 = vsub.f32 %v22135_v45, %v9605_v49 }
 0x868   : > { %v22299_v4 = vpop.eup %19553  ;;  %v9729_v18 = vmul.f32 1.442695, %v9695_v62 }
 0x869   : > { %v22301_v11 = vpop.eup %19555  ;;  %v9614_v24 = vpop.xlane.xlu0 %9613  ;;  %v9792_v10 = vsel %vm2488_vm3, %v22299_v4, 0.0 }
 0x86a   : > { %19559 = vpow2.f32 %v9729_v18  ;;  %v9698_v59 = vsub.f32 %v22142_v9, %v9614_v24  ;;  %v9611_v23 = vpop.xlane.xlu1 %9610  ;;  %9793 = vadd.xlane.f32.xlu0 %v9792_v10  ;;  %v9789_v7 = vsel %vm2488_vm3, %v22301_v11, 0.0 }
 0x86b   : > { %v9697_v54 = vsub.f32 %v22145_v15, %v9611_v23  ;;  %9790 = vadd.xlane.f32.xlu1 %v9789_v7 }
 0x86c   : > { %v9735_v49 = vmul.f32 1.442695, %v9698_v59 }
 0x86d   : > { %v9733_v51 = vmul.f32 1.442695, %v9697_v54 }
 0x86e   : > { %19561 = vpow2.f32 %v9735_v49 }
 0x86f   : > { %19563 = vpow2.f32 %v9733_v51 }
 0x870   : > { %v22309_v62 = vpop.eup %19557 }
 0x871   : > { %v9620_v41 = vpop.xlane.xlu0 %9619  ;;  %v9798_v8 = vsel %vm2488_vm3, %v22309_v62, 0.0 }
 0x872   : > { %v9700_v45 = vsub.f32 %v22152_v43, %v9620_v41  ;;  %v9617_v9 = vpop.xlane.xlu1 %9616  ;;  %9799 = vadd.xlane.f32.xlu0 %v9798_v8 }
 0x873   : > { %v9699_v18 = vsub.f32 %v22155_v35, %v9617_v9 }
 0x874   : > { %v22315_v17 = vpop.eup %19559  ;;  %v9739_v15 = vmul.f32 1.442695, %v9700_v45 }
 0x875   : > { %v9737_v12 = vmul.f32 1.442695, %v9699_v18  ;;  %v9795_v61 = vsel %vm2488_vm3, %v22315_v17, 0.0 }
 0x876   : > { %19565 = vpow2.f32 %v9739_v15  ;;  %9796 = vadd.xlane.f32.xlu1 %v9795_v61 }
 0x877   : > { %19567 = vpow2.f32 %v9737_v12 }
 0x878   : > { %v22319_v24 = vpop.eup %19561 }
 0x879   : > { %v22321_v10 = vpop.eup %19563  ;;  %v9626_v59 = vpop.xlane.xlu0 %9625  ;;  %v9804_v43 = vsel %vm2488_vm3, %v22319_v24, 0.0 }
 0x87a   : > { %v9702_v35 = vsub.f32 %v22162_v60, %v9626_v59  ;;  %v9623_v23 = vpop.xlane.xlu1 %9622  ;;  %9805 = vadd.xlane.f32.xlu0 %v9804_v43  ;;  %v9801_v7 = vsel %vm2488_vm3, %v22321_v10, 0.0 }
 0x87b   : > { %v9701_v54 = vsub.f32 %v22165_v39, %v9623_v23  ;;  %9802 = vadd.xlane.f32.xlu1 %v9801_v7 }
 0x87c   : > { %v9743_v49 = vmul.f32 1.442695, %v9702_v35 }
 0x87d   : > { %v9741_v51 = vmul.f32 1.442695, %v9701_v54 }
 0x87e   : > { %19569 = vpow2.f32 %v9743_v49 }
 0x87f   : > { %19571 = vpow2.f32 %v9741_v51 }
 0x880   : > { %v22329_v41 = vpop.eup %19565 }
 0x881   : > { %v22331_v8 = vpop.eup %19567  ;;  %v9632_v45 = vpop.xlane.xlu0 %9631  ;;  %v9810_v60 = vsel %vm2488_vm3, %v22329_v41, 0.0 }
 0x882   : > { %v9704_v9 = vsub.f32 %v22172_v48, %v9632_v45  ;;  %v9629_v18 = vpop.xlane.xlu1 %9628  ;;  %9811 = vadd.xlane.f32.xlu0 %v9810_v60  ;;  %v9807_v39 = vsel %vm2488_vm3, %v22331_v8, 0.0 }
 0x883   : > { %v9703_v15 = vsub.f32 %v22175_v20, %v9629_v18  ;;  %9808 = vadd.xlane.f32.xlu1 %v9807_v39 }
 0x884   : > { %v9747_v12 = vmul.f32 1.442695, %v9704_v9 }
 0x885   : > { %v9745_v61 = vmul.f32 1.442695, %v9703_v15 }
 0x886   : > { %19573 = vpow2.f32 %v9747_v12 }
 0x887   : > { %19575 = vpow2.f32 %v9745_v61 }
 0x888   : > { %v22339_v59 = vpop.eup %19569 }
 0x889   : > { %v22341_v43 = vpop.eup %19571  ;;  %v9638_v35 = vpop.xlane.xlu0 %9637  ;;  %v9816_v48 = vsel %vm2488_vm3, %v22339_v59, 0.0 }
 0x88a   : > { %v9706_v23 = vsub.f32 %v22182_v34, %v9638_v35  ;;  %v9635_v7 = vpop.xlane.xlu1 %9634  ;;  %9817 = vadd.xlane.f32.xlu0 %v9816_v48  ;;  %v9813_v20 = vsel %vm2488_vm3, %v22341_v43, 0.0 }
 0x88b   : > { %v9705_v54 = vsub.f32 %v22185_v6, %v9635_v7  ;;  %9814 = vadd.xlane.f32.xlu1 %v9813_v20 }
 0x88c   : > { %v9751_v49 = vmul.f32 1.442695, %v9706_v23 }
 0x88d   : > { %v9749_v51 = vmul.f32 1.442695, %v9705_v54 }
 0x88e   : > { %19577 = vpow2.f32 %v9751_v49 }
 0x88f   : > { %19579 = vpow2.f32 %v9749_v51 }
 0x890   : > { %v22349_v45 = vpop.eup %19573 }
 0x891   : > { %v22351_v60 = vpop.eup %19575  ;;  %v9644_v9 = vpop.xlane.xlu0 %9643  ;;  %v9822_v34 = vsel %vm2488_vm3, %v22349_v45, 0.0 }
 0x892   : > { %v9708_v18 = vsub.f32 %v22192_v21, %v9644_v9  ;;  %v9641_v39 = vpop.xlane.xlu1 %9640  ;;  %9823 = vadd.xlane.f32.xlu0 %v9822_v34  ;;  %v9819_v6 = vsel %vm2488_vm3, %v22351_v60, 0.0 }
 0x893   : > { %v9707_v15 = vsub.f32 %v22195_v16, %v9641_v39  ;;  %9820 = vadd.xlane.f32.xlu1 %v9819_v6 }
 0x894   : > { %v9755_v12 = vmul.f32 1.442695, %v9708_v18 }
 0x895   : > { %v9753_v61 = vmul.f32 1.442695, %v9707_v15 }
 0x896   : > { %19581 = vpow2.f32 %v9755_v12 }
 0x897   : > { %19583 = vpow2.f32 %v9753_v61 }
 0x898   : > { %v22359_v35 = vpop.eup %19577 }
 0x899   : > { %v9650_v48 = vpop.xlane.xlu0 %9649  ;;  %v9828_v23 = vsel %vm2488_vm3, %v22359_v35, 0.0  ;;  %v22363_v7 = vpop.eup %19579 }
 0x89a   : > { %v9710_v21 = vsub.f32 %v22202_v22, %v9650_v48  ;;  %v9647_v20 = vpop.xlane.xlu1 %9646  ;;  %9829 = vadd.xlane.f32.xlu1 %v9828_v23  ;;  %v9825_v51 = vsel %vm2488_vm3, %v22363_v7, 0.0 }
 0x89b   : > { %v9709_v54 = vsub.f32 %v22205_v19, %v9647_v20 }
 0x89c   : > { %v9759_v16 = vmul.f32 1.442695, %v9710_v21 }
 0x89d   : > { %v9757_v49 = vmul.f32 1.442695, %v9709_v54 }
 0x89e   : > { %19585 = vpow2.f32 %v9759_v16  ;;  %9826 = vadd.xlane.f32.xlu1 %v9825_v51 }
 0x89f   : > { %19587 = vpow2.f32 %v9757_v49 }
 0x8a0   : > { %v22369_v9 = vpop.eup %19581 }
 0x8a1   : > { %v22371_v34 = vpop.eup %19583  ;;  %v9656_v18 = vpop.xlane.xlu0 %9655  ;;  %v9834_v22 = vsel %vm2488_vm3, %v22369_v9, 0.0 }
 0x8a2   : > { %v9712_v39 = vsub.f32 %v22212_v44, %v9656_v18  ;;  %v9653_v6 = vpop.xlane.xlu1 %9652  ;;  %9835 = vadd.xlane.f32.xlu0 %v9834_v22  ;;  %v9831_v19 = vsel %vm2488_vm3, %v22371_v34, 0.0 }
 0x8a3   : > { %v9711_v15 = vsub.f32 %v22215_v50, %v9653_v6  ;;  %9832 = vadd.xlane.f32.xlu1 %v9831_v19 }
 0x8a4   : > { %v9763_v12 = vmul.f32 1.442695, %v9712_v39 }
 0x8a5   : > { %v9761_v61 = vmul.f32 1.442695, %v9711_v15 }
 0x8a6   : > { %19589 = vpow2.f32 %v9763_v12 }
 0x8a7   : > { %19591 = vpow2.f32 %v9761_v61 }
 0x8a8   : > { %v22379_v48 = vpop.eup %19585 }
 0x8a9   : > { %v9662_v23 = vpop.xlane.xlu0 %9661  ;;  %v9840_v21 = vsel %vm2488_vm3, %v22379_v48, 0.0  ;;  %v22383_v20 = vpop.eup %19587 }
 0x8aa   : > { %v9714_v44 = vsub.f32 %v22222_v47, %v9662_v23  ;;  %v9659_v54 = vpop.xlane.xlu1 %9658  ;;  %9841 = vadd.xlane.f32.xlu1 %v9840_v21  ;;  %v9837_v51 = vsel %vm2488_vm3, %v22383_v20, 0.0 }
 0x8ab   : > { %v9713_v16 = vsub.f32 %v22225_v32, %v9659_v54 }
 0x8ac   : > { %v9767_v50 = vmul.f32 1.442695, %v9714_v44 }
 0x8ad   : > { %v9765_v49 = vmul.f32 1.442695, %v9713_v16 }
 0x8ae   : > { %19593 = vpow2.f32 %v9767_v50  ;;  %9838 = vadd.xlane.f32.xlu1 %v9837_v51 }
 0x8af   : > { %19595 = vpow2.f32 %v9765_v49 }
 0x8b0   : > { %v22389_v18 = vpop.eup %19589 }
 0x8b1   : > { %v22391_v22 = vpop.eup %19591  ;;  %v9668_v39 = vpop.xlane.xlu0 %9667  ;;  %v9846_v47 = vsel %vm2488_vm3, %v22389_v18, 0.0 }
 0x8b2   : > { %v9716_v6 = vsub.f32 %v22232_v3, %v9668_v39  ;;  %v9665_v19 = vpop.xlane.xlu1 %9664  ;;  %9847 = vadd.xlane.f32.xlu0 %v9846_v47  ;;  %v9843_v32 = vsel %vm2488_vm3, %v22391_v22, 0.0 }
 0x8b3   : > { %v9715_v15 = vsub.f32 %v22235_v56, %v9665_v19  ;;  %9844 = vadd.xlane.f32.xlu1 %v9843_v32 }
 0x8b4   : > { %v9771_v12 = vmul.f32 1.442695, %v9716_v6 }
 0x8b5   : > { %v9769_v61 = vmul.f32 1.442695, %v9715_v15 }
 0x8b6   : > { %19597 = vpow2.f32 %v9771_v12 }
 0x8b7   : > { %19599 = vpow2.f32 %v9769_v61 }
 0x8b8   : > { %v22399_v23 = vpop.eup %19593 }
 0x8b9   : > { %v9674_v21 = vpop.xlane.xlu0 %9673  ;;  %v9852_v44 = vsel %vm2488_vm3, %v22399_v23, 0.0  ;;  %v22403_v54 = vpop.eup %19595 }
 0x8ba   : > { %v9718_v3 = vsub.f32 %v22242_v28, %v9674_v21  ;;  %v9671_v16 = vpop.xlane.xlu1 %9670  ;;  %9853 = vadd.xlane.f32.xlu1 %v9852_v44  ;;  %v9849_v51 = vsel %vm2488_vm3, %v22403_v54, 0.0 }
 0x8bb   : > { %v9717_v50 = vsub.f32 %v22245_v0, %v9671_v16 }
 0x8bc   : > { %v9775_v56 = vmul.f32 1.442695, %v9718_v3 }
 0x8bd   : > { %v9773_v49 = vmul.f32 1.442695, %v9717_v50 }
 0x8be   : > { %19601 = vpow2.f32 %v9775_v56  ;;  %9850 = vadd.xlane.f32.xlu1 %v9849_v51 }
 0x8bf   : > { %19603 = vpow2.f32 %v9773_v49 }
 0x8c0   : > { %v22409_v39 = vpop.eup %19597 }
 0x8c1   : > { %v9680_v47 = vpop.xlane.xlu0 %9679  ;;  %v9858_v6 = vsel %vm2488_vm3, %v22409_v39, 0.0  ;;  %v22413_v19 = vpop.eup %19599 }
 0x8c2   : > { %v9720_v28 = vsub.f32 %v22252_v53, %v9680_v47  ;;  %v9677_v32 = vpop.xlane.xlu1 %9676  ;;  %9859 = vadd.xlane.f32.xlu1 %v9858_v6  ;;  %v9855_v61 = vsel %vm2488_vm3, %v22413_v19, 0.0 }
 0x8c3   : > { %v9719_v0 = vsub.f32 %v22255_v58, %v9677_v32 }
 0x8c4   : > { %v9779_v15 = vmul.f32 1.442695, %v9720_v28 }
 0x8c5   : > { %v9777_v12 = vmul.f32 1.442695, %v9719_v0 }
 0x8c6   : > { %19605 = vpow2.f32 %v9779_v15  ;;  %9856 = vadd.xlane.f32.xlu1 %v9855_v61 }
 0x8c7   : > { %19607 = vpow2.f32 %v9777_v12 }
 0x8c8   : > { %v22419_v21 = vpop.eup %19601 }
 0x8c9   : > { %v22421_v44 = vpop.eup %19603  ;;  %v9686_v3 = vpop.xlane.xlu0 %9685  ;;  %v9864_v53 = vsel %vm2488_vm3, %v22419_v21, 0.0 }
 0x8ca   : > { %v9722_v16 = vsub.f32 %v22262_v37, %v9686_v3  ;;  %v9683_v50 = vpop.xlane.xlu1 %9682  ;;  %9865 = vadd.xlane.f32.xlu1 %v9864_v53  ;;  %v9861_v58 = vsel %vm2488_vm3, %v22421_v44, 0.0 }
 0x8cb   : > { %v9721_v56 = vsub.f32 %v22265_v2, %v9683_v50  ;;  %9862 = vadd.xlane.f32.xlu0 %v9861_v58 }
 0x8cc   : > { %v9783_v49 = vmul.f32 1.442695, %v9722_v16 }
 0x8cd   : > { %v9781_v51 = vmul.f32 1.442695, %v9721_v56 }
 0x8ce   : > { %19609 = vpow2.f32 %v9783_v49 }
 0x8cf   : > { %19611 = vpow2.f32 %v9781_v51  ;;  %v23860_v51 = vld [vmem:[#allocation2_spill] sm:$0xff] }
 0x8d0   : > { %v22429_v47 = vpop.eup %19605 }
 0x8d1   : > { %v22431_v6 = vpop.eup %19607  ;;  %v9692_v28 = vpop.xlane.xlu0 %9691  ;;  %v9870_v37 = vsel %vm2488_vm3, %v22429_v47, 0.0 }
 0x8d2   : > { %v9724_v32 = vsub.f32 %v22274_v30, %v9692_v28  ;;  %9871 = vadd.xlane.f32.xlu1 %v9870_v37  ;;  %v9867_v0 = vsel %vm2488_vm3, %v22431_v6, 0.0  ;;  %v9689_v16 = vpop.xlane.xlu1 %9688  ;;  %v23861_v28 = vld [vmem:[#allocation7_spill] sm:$0xff] }
 0x8d3   : > { %9868 = vadd.xlane.f32.xlu0 %v9867_v0 }
 0x8d4   : > { %v9787_v2 = vmul.f32 1.442695, %v9724_v32  ;;  %v9723_v32 = vsub.f32 %v22277_v46, %v9689_v16  ;;  %v23863_v46 = vld [vmem:[#allocation11_spill] sm:$0xff] }
 0x8d6   : > { %19613 = vpow2.f32 %v9787_v2 }
 0x8d8   : > { %v22438_v15 = vpop.eup %19609 }
 0x8d9   : > { %v22440_v12 = vpop.eup %19611  ;;  %v9876_v61 = vsel %vm2488_vm3, %v22438_v15, 0.0 }
 0x8da   : > { %9877 = vadd.xlane.f32.xlu1 %v9876_v61  ;;  %v9873_v3 = vsel %vm2488_vm3, %v22440_v12, 0.0  ;;  %v23862_v61 = vld [vmem:[#allocation13_spill] sm:$0xff] }
 0x8db   : > { %9874 = vadd.xlane.f32.xlu0 %v9873_v3 }
 0x8e0   : > { %v22446_v30 = vpop.eup %19613 }
 0x8e1   : > { %23859 = vst [vmem:[#allocation69_spill] sm:$0xff] %v22446_v30  ;;  %v9882_v53 = vsel %vm2488_vm3, %v22446_v30, 0.0 }
 0x8e2   : > { %9883 = vadd.xlane.f32.xlu1 %v9882_v53 }
 0x8f1   : > { %19118 = vrot.lane.b32.xlu0 %v23801_v40, %s19821_s12 }
 0x8f3   : > { %19113 = vrot.lane.b32.xlu1 %v23683_v27, %s19821_s12 }
 0x8f5   : > { %19123 = vrot.lane.b32.xlu0 %v23771_v55, %s19821_s12 }
 0x8f7   : > { %19143 = vrot.lane.b32.xlu1 %v23774_v33, %s19822_s21  ;;  %v9794_v50 = vpop.xlane.xlu0 %9793 }
 0x8f8   : > { %v9886_v58 = vadd.f32 1.0, %v9794_v50  ;;  %v9791_v56 = vpop.xlane.xlu1 %9790 }
 0x8f9   : > { %v9885_v49 = vadd.f32 1.0, %v9791_v56  ;;  %19128 = vrot.lane.b32.xlu0 %v23692_v36, %s19821_s12  ;;  %v19080_v56 = vunpack.i.l.bf16 %v22271_v13 }
 0x8fa   : > { %19615 = vrcp.f32 %v9886_v58  ;;  %v19081_v58 = vunpack.i.h.bf16 %v22271_v13 }
 0x8fb   : > { %19617 = vrcp.f32 %v9885_v49  ;;  %11729 = vrot.lane.b32.xlu1 %v23860_v51, %s19822_s21  ;;  %v9785_v49 = vmul.f32 1.442695, %v9723_v32 }
 0x8fc   : > { %v18416_v13 = vpack.c.bf16 %v19081_v58, %v19080_v56 }
 0x8ff   : > { %11818 = vrot.lane.b32.xlu1 %v23861_v28, %s19822_s21  ;;  %v9800_v37 = vpop.xlane.xlu0 %9799 }
 0x900   : > { %v9888_v0 = vadd.f32 1.0, %v9800_v37 }
 0x902   : > { %19619 = vrcp.f32 %v9888_v0 }
 0x903   : > { %v9797_v2 = vpop.xlane.xlu1 %9796  ;;  %19153 = vrot.lane.b32.xlu1 %v23862_v61, %s19822_s21 }
 0x904   : > { %v19616_v3 = vpop.eup %19615  ;;  %v9887_v53 = vadd.f32 1.0, %v9797_v2 }
 0x905   : > { %v19618_v50 = vpop.eup %19617  ;;  %v9920_v28 = vmul.f32 %v19616_v3, %v22299_v4  ;;  %v19086_v3 = vunpack.i.h.bf16 %v22281_v57 }
 0x906   : > { %19621 = vrcp.f32 %v9887_v53  ;;  %v9918_v51 = vmul.f32 %v19618_v50, %v22301_v11  ;;  %v23864_v11 = vld [vmem:[#allocation12_spill] sm:$0xff] }
 0x907   : > { %11911 = vrot.lane.b32.xlu1 %v23863_v46, %s19822_s21  ;;  %v9806_v16 = vpop.xlane.xlu0 %9805  ;;  %19623 = vpow2.f32 %v9785_v49 }
 0x908   : > { %v9890_v37 = vadd.f32 1.0, %v9806_v16  ;;  %v9803_v30 = vpop.xlane.xlu1 %9802  ;;  %17536 = vmatprep.mubr.msk.f32.mxu0 %vm2488_vm3, %v9918_v51  ;;  %v23865_v51 = vld [vmem:[#allocation19_spill] sm:$0xff]  ;;  %v19091_v16 = vunpack.i.h.bf16 %v22287_v52 }
 0x909   : > { %v9889_v2 = vadd.f32 1.0, %v9803_v30  ;;  %17537 = vmatmul.mubr.msk.f32.vlgmr.msra.gmra.mrb[128].mxu0 %vm2488_vm3, %v9920_v28  ;;  %v19085_v30 = vunpack.i.l.bf16 %v22281_v57 }
 0x90a   : > { %19625 = vrcp.f32 %v9890_v37  ;;  %18411 = vmatpush3.bf16.msra.mxu0 %v21873_v31  ;;  %v23866_v37 = vld [vmem:[#allocation17_spill] sm:$0xff] }
 0x90b   : > { %19627 = vrcp.f32 %v9889_v2  ;;  %12000 = vrot.lane.b32.xlu1 %v23864_v11, %s19822_s21  ;;  %18417 = vmatprep.subr.bf16.mxu0 %v18416_v13  ;;  %v18420_v57 = vpack.c.bf16 %v19086_v3, %v19085_v30  ;;  %v19095_v30 = vunpack.i.l.bf16 %v22285_v42 }
 0x90c   : > { %v19620_v4 = vpop.eup %19619 }
 0x90d   : > { %v9924_v56 = vmul.f32 %v19620_v4, %v22309_v62 }
 0x90f   : > { %19163 = vrot.lane.b32.xlu1 %v23711_v63, %s19822_s21  ;;  %v9812_v32 = vpop.xlane.xlu0 %9811 }
 0x910   : > { %v19622_v0 = vpop.eup %19621  ;;  %v9892_v53 = vadd.f32 1.0, %v9812_v32  ;;  %v9809_v50 = vpop.xlane.xlu1 %9808 }
 0x911   : > { %v9891_v58 = vadd.f32 1.0, %v9809_v50  ;;  %v9922_v31 = vmul.f32 %v19622_v0, %v22315_v17  ;;  %v22484_v49 = vpop.eup %19623  ;;  %v19090_v17 = vunpack.i.l.bf16 %v22287_v52  ;;  %v23867_v50 = vld [vmem:[#allocation24_spill] sm:$0xff] }
 0x912   : > { %19629 = vrcp.f32 %v9892_v53  ;;  %v9879_v11 = vsel %vm2488_vm3, %v22484_v49, 0.0 }
 0x913   : > { %19631 = vrcp.f32 %v9891_v58  ;;  %17543 = vmatprep.mubr.msk.f32.mxu1 %vm2488_vm3, %v9922_v31  ;;  %12093 = vrot.lane.b32.xlu1 %v23865_v51, %s19822_s21 }
 0x914   : > { %v19626_v28 = vpop.eup %19625  ;;  %17544 = vmatmul.mubr.msk.f32.vlgmr.msra.gmra.mrb[146].mxu1 %vm2488_vm3, %v9924_v56 }
 0x915   : > { %v19628_v46 = vpop.eup %19627  ;;  %18415 = vmatpush3.bf16.msra.mxu1 %v22076_v14  ;;  %v9928_v4 = vmul.f32 %v19626_v28, %v22319_v24  ;;  %v18424_v14 = vpack.c.bf16 %v19091_v16, %v19090_v17  ;;  %v19096_v24 = vunpack.i.h.bf16 %v22285_v42 }
 0x916   : > { %18421 = vmatprep.subr.bf16.mxu1 %v18420_v57  ;;  %v9926_v62 = vmul.f32 %v19628_v46, %v22321_v10  ;;  %v19101_v46 = vunpack.i.h.bf16 %v22291_v26 }
 0x917   : > { %12182 = vrot.lane.b32.xlu1 %v23866_v37, %s19822_s21  ;;  %v9818_v2 = vpop.xlane.xlu0 %9817  ;;  %v18428_v28 = vpack.c.bf16 %v19096_v24, %v19095_v30 }
 0x918   : > { %v9894_v32 = vadd.f32 1.0, %v9818_v2  ;;  %v9815_v0 = vpop.xlane.xlu1 %9814  ;;  %9880 = vadd.xlane.f32.xlu0 %v9879_v11  ;;  %17550 = vmatprep.mubr.msk.f32.mxu0 %vm2488_vm3, %v9926_v62 }
 0x919   : > { %v9893_v52 = vadd.f32 1.0, %v9815_v0  ;;  %17551 = vmatmul.mubr.msk.f32.vlgmr.msra.gmra.mrb[130].mxu0 %vm2488_vm3, %v9928_v4  ;;  %v19106_v4 = vunpack.i.h.bf16 %v22289_v29 }
 0x91a   : > { %19633 = vrcp.f32 %v9894_v32  ;;  %18419 = vmatpush3.bf16.msra.mxu0 %v18416_v13 }
 0x91b   : > { %19635 = vrcp.f32 %v9893_v52  ;;  %18425 = vmatprep.subr.bf16.mxu0 %v18424_v14  ;;  %19173 = vrot.lane.b32.xlu1 %v20218_v38, %s19822_s21 }
 0x91c   : > { %v19630_v10 = vpop.eup %19629 }
 0x91d   : > { %v19632_v3 = vpop.eup %19631  ;;  %v9932_v31 = vmul.f32 %v19630_v10, %v22329_v41  ;;  %v19100_v41 = vunpack.i.l.bf16 %v22291_v26 }
 0x91e   : > { %v9930_v53 = vmul.f32 %v19632_v3, %v22331_v8  ;;  %v23869_v3 = vld [vmem:[#allocation5_spill] sm:$0xff] }
 0x91f   : > { %12275 = vrot.lane.b32.xlu1 %v23867_v50, %s19822_s21  ;;  %v9824_v58 = vpop.xlane.xlu0 %9823  ;;  %v18432_v37 = vpack.c.bf16 %v19101_v46, %v19100_v41 }
 0x920   : > { %v9896_v13 = vadd.f32 1.0, %v9824_v58  ;;  %v9821_v56 = vpop.xlane.xlu1 %9820  ;;  %17557 = vmatprep.mubr.msk.f32.mxu1 %vm2488_vm3, %v9930_v53  ;;  %v23872_v53 = vld [vmem:[#allocation30_spill] sm:$0xff] }
 0x921   : > { %v9895_v51 = vadd.f32 1.0, %v9821_v56  ;;  %17558 = vmatmul.mubr.msk.f32.vlgmr.msra.gmra.mrb[148].mxu1 %vm2488_vm3, %v9932_v31  ;;  %v23873_v58 = vld [vmem:[#allocation66_spill] sm:$0xff] }
 0x922   : > { %19637 = vrcp.f32 %v9896_v13  ;;  %18423 = vmatpush3.bf16.msra.mxu1 %v18420_v57  ;;  %v19111_v31 = vunpack.i.h.bf16 %v23873_v58  ;;  %v19110_v13 = vunpack.i.l.bf16 %v23873_v58  ;;  %v23884_v58 = vld [vmem:[#allocation21_spill] sm:$0xff] }
 0x923   : > { %19639 = vrcp.f32 %v9895_v51  ;;  %18429 = vmatprep.subr.bf16.mxu1 %v18428_v28  ;;  %19183 = vrot.lane.b32.xlu1 %v20262_v1, %s19822_s21 }
 0x924   : > { %v19634_v42 = vpop.eup %19633 }
 0x925   : > { %v19636_v8 = vpop.eup %19635  ;;  %v9936_v62 = vmul.f32 %v19634_v42, %v22339_v59  ;;  %v23868_v59 = vld [vmem:[#allocation48_spill] sm:$0xff] }
 0x926   : > { %v9934_v16 = vmul.f32 %v19636_v8, %v22341_v43 }
 0x927   : > { %v9830_v17 = vpop.xlane.xlu1 %9829  ;;  %12366 = vrot.lane.b32.xlu1 %v23796_v25, %s19822_s21  ;;  %v19105_v25 = vunpack.i.l.bf16 %v22289_v29 }
 0x928   : > { %17564 = vmatprep.mubr.msk.f32.mxu0 %vm2488_vm3, %v9934_v16  ;;  %v9898_v57 = vadd.f32 1.0, %v9830_v17  ;;  %v18440_v16 = vpack.c.bf16 %v19111_v31, %v19110_v13  ;;  %v23885_v13 = vld [vmem:[#allocation46_spill] sm:$0xff] }
 0x929   : > { %17565 = vmatmul.mubr.msk.f32.vlgmr.msra.gmra.mrb[132].mxu0 %vm2488_vm3, %v9936_v62  ;;  %v18436_v29 = vpack.c.bf16 %v19106_v4, %v19105_v25  ;;  %v23876_v62 = vld [vmem:[#allocation38_spill] sm:$0xff]  ;;  %v23879_v4 = vld [vmem:[#allocation15_spill] sm:$0xff] }
 0x92a   : > { %18427 = vmatpush3.bf16.msra.mxu0 %v18424_v14  ;;  %19641 = vrcp.f32 %v9898_v57 }
 0x92b   : > { %18433 = vmatprep.subr.bf16.mxu0 %v18432_v37  ;;  %v9827_v2 = vpop.xlane.xlu1 %9826  ;;  %12455 = vrot.lane.b32.xlu1 %v23797_v5, %s19822_s21 }
 0x92c   : > { %v19638_v26 = vpop.eup %19637  ;;  %v9897_v43 = vadd.f32 1.0, %v9827_v2 }
 0x92d   : > { %v19640_v11 = vpop.eup %19639  ;;  %v9940_v5 = vmul.f32 %v19638_v26, %v22349_v45  ;;  %v23871_v45 = vld [vmem:[#allocation3_spill] sm:$0xff] }
 0x92e   : > { %19643 = vrcp.f32 %v9897_v43  ;;  %19133 = vrot.lane.b32.xlu0 %v23868_v59, %s19821_s12  ;;  %v9938_v32 = vmul.f32 %v19640_v11, %v22351_v60  ;;  %v23870_v60 = vld [vmem:[#allocation32_spill] sm:$0xff] }
 0x92f   : > { %19193 = vrot.lane.b32.xlu1 %v23683_v27, %s19822_s21  ;;  %v9836_v0 = vpop.xlane.xlu0 %9835 }
 0x930   : > { %v9900_v52 = vadd.f32 1.0, %v9836_v0  ;;  %v9833_v14 = vpop.xlane.xlu1 %9832  ;;  %17571 = vmatprep.mubr.msk.f32.mxu1 %vm2488_vm3, %v9938_v32 }
 0x931   : > { %v9899_v10 = vadd.f32 1.0, %v9833_v14  ;;  %17572 = vmatmul.mubr.msk.f32.vlgmr.msra.gmra.mrb[150].mxu1 %vm2488_vm3, %v9940_v5 }
 0x932   : > { %19645 = vrcp.f32 %v9900_v52  ;;  %18431 = vmatpush3.bf16.msra.mxu1 %v18428_v28  ;;  %19138 = vrot.lane.b32.xlu0 %v23869_v3, %s19822_s21  ;;  %v23874_v28 = vld [vmem:[#allocation10_spill] sm:$0xff]  ;;  %v23880_v52 = vld [vmem:[#allocation16_spill] sm:$0xff] }
 0x933   : > { %19647 = vrcp.f32 %v9899_v10  ;;  %18437 = vmatprep.subr.bf16.mxu1 %v18436_v29  ;;  %12548 = vrot.lane.b32.xlu1 %v23870_v60, %s19822_s21 }
 0x934   : > { %v19642_v24 = vpop.eup %19641 }
 0x935   : > { %v9944_v42 = vmul.f32 %v19642_v24, %v22359_v35 }
 0x936   : > { %11727 = vrot.lane.b32.xlu0 %v23871_v45, %s19822_s21 }
 0x937   : > { %v9842_v30 = vpop.xlane.xlu1 %9841  ;;  %12637 = vrot.lane.b32.xlu1 %v23872_v53, %s19822_s21  ;;  %v23883_v53 = vld [vmem:[#allocation42_spill] sm:$0xff] }
 0x938   : > { %v19644_v50 = vpop.eup %19643  ;;  %v9902_v56 = vadd.f32 1.0, %v9842_v30 }
 0x939   : > { %v9942_v51 = vmul.f32 %v19644_v50, %v22363_v7  ;;  %v23875_v7 = vld [vmem:[#allocation6_spill] sm:$0xff] }
 0x93a   : > { %19148 = vrot.lane.b32.xlu0 %v23874_v28, %s19822_s21  ;;  %19649 = vrcp.f32 %v9902_v56 }
 0x93b   : > { %v9839_v8 = vpop.xlane.xlu1 %9838  ;;  %19203 = vrot.lane.b32.xlu1 %v23771_v55, %s19822_s21  ;;  %17578 = vmatprep.mubr.msk.f32.mxu0 %vm2488_vm3, %v9942_v51 }
 0x93c   : > { %v19646_v46 = vpop.eup %19645  ;;  %v9901_v41 = vadd.f32 1.0, %v9839_v8  ;;  %17579 = vmatmul.mubr.msk.f32.vlgmr.msra.gmra.mrb[134].mxu0 %vm2488_vm3, %v9944_v42 }
 0x93d   : > { %v19648_v17 = vpop.eup %19647  ;;  %18435 = vmatpush3.bf16.msra.mxu0 %v18432_v37  ;;  %v9948_v2 = vmul.f32 %v19646_v46, %v22369_v9  ;;  %v23877_v37 = vld [vmem:[#allocation9_spill] sm:$0xff] }
 0x93e   : > { %19651 = vrcp.f32 %v9901_v41  ;;  %18441 = vmatprep.subr.bf16.mxu0 %v18440_v16  ;;  %11820 = vrot.lane.b32.xlu0 %v23875_v7, %s19822_s21  ;;  %v9946_v35 = vmul.f32 %v19648_v17, %v22371_v34  ;;  %v23878_v34 = vld [vmem:[#allocation36_spill] sm:$0xff] }
 0x93f   : > { %12730 = vrot.lane.b32.xlu1 %v23876_v62, %s19822_s21  ;;  %v9848_v57 = vpop.xlane.xlu0 %9847  ;;  %v23887_v41 = vld [vmem:[#allocation20_spill] sm:$0xff] }
 0x940   : > { %v9904_v26 = vadd.f32 1.0, %v9848_v57  ;;  %v9845_v43 = vpop.xlane.xlu1 %9844  ;;  %17585 = vmatprep.mubr.msk.f32.mxu1 %vm2488_vm3, %v9946_v35 }
 0x941   : > { %v9903_v11 = vadd.f32 1.0, %v9845_v43  ;;  %17586 = vmatmul.mubr.msk.f32.vlgmr.msra.gmra.mrb[152].mxu1 %vm2488_vm3, %v9948_v2  ;;  %v23890_v2 = vld [vmem:[#allocation31_spill] sm:$0xff] }
 0x942   : > { %19653 = vrcp.f32 %v9904_v26  ;;  %18439 = vmatpush3.bf16.msra.mxu1 %v18436_v29  ;;  %11909 = vrot.lane.b32.xlu0 %v23877_v37, %s19822_s21  ;;  %v23881_v29 = vld [vmem:[#allocation43_spill] sm:$0xff] }
 0x943   : > { %19655 = vrcp.f32 %v9903_v11  ;;  %12819 = vrot.lane.b32.xlu1 %v23878_v34, %s19822_s21 }
 0x944   : > { %v19650_v9 = vpop.eup %19649 }
 0x945   : > { %v9952_v14 = vmul.f32 %v19650_v9, %v22379_v48  ;;  %v23891_v9 = vld [vmem:[#allocation29_spill] sm:$0xff] }
 0x946   : > { %19158 = vrot.lane.b32.xlu0 %v23879_v4, %s19822_s21 }
 0x947   : > { %v9854_v25 = vpop.xlane.xlu1 %9853  ;;  %19213 = vrot.lane.b32.xlu1 %v23868_v59, %s19822_s21 }
 0x948   : > { %v19652_v32 = vpop.eup %19651  ;;  %v9906_v0 = vadd.f32 1.0, %v9854_v25 }
 0x949   : > { %v9950_v5 = vmul.f32 %v19652_v32, %v22383_v20  ;;  %v23882_v20 = vld [vmem:[#allocation14_spill] sm:$0xff] }
 0x94a   : > { %12002 = vrot.lane.b32.xlu0 %v23880_v52, %s19822_s21  ;;  %19657 = vrcp.f32 %v9906_v0 }
 0x94b   : > { %v9851_v10 = vpop.xlane.xlu1 %9850  ;;  %12912 = vrot.lane.b32.xlu1 %v23881_v29, %s19822_s21  ;;  %17592 = vmatprep.mubr.msk.f32.mxu0 %vm2488_vm3, %v9950_v5 }
 0x94c   : > { %v19654_v60 = vpop.eup %19653  ;;  %v9905_v45 = vadd.f32 1.0, %v9851_v10  ;;  %17593 = vmatmul.mubr.msk.f32.vlgmr.msra.gmra.mrb[136].mxu0 %vm2488_vm3, %v9952_v14 }
 0x94d   : > { %v19656_v24 = vpop.eup %19655  ;;  %18443 = vmatpush3.bf16.msra.mxu0 %v18440_v16  ;;  %v9956_v50 = vmul.f32 %v19654_v60, %v22389_v18 }
 0x94e   : > { %19659 = vrcp.f32 %v9905_v45  ;;  %12091 = vrot.lane.b32.xlu0 %v23882_v20, %s19822_s21  ;;  %v9954_v30 = vmul.f32 %v19656_v24, %v22391_v22  ;;  %v23886_v22 = vld [vmem:[#allocation22_spill] sm:$0xff] }
 0x94f   : > { %v9860_v48 = vpop.xlane.xlu1 %9859  ;;  %13003 = vrot.lane.b32.xlu1 %v23883_v53, %s19822_s21 }
 0x950   : > { %17599 = vmatprep.mubr.msk.f32.mxu1 %vm2488_vm3, %v9954_v30 }
 0x951   : > { %17600 = vmatmul.mubr.msk.f32.vlgmr.msra.gmra.mrb[154].mxu1 %vm2488_vm3, %v9956_v50 }
 0x952   : > { %19168 = vrot.lane.b32.xlu0 %v23884_v58, %s19822_s21 }
 0x953   : > { %v9857_v31 = vpop.xlane.xlu1 %9856  ;;  %13094 = vrot.lane.b32.xlu1 %v23885_v13, %s19822_s21 }
 0x954   : > { %v9907_v56 = vadd.f32 1.0, %v9857_v31  ;;  %v19658_v51 = vpop.eup %19657 }
 0x955   : > { %v9960_v16 = vmul.f32 %v19658_v51, %v22399_v23  ;;  %v23889_v23 = vld [vmem:[#allocation23_spill] sm:$0xff] }
 0x956   : > { %19661 = vrcp.f32 %v9907_v56  ;;  %12184 = vrot.lane.b32.xlu0 %v23886_v22, %s19822_s21  ;;  %v23893_v56 = vld [vmem:[#allocation35_spill] sm:$0xff] }
 0x957   : > { %19223 = vrot.lane.b32.xlu1 %v23774_v33, %s19823_s22  ;;  %v23888_v33 = vld [vmem:[#allocation26_spill] sm:$0xff]  ;;  %v9866_v17 = vpop.xlane.xlu1 %9865 }
 0x958   : > { %v19660_v18 = vpop.eup %19659  ;;  %v9863_v42 = vpop.xlane.xlu0 %9862  ;;  %v9910_v35 = vadd.f32 1.0, %v9866_v17 }
 0x959   : > { %v9909_v8 = vadd.f32 1.0, %v9863_v42  ;;  %v9958_v46 = vmul.f32 %v19660_v18, %v22403_v54 }
 0x95a   : > { %12273 = vrot.lane.b32.xlu0 %v23887_v41, %s19822_s21  ;;  %v11373_v41 = vld [vmem:[%s23470_s7 + $0x10] sm:$0xff] }
 0x95b   : > { %19663 = vrcp.f32 %v9909_v8  ;;  %19233 = vrot.lane.b32.xlu1 %v23862_v61, %s19823_s22  ;;  %17606 = vmatprep.mubr.msk.f32.mxu0 %vm2488_vm3, %v9958_v46 }
 0x95c   : > { %17607 = vmatmul.mubr.msk.f32.vlgmr.msra.gmra.mrb[138].mxu0 %vm2488_vm3, %v9960_v16  ;;  %19665 = vrcp.f32 %v9910_v35  ;;  %v23894_v16 = vld [vmem:[#allocation33_spill] sm:$0xff] }
 0x95e   : > { %19178 = vrot.lane.b32.xlu0 %v23888_v33, %s19822_s21 }
 0x95f   : > { %19248 = vrot.lane.b32.xlu1 %v23884_v58, %s19823_s22  ;;  %v9872_v61 = vpop.xlane.xlu1 %9871 }
 0x960   : > { %v19662_v54 = vpop.eup %19661  ;;  %v9869_v62 = vpop.xlane.xlu0 %9868  ;;  %v9912_v0 = vadd.f32 1.0, %v9872_v61 }
 0x961   : > { %v9962_v7 = vmul.f32 %v19662_v54, %v22413_v19  ;;  %v9908_v19 = vadd.f32 1.0, %v9860_v48  ;;  %v9911_v34 = vadd.f32 1.0, %v9869_v62  ;;  %v23898_v62 = vld [vmem:[#allocation47_spill] sm:$0xff] }
 0x962   : > { %12364 = vrot.lane.b32.xlu0 %v23889_v23, %s19822_s21  ;;  %v23897_v23 = vld [vmem:[#allocation44_spill] sm:$0xff] }
 0x963   : > { %17613 = vmatprep.mubr.msk.f32.mxu1 %vm2488_vm3, %v9962_v7 }
 0x965   : > { %v19664_v57 = vpop.eup %19663 }
 0x966   : > { %19188 = vrot.lane.b32.xlu0 %v23890_v2, %s19822_s21  ;;  %v9966_v26 = vmul.f32 %v19664_v57, %v22421_v44  ;;  %v23892_v44 = vld [vmem:[#allocation28_spill] sm:$0xff]  ;;  %v19666_v29 = vpop.eup %19665 }
 0x967   : > { %v9878_v43 = vpop.xlane.xlu1 %9877  ;;  %v9968_v24 = vmul.f32 %v19666_v29, %v22419_v21 }
 0x968   : > { %17620 = vmatprep.mubr.msk.f32.mxu0 %vm2488_vm3, %v9966_v26  ;;  %v9875_v11 = vpop.xlane.xlu0 %9874  ;;  %v9914_v25 = vadd.f32 1.0, %v9878_v43 }
 0x969   : > { %v9913_v37 = vadd.f32 1.0, %v9875_v11 }
 0x96a   : > { %12457 = vrot.lane.b32.xlu0 %v23891_v9, %s19822_s21 }
 0x96b   : > { %19667 = vrcp.f32 %v9913_v37 }
 0x96c   : > { %v19119_v32 = vpop.permute.xlu0 %19118  ;;  %19669 = vrcp.f32 %v9908_v19 }
 0x96d   : > { %v19121_v5 = vunpack.i.h.bf16 %v19119_v32  ;;  %v19120_v52 = vunpack.i.l.bf16 %v19119_v32  ;;  %19671 = vrcp.f32 %v9911_v34 }
 0x96e   : > { %12546 = vrot.lane.b32.xlu0 %v23892_v44, %s19822_s21  ;;  %19673 = vrcp.f32 %v9914_v25 }
 0x96f   : > { %v9884_v14 = vpop.xlane.xlu1 %9883  ;;  %v18448_v10 = vpack.c.bf16 %v19121_v5, %v19120_v52  ;;  %19675 = vrcp.f32 %v9912_v0 }
 0x970   : > { %v19124_v60 = vpop.permute.xlu0 %19123  ;;  %v9916_v43 = vadd.f32 1.0, %v9884_v14 }
 0x971   : > { %18449 = vmatprep.subr.bf16.mxu0 %v18448_v10  ;;  %v19126_v20 = vunpack.i.h.bf16 %v19124_v60  ;;  %v19125_v30 = vunpack.i.l.bf16 %v19124_v60 }
 0x972   : > { %19198 = vrot.lane.b32.xlu0 %v23801_v40, %s19822_s21  ;;  %18451 = vmatpush3.bf16.msra.mxu0 %v18448_v10  ;;  %19677 = vrcp.f32 %v9916_v43 }
 0x973   : > { %v19114_v45 = vpop.permute.xlu1 %19113  ;;  %v18452_v21 = vpack.c.bf16 %v19126_v20, %v19125_v30 }
 0x974   : > { %v19116_v48 = vunpack.i.h.bf16 %v19114_v45  ;;  %v19115_v53 = vunpack.i.l.bf16 %v19114_v45  ;;  %v19129_v50 = vpop.permute.xlu0 %19128  ;;  %v23900_v45 = vld [vmem:[#allocation69_spill] sm:$0xff] }
 0x975   : > { %v19668_v58 = vpop.eup %19667  ;;  %v19131_v31 = vunpack.i.h.bf16 %v19129_v50  ;;  %v19130_v13 = vunpack.i.l.bf16 %v19129_v50  ;;  %17621 = vmatmul.mubr.msk.f32.vlgmr.msra.gmra.mrb[140].mxu0 %vm2488_vm3, %v9968_v24 }
 0x976   : > { %12639 = vrot.lane.b32.xlu0 %v23893_v56, %s19822_s21  ;;  %v18444_v22 = vpack.c.bf16 %v19116_v48, %v19115_v53  ;;  %v9974_v51 = vmul.f32 %v19668_v58, %v22440_v12  ;;  %v19670_v18 = vpop.eup %19669 }
 0x977   : > { %v18456_v42 = vpack.c.bf16 %v19131_v31, %v19130_v13  ;;  %v19672_v8 = vpop.eup %19671  ;;  %v9964_v12 = vmul.f32 %v19670_v18, %v22409_v39  ;;  %v23895_v39 = vld [vmem:[#allocation39_spill] sm:$0xff] }
 0x978   : > { %18445 = vmatprep.subr.bf16.mxu1 %v18444_v22  ;;  %17634 = vmatprep.mubr.msk.f32.mxu0 %vm2488_vm3, %v9974_v51  ;;  %v19674_v46 = vpop.eup %19673  ;;  %v9970_v54 = vmul.f32 %v19672_v8, %v22431_v6  ;;  %v23896_v6 = vld [vmem:[#allocation40_spill] sm:$0xff] }
 0x979   : > { %18447 = vmatpush3.bf16.msra.mxu1 %v18444_v22  ;;  %18457 = vmatprep.subr.bf16.mxu0 %v18456_v42  ;;  %v19676_v17 = vpop.eup %19675  ;;  %v9976_v7 = vmul.f32 %v19674_v46, %v22438_v15  ;;  %v19144_v15 = vpop.permute.xlu1 %19143 }
 0x97a   : > { %12728 = vrot.lane.b32.xlu0 %v23894_v16, %s19822_s21  ;;  %18453 = vmatprep.subr.bf16.mxu1 %v18452_v21  ;;  %v9972_v35 = vmul.f32 %v19676_v17, %v22429_v47  ;;  %v19146_v10 = vunpack.i.h.bf16 %v19144_v15  ;;  %v19145_v29 = vunpack.i.l.bf16 %v19144_v15 }
 0x97b   : > { %18459 = vmatpush3.bf16.msra.mxu0 %v18456_v42 }
 0x97c   : > { %17614 = vmatmul.mubr.msk.f32.vlgmr.msra.gmra.mrb[156].mxu1 %vm2488_vm3, %v9964_v12  ;;  %17644 = vmatprep.subr.mxu0 %v11373_v41  ;;  %v19678_v5 = vpop.eup %19677  ;;  %v18470_v30 = vpack.c.bf16 %v19146_v10, %v19145_v29 }
 0x97d   : > { %18455 = vmatpush3.bf16.msra.mxu1 %v18452_v21  ;;  %17627 = vmatprep.mubr.msk.f32.mxu1 %vm2488_vm3, %v9970_v54  ;;  %v11730_v61 = vpop.permute.xlu1 %11729  ;;  %v9980_v24 = vmul.f32 %v19678_v5, %v23900_v45 }
 0x97e   : > { %17635 = vmatmul.mubr.msk.f32.vlgmr.msra.gmra.mrb[142].mxu0 %vm2488_vm3, %v9976_v7  ;;  %19208 = vrot.lane.b32.xlu0 %v23692_v36, %s19822_s21 }
 0x97f   : > { %17645 = vmatpush3.msra.mxu0 %v11373_v41 }
 0x980   : > { %17628 = vmatmul.mubr.msk.f32.vlgmr.msra.gmra.mrb[158].mxu1 %vm2488_vm3, %v9972_v35 }
 0x981   : > { %v11819_v47 = vpop.permute.xlu1 %11818 }
 0x982   : > { %12821 = vrot.lane.b32.xlu0 %v23895_v39, %s19822_s21 }
 0x985   : > { %v19154_v57 = vpop.permute.xlu1 %19153 }
 0x986   : > { %12910 = vrot.lane.b32.xlu0 %v23896_v6, %s19822_s21  ;;  %v19156_v22 = vunpack.i.h.bf16 %v19154_v57  ;;  %v19155_v51 = vunpack.i.l.bf16 %v19154_v57 }
 0x988   : > { %v18482_v8 = vpack.c.bf16 %v19156_v22, %v19155_v51 }
 0x989   : > { %v11912_v26 = vpop.permute.xlu1 %11911 }
 0x98a   : > { %13001 = vrot.lane.b32.xlu0 %v23897_v23, %s19822_s21 }
 0x98d   : > { %v12001_v19 = vpop.permute.xlu1 %12000 }
 0x98e   : > { %13092 = vrot.lane.b32.xlu0 %v23898_v62, %s19822_s21 }
 0x991   : > { %v19164_v9 = vpop.permute.xlu1 %19163 }
 0x992   : > { %19218 = vrot.lane.b32.xlu0 %v23869_v3, %s19823_s22  ;;  %v19166_v35 = vunpack.i.h.bf16 %v19164_v9  ;;  %v19165_v39 = vunpack.i.l.bf16 %v19164_v9 }
 0x994   : > { %v18494_v23 = vpack.c.bf16 %v19166_v35, %v19165_v39 }
 0x995   : > { %v22656_v44 = vpop.permute.xlu1 %12093 }
 0x996   : > { %19228 = vrot.lane.b32.xlu0 %v23874_v28, %s19823_s22 }
 0x999   : > { %v12183_v48 = vpop.permute.xlu1 %12182 }
 0x99a   : > { %19238 = vrot.lane.b32.xlu0 %v23879_v4, %s19823_s22 }
 0x99d   : > { %v22669_v31 = vpop.permute.xlu1 %19173 }
 0x99e   : > { %19243 = vrot.lane.b32.xlu0 %v23711_v63, %s19823_s22 }
 0x9a1   : > { %v22677_v18 = vpop.permute.xlu1 %12275 }
 0x9a2   : > { %19253 = vrot.lane.b32.xlu0 %v20218_v38, %s19823_s22 }
 0x9a5   : > { %v9881_v11 = vpop.xlane.xlu0 %9880  ;;  %v22685_v46 = vpop.permute.xlu1 %19183 }
 0x9a6   : > { %v9915_v37 = vadd.f32 1.0, %v9881_v11  ;;  %v19185_v45 = vunpack.i.l.bf16 %v22685_v46 }
 0x9a8   : > { %19679 = vrcp.f32 %v9915_v37 }
 0x9a9   : > { %v19134_v3 = vpop.permute.xlu0 %19133  ;;  %v22688_v54 = vpop.permute.xlu1 %12366 }
 0x9aa   : > { %v19136_v34 = vunpack.i.h.bf16 %v19134_v3  ;;  %v19135_v28 = vunpack.i.l.bf16 %v19134_v3 }
 0x9ac   : > { %v18460_v25 = vpack.c.bf16 %v19136_v34, %v19135_v28 }
 0x9ad   : > { %v19139_v32 = vpop.permute.xlu0 %19138  ;;  %v22695_v15 = vpop.permute.xlu1 %12455 }
 0x9ae   : > { %v19141_v4 = vunpack.i.h.bf16 %v19139_v32  ;;  %v19140_v0 = vunpack.i.l.bf16 %v19139_v32  ;;  %18461 = vmatprep.subr.bf16.mxu1 %v18460_v25 }
 0x9af   : > { %18463 = vmatpush3.bf16.msra.mxu1 %v18460_v25 }
 0x9b0   : > { %v18464_v63 = vpack.c.bf16 %v19141_v4, %v19140_v0  ;;  %v19176_v4 = vunpack.i.h.bf16 %v22669_v31  ;;  %v19175_v0 = vunpack.i.l.bf16 %v22669_v31 }
 0x9b1   : > { %v11728_v52 = vpop.permute.xlu0 %11727  ;;  %v19194_v43 = vpop.permute.xlu1 %19193 }
 0x9b2   : > { %v19680_v38 = vpop.eup %19679  ;;  %18466 = vmatprep.subr.msk.bf16.mxu1 %vm20068_vm2, %v18464_v63 }
 0x9b3   : > { %v9978_v60 = vmul.f32 %v19680_v38, %v22484_v49 }
 0x9b5   : > { %v19149_v20 = vpop.permute.xlu0 %19148  ;;  %17641 = vmatprep.mubr.msk.f32.mxu1 %vm2488_vm3, %v9978_v60  ;;  %v12549_v9 = vpop.permute.xlu1 %12548  ;;  %v19186_v60 = vunpack.i.h.bf16 %v22685_v46 }
 0x9b6   : > { %17642 = vmatmul.mubr.msk.f32.vlgmr.msra.gmra.mrb[160].mxu1 %vm2488_vm3, %v9980_v24  ;;  %v19151_v50 = vunpack.i.h.bf16 %v19149_v20  ;;  %v19150_v49 = vunpack.i.l.bf16 %v19149_v20 }
 0x9b7   : > { %17698 = vmatprep.mubr.msk.f32.mxu1 %vm1095_vm1, %v11728_v52  ;;  %v18506_v52 = vpack.c.bf16 %v19176_v4, %v19175_v0 }
 0x9b8   : > { %18469 = vmatpush3.bf16.xpose.msk.msra.mxu1 %vm20068_vm2, %v18464_v63  ;;  %v18476_v13 = vpack.c.bf16 %v19151_v50, %v19150_v49  ;;  %v19196_v49 = vunpack.i.h.bf16 %v19194_v43 }
 0x9b9   : > { %v11821_v53 = vpop.permute.xlu0 %11820  ;;  %18472 = vmatprep.subr.msk.bf16.mxu1 %vm20068_vm2, %v18470_v30 }
 0x9bd   : > { %v11910_v58 = vpop.permute.xlu0 %11909 }
 0x9bf   : > { %17699 = vmatmul.mubr.msk.f32.vlgmr.msra.gmra.mrb[162].mxu1 %vm1095_vm1, %v11730_v61 }
 0x9c0   : > { %18475 = vmatpush3.bf16.xpose.msk.msra.mxu1 %vm20068_vm2, %v18470_v30  ;;  %17705 = vmatprep.mubr.msk.f32.mxu1 %vm1095_vm1, %v11819_v47 }
 0x9c1   : > { %v19159_v56 = vpop.permute.xlu0 %19158  ;;  %18478 = vmatprep.subr.msk.bf16.mxu1 %vm20068_vm2, %v18476_v13 }
 0x9c2   : > { %v19161_v41 = vunpack.i.h.bf16 %v19159_v56  ;;  %v19160_v16 = vunpack.i.l.bf16 %v19159_v56 }
 0x9c4   : > { %v18488_v17 = vpack.c.bf16 %v19161_v41, %v19160_v16 }
 0x9c5   : > { %v12003_v42 = vpop.permute.xlu0 %12002 }
 0x9c7   : > { %17706 = vmatmul.mubr.msk.f32.vlgmr.msra.gmra.mrb[164].mxu1 %vm1095_vm1, %v11821_v53  ;;  %v18518_v53 = vpack.c.bf16 %v19186_v60, %v19185_v45 }
 0x9c8   : > { %18481 = vmatpush3.bf16.xpose.msk.msra.mxu1 %vm20068_vm2, %v18476_v13  ;;  %17712 = vmatprep.mubr.msk.f32.mxu1 %vm1095_vm1, %v11910_v58  ;;  %v19195_v58 = vunpack.i.l.bf16 %v19194_v43 }
 0x9c9   : > { %v12092_v21 = vpop.permute.xlu0 %12091  ;;  %18484 = vmatprep.subr.msk.bf16.mxu1 %vm20068_vm2, %v18482_v8 }
 0x9ca   : > { %v18530_v51 = vpack.c.bf16 %v19196_v49, %v19195_v58 }
 0x9cd   : > { %v19169_v12 = vpop.permute.xlu0 %19168 }
 0x9ce   : > { %v19171_v57 = vunpack.i.h.bf16 %v19169_v12 }
 0x9cf   : > { %17713 = vmatmul.mubr.msk.f32.vlgmr.msra.gmra.mrb[166].mxu1 %vm1095_vm1, %v11912_v26  ;;  %v19170_v26 = vunpack.i.l.bf16 %v19169_v12 }
 0x9d0   : > { %18487 = vmatpush3.bf16.xpose.msk.msra.mxu1 %vm20068_vm2, %v18482_v8  ;;  %17719 = vmatprep.mubr.msk.f32.mxu1 %vm1095_vm1, %v12001_v19 }
 0x9d1   : > { %v12185_v7 = vpop.permute.xlu0 %12184  ;;  %18490 = vmatprep.subr.msk.bf16.mxu1 %vm20068_vm2, %v18488_v17  ;;  %v18500_v34 = vpack.c.bf16 %v19171_v57, %v19170_v26 }
 0x9d5   : > { %v12274_v6 = vpop.permute.xlu0 %12273 }
 0x9d7   : > { %17720 = vmatmul.mubr.msk.f32.vlgmr.msra.gmra.mrb[168].mxu1 %vm1095_vm1, %v12003_v42 }
 0x9d8   : > { %18493 = vmatpush3.bf16.xpose.msk.msra.mxu1 %vm20068_vm2, %v18488_v17  ;;  %17726 = vmatprep.mubr.msk.f32.mxu1 %vm1095_vm1, %v12092_v21 }
 0x9d9   : > { %v19179_v61 = vpop.permute.xlu0 %19178  ;;  %18496 = vmatprep.subr.msk.bf16.mxu1 %vm20068_vm2, %v18494_v23 }
 0x9da   : > { %v19181_v62 = vunpack.i.h.bf16 %v19179_v61  ;;  %v19180_v47 = vunpack.i.l.bf16 %v19179_v61 }
 0x9dc   : > { %v18512_v11 = vpack.c.bf16 %v19181_v62, %v19180_v47  ;;  %v17538_v19 = vpop.f32.mrb[128].mxu0 }
 0x9dd   : > { %v12365_v37 = vpop.permute.xlu0 %12364  ;;  %v10059_v3 = vpop.f32.mrb[129].mxu0 }
 0x9de   : > { %18514 = vmatprep.subr.msk.bf16.mxu0 %vm20068_vm2, %v18512_v11  ;;  %17646 = vmatprep.mubr.msk.f32.mxu0 %vm1095_vm1, %v10059_v3 }
 0x9df   : > { %17727 = vmatmul.mubr.msk.f32.vlgmr.msra.gmra.mrb[170].mxu1 %vm1095_vm1, %v22656_v44  ;;  %17647 = vmatmul.mubr.msk.f32.vlgmr.msra.gmra.mrb[96].mxu0 %vm1095_vm1, %v17538_v19  ;;  %v22726_v44 = vpop.permute.xlu1 %12637 }
 0x9e0   : > { %18499 = vmatpush3.bf16.xpose.msk.msra.mxu1 %vm20068_vm2, %v18494_v23  ;;  %17733 = vmatprep.mubr.msk.f32.mxu1 %vm1095_vm1, %v12183_v48 }
 0x9e1   : > { %18517 = vmatpush3.bf16.xpose.msk.msra.mxu0 %vm20068_vm2, %v18512_v11  ;;  %v19189_v28 = vpop.permute.xlu0 %19188  ;;  %18502 = vmatprep.subr.msk.bf16.mxu1 %vm20068_vm2, %v18500_v34 }
 0x9e2   : > { %v19191_v25 = vunpack.i.h.bf16 %v19189_v28  ;;  %v19190_v32 = vunpack.i.l.bf16 %v19189_v28 }
 0x9e3   : > { %v19204_v48 = vpop.permute.xlu1 %19203 }
 0x9e4   : > { %v22718_v63 = vpack.c.bf16 %v19191_v25, %v19190_v32  ;;  %v19206_v8 = vunpack.i.h.bf16 %v19204_v48  ;;  %v19205_v21 = vunpack.i.l.bf16 %v19204_v48 }
 0x9e5   : > { %v22720_v5 = vpop.permute.xlu0 %12457 }
 0x9e6   : > { %18526 = vmatprep.subr.msk.bf16.mxu0 %vm20068_vm2, %v22718_v63  ;;  %v18542_v12 = vpack.c.bf16 %v19206_v8, %v19205_v21 }
 0x9e7   : > { %v17545_v38 = vpop.f32.mrb[146].mxu1  ;;  %17734 = vmatmul.mubr.msk.f32.vlgmr.msra.gmra.mrb[172].mxu1 %vm1095_vm1, %v12185_v7  ;;  %v12731_v31 = vpop.permute.xlu1 %12730 }
 0x9e8   : > { %v10146_v10 = vpop.f32.mrb[147].mxu1  ;;  %18505 = vmatpush3.bf16.xpose.msk.msra.mxu1 %vm20068_vm2, %v18500_v34  ;;  %17740 = vmatprep.mubr.msk.f32.mxu1 %vm1095_vm1, %v12274_v6 }
 0x9e9   : > { %v12547_v29 = vpop.permute.xlu0 %12546  ;;  %17649 = vmatprep.mubr.msk.f32.mxu0 %vm1095_vm1, %v10146_v10  ;;  %18508 = vmatprep.subr.msk.bf16.mxu1 %vm20068_vm2, %v18506_v52 }
 0x9ea   : > { %17650 = vmatmul.mubr.msk.f32.gmra.mrb[98].mxu0 %vm1095_vm1, %v17545_v38 }
 0x9eb   : > { %v22761_v42 = vpop.permute.xlu1 %12819 }
 0x9ec   : > { %v17552_v24 = vpop.f32.mrb[130].mxu0 }
 0x9ed   : > { %v10233_v20 = vpop.f32.mrb[131].mxu0  ;;  %v22737_v30 = vpop.permute.xlu0 %19198 }
 0x9ee   : > { %17652 = vmatprep.mubr.msk.f32.mxu0 %vm1095_vm1, %v10233_v20  ;;  %v19201_v8 = vunpack.i.h.bf16 %v22737_v30  ;;  %v19200_v21 = vunpack.i.l.bf16 %v22737_v30 }
 0x9ef   : > { %17653 = vmatmul.mubr.msk.f32.gmra.mrb[100].mxu0 %vm1095_vm1, %v17552_v24  ;;  %17741 = vmatmul.mubr.msk.f32.vlgmr.msra.gmra.mrb[174].mxu1 %vm1095_vm1, %v22677_v18  ;;  %v19214_v17 = vpop.permute.xlu1 %19213 }
 0x9f0   : > { %18511 = vmatpush3.bf16.xpose.msk.msra.mxu1 %vm20068_vm2, %v18506_v52  ;;  %17747 = vmatprep.mubr.msk.f32.mxu1 %vm1095_vm1, %v12365_v37  ;;  %v19216_v7 = vunpack.i.h.bf16 %v19214_v17  ;;  %v19215_v35 = vunpack.i.l.bf16 %v19214_v17 }
 0x9f1   : > { %v22746_v50 = vpop.permute.xlu0 %12639  ;;  %18520 = vmatprep.subr.msk.bf16.mxu1 %vm20068_vm2, %v18518_v53 }
 0x9f2   : > { %v18554_v61 = vpack.c.bf16 %v19216_v7, %v19215_v35 }
 0x9f3   : > { %v12913_v47 = vpop.permute.xlu1 %12912 }
 0x9f4   : > { %v17559_v13 = vpop.f32.mrb[148].mxu1 }
 0x9f5   : > { %v10320_v56 = vpop.f32.mrb[149].mxu1  ;;  %v12729_v22 = vpop.permute.xlu0 %12728 }
 0x9f6   : > { %17655 = vmatprep.mubr.msk.f32.mxu0 %vm1095_vm1, %v10320_v56 }
 0x9f7   : > { %17656 = vmatmul.mubr.msk.f32.gmra.mrb[102].mxu0 %vm1095_vm1, %v17559_v13  ;;  %17748 = vmatmul.mubr.msk.f32.vlgmr.msra.gmra.mrb[176].mxu1 %vm1095_vm1, %v22688_v54  ;;  %v22786_v43 = vpop.permute.xlu1 %13003 }
 0x9f8   : > { %18523 = vmatpush3.bf16.xpose.msk.msra.mxu1 %vm20068_vm2, %v18518_v53  ;;  %17761 = vmatprep.mubr.msk.f32.mxu1 %vm1095_vm1, %v12547_v29 }
 0x9f9   : > { %v22757_v18 = vpop.permute.xlu0 %19208  ;;  %18532 = vmatprep.subr.msk.bf16.mxu1 %vm20068_vm2, %v18530_v51 }
 0x9fa   : > { %v19211_v17 = vunpack.i.h.bf16 %v22757_v18 }
 0x9fb   : > { %v13095_v32 = vpop.permute.xlu1 %13094 }
 0x9fc   : > { %v17566_v46 = vpop.f32.mrb[132].mxu0 }
 0x9fd   : > { %v10407_v41 = vpop.f32.mrb[133].mxu0  ;;  %v22763_v16 = vpop.permute.xlu0 %12821 }
 0x9fe   : > { %17658 = vmatprep.mubr.msk.f32.mxu0 %vm1095_vm1, %v10407_v41  ;;  %v22824_v41 = vld [vmem:[%s23469_s6 + $0x38] sm:$0xff] }
 0x9ff   : > { %17659 = vmatmul.mubr.msk.f32.gmra.mrb[104].mxu0 %vm1095_vm1, %v17566_v46  ;;  %17762 = vmatmul.mubr.msk.f32.vlgmr.msra.gmra.mrb[178].mxu1 %vm1095_vm1, %v12549_v9  ;;  %v18536_v46 = vpack.c.bf16 %v19201_v8, %v19200_v21 }
 0xa00   : > { %18535 = vmatpush3.bf16.xpose.msk.msra.mxu1 %vm20068_vm2, %v18530_v51  ;;  %17775 = vmatprep.mubr.msk.f32.mxu1 %vm1095_vm1, %v12729_v22 }
 0xa01   : > { %v12911_v54 = vpop.permute.xlu0 %12910  ;;  %18544 = vmatprep.subr.msk.bf16.mxu1 %vm20068_vm2, %v18542_v12 }
 0xa04   : > { %v17573_v39 = vpop.f32.mrb[150].mxu1 }
 0xa05   : > { %v10494_v6 = vpop.f32.mrb[151].mxu1  ;;  %v22773_v23 = vpop.permute.xlu0 %13001 }
 0xa06   : > { %17661 = vmatprep.mubr.msk.f32.mxu0 %vm1095_vm1, %v10494_v6 }
 0xa07   : > { %17662 = vmatmul.mubr.msk.f32.gmra.mrb[106].mxu0 %vm1095_vm1, %v17573_v39  ;;  %17776 = vmatmul.mubr.msk.f32.vlgmr.msra.gmra.mrb[180].mxu1 %vm1095_vm1, %v12731_v31 }
 0xa08   : > { %18547 = vmatpush3.bf16.xpose.msk.msra.mxu1 %vm20068_vm2, %v18542_v12  ;;  %17789 = vmatprep.mubr.msk.f32.mxu1 %vm1095_vm1, %v12911_v54 }
 0xa09   : > { %v13093_v62 = vpop.permute.xlu0 %13092  ;;  %18556 = vmatprep.subr.msk.bf16.mxu1 %vm20068_vm2, %v18554_v61 }
 0xa0d   : > { %v22783_v57 = vpop.permute.xlu0 %19218 }
 0xa0f   : > { %v17580_v26 = vpop.f32.mrb[134].mxu0  ;;  %17790 = vmatmul.mubr.msk.f32.vlgmr.msra.gmra.mrb[182].mxu1 %vm1095_vm1, %v12913_v47 }
 0xa10   : > { %v10581_v11 = vpop.f32.mrb[135].mxu0  ;;  %18559 = vmatpush3.bf16.xpose.msk.msra.mxu1 %vm20068_vm2, %v18554_v61  ;;  %17803 = vmatprep.mubr.msk.f32.mxu1 %vm1095_vm1, %v13093_v62  ;;  %v19221_v61 = vunpack.i.h.bf16 %v22783_v57  ;;  %v19220_v62 = vunpack.i.l.bf16 %v22783_v57 }
 0xa11   : > { %v19229_v19 = vpop.permute.xlu0 %19228  ;;  %17664 = vmatprep.mubr.msk.f32.mxu0 %vm1095_vm1, %v10581_v11 }
 0xa12   : > { %v19231_v37 = vunpack.i.h.bf16 %v19229_v19  ;;  %v19230_v3 = vunpack.i.l.bf16 %v19229_v19  ;;  %17665 = vmatmul.mubr.msk.f32.gmra.mrb[108].mxu0 %vm1095_vm1, %v17580_v26  ;;  %v19224_v26 = vpop.permute.xlu1 %19223 }
 0xa14   : > { %v18568_v34 = vpack.c.bf16 %v19231_v37, %v19230_v3  ;;  %v17587_v28 = vpop.f32.mrb[152].mxu1  ;;  %v19226_v3 = vunpack.i.h.bf16 %v19224_v26 }
 0xa15   : > { %v10668_v9 = vpop.f32.mrb[153].mxu1  ;;  %v19239_v25 = vpop.permute.xlu0 %19238 }
 0xa16   : > { %v19241_v4 = vunpack.i.h.bf16 %v19239_v25  ;;  %v19240_v0 = vunpack.i.l.bf16 %v19239_v25  ;;  %17667 = vmatprep.mubr.msk.f32.mxu0 %vm1095_vm1, %v10668_v9  ;;  %18569 = vmatprep.subr.bf16.mxu1 %v18568_v34 }
 0xa17   : > { %17668 = vmatmul.mubr.msk.f32.gmra.mrb[110].mxu0 %vm1095_vm1, %v17587_v28  ;;  %17804 = vmatmul.mubr.msk.f32.vlgmr.msra.gmra.mrb[184].mxu1 %vm1095_vm1, %v13095_v32 }
 0xa18   : > { %v22796_v52 = vpack.c.bf16 %v19241_v4, %v19240_v0  ;;  %18571 = vmatpush3.bf16.msra.mxu1 %v18568_v34  ;;  %v19225_v34 = vunpack.i.l.bf16 %v19224_v26 }
 0xa1a   : > { %18577 = vmatprep.subr.bf16.mxu1 %v22796_v52  ;;  %v22886_v28 = vpack.c.bf16 %v19226_v3, %v19225_v34 }
 0xa1f   : > { %v17594_v38 = vpop.f32.mrb[136].mxu0 }
 0xa20   : > { %v10755_v10 = vpop.f32.mrb[137].mxu0 }
 0xa21   : > { %17670 = vmatprep.mubr.msk.f32.mxu0 %vm1095_vm1, %v10755_v10 }
 0xa22   : > { %17671 = vmatmul.mubr.msk.f32.gmra.mrb[112].mxu0 %vm1095_vm1, %v17594_v38 }
 0xa24   : > { %v17601_v29 = vpop.f32.mrb[154].mxu1 }
 0xa25   : > { %v10842_v60 = vpop.f32.mrb[155].mxu1 }
 0xa26   : > { %17673 = vmatprep.mubr.msk.f32.mxu0 %vm1095_vm1, %v10842_v60 }
 0xa27   : > { %17674 = vmatmul.mubr.msk.f32.gmra.mrb[114].mxu0 %vm1095_vm1, %v17601_v29 }
 0xa2f   : > { %v17608_v45 = vpop.f32.mrb[138].mxu0 }
 0xa30   : > { %v10929_v24 = vpop.f32.mrb[139].mxu0 }
 0xa31   : > { %17676 = vmatprep.mubr.msk.f32.mxu0 %vm1095_vm1, %v10929_v24 }
 0xa32   : > { %17677 = vmatmul.mubr.msk.f32.gmra.mrb[116].mxu0 %vm1095_vm1, %v17608_v45 }
 0xa48   : > { %v17622_v20 = vpop.f32.mrb[140].mxu0 }
 0xa49   : > { %v11103_v48 = vpop.f32.mrb[141].mxu0 }
 0xa4f   : > { %v17615_v53 = vpop.f32.mrb[156].mxu1 }
 0xa50   : > { %v11016_v49 = vpop.f32.mrb[157].mxu1 }
 0xa51   : > { %v17636_v58 = vpop.f32.mrb[142].mxu0  ;;  %17679 = vmatprep.mubr.msk.f32.mxu0 %vm1095_vm1, %v11016_v49 }
 0xa52   : > { %v11277_v31 = vpop.f32.mrb[143].mxu0  ;;  %17680 = vmatmul.mubr.msk.f32.gmra.mrb[118].mxu0 %vm1095_vm1, %v17615_v53 }
 0xa53   : > { %v17629_v13 = vpop.f32.mrb[158].mxu1  ;;  %17682 = vmatprep.mubr.msk.f32.mxu0 %vm1095_vm1, %v11103_v48 }
 0xa54   : > { %v11190_v56 = vpop.f32.mrb[159].mxu1 }
 0xa56   : > { %17683 = vmatmul.mubr.msk.f32.gmra.mrb[120].mxu0 %vm1095_vm1, %v17622_v20 }
 0xa57   : > { %17685 = vmatprep.mubr.msk.f32.mxu0 %vm1095_vm1, %v11190_v56 }
 0xa5a   : > { %17686 = vmatmul.mubr.msk.f32.gmra.mrb[122].mxu0 %vm1095_vm1, %v17629_v13 }
 0xa5b   : > { %17688 = vmatprep.mubr.msk.f32.mxu0 %vm1095_vm1, %v11277_v31 }
 0xa5e   : > { %17689 = vmatmul.mubr.msk.f32.gmra.mrb[124].mxu0 %vm1095_vm1, %v17636_v58 }
 0xa89   : > { %v17643_v22 = vpop.f32.mrb[160].mxu1 }
 0xa8a   : > { %v11364_v51 = vpop.f32.mrb[161].mxu1 }
 0xa8b   : > { %17691 = vmatprep.mubr.msk.f32.mxu0 %vm1095_vm1, %v11364_v51 }
 0xa8c   : > { %17692 = vmatmul.mubr.msk.f32.gmra.mrb[126].mxu0 %vm1095_vm1, %v17643_v22 }
 0xa8d   : > { %17754 = vmatprep.mubr.msk.f32.mxu0 %vm1095_vm1, %v22695_v15  ;;  %v22834_v15 = vld [vmem:[%s23469_s6 + $0x30] sm:$0xff] }
 0xa90   : > { %17755 = vmatmul.mubr.msk.f32.vlgmr.msra.gmra.mrb[144].mxu0 %vm1095_vm1, %v22720_v5 }
 0xa91   : > { %18529 = vmatpush3.bf16.xpose.msk.msra.mxu0 %vm20068_vm2, %v22718_v63  ;;  %17768 = vmatprep.mubr.msk.f32.mxu0 %vm1095_vm1, %v22726_v44  ;;  %v19210_v63 = vunpack.i.l.bf16 %v22757_v18 }
 0xa92   : > { %18538 = vmatprep.subr.msk.bf16.mxu0 %vm20068_vm2, %v18536_v46  ;;  %v17700_v5 = vpop.f32.mrb[162].mxu1 }
 0xa93   : > { %v22839_v30 = vadd.f32 %v17700_v5, %v22824_v41  ;;  %v11809_v12 = vpop.f32.mrb[163].mxu1  ;;  %v18548_v35 = vpack.c.bf16 %v19211_v17, %v19210_v63 }
 0xa94   : > { %v22844_v54 = vadd.f32 %v11809_v12, %v22834_v15 }
 0xa95   : > { %v13186_v44 = vsel %vm2488_vm3, %v22839_v30, -inf }
 0xa96   : > { %13187 = vmax.xlane.f32.xlu1 %v13186_v44  ;;  %v13183_v7 = vsel %vm2488_vm3, %v22844_v54, -inf }
 0xa97   : > { %13184 = vmax.xlane.f32.xlu0 %v13183_v7 }
 0xa98   : > { %17769 = vmatmul.mubr.msk.f32.vlgmr.msra.gmra.mrb[146].mxu0 %vm1095_vm1, %v22746_v50 }
 0xa99   : > { %18541 = vmatpush3.bf16.xpose.msk.msra.mxu0 %vm20068_vm2, %v18536_v46  ;;  %17782 = vmatprep.mubr.msk.f32.mxu0 %vm1095_vm1, %v22761_v42  ;;  %v18560_v42 = vpack.c.bf16 %v19221_v61, %v19220_v62 }
 0xa9a   : > { %18550 = vmatprep.subr.msk.bf16.mxu0 %vm20068_vm2, %v18548_v35  ;;  %v17707_v18 = vpop.f32.mrb[164].mxu1 }
 0xa9b   : > { %v22859_v39 = vadd.f32 %v17707_v18, %v22824_v41  ;;  %v11900_v6 = vpop.f32.mrb[165].mxu1 }
 0xa9c   : > { %v22864_v50 = vadd.f32 %v11900_v6, %v22834_v15 }
 0xa9d   : > { %v13192_v47 = vsel %vm2488_vm3, %v22859_v39, -inf }
 0xa9e   : > { %13193 = vmax.xlane.f32.xlu0 %v13192_v47  ;;  %v13189_v57 = vsel %vm2488_vm3, %v22864_v50, -inf }
 0xaa0   : > { %17783 = vmatmul.mubr.msk.f32.vlgmr.msra.gmra.mrb[148].mxu0 %vm1095_vm1, %v22763_v16 }
 0xaa1   : > { %18553 = vmatpush3.bf16.xpose.msk.msra.mxu0 %vm20068_vm2, %v18548_v35  ;;  %17796 = vmatprep.mubr.msk.f32.mxu0 %vm1095_vm1, %v22773_v23 }
 0xaa2   : > { %18561 = vmatprep.subr.bf16.mxu0 %v18560_v42  ;;  %v17714_v11 = vpop.f32.mrb[166].mxu1  ;;  %13190 = vmax.xlane.f32.xlu0 %v13189_v57 }
 0xaa3   : > { %v22877_v19 = vadd.f32 %v17714_v11, %v22824_v41  ;;  %v11991_v37 = vpop.f32.mrb[167].mxu1 }
 0xaa4   : > { %v22880_v16 = vadd.f32 %v11991_v37, %v22834_v15 }
 0xaa5   : > { %v13198_v14 = vsel %vm2488_vm3, %v22877_v19, -inf }
 0xaa6   : > { %13199 = vmax.xlane.f32.xlu0 %v13198_v14  ;;  %v13195_v23 = vsel %vm2488_vm3, %v22880_v16, -inf }
 0xaa7   : > { %13196 = vmax.xlane.f32.xlu1 %v13195_v23 }
 0xaa8   : > { %17797 = vmatmul.mubr.msk.f32.vlgmr.msra.gmra.mrb[150].mxu0 %vm1095_vm1, %v22786_v43 }
 0xaa9   : > { %18563 = vmatpush3.bf16.msra.mxu0 %v18560_v42 }
 0xaaa   : > { %18565 = vmatprep.subr.bf16.mxu0 %v22886_v28  ;;  %v17721_v9 = vpop.f32.mrb[168].mxu1 }
 0xaab   : > { %v22892_v25 = vadd.f32 %v17721_v9, %v22824_v41  ;;  %v12082_v32 = vpop.f32.mrb[169].mxu1 }
 0xaac   : > { %v22895_v4 = vadd.f32 %v12082_v32, %v22834_v15 }
 0xaad   : > { %v13204_v0 = vsel %vm2488_vm3, %v22892_v25, -inf }
 0xaae   : > { %13205 = vmax.xlane.f32.xlu0 %v13204_v0  ;;  %v13201_v38 = vsel %vm2488_vm3, %v22895_v4, -inf }
 0xaaf   : > { %13202 = vmax.xlane.f32.xlu1 %v13201_v38 }
 0xab2   : > { %v17728_v43 = vpop.f32.mrb[170].mxu1 }
 0xab3   : > { %v22902_v10 = vadd.f32 %v17728_v43, %v22824_v41  ;;  %v12173_v29 = vpop.f32.mrb[171].mxu1 }
 0xab4   : > { %v22905_v60 = vadd.f32 %v12173_v29, %v22834_v15 }
 0xab5   : > { %v13210_v45 = vsel %vm2488_vm3, %v22902_v10, -inf }
 0xab6   : > { %13211 = vmax.xlane.f32.xlu0 %v13210_v45  ;;  %v13207_v24 = vsel %vm2488_vm3, %v22905_v60, -inf }
 0xab7   : > { %13208 = vmax.xlane.f32.xlu1 %v13207_v24 }
 0xaba   : > { %v17735_v20 = vpop.f32.mrb[172].mxu1 }
 0xabb   : > { %v22912_v48 = vadd.f32 %v17735_v20, %v22824_v41  ;;  %v12264_v53 = vpop.f32.mrb[173].mxu1  ;;  %v22981_v20 = vpop.permute.xlu1 %19233 }
 0xabc   : > { %v22915_v49 = vadd.f32 %v12264_v53, %v22834_v15  ;;  %v22983_v53 = vpop.permute.xlu0 %19243 }
 0xabd   : > { %v13216_v58 = vsel %vm2488_vm3, %v22912_v48, -inf }
 0xabe   : > { %13217 = vmax.xlane.f32.xlu0 %v13216_v58  ;;  %v13213_v31 = vsel %vm2488_vm3, %v22915_v49, -inf }
 0xabf   : > { %13214 = vmax.xlane.f32.xlu1 %v13213_v31  ;;  %v22985_v58 = vpop.permute.xlu1 %19248 }
 0xac0   : > { %v22987_v31 = vpop.permute.xlu0 %19253 }
 0xac2   : > { %v17742_v13 = vpop.f32.mrb[174].mxu1 }
 0xac3   : > { %v22922_v56 = vadd.f32 %v17742_v13, %v22824_v41  ;;  %v12355_v22 = vpop.f32.mrb[175].mxu1 }
 0xac4   : > { %v22925_v51 = vadd.f32 %v12355_v22, %v22834_v15 }
 0xac5   : > { %v13222_v8 = vsel %vm2488_vm3, %v22922_v56, -inf }
 0xac6   : > { %13223 = vmax.xlane.f32.xlu0 %v13222_v8  ;;  %v13219_v21 = vsel %vm2488_vm3, %v22925_v51, -inf }
 0xac7   : > { %13220 = vmax.xlane.f32.xlu1 %v13219_v21 }
 0xaca   : > { %v17749_v46 = vpop.f32.mrb[176].mxu1 }
 0xacb   : > { %v22932_v5 = vadd.f32 %v17749_v46, %v22824_v41  ;;  %v12446_v12 = vpop.f32.mrb[177].mxu1 }
 0xacc   : > { %v22935_v17 = vadd.f32 %v12446_v12, %v22834_v15 }
 0xacd   : > { %v13228_v63 = vsel %vm2488_vm3, %v22932_v5, -inf }
 0xace   : > { %13229 = vmax.xlane.f32.xlu0 %v13228_v63  ;;  %v13225_v44 = vsel %vm2488_vm3, %v22935_v17, -inf }
 0xacf   : > { %13226 = vmax.xlane.f32.xlu1 %v13225_v44 }
 0xad2   : > { %v17763_v7 = vpop.f32.mrb[178].mxu1 }
 0xad3   : > { %v22942_v35 = vadd.f32 %v17763_v7, %v22824_v41  ;;  %v12628_v18 = vpop.f32.mrb[179].mxu1 }
 0xad4   : > { %v22945_v6 = vadd.f32 %v12628_v18, %v22834_v15 }
 0xad5   : > { %v13240_v61 = vsel %vm2488_vm3, %v22942_v35, -inf }
 0xad6   : > { %13241 = vmax.xlane.f32.xlu0 %v13240_v61  ;;  %v13237_v62 = vsel %vm2488_vm3, %v22945_v6, -inf }
 0xad7   : > { %13238 = vmax.xlane.f32.xlu1 %v13237_v62 }
 0xada   : > { %v17777_v47 = vpop.f32.mrb[180].mxu1 }
 0xadb   : > { %v22952_v42 = vadd.f32 %v17777_v47, %v22824_v41  ;;  %v12810_v26 = vpop.f32.mrb[181].mxu1 }
 0xadc   : > { %v22955_v57 = vadd.f32 %v12810_v26, %v22834_v15 }
 0xadd   : > { %v13252_v11 = vsel %vm2488_vm3, %v22952_v42, -inf }
 0xade   : > { %13253 = vmax.xlane.f32.xlu0 %v13252_v11  ;;  %v13249_v37 = vsel %vm2488_vm3, %v22955_v57, -inf }
 0xadf   : > { %13250 = vmax.xlane.f32.xlu1 %v13249_v37 }
 0xae2   : > { %v17791_v3 = vpop.f32.mrb[182].mxu1 }
 0xae3   : > { %v22962_v34 = vadd.f32 %v17791_v3, %v22824_v41  ;;  %v12992_v14 = vpop.f32.mrb[183].mxu1 }
 0xae4   : > { %v22965_v23 = vadd.f32 %v12992_v14, %v22834_v15 }
 0xae5   : > { %v13264_v9 = vsel %vm2488_vm3, %v22962_v34, -inf }
 0xae6   : > { %13265 = vmax.xlane.f32.xlu0 %v13264_v9  ;;  %v13261_v32 = vsel %vm2488_vm3, %v22965_v23, -inf }
 0xae7   : > { %13262 = vmax.xlane.f32.xlu1 %v13261_v32 }
 0xaea   : > { %v17805_v0 = vpop.f32.mrb[184].mxu1 }
 0xaeb   : > { %v22972_v38 = vadd.f32 %v17805_v0, %v22824_v41  ;;  %v13174_v43 = vpop.f32.mrb[185].mxu1 }
 0xaec   : > { %v22975_v29 = vadd.f32 %v13174_v43, %v22834_v15 }
 0xaed   : > { %v13276_v45 = vsel %vm2488_vm3, %v22972_v38, -inf }
 0xaee   : > { %13277 = vmax.xlane.f32.xlu0 %v13276_v45  ;;  %v13273_v24 = vsel %vm2488_vm3, %v22975_v29, -inf }
 0xaef   : > { %13274 = vmax.xlane.f32.xlu1 %v13273_v24 }
 0xb23   : > { %v13188_v13 = vpop.xlane.xlu1 %13187 }
 0xb24   : > { %v13280_v22 = vsub.f32 %v22839_v30, %v13188_v13  ;;  %v13185_v8 = vpop.xlane.xlu0 %13184 }
 0xb25   : > { %v13279_v21 = vsub.f32 %v22844_v54, %v13185_v8 }
 0xb26   : > { %v13313_v46 = vmul.f32 1.442695, %v13280_v22 }
 0xb27   : > { %v13311_v12 = vmul.f32 1.442695, %v13279_v21 }
 0xb28   : > { %19681 = vpow2.f32 %v13313_v46 }
 0xb29   : > { %19683 = vpow2.f32 %v13311_v12 }
 0xb2b   : > { %v13194_v63 = vpop.xlane.xlu0 %13193 }
 0xb2c   : > { %v13282_v44 = vsub.f32 %v22859_v39, %v13194_v63 }
 0xb2e   : > { %v13317_v7 = vmul.f32 1.442695, %v13282_v44 }
 0xb2f   : > { %v13191_v18 = vpop.xlane.xlu0 %13190 }
 0xb30   : > { %19685 = vpow2.f32 %v13317_v7  ;;  %v13281_v61 = vsub.f32 %v22864_v50, %v13191_v18 }
 0xb32   : > { %v22993_v62 = vpop.eup %19681  ;;  %v13315_v47 = vmul.f32 1.442695, %v13281_v61 }
 0xb33   : > { %v22995_v26 = vpop.eup %19683  ;;  %v13200_v30 = vpop.xlane.xlu0 %13199  ;;  %v13378_v54 = vsel %vm2488_vm3, %v22993_v62, 0.0 }
 0xb34   : > { %19687 = vpow2.f32 %v13315_v47  ;;  %v13284_v11 = vsub.f32 %v22877_v19, %v13200_v30  ;;  %v13197_v37 = vpop.xlane.xlu1 %13196  ;;  %13379 = vadd.xlane.f32.xlu0 %v13378_v54  ;;  %v13375_v39 = vsel %vm2488_vm3, %v22995_v26, 0.0 }
 0xb35   : > { %v13283_v3 = vsub.f32 %v22880_v16, %v13197_v37  ;;  %13376 = vadd.xlane.f32.xlu1 %v13375_v39 }
 0xb36   : > { %v13321_v50 = vmul.f32 1.442695, %v13284_v11 }
 0xb37   : > { %v13319_v14 = vmul.f32 1.442695, %v13283_v3 }
 0xb38   : > { %19689 = vpow2.f32 %v13321_v50 }
 0xb39   : > { %19691 = vpow2.f32 %v13319_v14 }
 0xb3a   : > { %v23003_v9 = vpop.eup %19685 }
 0xb3b   : > { %v13206_v32 = vpop.xlane.xlu0 %13205  ;;  %v13384_v0 = vsel %vm2488_vm3, %v23003_v9, 0.0 }
 0xb3c   : > { %v13286_v19 = vsub.f32 %v22892_v25, %v13206_v32  ;;  %v13203_v43 = vpop.xlane.xlu1 %13202  ;;  %13385 = vadd.xlane.f32.xlu0 %v13384_v0 }
 0xb3d   : > { %v13285_v45 = vsub.f32 %v22895_v4, %v13203_v43 }
 0xb3e   : > { %v23009_v24 = vpop.eup %19687  ;;  %v13325_v16 = vmul.f32 1.442695, %v13286_v19 }
 0xb3f   : > { %v13323_v13 = vmul.f32 1.442695, %v13285_v45  ;;  %v13381_v22 = vsel %vm2488_vm3, %v23009_v24, 0.0 }
 0xb40   : > { %19693 = vpow2.f32 %v13325_v16  ;;  %13382 = vadd.xlane.f32.xlu1 %v13381_v22 }
 0xb41   : > { %19695 = vpow2.f32 %v13323_v13 }
 0xb42   : > { %v23013_v8 = vpop.eup %19689 }
 0xb43   : > { %v23015_v21 = vpop.eup %19691  ;;  %v13212_v46 = vpop.xlane.xlu0 %13211  ;;  %v13390_v25 = vsel %vm2488_vm3, %v23013_v8, 0.0 }
 0xb44   : > { %v13288_v4 = vsub.f32 %v22902_v10, %v13212_v46  ;;  %v13209_v12 = vpop.xlane.xlu1 %13208  ;;  %13391 = vadd.xlane.f32.xlu0 %v13390_v25  ;;  %v13387_v63 = vsel %vm2488_vm3, %v23015_v21, 0.0 }
 0xb45   : > { %v13287_v44 = vsub.f32 %v22905_v60, %v13209_v12  ;;  %13388 = vadd.xlane.f32.xlu1 %v13387_v63 }
 0xb46   : > { %v13329_v7 = vmul.f32 1.442695, %v13288_v4 }
 0xb47   : > { %v13327_v18 = vmul.f32 1.442695, %v13287_v44 }
 0xb48   : > { %19697 = vpow2.f32 %v13329_v7 }
 0xb49   : > { %19699 = vpow2.f32 %v13327_v18 }
 0xb4a   : > { %v23023_v61 = vpop.eup %19693 }
 0xb4b   : > { %v23025_v47 = vpop.eup %19695  ;;  %v13218_v30 = vpop.xlane.xlu0 %13217  ;;  %v13396_v10 = vsel %vm2488_vm3, %v23023_v61, 0.0 }
 0xb4c   : > { %v13290_v54 = vsub.f32 %v22912_v48, %v13218_v30  ;;  %v13215_v11 = vpop.xlane.xlu1 %13214  ;;  %13397 = vadd.xlane.f32.xlu0 %v13396_v10  ;;  %v13393_v60 = vsel %vm2488_vm3, %v23025_v47, 0.0 }
 0xb4d   : > { %v13289_v37 = vsub.f32 %v22915_v49, %v13215_v11  ;;  %13394 = vadd.xlane.f32.xlu1 %v13393_v60 }
 0xb4e   : > { %v13333_v39 = vmul.f32 1.442695, %v13290_v54 }
 0xb4f   : > { %v13331_v3 = vmul.f32 1.442695, %v13289_v37 }
 0xb50   : > { %19701 = vpow2.f32 %v13333_v39 }
 0xb51   : > { %19703 = vpow2.f32 %v13331_v3 }
 0xb52   : > { %v23033_v50 = vpop.eup %19697 }
 0xb53   : > { %v23035_v14 = vpop.eup %19699  ;;  %v13224_v32 = vpop.xlane.xlu0 %13223  ;;  %v13402_v48 = vsel %vm2488_vm3, %v23033_v50, 0.0 }
 0xb54   : > { %v13292_v0 = vsub.f32 %v22922_v56, %v13224_v32  ;;  %v13221_v19 = vpop.xlane.xlu1 %13220  ;;  %13403 = vadd.xlane.f32.xlu0 %v13402_v48  ;;  %v13399_v49 = vsel %vm2488_vm3, %v23035_v14, 0.0 }
 0xb55   : > { %v13291_v43 = vsub.f32 %v22925_v51, %v13221_v19  ;;  %13400 = vadd.xlane.f32.xlu1 %v13399_v49 }
 0xb56   : > { %v13337_v45 = vmul.f32 1.442695, %v13292_v0 }
 0xb57   : > { %v13335_v16 = vmul.f32 1.442695, %v13291_v43 }
 0xb58   : > { %19705 = vpow2.f32 %v13337_v45 }
 0xb59   : > { %19707 = vpow2.f32 %v13335_v16 }
 0xb5a   : > { %v23043_v13 = vpop.eup %19701 }
 0xb5b   : > { %v23045_v22 = vpop.eup %19703  ;;  %v13230_v46 = vpop.xlane.xlu0 %13229  ;;  %v13408_v56 = vsel %vm2488_vm3, %v23043_v13, 0.0 }
 0xb5c   : > { %v13294_v25 = vsub.f32 %v22932_v5, %v13230_v46  ;;  %v13227_v4 = vpop.xlane.xlu1 %13226  ;;  %13409 = vadd.xlane.f32.xlu0 %v13408_v56  ;;  %v13405_v51 = vsel %vm2488_vm3, %v23045_v22, 0.0 }
 0xb5d   : > { %v13293_v12 = vsub.f32 %v22935_v17, %v13227_v4  ;;  %13406 = vadd.xlane.f32.xlu1 %v13405_v51 }
 0xb5e   : > { %v13341_v63 = vmul.f32 1.442695, %v13294_v25 }
 0xb5f   : > { %v13339_v44 = vmul.f32 1.442695, %v13293_v12 }
 0xb60   : > { %19709 = vpow2.f32 %v13341_v63 }
 0xb61   : > { %19711 = vpow2.f32 %v13339_v44 }
 0xb62   : > { %v23053_v7 = vpop.eup %19705 }
 0xb63   : > { %v13242_v18 = vpop.xlane.xlu0 %13241  ;;  %v17756_v30 = vpop.f32.mrb[144].mxu0  ;;  %v13414_v10 = vsel %vm2488_vm3, %v23053_v7, 0.0 }
 0xb64   : > { %v23057_v5 = vpop.eup %19707  ;;  %v13298_v54 = vsub.f32 %v22942_v35, %v13242_v18  ;;  %v23061_v11 = vadd.f32 %v17756_v30, %v22824_v41  ;;  %v13239_v17 = vpop.xlane.xlu1 %13238  ;;  %13415 = vadd.xlane.f32.xlu1 %v13414_v10 }
 0xb65   : > { %v12537_v60 = vpop.f32.mrb[145].mxu0  ;;  %v13297_v37 = vsub.f32 %v22945_v6, %v13239_v17  ;;  %v13411_v35 = vsel %vm2488_vm3, %v23057_v5, 0.0 }
 0xb66   : > { %v13349_v39 = vmul.f32 1.442695, %v13298_v54  ;;  %v13234_v3 = vsel %vm2488_vm3, %v23061_v11, -inf  ;;  %v23067_v48 = vadd.f32 %v12537_v60, %v22834_v15 }
 0xb67   : > { %v13347_v32 = vmul.f32 1.442695, %v13297_v37  ;;  %13235 = vmax.xlane.f32.xlu0 %v13234_v3 }
 0xb68   : > { %19713 = vpow2.f32 %v13349_v39  ;;  %13412 = vadd.xlane.f32.xlu1 %v13411_v35  ;;  %v13231_v43 = vsel %vm2488_vm3, %v23067_v48, -inf }
 0xb69   : > { %19715 = vpow2.f32 %v13347_v32 }
 0xb6a   : > { %v23071_v0 = vpop.eup %19709 }
 0xb6b   : > { %v17770_v19 = vpop.f32.mrb[146].mxu0  ;;  %v13254_v49 = vpop.xlane.xlu0 %13253  ;;  %v13420_v6 = vsel %vm2488_vm3, %v23071_v0, 0.0 }
 0xb6c   : > { %v23077_v45 = vpop.eup %19711  ;;  %v23080_v16 = vadd.f32 %v17770_v19, %v22824_v41  ;;  %v13302_v46 = vsub.f32 %v22952_v42, %v13254_v49  ;;  %v12719_v56 = vpop.f32.mrb[147].mxu0  ;;  %13421 = vadd.xlane.f32.xlu0 %v13420_v6  ;;  %13232 = vmax.xlane.f32.xlu1 %v13231_v43 }
 0xb6d   : > { %v13251_v25 = vpop.xlane.xlu1 %13250  ;;  %v23085_v12 = vadd.f32 %v12719_v56, %v22834_v15  ;;  %v13417_v44 = vsel %vm2488_vm3, %v23077_v45, 0.0 }
 0xb6e   : > { %v13357_v4 = vmul.f32 1.442695, %v13302_v46  ;;  %v13301_v51 = vsub.f32 %v22955_v57, %v13251_v25  ;;  %v13246_v63 = vsel %vm2488_vm3, %v23080_v16, -inf }
 0xb6f   : > { %v13243_v57 = vsel %vm2488_vm3, %v23085_v12, -inf }
 0xb70   : > { %13247 = vmax.xlane.f32.xlu0 %v13246_v63  ;;  %13418 = vadd.xlane.f32.xlu1 %v13417_v44  ;;  %19717 = vpow2.f32 %v13357_v4  ;;  %v13355_v42 = vmul.f32 1.442695, %v13301_v51 }
 0xb72   : > { %v23091_v18 = vpop.eup %19713  ;;  %19719 = vpow2.f32 %v13355_v42 }
 0xb73   : > { %v17784_v30 = vpop.f32.mrb[148].mxu0  ;;  %v13432_v10 = vsel %vm2488_vm3, %v23091_v18, 0.0  ;;  %v23097_v54 = vpop.eup %19715 }
 0xb74   : > { %v23100_v17 = vadd.f32 %v17784_v30, %v22824_v41  ;;  %v12901_v60 = vpop.f32.mrb[149].mxu0  ;;  %13433 = vadd.xlane.f32.xlu0 %v13432_v10  ;;  %13244 = vmax.xlane.f32.xlu1 %v13243_v57  ;;  %v13429_v3 = vsel %vm2488_vm3, %v23097_v54, 0.0  ;;  %v13263_v51 = vpop.xlane.xlu1 %13262 }
 0xb75   : > { %v23103_v37 = vadd.f32 %v12901_v60, %v22834_v15  ;;  %v13266_v44 = vpop.xlane.xlu0 %13265 }
 0xb76   : > { %v13258_v39 = vsel %vm2488_vm3, %v23100_v17, -inf  ;;  %v13306_v10 = vsub.f32 %v22962_v34, %v13266_v44 }
 0xb77   : > { %v13255_v35 = vsel %vm2488_vm3, %v23103_v37, -inf }
 0xb78   : > { %13259 = vmax.xlane.f32.xlu0 %v13258_v39  ;;  %13430 = vadd.xlane.f32.xlu1 %v13429_v3 }
 0xb7a   : > { %v23111_v19 = vpop.eup %19717 }
 0xb7b   : > { %v17798_v32 = vpop.f32.mrb[150].mxu0  ;;  %v13444_v46 = vsel %vm2488_vm3, %v23111_v19, 0.0  ;;  %v13278_v57 = vpop.xlane.xlu0 %13277 }
 0xb7c   : > { %v23114_v49 = vadd.f32 %v17798_v32, %v22824_v41  ;;  %v13083_v6 = vpop.f32.mrb[151].mxu0  ;;  %13256 = vmax.xlane.f32.xlu1 %v13255_v35  ;;  %v23120_v56 = vpop.eup %19719  ;;  %v13310_v39 = vsub.f32 %v22972_v38, %v13278_v57 }
 0xb7d   : > { %v23123_v25 = vadd.f32 %v13083_v6, %v22834_v15  ;;  %v13441_v4 = vsel %vm2488_vm3, %v23120_v56, 0.0  ;;  %v13305_v15 = vsub.f32 %v22965_v23, %v13263_v51  ;;  %v13275_v63 = vpop.xlane.xlu1 %13274 }
 0xb7e   : > { %v13270_v43 = vsel %vm2488_vm3, %v23114_v49, -inf  ;;  %v13309_v30 = vsub.f32 %v22975_v29, %v13275_v63 }
 0xb7f   : > { %13271 = vmax.xlane.f32.xlu0 %v13270_v43  ;;  %v13267_v41 = vsel %vm2488_vm3, %v23123_v25, -inf  ;;  %v13363_v42 = vmul.f32 1.442695, %v13305_v15 }
 0xb80   : > { %13445 = vadd.xlane.f32.xlu1 %v13444_v46  ;;  %v13371_v60 = vmul.f32 1.442695, %v13309_v30  ;;  %v19236_v30 = vunpack.i.h.bf16 %v22981_v20 }
 0xb81   : > { %19721 = vpow2.f32 %v13363_v42 }
 0xb82   : > { %19723 = vpow2.f32 %v13371_v60 }
 0xb84   : > { %13442 = vadd.xlane.f32.xlu1 %v13441_v4 }
 0xb88   : > { %13268 = vmax.xlane.f32.xlu1 %v13267_v41 }
 0xb95   : > { %19263 = vrot.lane.b32.xlu0 %v20262_v1, %s19823_s22  ;;  %v13365_v1 = vmul.f32 1.442695, %v13306_v10  ;;  %v19235_v10 = vunpack.i.l.bf16 %v22981_v20 }
 0xb97   : > { %19725 = vpow2.f32 %v13365_v1 }
 0xb99   : > { %19268 = vrot.lane.b32.xlu0 %v23890_v2, %s19823_s22  ;;  %19258 = vrot.lane.b32.xlu1 %v23888_v33, %s19823_s22  ;;  %v13373_v2 = vmul.f32 1.442695, %v13310_v39  ;;  %v23139_v33 = vpop.eup %19721 }
 0xb9a   : > { %v13453_v23 = vsel %vm2488_vm3, %v23139_v33, 0.0  ;;  %v23143_v3 = vpop.eup %19723 }
 0xb9b   : > { %19727 = vpow2.f32 %v13373_v2  ;;  %v13465_v34 = vsel %vm2488_vm3, %v23143_v3, 0.0 }
 0xba1   : > { %v23145_v29 = vpop.eup %19725 }
 0xba2   : > { %v13456_v38 = vsel %vm2488_vm3, %v23145_v29, 0.0 }
 0xba5   : > { %v23151_v32 = vpop.eup %19727 }
 0xba6   : > { %v13468_v35 = vsel %vm2488_vm3, %v23151_v32, 0.0 }
 0xbb8   : > { %13454 = vadd.xlane.f32.xlu0 %v13453_v23  ;;  %v18572_v23 = vpack.c.bf16 %v19236_v30, %v19235_v10 }
 0xbbc   : > { %13466 = vadd.xlane.f32.xlu0 %v13465_v34 }
 0xbbd   : > { %13457 = vadd.xlane.f32.xlu1 %v13456_v38 }
 0xbc1   : > { %v13380_v6 = vpop.xlane.xlu0 %13379  ;;  %13469 = vadd.xlane.f32.xlu1 %v13468_v35 }
 0xbc2   : > { %v13472_v43 = vadd.f32 1.0, %v13380_v6  ;;  %v13377_v46 = vpop.xlane.xlu1 %13376 }
 0xbc3   : > { %v13471_v4 = vadd.f32 1.0, %v13377_v46 }
 0xbc4   : > { %19729 = vrcp.f32 %v13472_v43 }
 0xbc5   : > { %19731 = vrcp.f32 %v13471_v4 }
 0xbc9   : > { %v13386_v41 = vpop.xlane.xlu0 %13385 }
 0xbca   : > { %v13474_v51 = vadd.f32 1.0, %v13386_v41 }
 0xbcc   : > { %19733 = vrcp.f32 %v13474_v51 }
 0xbcd   : > { %v13383_v15 = vpop.xlane.xlu1 %13382 }
 0xbce   : > { %v19730_v63 = vpop.eup %19729  ;;  %v13473_v44 = vadd.f32 1.0, %v13383_v15 }
 0xbcf   : > { %v19732_v42 = vpop.eup %19731  ;;  %v13506_v1 = vmul.f32 %v19730_v63, %v22993_v62  ;;  %v19245_v62 = vunpack.i.l.bf16 %v22983_v53  ;;  %v19251_v63 = vunpack.i.h.bf16 %v22985_v58 }
 0xbd0   : > { %19735 = vrcp.f32 %v13473_v44  ;;  %v13504_v57 = vmul.f32 %v19732_v42, %v22995_v26  ;;  %v19246_v26 = vunpack.i.h.bf16 %v22983_v53  ;;  %v19250_v53 = vunpack.i.l.bf16 %v22985_v58 }
 0xbd1   : > { %v13392_v60 = vpop.xlane.xlu0 %13391 }
 0xbd2   : > { %v13476_v39 = vadd.f32 1.0, %v13392_v60  ;;  %v13389_v2 = vpop.xlane.xlu1 %13388  ;;  %17810 = vmatprep.mubr.msk.f32.mxu0 %vm2488_vm3, %v13504_v57  ;;  %v18580_v51 = vpack.c.bf16 %v19246_v26, %v19245_v62  ;;  %v18584_v10 = vpack.c.bf16 %v19251_v63, %v19250_v53 }
 0xbd3   : > { %v13475_v34 = vadd.f32 1.0, %v13389_v2  ;;  %17811 = vmatmul.mubr.msk.f32.vlgmr.msra.gmra.mrb[152].mxu0 %vm2488_vm3, %v13506_v1  ;;  %v19255_v1 = vunpack.i.l.bf16 %v22987_v31 }
 0xbd4   : > { %19737 = vrcp.f32 %v13476_v39  ;;  %18567 = vmatpush3.bf16.msra.mxu0 %v22886_v28 }
 0xbd5   : > { %19739 = vrcp.f32 %v13475_v34  ;;  %18573 = vmatprep.subr.bf16.mxu0 %v18572_v23 }
 0xbd6   : > { %v19734_v20 = vpop.eup %19733 }
 0xbd7   : > { %v13510_v41 = vmul.f32 %v19734_v20, %v23003_v9 }
 0xbd9   : > { %v13398_v38 = vpop.xlane.xlu0 %13397 }
 0xbda   : > { %v19736_v35 = vpop.eup %19735  ;;  %v13478_v6 = vadd.f32 1.0, %v13398_v38  ;;  %v13395_v43 = vpop.xlane.xlu1 %13394 }
 0xbdb   : > { %v13477_v46 = vadd.f32 1.0, %v13395_v43  ;;  %v13508_v4 = vmul.f32 %v19736_v35, %v23009_v24 }
 0xbdc   : > { %19741 = vrcp.f32 %v13478_v6 }
 0xbdd   : > { %19743 = vrcp.f32 %v13477_v46  ;;  %17817 = vmatprep.mubr.msk.f32.mxu0 %vm2488_vm3, %v13508_v4 }
 0xbde   : > { %v19738_v28 = vpop.eup %19737  ;;  %17818 = vmatmul.mubr.msk.f32.vlgmr.msra.gmra.mrb[154].mxu0 %vm2488_vm3, %v13510_v41 }
 0xbdf   : > { %v19740_v15 = vpop.eup %19739  ;;  %18575 = vmatpush3.bf16.msra.mxu0 %v18572_v23  ;;  %v13514_v42 = vmul.f32 %v19738_v28, %v23013_v8 }
 0xbe0   : > { %18581 = vmatprep.subr.bf16.mxu0 %v18580_v51  ;;  %v13512_v44 = vmul.f32 %v19740_v15, %v23015_v21  ;;  %v19256_v21 = vunpack.i.h.bf16 %v22987_v31 }
 0xbe1   : > { %v13404_v24 = vpop.xlane.xlu0 %13403 }
 0xbe2   : > { %v13480_v9 = vadd.f32 1.0, %v13404_v24  ;;  %17824 = vmatprep.mubr.msk.f32.mxu1 %vm2488_vm3, %v13512_v44  ;;  %v13401_v30 = vpop.xlane.xlu1 %13400  ;;  %v18588_v20 = vpack.c.bf16 %v19256_v21, %v19255_v1 }
 0xbe3   : > { %v13479_v57 = vadd.f32 1.0, %v13401_v30  ;;  %17825 = vmatmul.mubr.msk.f32.vlgmr.msra.gmra.mrb[186].mxu1 %vm2488_vm3, %v13514_v42 }
 0xbe4   : > { %19745 = vrcp.f32 %v13480_v9  ;;  %18579 = vmatpush3.bf16.msra.mxu1 %v22796_v52 }
 0xbe5   : > { %19747 = vrcp.f32 %v13479_v57  ;;  %18585 = vmatprep.subr.bf16.mxu1 %v18584_v10 }
 0xbe6   : > { %v19742_v58 = vpop.eup %19741 }
 0xbe7   : > { %v19744_v60 = vpop.eup %19743  ;;  %v13518_v2 = vmul.f32 %v19742_v58, %v23023_v61 }
 0xbe8   : > { %v13516_v8 = vmul.f32 %v19744_v60, %v23025_v47 }
 0xbe9   : > { %v13410_v39 = vpop.xlane.xlu0 %13409 }
 0xbea   : > { %v13482_v23 = vadd.f32 1.0, %v13410_v39  ;;  %v13407_v34 = vpop.xlane.xlu1 %13406  ;;  %17831 = vmatprep.mubr.msk.f32.mxu0 %vm2488_vm3, %v13516_v8 }
 0xbeb   : > { %v13481_v38 = vadd.f32 1.0, %v13407_v34  ;;  %17832 = vmatmul.mubr.msk.f32.vlgmr.msra.gmra.mrb[156].mxu0 %vm2488_vm3, %v13518_v2 }
 0xbec   : > { %19749 = vrcp.f32 %v13482_v23  ;;  %18583 = vmatpush3.bf16.msra.mxu0 %v18580_v51 }
 0xbed   : > { %19751 = vrcp.f32 %v13481_v38  ;;  %18589 = vmatprep.subr.bf16.mxu0 %v18588_v20 }
 0xbee   : > { %v19746_v52 = vpop.eup %19745 }
 0xbef   : > { %v19748_v35 = vpop.eup %19747  ;;  %v13522_v26 = vmul.f32 %v19746_v52, %v23033_v50 }
 0xbf0   : > { %v13520_v31 = vmul.f32 %v19748_v35, %v23035_v14 }
 0xbf1   : > { %v13416_v47 = vpop.xlane.xlu1 %13415 }
 0xbf2   : > { %17838 = vmatprep.mubr.msk.f32.mxu1 %vm2488_vm3, %v13520_v31  ;;  %v13484_v61 = vadd.f32 1.0, %v13416_v47 }
 0xbf3   : > { %17839 = vmatmul.mubr.msk.f32.vlgmr.msra.gmra.mrb[188].mxu1 %vm2488_vm3, %v13522_v26 }
 0xbf4   : > { %18587 = vmatpush3.bf16.msra.mxu1 %v18584_v10  ;;  %v13236_v62 = vpop.xlane.xlu0 %13235  ;;  %19753 = vrcp.f32 %v13484_v61 }
 0xbf5   : > { %v13296_v6 = vsub.f32 %v23061_v11, %v13236_v62  ;;  %v13413_v43 = vpop.xlane.xlu1 %13412 }
 0xbf6   : > { %v19750_v46 = vpop.eup %19749  ;;  %v13483_v4 = vadd.f32 1.0, %v13413_v43 }
 0xbf7   : > { %v19752_v41 = vpop.eup %19751  ;;  %v13345_v28 = vmul.f32 1.442695, %v13296_v6  ;;  %v13526_v15 = vmul.f32 %v19750_v46, %v23043_v13 }
 0xbf8   : > { %19755 = vrcp.f32 %v13483_v4  ;;  %v13524_v14 = vmul.f32 %v19752_v41, %v23045_v22 }
 0xbf9   : > { %19757 = vpow2.f32 %v13345_v28  ;;  %v13422_v50 = vpop.xlane.xlu0 %13421  ;;  %v13233_v51 = vpop.xlane.xlu1 %13232 }
 0xbfa   : > { %v13295_v63 = vsub.f32 %v23067_v48, %v13233_v51  ;;  %17845 = vmatprep.mubr.msk.f32.mxu0 %vm2488_vm3, %v13524_v14  ;;  %v13486_v53 = vadd.f32 1.0, %v13422_v50 }
 0xbfb   : > { %17846 = vmatmul.mubr.msk.f32.vlgmr.msra.gmra.mrb[158].mxu0 %vm2488_vm3, %v13526_v15 }
 0xbfc   : > { %v13343_v11 = vmul.f32 1.442695, %v13295_v63  ;;  %18591 = vmatpush3.bf16.msra.mxu0 %v18588_v20 }
 0xbfd   : > { %v13248_v44 = vpop.xlane.xlu0 %13247  ;;  %v13419_v24 = vpop.xlane.xlu1 %13418 }
 0xbfe   : > { %19759 = vpow2.f32 %v13343_v11  ;;  %v13300_v42 = vsub.f32 %v23080_v16, %v13248_v44  ;;  %v13485_v22 = vadd.f32 1.0, %v13419_v24  ;;  %v19754_v30 = vpop.eup %19753 }
 0xbff   : > { %19761 = vrcp.f32 %v13486_v53  ;;  %v13530_v16 = vmul.f32 %v19754_v30, %v23053_v7 }
 0xc00   : > { %v13353_v9 = vmul.f32 1.442695, %v13300_v42  ;;  %19763 = vrcp.f32 %v13485_v22 }
 0xc01   : > { %v13434_v13 = vpop.xlane.xlu0 %13433  ;;  %v13245_v10 = vpop.xlane.xlu1 %13244 }
 0xc02   : > { %v19756_v48 = vpop.eup %19755  ;;  %19765 = vpow2.f32 %v13353_v9  ;;  %v13299_v57 = vsub.f32 %v23085_v12, %v13245_v10  ;;  %v13490_v8 = vadd.f32 1.0, %v13434_v13 }
 0xc03   : > { %v23193_v58 = vpop.eup %19757  ;;  %v13528_v60 = vmul.f32 %v19756_v48, %v23057_v5 }
 0xc04   : > { %v13351_v21 = vmul.f32 1.442695, %v13299_v57  ;;  %v13426_v1 = vsel %vm2488_vm3, %v23193_v58, 0.0 }
 0xc05   : > { %17852 = vmatprep.mubr.msk.f32.mxu1 %vm2488_vm3, %v13528_v60  ;;  %v13260_v39 = vpop.xlane.xlu0 %13259  ;;  %13427 = vadd.xlane.f32.xlu1 %v13426_v1  ;;  %v13431_v2 = vpop.xlane.xlu1 %13430 }
 0xc06   : > { %19767 = vpow2.f32 %v13351_v21  ;;  %v13304_v23 = vsub.f32 %v23100_v17, %v13260_v39  ;;  %v13489_v12 = vadd.f32 1.0, %v13431_v2  ;;  %17853 = vmatmul.mubr.msk.f32.vlgmr.msra.gmra.mrb[190].mxu1 %vm2488_vm3, %v13530_v16 }
 0xc08   : > { %v23202_v34 = vpop.eup %19759  ;;  %v13361_v5 = vmul.f32 1.442695, %v13304_v23  ;;  %19769 = vrcp.f32 %v13489_v12 }
 0xc09   : > { %v19762_v20 = vpop.eup %19761  ;;  %19771 = vrcp.f32 %v13490_v8  ;;  %v13257_v38 = vpop.xlane.xlu1 %13256  ;;  %v13423_v7 = vsel %vm2488_vm3, %v23202_v34, 0.0 }
 0xc0a   : > { %v19764_v52 = vpop.eup %19763  ;;  %19773 = vpow2.f32 %v13361_v5  ;;  %v13303_v35 = vsub.f32 %v23103_v37, %v13257_v38  ;;  %13424 = vadd.xlane.f32.xlu1 %v13423_v7  ;;  %v13534_v61 = vmul.f32 %v19762_v20, %v23071_v0 }
 0xc0b   : > { %v13532_v17 = vmul.f32 %v19764_v52, %v23077_v45 }
 0xc0c   : > { %v23208_v31 = vpop.eup %19765  ;;  %v13359_v47 = vmul.f32 1.442695, %v13303_v35  ;;  %v13272_v26 = vpop.xlane.xlu0 %13271 }
 0xc0d   : > { %v13308_v62 = vsub.f32 %v23114_v49, %v13272_v26  ;;  %17859 = vmatprep.mubr.msk.f32.mxu0 %vm2488_vm3, %v13532_v17  ;;  %v23213_v6 = vpop.xlane.xlu1 %13445  ;;  %v13438_v43 = vsel %vm2488_vm3, %v23208_v31, 0.0 }
 0xc0e   : > { %19775 = vpow2.f32 %v13359_v47  ;;  %13439 = vadd.xlane.f32.xlu1 %v13438_v43  ;;  %17860 = vmatmul.mubr.msk.f32.vlgmr.msra.gmra.mrb[160].mxu0 %vm2488_vm3, %v13534_v61  ;;  %v13494_v52 = vadd.f32 1.0, %v23213_v6 }
 0xc0f   : > { %v13369_v45 = vmul.f32 1.442695, %v13308_v62 }
 0xc10   : > { %v23218_v37 = vpop.eup %19767  ;;  %v19264_v46 = vpop.permute.xlu0 %19263 }
 0xc11   : > { %19777 = vpow2.f32 %v13369_v45  ;;  %v19266_v4 = vunpack.i.h.bf16 %v19264_v46  ;;  %v19265_v0 = vunpack.i.l.bf16 %v19264_v46  ;;  %v13443_v41 = vpop.xlane.xlu1 %13442  ;;  %v13435_v49 = vsel %vm2488_vm3, %v23218_v37, 0.0 }
 0xc12   : > { %v19770_v28 = vpop.eup %19769  ;;  %v13493_v14 = vadd.f32 1.0, %v13443_v41  ;;  %13436 = vadd.xlane.f32.xlu1 %v13435_v49 }
 0xc13   : > { %v19772_v50 = vpop.eup %19771  ;;  %v18596_v51 = vpack.c.bf16 %v19266_v4, %v19265_v0  ;;  %v13540_v15 = vmul.f32 %v19770_v28, %v23097_v54 }
 0xc14   : > { %v23223_v63 = vpop.eup %19773  ;;  %19779 = vrcp.f32 %v13493_v14  ;;  %v19269_v44 = vpop.permute.xlu0 %19268  ;;  %v13542_v24 = vmul.f32 %v19772_v50, %v23091_v18 }
 0xc15   : > { %18597 = vmatprep.subr.bf16.mxu0 %v18596_v51  ;;  %17873 = vmatprep.mubr.msk.f32.mxu0 %vm2488_vm3, %v13540_v15  ;;  %v13269_v53 = vpop.xlane.xlu1 %13268  ;;  %v13450_v11 = vsel %vm2488_vm3, %v23223_v63, 0.0  ;;  %v19271_v9 = vunpack.i.h.bf16 %v19269_v44  ;;  %v19270_v30 = vunpack.i.l.bf16 %v19269_v44 }
 0xc16   : > { %18599 = vmatpush3.bf16.msra.mxu0 %v18596_v51  ;;  %13451 = vadd.xlane.f32.xlu1 %v13450_v11  ;;  %v13307_v16 = vsub.f32 %v23123_v25, %v13269_v53 }
 0xc17   : > { %v18600_v21 = vpack.c.bf16 %v19271_v9, %v19270_v30 }
 0xc18   : > { %v23229_v42 = vpop.eup %19775  ;;  %v13367_v8 = vmul.f32 1.442695, %v13307_v16 }
 0xc19   : > { %17874 = vmatmul.mubr.msk.f32.vlgmr.msra.gmra.mrb[162].mxu0 %vm2488_vm3, %v13542_v24  ;;  %v19259_v54 = vpop.permute.xlu1 %19258  ;;  %v13447_v22 = vsel %vm2488_vm3, %v23229_v42, 0.0 }
 0xc1a   : > { %v19261_v13 = vunpack.i.h.bf16 %v19259_v54  ;;  %v19260_v10 = vunpack.i.l.bf16 %v19259_v54  ;;  %13448 = vadd.xlane.f32.xlu0 %v13447_v22  ;;  %19781 = vpow2.f32 %v13367_v8 }
 0xc1b   : > { %v23234_v48 = vpop.eup %19777 }
 0xc1c   : > { %v18592_v57 = vpack.c.bf16 %v19261_v13, %v19260_v10  ;;  %v13462_v60 = vsel %vm2488_vm3, %v23234_v48, 0.0 }
 0xc1d   : > { %13463 = vadd.xlane.f32.xlu1 %v13462_v60 }
 0xc1e   : > { %v19780_v18 = vpop.eup %19779  ;;  %18593 = vmatprep.subr.bf16.mxu1 %v18592_v57 }
 0xc1f   : > { %18595 = vmatpush3.bf16.msra.mxu1 %v18592_v57  ;;  %v13548_v1 = vmul.f32 %v19780_v18, %v23120_v56 }
 0xc20   : > { %18601 = vmatprep.subr.bf16.mxu1 %v18600_v21 }
 0xc21   : > { %17887 = vmatprep.mubr.msk.f32.mxu0 %vm2488_vm3, %v13548_v1 }
 0xc24   : > { %v23249_v56 = vpop.eup %19781 }
 0xc25   : > { %v13459_v39 = vsel %vm2488_vm3, %v23249_v56, 0.0 }
 0xc2e   : > { %19273 = vrot.lane.b32.xlu1 %v23683_v27, %s19823_s22 }
 0xc30   : > { %19278 = vrot.lane.b32.xlu0 %v23801_v40, %s19823_s22 }
 0xc34   : > { %19283 = vrot.lane.b32.xlu0 %v23771_v55, %s19823_s22 }
 0xc38   : > { %19288 = vrot.lane.b32.xlu0 %v23692_v36, %s19823_s22 }
 0xc45   : > { %v13455_v12 = vpop.xlane.xlu0 %13454 }
 0xc46   : > { %v13497_v47 = vadd.f32 1.0, %v13455_v12 }
 0xc4a   : > { %v13458_v27 = vpop.xlane.xlu1 %13457 }
 0xc4b   : > { %v13498_v4 = vadd.f32 1.0, %v13458_v27 }
 0xc4e   : > { %v23255_v40 = vpop.xlane.xlu1 %13469 }
 0xc57   : > { %13460 = vadd.xlane.f32.xlu0 %v13459_v39 }
 0xc6d   : > { %19293 = vrot.lane.b32.xlu0 %v23868_v59, %s19823_s22  ;;  %v13467_v59 = vpop.xlane.xlu0 %13466 }
 0xc6e   : > { %v13501_v0 = vadd.f32 1.0, %v13467_v59  ;;  %v13502_v59 = vadd.f32 1.0, %v23255_v40 }
 0xc92   : > { %v13428_v55 = vpop.xlane.xlu1 %13427 }
 0xc93   : > { %v13488_v2 = vadd.f32 1.0, %v13428_v55 }
 0xc95   : > { %19783 = vrcp.f32 %v13488_v2 }
 0xc97   : > { %v13425_v23 = vpop.xlane.xlu1 %13424 }
 0xc98   : > { %v13487_v36 = vadd.f32 1.0, %v13425_v23 }
 0xc9a   : > { %19785 = vrcp.f32 %v13487_v36 }
 0xc9b   : > { %v13440_v25 = vpop.xlane.xlu1 %13439 }
 0xc9c   : > { %v13492_v5 = vadd.f32 1.0, %v13440_v25 }
 0xc9e   : > { %19787 = vrcp.f32 %v13492_v5 }
 0xc9f   : > { %v13437_v20 = vpop.xlane.xlu1 %13436  ;;  %v19784_v7 = vpop.eup %19783 }
 0xca0   : > { %v13491_v38 = vadd.f32 1.0, %v13437_v20  ;;  %v13538_v43 = vmul.f32 %v19784_v7, %v23193_v58 }
 0xca2   : > { %19789 = vrcp.f32 %v13491_v38 }
 0xca3   : > { %v13452_v35 = vpop.xlane.xlu1 %13451  ;;  %19791 = vrcp.f32 %v13494_v52 }
 0xca4   : > { %v19786_v17 = vpop.eup %19785  ;;  %v13496_v26 = vadd.f32 1.0, %v13452_v35  ;;  %19793 = vrcp.f32 %v13497_v47 }
 0xca5   : > { %v13536_v61 = vmul.f32 %v19786_v17, %v23202_v34 }
 0xca6   : > { %v23259_v62 = vpop.f32.mrb[152].mxu0  ;;  %19795 = vrcp.f32 %v13496_v26 }
 0xca7   : > { %v23262_v45 = vpop.f32.mrb[153].mxu0  ;;  %v13449_v46 = vpop.xlane.xlu0 %13448  ;;  %17866 = vmatprep.mubr.msk.f32.mxu1 %vm2488_vm3, %v13536_v61 }
 0xca8   : > { %v13495_v6 = vadd.f32 1.0, %v13449_v46  ;;  %17867 = vmatmul.mubr.msk.f32.vlgmr.msra.gmra.mrb[192].mxu1 %vm2488_vm3, %v13538_v43  ;;  %v19788_v41 = vpop.eup %19787 }
 0xca9   : > { %18603 = vmatpush3.bf16.msra.mxu1 %v18600_v21  ;;  %v13546_v53 = vmul.f32 %v19788_v41, %v23208_v31 }
 0xcaa   : > { %19797 = vrcp.f32 %v13495_v6  ;;  %v23266_v34 = vpop.xlane.xlu1 %13463 }
 0xcab   : > { %v19279_v49 = vpop.permute.xlu0 %19278  ;;  %19799 = vrcp.f32 %v13498_v4 }
 0xcac   : > { %v19790_v58 = vpop.eup %19789  ;;  %v19281_v28 = vunpack.i.h.bf16 %v19279_v49  ;;  %v19280_v14 = vunpack.i.l.bf16 %v19279_v49  ;;  %19801 = vrcp.f32 %v13501_v0  ;;  %v14959_v0 = vld [vmem:[%s23470_s7 + $0x18] sm:$0xff] }
 0xcad   : > { %v13544_v50 = vmul.f32 %v19790_v58, %v23218_v37  ;;  %v19792_v9 = vpop.eup %19791  ;;  %19803 = vrcp.f32 %v13502_v59 }
 0xcae   : > { %v18608_v51 = vpack.c.bf16 %v19281_v28, %v19280_v14  ;;  %v19274_v15 = vpop.permute.xlu1 %19273  ;;  %v19794_v37 = vpop.eup %19793  ;;  %v13550_v16 = vmul.f32 %v19792_v9, %v23111_v19 }
 0xcaf   : > { %v19276_v11 = vunpack.i.h.bf16 %v19274_v15  ;;  %v19275_v44 = vunpack.i.l.bf16 %v19274_v15  ;;  %v19284_v24 = vpop.permute.xlu0 %19283  ;;  %17880 = vmatprep.mubr.msk.f32.mxu1 %vm2488_vm3, %v13544_v50  ;;  %v13556_v2 = vmul.f32 %v19794_v37, %v23139_v33 }
 0xcb0   : > { %v19286_v54 = vunpack.i.h.bf16 %v19284_v24  ;;  %v19285_v22 = vunpack.i.l.bf16 %v19284_v24  ;;  %17881 = vmatmul.mubr.msk.f32.vlgmr.msra.gmra.mrb[194].mxu1 %vm2488_vm3, %v13546_v53  ;;  %18609 = vmatprep.subr.bf16.mxu1 %v18608_v51  ;;  %v19796_v31 = vpop.eup %19795  ;;  %v23334_v24 = vld [vmem:[%s23471_s8] ss:$0 sm:$0xff] }
 0xcb1   : > { %v18604_v30 = vpack.c.bf16 %v19276_v11, %v19275_v44  ;;  %v23272_v13 = vpop.f32.mrb[154].mxu0  ;;  %18611 = vmatpush3.bf16.msra.mxu1 %v18608_v51  ;;  %v13554_v25 = vmul.f32 %v19796_v31, %v23223_v63 }
 0xcb2   : > { %v18612_v10 = vpack.c.bf16 %v19286_v54, %v19285_v22  ;;  %v23274_v57 = vpop.f32.mrb[155].mxu0 }
 0xcb3   : > { %18605 = vmatprep.subr.bf16.mxu0 %v18604_v30  ;;  %v19289_v60 = vpop.permute.xlu0 %19288 }
 0xcb4   : > { %v19798_v18 = vpop.eup %19797  ;;  %v19291_v21 = vunpack.i.h.bf16 %v19289_v60  ;;  %v19290_v1 = vunpack.i.l.bf16 %v19289_v60  ;;  %18607 = vmatpush3.bf16.msra.mxu0 %v18604_v30 }
 0xcb5   : > { %18613 = vmatprep.subr.bf16.mxu0 %v18612_v10  ;;  %v13552_v8 = vmul.f32 %v19798_v18, %v23229_v42  ;;  %v19800_v39 = vpop.eup %19799 }
 0xcb6   : > { %v18616_v27 = vpack.c.bf16 %v19291_v21, %v19290_v1  ;;  %v17826_v55 = vpop.f32.mrb[186].mxu1  ;;  %v19802_v23 = vpop.eup %19801  ;;  %v13558_v19 = vmul.f32 %v19800_v39, %v23145_v29  ;;  %v13500_v29 = vadd.f32 1.0, %v23266_v34 }
 0xcb7   : > { %17888 = vmatmul.mubr.msk.f32.vlgmr.msra.gmra.mrb[164].mxu0 %vm2488_vm3, %v13550_v16  ;;  %v13819_v36 = vpop.f32.mrb[187].mxu1  ;;  %17894 = vmatprep.mubr.msk.f32.mxu1 %vm2488_vm3, %v13552_v8  ;;  %v13564_v42 = vmul.f32 %v19802_v23, %v23143_v3  ;;  %v19804_v4 = vpop.eup %19803 }
 0xcb8   : > { %18615 = vmatpush3.bf16.msra.mxu0 %v18612_v10  ;;  %17901 = vmatprep.mubr.msk.f32.mxu0 %vm2488_vm3, %v13556_v2  ;;  %19805 = vrcp.f32 %v13500_v29  ;;  %v13566_v34 = vmul.f32 %v19804_v4, %v23151_v32  ;;  %v23902_v29 = vld [vmem:[#allocation8_spill] sm:$0xff]  ;;  %v23904_v4 = vld [vmem:[#allocation62_spill] sm:$0xff] }
 0xcb9   : > { %17895 = vmatmul.mubr.msk.f32.vlgmr.msra.gmra.mrb[196].mxu1 %vm2488_vm3, %v13554_v25  ;;  %18617 = vmatprep.subr.bf16.mxu1 %v18616_v27 }
 0xcba   : > { %18619 = vmatpush3.bf16.msra.mxu1 %v18616_v27 }
 0xcbb   : > { %17902 = vmatmul.mubr.msk.f32.vlgmr.msra.gmra.mrb[166].mxu0 %vm2488_vm3, %v13558_v19 }
 0xcbc   : > { %17915 = vmatprep.mubr.msk.f32.mxu0 %vm2488_vm3, %v13564_v42 }
 0xcbe   : > { %v17833_v33 = vpop.f32.mrb[156].mxu0 }
 0xcbf   : > { %v13906_v12 = vpop.f32.mrb[157].mxu0 }
 0xcc2   : > { %v19806_v41 = vpop.eup %19805 }
 0xcc3   : > { %v13562_v28 = vmul.f32 %v19806_v41, %v23234_v48  ;;  %v23905_v41 = vld [vmem:[#allocation82_spill] sm:$0xff] }
 0xcc6   : > { %v17840_v5 = vpop.f32.mrb[188].mxu1 }
 0xcc7   : > { %v13993_v20 = vpop.f32.mrb[189].mxu1 }
 0xcce   : > { %v17847_v63 = vpop.f32.mrb[158].mxu0 }
 0xccf   : > { %v14080_v38 = vpop.f32.mrb[159].mxu0 }
 0xcd9   : > { %v17854_v7 = vpop.f32.mrb[190].mxu1 }
 0xcda   : > { %v14167_v52 = vpop.f32.mrb[191].mxu1 }
 0xce1   : > { %v17861_v35 = vpop.f32.mrb[160].mxu0 }
 0xce2   : > { %v14254_v17 = vpop.f32.mrb[161].mxu0 }
 0xce4   : > { %v13461_v3 = vpop.xlane.xlu0 %13460 }
 0xce5   : > { %v13499_v47 = vadd.f32 1.0, %v13461_v3 }
 0xce7   : > { %19807 = vrcp.f32 %v13499_v47 }
 0xce8   : > { %v19294_v26 = vpop.permute.xlu0 %19293 }
 0xce9   : > { %v19296_v61 = vunpack.i.h.bf16 %v19294_v26  ;;  %v19295_v43 = vunpack.i.l.bf16 %v19294_v26 }
 0xceb   : > { %v18620_v46 = vpack.c.bf16 %v19296_v61, %v19295_v43  ;;  %v23903_v61 = vld [vmem:[#allocation80_spill] sm:$0xff] }
 0xcec   : > { %v17875_v6 = vpop.f32.mrb[162].mxu0 }
 0xced   : > { %v14428_v40 = vpop.f32.mrb[163].mxu0  ;;  %18621 = vmatprep.subr.bf16.mxu0 %v18620_v46 }
 0xcee   : > { %18623 = vmatpush3.bf16.msra.mxu0 %v18620_v46 }
 0xcef   : > { %17918 = vmatprep.subr.mxu0 %v14959_v0 }
 0xcf1   : > { %v19808_v49 = vpop.eup %19807  ;;  %17916 = vmatmul.mubr.msk.f32.vlgmr.msra.gmra.mrb[168].mxu0 %vm2488_vm3, %v13566_v34 }
 0xcf2   : > { %17920 = vmatprep.mubr.msk.f32.mxu0 %vm1095_vm1, %v23262_v45  ;;  %v13560_v58 = vmul.f32 %v19808_v49, %v23249_v56  ;;  %17919 = vmatpush3.msra.mxu0 %v14959_v0 }
 0xcf4   : > { %17908 = vmatprep.mubr.msk.f32.mxu1 %vm2488_vm3, %v13560_v58 }
 0xcf5   : > { %17909 = vmatmul.mubr.msk.f32.vlgmr.msra.gmra.mrb[198].mxu1 %vm2488_vm3, %v13562_v28  ;;  %17921 = vmatmul.mubr.msk.f32.vlgmr.msra.gmra.mrb[96].mxu0 %vm1095_vm1, %v23259_v62  ;;  %v23906_v28 = vld [vmem:[#allocation81_spill] sm:$0xff] }
 0xcf6   : > { %17923 = vmatprep.mubr.msk.f32.mxu0 %vm1095_vm1, %v23274_v57 }
 0xcf9   : > { %17924 = vmatmul.mubr.msk.f32.gmra.mrb[98].mxu0 %vm1095_vm1, %v23272_v13 }
 0xcfa   : > { %17926 = vmatprep.mubr.msk.f32.mxu0 %vm1095_vm1, %v13819_v36 }
 0xcfd   : > { %17927 = vmatmul.mubr.msk.f32.gmra.mrb[100].mxu0 %vm1095_vm1, %v17826_v55 }
 0xcfe   : > { %17929 = vmatprep.mubr.msk.f32.mxu0 %vm1095_vm1, %v13906_v12 }
 0xd01   : > { %17930 = vmatmul.mubr.msk.f32.gmra.mrb[102].mxu0 %vm1095_vm1, %v17833_v33 }
 0xd02   : > { %17932 = vmatprep.mubr.msk.f32.mxu0 %vm1095_vm1, %v13993_v20 }
 0xd05   : > { %17933 = vmatmul.mubr.msk.f32.gmra.mrb[104].mxu0 %vm1095_vm1, %v17840_v5 }
 0xd06   : > { %17935 = vmatprep.mubr.msk.f32.mxu0 %vm1095_vm1, %v14080_v38 }
 0xd09   : > { %17936 = vmatmul.mubr.msk.f32.gmra.mrb[106].mxu0 %vm1095_vm1, %v17847_v63 }
 0xd0a   : > { %17938 = vmatprep.mubr.msk.f32.mxu0 %vm1095_vm1, %v14167_v52  ;;  %v23901_v52 = vld [vmem:[#allocation41_spill] sm:$0xff] }
 0xd0d   : > { %17939 = vmatmul.mubr.msk.f32.gmra.mrb[108].mxu0 %vm1095_vm1, %v17854_v7 }
 0xd0e   : > { %17941 = vmatprep.mubr.msk.f32.mxu0 %vm1095_vm1, %v14254_v17 }
 0xd11   : > { %17942 = vmatmul.mubr.msk.f32.gmra.mrb[110].mxu0 %vm1095_vm1, %v17861_v35 }
 0xd7b   : > { %v17868_v32 = vpop.f32.mrb[192].mxu1 }
 0xd7c   : > { %v14341_v48 = vpop.f32.mrb[193].mxu1 }
 0xd7d   : > { %17944 = vmatprep.mubr.msk.f32.mxu0 %vm1095_vm1, %v14341_v48 }
 0xd7e   : > { %17945 = vmatmul.mubr.msk.f32.gmra.mrb[112].mxu0 %vm1095_vm1, %v17868_v32 }
 0xd7f   : > { %17947 = vmatprep.mubr.msk.f32.mxu0 %vm1095_vm1, %v14428_v40 }
 0xd82   : > { %17948 = vmatmul.mubr.msk.f32.gmra.mrb[114].mxu0 %vm1095_vm1, %v17875_v6 }
 0xd83   : > { %v17882_v56 = vpop.f32.mrb[194].mxu1 }
 0xd84   : > { %v14515_v62 = vpop.f32.mrb[195].mxu1 }
 0xd85   : > { %17950 = vmatprep.mubr.msk.f32.mxu0 %vm1095_vm1, %v14515_v62 }
 0xd86   : > { %17951 = vmatmul.mubr.msk.f32.gmra.mrb[116].mxu0 %vm1095_vm1, %v17882_v56 }
 0xd8a   : > { %v17889_v45 = vpop.f32.mrb[164].mxu0 }
 0xd8b   : > { %v14602_v14 = vpop.f32.mrb[165].mxu0 }
 0xd8c   : > { %v17896_v50 = vpop.f32.mrb[196].mxu1  ;;  %17953 = vmatprep.mubr.msk.f32.mxu0 %vm1095_vm1, %v14602_v14 }
 0xd8d   : > { %v14689_v51 = vpop.f32.mrb[197].mxu1  ;;  %17954 = vmatmul.mubr.msk.f32.gmra.mrb[118].mxu0 %vm1095_vm1, %v17889_v45  ;;  %v23907_v45 = vld [vmem:[#allocation55_spill] sm:$0xff] }
 0xd8e   : > { %v17903_v15 = vpop.f32.mrb[166].mxu0  ;;  %17956 = vmatprep.mubr.msk.f32.mxu0 %vm1095_vm1, %v14689_v51  ;;  %v23908_v51 = vld [vmem:[#allocation83_spill] sm:$0xff] }
 0xd8f   : > { %v14776_v53 = vpop.f32.mrb[167].mxu0 }
 0xd91   : > { %17957 = vmatmul.mubr.msk.f32.gmra.mrb[120].mxu0 %vm1095_vm1, %v17896_v50 }
 0xd92   : > { %17959 = vmatprep.mubr.msk.f32.mxu0 %vm1095_vm1, %v14776_v53 }
 0xd95   : > { %17960 = vmatmul.mubr.msk.f32.gmra.mrb[122].mxu0 %vm1095_vm1, %v17903_v15 }
 0xdc4   : > { %v17917_v11 = vpop.f32.mrb[168].mxu0 }
 0xdc5   : > { %v14950_v44 = vpop.f32.mrb[169].mxu0 }
 0xdc8   : > { %v17910_v54 = vpop.f32.mrb[198].mxu1  ;;  %v17922_v22 = vpop.f32.mrb[96].mxu0 }
 0xdc9   : > { %v15321_v9 = vadd.f32 %v17922_v22, %v23334_v24  ;;  %v14863_v30 = vpop.f32.mrb[199].mxu1  ;;  %v15122_v13 = vpop.f32.mrb[97].mxu0 }
 0xdca   : > { %v15320_v37 = vadd.f32 %v23334_v24, %v15122_v13  ;;  %17962 = vmatprep.mubr.msk.f32.mxu0 %vm1095_vm1, %v14863_v30  ;;  %v23910_v30 = vld [vmem:[#allocation25_spill] sm:$0xff] }
 0xdcb   : > { %15353 = vst.msk [vmem:[%s23340_s16 + $0x8] sm:$0xff] %vm433_vm0, %v15321_v9  ;;  %17963 = vmatmul.mubr.msk.f32.gmra.mrb[124].mxu0 %vm1095_vm1, %v17910_v54  ;;  %v23909_v54 = vld [vmem:[#allocation27_spill] sm:$0xff] }
 0xdcc   : > { %15352 = vst.msk [vmem:[%s23340_s16] sm:$0xff] %vm433_vm0, %v15320_v37  ;;  %v17925_v10 = vpop.f32.mrb[98].mxu0  ;;  %17965 = vmatprep.mubr.msk.f32.mxu0 %vm1095_vm1, %v14950_v44 }
 0xdcd   : > { %v15323_v57 = vadd.f32 %v17925_v10, %v23334_v24  ;;  %v15132_v31 = vpop.f32.mrb[99].mxu0 }
 0xdce   : > { %v15322_v60 = vadd.f32 %v23334_v24, %v15132_v31  ;;  %v23911_v31 = vld [vmem:[#allocation37_spill] sm:$0xff] }
 0xdcf   : > { %15355 = vst.msk [vmem:[%s23340_s16 + $0x18] sm:$0xff] %vm433_vm0, %v15323_v57  ;;  %17966 = vmatmul.mubr.msk.f32.gmra.mrb[126].mxu0 %vm1095_vm1, %v17917_v11 }
 0xdd0   : > { %15354 = vst.msk [vmem:[%s23340_s16 + $0x10] sm:$0xff] %vm433_vm0, %v15322_v60  ;;  %v17928_v18 = vpop.f32.mrb[100].mxu0 }
 0xdd1   : > { %v15325_v21 = vadd.f32 %v17928_v18, %v23334_v24  ;;  %v15142_v1 = vpop.f32.mrb[101].mxu0 }
 0xdd2   : > { %v15324_v16 = vadd.f32 %v23334_v24, %v15142_v1 }
 0xdd3   : > { %15357 = vst.msk [vmem:[%s23340_s16 + $0x28] sm:$0xff] %vm433_vm0, %v15325_v21  ;;  %v23912_v21 = vld [vmem:[#allocation65_spill] sm:$0xff] }
 0xdd4   : > { %15356 = vst.msk [vmem:[%s23340_s16 + $0x20] sm:$0xff] %vm433_vm0, %v15324_v16  ;;  %v17931_v8 = vpop.f32.mrb[102].mxu0 }
 0xdd5   : > { %v15327_v39 = vadd.f32 %v17931_v8, %v23334_v24  ;;  %v15152_v27 = vpop.f32.mrb[103].mxu0 }
 0xdd6   : > { %v15326_v55 = vadd.f32 %v23334_v24, %v15152_v27  ;;  %v23913_v27 = vld [vmem:[#allocation34_spill] sm:$0xff] }
 0xdd7   : > { %15359 = vst.msk [vmem:[%s23340_s16 + $0x38] sm:$0xff] %vm433_vm0, %v15327_v39 }
 0xdd8   : > { %15358 = vst.msk [vmem:[%s23340_s16 + $0x30] sm:$0xff] %vm433_vm0, %v15326_v55  ;;  %v17934_v2 = vpop.f32.mrb[104].mxu0 }
 0xdd9   : > { %v15329_v23 = vadd.f32 %v17934_v2, %v23334_v24  ;;  %v15162_v36 = vpop.f32.mrb[105].mxu0 }
 0xdda   : > { %v15328_v25 = vadd.f32 %v23334_v24, %v15162_v36 }
 0xddb   : > { %15361 = vst.msk [vmem:[%s23340_s16 + $0x48] sm:$0xff] %vm433_vm0, %v15329_v23  ;;  %v23914_v23 = vld [vmem:[#allocation64_spill] sm:$0xff] }
 0xddc   : > { %15360 = vst.msk [vmem:[%s23340_s16 + $0x40] sm:$0xff] %vm433_vm0, %v15328_v25  ;;  %v17937_v19 = vpop.f32.mrb[106].mxu0 }
 0xddd   : > { %v15331_v42 = vadd.f32 %v17937_v19, %v23334_v24  ;;  %v15172_v33 = vpop.f32.mrb[107].mxu0 }
 0xdde   : > { %v15330_v12 = vadd.f32 %v23334_v24, %v15172_v33  ;;  %v23915_v33 = vld [vmem:[#allocation57_spill] sm:$0xff] }
 0xddf   : > { %15363 = vst.msk [vmem:[%s23340_s16 + $0x58] sm:$0xff] %vm433_vm0, %v15331_v42 }
 0xde0   : > { %15362 = vst.msk [vmem:[%s23340_s16 + $0x50] sm:$0xff] %vm433_vm0, %v15330_v12  ;;  %v17940_v5 = vpop.f32.mrb[108].mxu0 }
 0xde1   : > { %v15333_v20 = vadd.f32 %v17940_v5, %v23334_v24  ;;  %v15182_v63 = vpop.f32.mrb[109].mxu0 }
 0xde2   : > { %v15332_v38 = vadd.f32 %v23334_v24, %v15182_v63 }
 0xde3   : > { %15365 = vst.msk [vmem:[%s23340_s16 + $0x68] sm:$0xff] %vm433_vm0, %v15333_v20  ;;  %v23916_v20 = vld [vmem:[#allocation45_spill] sm:$0xff] }
 0xde4   : > { %15364 = vst.msk [vmem:[%s23340_s16 + $0x60] sm:$0xff] %vm433_vm0, %v15332_v38  ;;  %v17943_v7 = vpop.f32.mrb[110].mxu0 }
 0xde5   : > { %v18626_v59 = vadd.f32 %v17943_v7, %v23901_v52  ;;  %v15192_v35 = vpop.f32.mrb[111].mxu0 }
 0xde6   : > { %v18627_v17 = vadd.f32 %v15192_v35, %v23902_v29 }
 0xde7   : > { %v15335_v3 = vadd.f32 %v18626_v59, %v23334_v24  ;;  %v23917_v59 = vld [vmem:[#allocation68_spill] sm:$0xff] }
 0xde8   : > { %v15334_v47 = vadd.f32 %v18627_v17, %v23334_v24  ;;  %v23918_v17 = vld [vmem:[#allocation67_spill] sm:$0xff] }
 0xde9   : > { %15367 = vst.msk [vmem:[%s23340_s16 + $0x78] sm:$0xff] %vm433_vm0, %v15335_v3 }
 0xdea   : > { %15366 = vst.msk [vmem:[%s23340_s16 + $0x70] sm:$0xff] %vm433_vm0, %v15334_v47 }
 0xe51   : > { %v17946_v26 = vpop.f32.mrb[112].mxu0 }
 0xe52   : > { %v18628_v43 = vadd.f32 %v17946_v26, %v23903_v61  ;;  %v15202_v46 = vpop.f32.mrb[113].mxu0 }
 0xe53   : > { %v18629_v6 = vadd.f32 %v15202_v46, %v23904_v4 }
 0xe54   : > { %v15337_v0 = vadd.f32 %v18628_v43, %v23334_v24 }
 0xe55   : > { %v15336_v40 = vadd.f32 %v18629_v6, %v23334_v24  ;;  %v17949_v34 = vpop.f32.mrb[114].mxu0 }
 0xe56   : > { %15369 = vst.msk [vmem:[%s23340_s16 + $0x88] sm:$0xff] %vm433_vm0, %v15337_v0  ;;  %v18630_v49 = vadd.f32 %v17949_v34, %v23905_v41  ;;  %v15212_v58 = vpop.f32.mrb[115].mxu0 }
 0xe57   : > { %15368 = vst.msk [vmem:[%s23340_s16 + $0x80] sm:$0xff] %vm433_vm0, %v15336_v40  ;;  %v18631_v32 = vadd.f32 %v15212_v58, %v23906_v28 }
 0xe58   : > { %v15339_v48 = vadd.f32 %v18630_v49, %v23334_v24 }
 0xe59   : > { %v15338_v56 = vadd.f32 %v18631_v32, %v23334_v24  ;;  %v17952_v62 = vpop.f32.mrb[116].mxu0 }
 0xe5a   : > { %15371 = vst.msk [vmem:[%s23340_s16 + $0x98] sm:$0xff] %vm433_vm0, %v15339_v48  ;;  %v18632_v14 = vadd.f32 %v17952_v62, %v23907_v45  ;;  %v15222_v50 = vpop.f32.mrb[117].mxu0 }
 0xe5b   : > { %15370 = vst.msk [vmem:[%s23340_s16 + $0x90] sm:$0xff] %vm433_vm0, %v15338_v56  ;;  %v18633_v15 = vadd.f32 %v15222_v50, %v23908_v51 }
 0xe5c   : > { %v15341_v53 = vadd.f32 %v18632_v14, %v23334_v24 }
 0xe5d   : > { %v15340_v11 = vadd.f32 %v18633_v15, %v23334_v24 }
 0xe5e   : > { %15373 = vst.msk [vmem:[%s23340_s16 + $0xa8] sm:$0xff] %vm433_vm0, %v15341_v53 }
 0xe5f   : > { %15372 = vst.msk [vmem:[%s23340_s16 + $0xa0] sm:$0xff] %vm433_vm0, %v15340_v11 }
 0xe60   : > { %v17955_v44 = vpop.f32.mrb[118].mxu0 }
 0xe61   : > { %v18634_v22 = vadd.f32 %v17955_v44, %v23909_v54  ;;  %v15232_v9 = vpop.f32.mrb[119].mxu0 }
 0xe62   : > { %v18635_v13 = vadd.f32 %v15232_v9, %v23910_v30 }
 0xe63   : > { %v15343_v37 = vadd.f32 %v18634_v22, %v23334_v24 }
 0xe64   : > { %v15342_v10 = vadd.f32 %v18635_v13, %v23334_v24  ;;  %v17958_v57 = vpop.f32.mrb[120].mxu0 }
 0xe65   : > { %15375 = vst.msk [vmem:[%s23340_s16 + $0xb8] sm:$0xff] %vm433_vm0, %v15343_v37  ;;  %v18636_v60 = vadd.f32 %v17958_v57, %v23911_v31  ;;  %v15242_v18 = vpop.f32.mrb[121].mxu0 }
 0xe66   : > { %15374 = vst.msk [vmem:[%s23340_s16 + $0xb0] sm:$0xff] %vm433_vm0, %v15342_v10  ;;  %v18637_v1 = vadd.f32 %v15242_v18, %v23912_v21 }
 0xe67   : > { %v15345_v16 = vadd.f32 %v18636_v60, %v23334_v24 }
 0xe68   : > { %v15344_v8 = vadd.f32 %v18637_v1, %v23334_v24  ;;  %v17961_v39 = vpop.f32.mrb[122].mxu0 }
 0xe69   : > { %15377 = vst.msk [vmem:[%s23340_s16 + $0xc8] sm:$0xff] %vm433_vm0, %v15345_v16  ;;  %v18638_v55 = vadd.f32 %v17961_v39, %v23913_v27  ;;  %v15252_v2 = vpop.f32.mrb[123].mxu0 }
 0xe6a   : > { %15376 = vst.msk [vmem:[%s23340_s16 + $0xc0] sm:$0xff] %vm433_vm0, %v15344_v8  ;;  %v18639_v36 = vadd.f32 %v15252_v2, %v23914_v23 }
 0xe6b   : > { %v15347_v25 = vadd.f32 %v18638_v55, %v23334_v24 }
 0xe6c   : > { %v15346_v19 = vadd.f32 %v18639_v36, %v23334_v24 }
 0xe6d   : > { %15379 = vst.msk [vmem:[%s23340_s16 + $0xd8] sm:$0xff] %vm433_vm0, %v15347_v25 }
 0xe6e   : > { %15378 = vst.msk [vmem:[%s23340_s16 + $0xd0] sm:$0xff] %vm433_vm0, %v15346_v19 }
 0xe9e   : > { %v17964_v42 = vpop.f32.mrb[124].mxu0 }
 0xe9f   : > { %v18640_v12 = vadd.f32 %v17964_v42, %v23915_v33  ;;  %v15262_v5 = vpop.f32.mrb[125].mxu0 }
 0xea0   : > { %v18641_v63 = vadd.f32 %v15262_v5, %v23916_v20 }
 0xea1   : > { %v15349_v38 = vadd.f32 %v18640_v12, %v23334_v24 }
 0xea2   : > { %v15348_v7 = vadd.f32 %v18641_v63, %v23334_v24  ;;  %v17967_v52 = vpop.f32.mrb[126].mxu0 }
 0xea3   : > { %15381 = vst.msk [vmem:[%s23340_s16 + $0xe8] sm:$0xff] %vm433_vm0, %v15349_v38  ;;  %v18642_v35 = vadd.f32 %v17967_v52, %v23917_v59  ;;  %v15272_v29 = vpop.f32.mrb[127].mxu0 }
 0xea4   : > { %15380 = vst.msk [vmem:[%s23340_s16 + $0xe0] sm:$0xff] %vm433_vm0, %v15348_v7  ;;  %v18643_v3 = vadd.f32 %v15272_v29, %v23918_v17 }
 0xea5   : > { %v15351_v47 = vadd.f32 %v18642_v35, %v23334_v24 }
 0xea6   : > { %v15350_v26 = vadd.f32 %v18643_v3, %v23334_v24 }
 0xea7   : > { %15383 = vst.msk [vmem:[%s23340_s16 + $0xf8] sm:$0xff] %vm433_vm0, %v15351_v47 }
 0xea8   : > { %15382 = vst.msk [vmem:[%s23340_s16 + $0xf0] sm:$0xff] %vm433_vm0, %v15350_v26 }
 0xea9 PF: > { %s19_s30 = sadd.s32 1, %s19815_s30  }
 0xeaa   : > { %p16_p4 = scmp.ge.s32.totalorder %s19_s30, 4  }
 0xeac   :  { %18 = sbr.rel (!%p16_p4) target bundleno = 1 (0x1), region = 89 }

</bundles_post_ra>
